<compile_context>
chip_gen: v5e
topology: v5e:2x2
jax: 0.10.0
libtpu: 0.0.40
codegen_flags: <defaults>
</compile_context>

<pallas_src>
import functools

import jax
import jax.numpy as jnp
from jax import lax
from jax.experimental import pallas as pl
from jax.experimental.pallas import tpu as pltpu

_BN_EPS = 1e-5
_WINDOW_VMEM_BUDGET = 1 << 20          # per-tile halo-window budget (bytes)
_VMEM_LIMIT = 32 * 1024 * 1024         # safe on v5e/v6e (128 MiB) and v7x (64 MiB)


# ------------------------------ tile sizing -----------------------------------

def _pick_tile_h(H, W, C):
    """Largest H-band (divisor of H, multiple of 8 or == H) fitting the budget."""
    cands = [th for th in range(1, H + 1)
             if H % th == 0 and (th == H or th % 8 == 0)]
    fitting = [th for th in cands
               if (th + 2) * (W + 2) * C * 4 <= _WINDOW_VMEM_BUDGET]
    return max(fitting) if fitting else min(cands)


# --------------------------------- kernels -------------------------------------

def _stage1_kernel(x_ref, w1_ref, h1_ref, st_ref, *, TH, W, C, Cin):
    """1x1 conv (conv1) + per-tile BN1 partial stats."""
    x = x_ref[...].reshape(TH * W, Cin)
    w1 = w1_ref[...]
    if Cin <= 16:
        # K is tiny: Cin VPU FMAs instead of a (wasted) MXU dot.
        h = x[:, 0:1] * w1[0:1, :]
        for c in range(1, Cin):
            h = h + x[:, c:c + 1] * w1[c:c + 1, :]
    else:
        h = jnp.dot(x.astype(jnp.bfloat16), w1.astype(jnp.bfloat16),
                    preferred_element_type=jnp.float32)
    h1_ref[...] = h.reshape(1, TH, W, C)
    s = jnp.sum(h, axis=0, keepdims=True)
    q = jnp.sum(h * h, axis=0, keepdims=True)
    st_ref[...] = jnp.concatenate([s, q], axis=0).reshape(1, 1, 2, C)


def _stage2_kernel(win_ref, a1_ref, lmask_ref, w2t_ref, star1_ref,
                   h2_ref, st_ref, *, TH, W, C):
    """BN1 + StarReLU1 + depthwise 3x3 conv (lane-dense) + BN2 partial stats."""
    t = pl.program_id(1)
    t_last = pl.num_programs(1) - 1
    WC = W * C
    WP = (W + 2) * C

    win = win_ref[...].reshape(TH + 2, WP)          # halo'd row band of h1_pre
    scale = a1_ref[0:1, :]                          # BN1 affine, lane-tiled
    shift = a1_ref[1:2, :]
    s1 = star1_ref[0:1, 0:1]
    b1 = star1_ref[0:1, 1:2]

    r = jnp.clip(win * scale + shift, 0.0, 6.0)     # BN1 + ReLU6
    act = (s1 * r * r + b1) * lmask_ref[...]        # StarReLU; zero W-pad lanes

    ri = lax.broadcasted_iota(jnp.int32, (TH + 2, WP), 0)
    row_ok = ((ri >= 1) | (t > 0)) & ((ri <= TH) | (t < t_last))
    h1 = jnp.where(row_ok, act, 0.0)                # zero global H-pad rows

    w2t = w2t_ref[...]                              # (9, W*C), loaded once
    acc = h1[0:TH, 0:WC] * w2t[0:1, :]
    for k in range(1, 9):
        dh, dw = divmod(k, 3)
        acc = acc + h1[dh:dh + TH, dw * C:dw * C + WC] * w2t[k:k + 1, :]

    h2_ref[...] = acc.reshape(1, TH, WC)
    s = jnp.sum(acc, axis=0, keepdims=True)
    q = jnp.sum(acc * acc, axis=0, keepdims=True)
    st_ref[...] = jnp.concatenate([s, q], axis=0).reshape(1, 1, 2, WC)


def _stage3_taps(win_ref, x_ref, a2_ref, star2_ref, *, TH, W, C, Cin):
    """BN2 + StarReLU2 on the halo'd h2_pre window; pack 9 taps + x into one operand."""
    t = pl.program_id(1)
    t_last = pl.num_programs(1) - 1

    win = win_ref[...].reshape(TH + 2, W + 2, C)
    sc = a2_ref[0:1, :].reshape(1, 1, C)
    sh = a2_ref[1:2, :].reshape(1, 1, C)
    s2 = star2_ref[0:1, 0:1].reshape(1, 1, 1)
    b2 = star2_ref[0:1, 1:2].reshape(1, 1, 1)

    r = jnp.clip(win * sc + sh, 0.0, 6.0)
    act = s2 * r * r + b2

    ri = lax.broadcasted_iota(jnp.int32, (TH + 2, W + 2, 1), 0)
    wi = lax.broadcasted_iota(jnp.int32, (TH + 2, W + 2, 1), 1)
    valid = ((wi >= 1) & (wi <= W)
             & ((ri >= 1) | (t > 0)) & ((ri <= TH) | (t < t_last)))
    h2 = jnp.where(valid, act, 0.0)

    pieces = [h2[dh:dh + TH, dw:dw + W, :].reshape(TH * W, C)
              for dh in range(3) for dw in range(3)]
    pieces.append(x_ref[...].reshape(TH * W, Cin))
    return jnp.concatenate(pieces, axis=1).astype(jnp.bfloat16)


def _stage3_stats_kernel(win_ref, x_ref, a2_ref, w3s_ref, star2_ref, st_ref,
                         *, TH, W, C, Cin):
    """conv3 + match-conv via one bf16 matmul; emit BN3/BN4 partial stats only."""
    cat = _stage3_taps(win_ref, x_ref, a2_ref, star2_ref, TH=TH, W=W, C=C, Cin=Cin)
    prod = jnp.dot(cat, w3s_ref[...], preferred_element_type=jnp.float32)
    s = jnp.sum(prod, axis=0, keepdims=True)
    q = jnp.sum(prod * prod, axis=0, keepdims=True)
    st_ref[...] = jnp.concatenate([s, q], axis=0).reshape(1, 1, 2, 2 * C)


def _stage3_apply_kernel(win_ref, x_ref, a2_ref, w3f_ref, shift34_ref,
                         star2_ref, star3_ref, o_ref, *, TH, W, C, Cin):
    """BN3(conv3) + BN4(match conv) folded into one bf16 matmul, add, StarReLU3."""
    cat = _stage3_taps(win_ref, x_ref, a2_ref, star2_ref, TH=TH, W=W, C=C, Cin=Cin)
    y = jnp.dot(cat, w3f_ref[...], preferred_element_type=jnp.float32)
    y = y + shift34_ref[...]
    r = jnp.clip(y, 0.0, 6.0)
    s3 = star3_ref[0:1, 0:1]
    b3 = star3_ref[0:1, 1:2]
    o_ref[...] = (s3 * r * r + b3).reshape(1, TH, W, C)


# --------------------------------- glue ----------------------------------------

def _bn_affine(st, count, gamma, beta):
    """Reduce per-tile [sum, sumsq] partials -> BN (scale, shift) per channel."""
    s = st[:, 0, :].sum(axis=0)
    q = st[:, 1, :].sum(axis=0)
    mu = s / count
    var = jnp.maximum(q / count - mu * mu, 0.0)
    scale = gamma * jax.lax.rsqrt(var + _BN_EPS)
    shift = beta - mu * scale
    return scale, shift


def cnn_block_forward(x_nchw, params):
    """Forward pass of CNNBlock.  Input/output are NCHW (PyTorch convention)."""
    N, Cin, H, W = x_nchw.shape
    Cout = params["w1"].shape[0]
    C = Cout
    if Cin == Cout:
        # TODO(synk): identity residual (no match_channels/norm4) not implemented.
        raise NotImplementedError("CNNBlock kernel assumes in_channels != out_channels")

    TH = _pick_tile_h(H, W, C)
    T = H // TH
    M = N * H * W

    x_nhwc = jnp.transpose(x_nchw, (0, 2, 3, 1)).astype(jnp.float32)

    # ----- weight massaging (tiny glue) -----
    w1 = params["w1"][:, :, 0, 0].T                         # (Cin, C)
    wm = params["wm"][:, :, 0, 0].T                         # (Cin, C)
    w2k = params["w2"][:, 0, :, :].reshape(C, 9).T          # (9, C), tap = dh*3+dw
    w2t = jnp.tile(w2k, (1, W))                             # (9, W*C) lane-tiled
    w3flat = jnp.transpose(params["w3"], (2, 3, 1, 0)).reshape(9 * C, C)
    # Block-diagonal weight for the stats pass: [h3_pre | xr_pre] in one matmul.
    w3s = jnp.concatenate(
        [jnp.concatenate([w3flat, jnp.zeros((9 * C, C), jnp.float32)], axis=1),
         jnp.concatenate([jnp.zeros((Cin, C), jnp.float32), wm], axis=1)],
        axis=0).astype(jnp.bfloat16)                        # (9C+Cin, 2C)

    star1 = params["star1"].reshape(1, 2).astype(jnp.float32)
    star2 = params["star2"].reshape(1, 2).astype(jnp.float32)
    star3 = params["star3"].reshape(1, 2).astype(jnp.float32)

    cparams = pltpu.CompilerParams(
        dimension_semantics=("parallel", "parallel"),
        vmem_limit_bytes=_VMEM_LIMIT)

    # ----- stage 1: 1x1 conv + BN1 partial stats -----
    h1_pre, st1 = pl.pallas_call(
        functools.partial(_stage1_kernel, TH=TH, W=W, C=C, Cin=Cin),
        out_shape=(jax.ShapeDtypeStruct((N, H, W, C), jnp.float32),
                   jax.ShapeDtypeStruct((N, T, 2, C), jnp.float32)),
        grid=(N, T),
        in_specs=[
            pl.BlockSpec((1, TH, W, Cin), lambda n, t: (n, t, 0, 0)),
            pl.BlockSpec((Cin, C), lambda n, t: (0, 0)),
        ],
        out_specs=(
            pl.BlockSpec((1, TH, W, C), lambda n, t: (n, t, 0, 0)),
            pl.BlockSpec((1, 1, 2, C), lambda n, t: (n, t, 0, 0)),
        ),
        compiler_params=cparams,
    )(x_nhwc, w1)

    sc1, sh1 = _bn_affine(st1.reshape(N * T, 2, C), M, params["g1"], params["b1"])

    # ----- halo'd row-band windows of h1_pre (lane-dense (rows, (W+2)*C)) -----
    h1_pad = jnp.pad(h1_pre, ((0, 0), (1, 1), (1, 1), (0, 0)))
    h1_pad = h1_pad.reshape(N, H + 2, (W + 2) * C)
    h1_win = jnp.stack([h1_pad[:, t * TH:t * TH + TH + 2, :] for t in range(T)],
                       axis=1)                              # (N, T, TH+2, (W+2)*C)

    a1 = jnp.stack([jnp.tile(sc1, W + 2), jnp.tile(sh1, W + 2)], axis=0)
    wcol = jnp.arange((W + 2) * C) // C
    lmask = ((wcol >= 1) & (wcol <= W)).astype(jnp.float32).reshape(1, (W + 2) * C)

    # ----- stage 2: BN1+StarReLU1 + depthwise 3x3 + BN2 partial stats -----
    h2_flat, st2 = pl.pallas_call(
        functools.partial(_stage2_kernel, TH=TH, W=W, C=C),
        out_shape=(jax.ShapeDtypeStruct((N, H, W * C), jnp.float32),
                   jax.ShapeDtypeStruct((N, T, 2, W * C), jnp.float32)),
        grid=(N, T),
        in_specs=[
            pl.BlockSpec((1, 1, TH + 2, (W + 2) * C), lambda n, t: (n, t, 0, 0)),
            pl.BlockSpec((2, (W + 2) * C), lambda n, t: (0, 0)),
            pl.BlockSpec((1, (W + 2) * C), lambda n, t: (0, 0)),
            pl.BlockSpec((9, W * C), lambda n, t: (0, 0)),
            pl.BlockSpec((1, 2), lambda n, t: (0, 0)),
        ],
        out_specs=(
            pl.BlockSpec((1, TH, W * C), lambda n, t: (n, t, 0)),
            pl.BlockSpec((1, 1, 2, W * C), lambda n, t: (n, t, 0, 0)),
        ),
        compiler_params=cparams,
    )(h1_win, a1, lmask, w2t, star1)

    st2r = st2.reshape(N * T, 2, W, C).sum(axis=2)          # de-tile lanes -> (.,2,C)
    sc2, sh2 = _bn_affine(st2r, M, params["g2"], params["b2"])
    a2 = jnp.stack([sc2, sh2], axis=0)                      # (2, C)

    # ----- halo'd windows of h2_pre for the dense 3x3 conv -----
    h2_pre = h2_flat.reshape(N, H, W, C)
    h2_pad = jnp.pad(h2_pre, ((0, 0), (1, 1), (1, 1), (0, 0)))
    h2_win = jnp.stack([h2_pad[:, t * TH:t * TH + TH + 2] for t in range(T)],
                       axis=1)                              # (N, T, TH+2, W+2, C)

    # ----- stage 3a: conv3 + match-conv partial stats (no big output written) -----
    st3 = pl.pallas_call(
        functools.partial(_stage3_stats_kernel, TH=TH, W=W, C=C, Cin=Cin),
        out_shape=jax.ShapeDtypeStruct((N, T, 2, 2 * C), jnp.float32),
        grid=(N, T),
        in_specs=[
            pl.BlockSpec((1, 1, TH + 2, W + 2, C), lambda n, t: (n, t, 0, 0, 0)),
            pl.BlockSpec((1, TH, W, Cin), lambda n, t: (n, t, 0, 0)),
            pl.BlockSpec((2, C), lambda n, t: (0, 0)),
            pl.BlockSpec((9 * C + Cin, 2 * C), lambda n, t: (0, 0)),
            pl.BlockSpec((1, 2), lambda n, t: (0, 0)),
        ],
        out_specs=pl.BlockSpec((1, 1, 2, 2 * C), lambda n, t: (n, t, 0, 0)),
        compiler_params=cparams,
    )(h2_win, x_nhwc, a2, w3s, star2)

    st3r = st3.reshape(N * T, 2, 2 * C)
    sc3, sh3 = _bn_affine(st3r[:, :, :C], M, params["g3"], params["b3"])
    sc4, sh4 = _bn_affine(st3r[:, :, C:], M, params["g4"], params["b4"])

    # Fold BN3/BN4 scales into one packed weight; shifts collapse into one bias row.
    w3f = jnp.concatenate([w3flat * sc3[None, :], wm * sc4[None, :]],
                          axis=0).astype(jnp.bfloat16)      # (9C+Cin, C)
    shift34 = (sh3 + sh4).reshape(1, C)

    # ----- stage 3b: single matmul + residual add + StarReLU3 -----
    out_nhwc = pl.pallas_call(
        functools.partial(_stage3_apply_kernel, TH=TH, W=W, C=C, Cin=Cin),
        out_shape=jax.ShapeDtypeStruct((N, H, W, C), jnp.float32),
        grid=(N, T),
        in_specs=[
            pl.BlockSpec((1, 1, TH + 2, W + 2, C), lambda n, t: (n, t, 0, 0, 0)),
            pl.BlockSpec((1, TH, W, Cin), lambda n, t: (n, t, 0, 0)),
            pl.BlockSpec((2, C), lambda n, t: (0, 0)),
            pl.BlockSpec((9 * C + Cin, C), lambda n, t: (0, 0)),
            pl.BlockSpec((1, C), lambda n, t: (0, 0)),
            pl.BlockSpec((1, 2), lambda n, t: (0, 0)),
            pl.BlockSpec((1, 2), lambda n, t: (0, 0)),
        ],
        out_specs=pl.BlockSpec((1, TH, W, C), lambda n, t: (n, t, 0, 0)),
        compiler_params=cparams,
    )(h2_win, x_nhwc, a2, w3f, shift34, star2, star3)

    return jnp.transpose(out_nhwc, (0, 3, 1, 2))


# ------------------------------ pure-JAX reference ------------------------------

def _reference(x, p):
    prec = jax.lax.Precision.HIGHEST
    Cout = p["w1"].shape[0]

    def conv(x, w, groups=1, pad="SAME"):
        return jax.lax.conv_general_dilated(
            x, w, (1, 1), pad, dimension_numbers=("NCHW", "OIHW", "NCHW"),
            feature_group_count=groups, precision=prec)

    def bn(x, g, b):
        mu = jnp.mean(x, axis=(0, 2, 3), keepdims=True)
        var = jnp.mean((x - mu) ** 2, axis=(0, 2, 3), keepdims=True)
        return ((x - mu) * jax.lax.rsqrt(var + _BN_EPS)
                * g[None, :, None, None] + b[None, :, None, None])

    def star(x, sp):
        r = jnp.clip(x, 0.0, 6.0)
        return sp[0] * r * r + sp[1]

    h = star(bn(conv(x, p["w1"], pad="VALID"), p["g1"], p["b1"]), p["star1"])
    h = star(bn(conv(h, p["w2"], groups=Cout), p["g2"], p["b2"]), p["star2"])
    h = bn(conv(h, p["w3"]), p["g3"], p["b3"])
    xr = bn(conv(x, p["wm"], pad="VALID"), p["g4"], p["b4"])
    return star(xr + h, p["star3"])


# ----------------------------------- main ----------------------------------------

if __name__ == "__main__":
    N, Cin, Cout, H, W = 2, 4, 8, 16, 16

    key = jax.random.PRNGKey(0)
    kx, k1, k2, k3, k4 = jax.random.split(key, 5)
    x = jax.random.normal(kx, (N, Cin, H, W), jnp.float32)

    # Conv weights in PyTorch OIHW layout (deterministic synthetic init).
    w1 = 0.30 * jax.random.normal(k1, (Cout, Cin, 1, 1), jnp.float32)
    w2 = 0.30 * jax.random.normal(k2, (Cout, 1, 3, 3), jnp.float32)
    w3 = 0.15 * jax.random.normal(k3, (Cout, Cout, 3, 3), jnp.float32)
    wm = 0.30 * jax.random.normal(k4, (Cout, Cin, 1, 1), jnp.float32)

    # BatchNorm2d defaults: gamma=1, beta=0.  StarReLU defaults: scale=1, bias=0.
    gamma = jnp.ones((Cout,), jnp.float32)
    beta = jnp.zeros((Cout,), jnp.float32)
    star = jnp.array([1.0, 0.0], jnp.float32)

    params = dict(w1=w1, w2=w2, w3=w3, wm=wm,
                  g1=gamma, b1=beta, g2=gamma, b2=beta,
                  g3=gamma, b3=beta, g4=gamma, b4=beta,
                  star1=star, star2=star, star3=star)

    fwd = jax.jit(cnn_block_forward)
    out = jax.block_until_ready(fwd(x, params))
    assert out.shape == (N, Cout, H, W) and out.dtype == jnp.float32

    ref = _reference(x, params)
    if not jnp.allclose(out, ref, rtol=5e-2, atol=5e-2):
        max_err = float(jnp.max(jnp.abs(out - ref)))
        raise AssertionError(f"Pallas output mismatch vs reference, max|err|={max_err}")

    print("KERNEL_OK")
</pallas_src>

<mosaic_0001>
module attributes {stable_mosaic.version = 11 : i64} {
  func.func @_stage1_kernel(%arg0: i32, %arg1: i32, %arg2: memref<1x16x16x4xf32, #tpu.memory_space<vmem>>, %arg3: memref<4x8xf32, #tpu.memory_space<vmem>>, %arg4: memref<1x16x16x8xf32, #tpu.memory_space<vmem>>, %arg5: memref<1x1x2x8xf32, #tpu.memory_space<vmem>>) attributes {dimension_semantics = [#tpu.dimension_semantics<parallel>, #tpu.dimension_semantics<parallel>], iteration_bounds = array<i64: 2, 1>, scalar_prefetch = 0 : i64, scratch_operands = 0 : i64, tpu.core_type = #tpu.core_type<tc>, window_params = [{transform_indices = @transform_0, window_bounds = array<i64: 1, 16, 16, 4>}, {pipeline_mode = #tpu.pipeline_mode<synchronous>, transform_indices = @transform_1, window_bounds = array<i64: 4, 8>}, {transform_indices = @transform_2, window_bounds = array<i64: 1, 16, 16, 8>}, {transform_indices = @transform_3, window_bounds = array<i64: 1, 1, 2, 8>}]} {
    %c0 = arith.constant 0 : index
    %c0_0 = arith.constant 0 : index
    %c0_1 = arith.constant 0 : index
    %c0_2 = arith.constant 0 : index
    %0 = vector.load %arg2[%c0, %c0_0, %c0_1, %c0_2] : memref<1x16x16x4xf32, #tpu.memory_space<vmem>>, vector<1x16x16x4xf32>
    %1 = vector.shape_cast %0 : vector<1x16x16x4xf32> to vector<256x4xf32>
    %c0_3 = arith.constant 0 : index
    %c0_4 = arith.constant 0 : index
    %2 = vector.load %arg3[%c0_3, %c0_4] : memref<4x8xf32, #tpu.memory_space<vmem>>, vector<4x8xf32>
    %3 = vector.extract_strided_slice %1 {offsets = [0, 0], sizes = [256, 1], strides = [1, 1]} : vector<256x4xf32> to vector<256x1xf32>
    %4 = vector.extract_strided_slice %2 {offsets = [0, 0], sizes = [1, 8], strides = [1, 1]} : vector<4x8xf32> to vector<1x8xf32>
    %5 = vector.broadcast %3 : vector<256x1xf32> to vector<256x8xf32>
    %6 = vector.broadcast %4 : vector<1x8xf32> to vector<256x8xf32>
    %7 = arith.mulf %5, %6 : vector<256x8xf32>
    %8 = vector.extract_strided_slice %1 {offsets = [0, 1], sizes = [256, 1], strides = [1, 1]} : vector<256x4xf32> to vector<256x1xf32>
    %9 = vector.extract_strided_slice %2 {offsets = [1, 0], sizes = [1, 8], strides = [1, 1]} : vector<4x8xf32> to vector<1x8xf32>
    %10 = vector.broadcast %8 : vector<256x1xf32> to vector<256x8xf32>
    %11 = vector.broadcast %9 : vector<1x8xf32> to vector<256x8xf32>
    %12 = arith.mulf %10, %11 : vector<256x8xf32>
    %13 = arith.addf %7, %12 : vector<256x8xf32>
    %14 = vector.extract_strided_slice %1 {offsets = [0, 2], sizes = [256, 1], strides = [1, 1]} : vector<256x4xf32> to vector<256x1xf32>
    %15 = vector.extract_strided_slice %2 {offsets = [2, 0], sizes = [1, 8], strides = [1, 1]} : vector<4x8xf32> to vector<1x8xf32>
    %16 = vector.broadcast %14 : vector<256x1xf32> to vector<256x8xf32>
    %17 = vector.broadcast %15 : vector<1x8xf32> to vector<256x8xf32>
    %18 = arith.mulf %16, %17 : vector<256x8xf32>
    %19 = arith.addf %13, %18 : vector<256x8xf32>
    %20 = vector.extract_strided_slice %1 {offsets = [0, 3], sizes = [256, 1], strides = [1, 1]} : vector<256x4xf32> to vector<256x1xf32>
    %21 = vector.extract_strided_slice %2 {offsets = [3, 0], sizes = [1, 8], strides = [1, 1]} : vector<4x8xf32> to vector<1x8xf32>
    %22 = vector.broadcast %20 : vector<256x1xf32> to vector<256x8xf32>
    %23 = vector.broadcast %21 : vector<1x8xf32> to vector<256x8xf32>
    %24 = arith.mulf %22, %23 : vector<256x8xf32>
    %25 = arith.addf %19, %24 : vector<256x8xf32>
    %26 = vector.shape_cast %25 : vector<256x8xf32> to vector<1x16x16x8xf32>
    %c0_5 = arith.constant 0 : index
    %c0_6 = arith.constant 0 : index
    %c0_7 = arith.constant 0 : index
    %c0_8 = arith.constant 0 : index
    %27 = vector.load %arg4[%c0_5, %c0_6, %c0_7, %c0_8] : memref<1x16x16x8xf32, #tpu.memory_space<vmem>>, vector<1x16x16x8xf32>
    tpu.vector_store %arg4[%c0_5, %c0_6, %c0_7, %c0_8], %26 {strides = array<i32>} : memref<1x16x16x8xf32, #tpu.memory_space<vmem>>, vector<1x16x16x8xf32>,
    %cst = arith.constant dense<0.000000e+00> : vector<8xf32>
    %28 = vector.multi_reduction <add>, %25, %cst [0] : vector<256x8xf32> to vector<8xf32>
    %29 = vector.shape_cast %28 : vector<8xf32> to vector<1x8xf32>
    %30 = arith.mulf %25, %25 : vector<256x8xf32>
    %cst_9 = arith.constant dense<0.000000e+00> : vector<8xf32>
    %31 = vector.multi_reduction <add>, %30, %cst_9 [0] : vector<256x8xf32> to vector<8xf32>
    %32 = vector.shape_cast %31 : vector<8xf32> to vector<1x8xf32>
    %33 = tpu.concatenate %29, %32 in 0 : vector<1x8xf32>, vector<1x8xf32> -> vector<2x8xf32>
    %34 = vector.shape_cast %33 : vector<2x8xf32> to vector<1x1x2x8xf32>
    %c0_10 = arith.constant 0 : index
    %c0_11 = arith.constant 0 : index
    %c0_12 = arith.constant 0 : index
    %c0_13 = arith.constant 0 : index
    %35 = vector.load %arg5[%c0_10, %c0_11, %c0_12, %c0_13] : memref<1x1x2x8xf32, #tpu.memory_space<vmem>>, vector<1x1x2x8xf32>
    tpu.vector_store %arg5[%c0_10, %c0_11, %c0_12, %c0_13], %34 {strides = array<i32>} : memref<1x1x2x8xf32, #tpu.memory_space<vmem>>, vector<1x1x2x8xf32>,
    return
  }
  func.func @transform_0(%arg0: i32, %arg1: i32) -> (i32, i32, i32, i32) {
    %c0_i32 = arith.constant 0 : i32
    %c0_i32_0 = arith.constant 0 : i32
    %c0_i32_1 = arith.constant 0 : i32
    return %arg0, %arg1, %c0_i32, %c0_i32_0 : i32, i32, i32, i32
  }
  func.func @transform_1(%arg0: i32, %arg1: i32) -> (i32, i32) {
    %c0_i32 = arith.constant 0 : i32
    %c0_i32_0 = arith.constant 0 : i32
    %c0_i32_1 = arith.constant 0 : i32
    return %c0_i32, %c0_i32_0 : i32, i32
  }
  func.func @transform_2(%arg0: i32, %arg1: i32) -> (i32, i32, i32, i32) {
    %c0_i32 = arith.constant 0 : i32
    %c0_i32_0 = arith.constant 0 : i32
    %c0_i32_1 = arith.constant 0 : i32
    return %arg0, %arg1, %c0_i32, %c0_i32_0 : i32, i32, i32, i32
  }
  func.func @transform_3(%arg0: i32, %arg1: i32) -> (i32, i32, i32, i32) {
    %c0_i32 = arith.constant 0 : i32
    %c0_i32_0 = arith.constant 0 : i32
    %c0_i32_1 = arith.constant 0 : i32
    return %arg0, %arg1, %c0_i32, %c0_i32_0 : i32, i32, i32, i32
  }
}

module attributes {stable_mosaic.version = 11 : i64} {
  func.func @_stage2_kernel(%arg0: i32, %arg1: i32, %arg2: memref<1x1x18x144xf32, #tpu.memory_space<vmem>>, %arg3: memref<2x144xf32, #tpu.memory_space<vmem>>, %arg4: memref<1x144xf32, #tpu.memory_space<vmem>>, %arg5: memref<9x128xf32, #tpu.memory_space<vmem>>, %arg6: memref<1x2xf32, #tpu.memory_space<vmem>>, %arg7: memref<1x16x128xf32, #tpu.memory_space<vmem>>, %arg8: memref<1x1x2x128xf32, #tpu.memory_space<vmem>>) attributes {dimension_semantics = [#tpu.dimension_semantics<parallel>, #tpu.dimension_semantics<parallel>], iteration_bounds = array<i64: 2, 1>, scalar_prefetch = 0 : i64, scratch_operands = 0 : i64, tpu.core_type = #tpu.core_type<tc>, window_params = [{transform_indices = @transform_0, window_bounds = array<i64: 1, 1, 18, 144>}, {pipeline_mode = #tpu.pipeline_mode<synchronous>, transform_indices = @transform_1, window_bounds = array<i64: 2, 144>}, {pipeline_mode = #tpu.pipeline_mode<synchronous>, transform_indices = @transform_2, window_bounds = array<i64: 1, 144>}, {pipeline_mode = #tpu.pipeline_mode<synchronous>, transform_indices = @transform_3, window_bounds = array<i64: 9, 128>}, {pipeline_mode = #tpu.pipeline_mode<synchronous>, transform_indices = @transform_4, window_bounds = array<i64: 1, 2>}, {transform_indices = @transform_5, window_bounds = array<i64: 1, 16, 128>}, {transform_indices = @transform_6, window_bounds = array<i64: 1, 1, 2, 128>}]} {
    %c0 = arith.constant 0 : index
    %c0_0 = arith.constant 0 : index
    %c0_1 = arith.constant 0 : index
    %c0_2 = arith.constant 0 : index
    %0 = vector.load %arg2[%c0, %c0_0, %c0_1, %c0_2] : memref<1x1x18x144xf32, #tpu.memory_space<vmem>>, vector<1x1x18x144xf32>
    %1 = vector.shape_cast %0 : vector<1x1x18x144xf32> to vector<18x144xf32>
    %c0_3 = arith.constant 0 : index
    %c0_4 = arith.constant 0 : index
    %2 = vector.load %arg3[%c0_3, %c0_4] : memref<2x144xf32, #tpu.memory_space<vmem>>, vector<1x144xf32>
    %c1 = arith.constant 1 : index
    %c0_5 = arith.constant 0 : index
    %3 = vector.load %arg3[%c1, %c0_5] : memref<2x144xf32, #tpu.memory_space<vmem>>, vector<1x144xf32>
    %c0_6 = arith.constant 0 : index
    %c0_7 = arith.constant 0 : index
    %4 = vector.load %arg6[%c0_6, %c0_7] : memref<1x2xf32, #tpu.memory_space<vmem>>, vector<1x1xf32>
    %c0_8 = arith.constant 0 : index
    %c1_9 = arith.constant 1 : index
    %5 = vector.load %arg6[%c0_8, %c1_9] : memref<1x2xf32, #tpu.memory_space<vmem>>, vector<1x1xf32>
    %6 = vector.broadcast %2 : vector<1x144xf32> to vector<18x144xf32>
    %7 = arith.mulf %1, %6 : vector<18x144xf32>
    %8 = vector.broadcast %3 : vector<1x144xf32> to vector<18x144xf32>
    %9 = arith.addf %7, %8 : vector<18x144xf32>
    %cst = arith.constant 0.000000e+00 : f32
    %cst_10 = arith.constant 6.000000e+00 : f32
    %10 = vector.broadcast %cst : f32 to vector<18x144xf32>
    %11 = arith.maximumf %10, %9 : vector<18x144xf32>
    %12 = vector.broadcast %cst_10 : f32 to vector<18x144xf32>
    %13 = arith.minimumf %12, %11 : vector<18x144xf32>
    %14 = vector.broadcast %4 : vector<1x1xf32> to vector<18x144xf32>
    %15 = arith.mulf %14, %13 : vector<18x144xf32>
    %16 = arith.mulf %15, %13 : vector<18x144xf32>
    %17 = vector.broadcast %5 : vector<1x1xf32> to vector<18x144xf32>
    %18 = arith.addf %16, %17 : vector<18x144xf32>
    %c0_11 = arith.constant 0 : index
    %c0_12 = arith.constant 0 : index
    %19 = vector.load %arg4[%c0_11, %c0_12] : memref<1x144xf32, #tpu.memory_space<vmem>>, vector<1x144xf32>
    %20 = vector.broadcast %19 : vector<1x144xf32> to vector<18x144xf32>
    %21 = arith.mulf %18, %20 : vector<18x144xf32>
    %22 = tpu.iota {dimensions = array<i32: 0>} : vector<18x144xi32>
    %c1_i32 = arith.constant 1 : i32
    %23 = vector.broadcast %c1_i32 : i32 to vector<18x144xi32>
    %24 = arith.cmpi sge, %22, %23 : vector<18x144xi32>
    %c0_i32 = arith.constant 0 : i32
    %25 = arith.cmpi sgt, %arg1, %c0_i32 : i32
    %26 = vector.broadcast %25 : i1 to vector<18x144xi1>
    %27 = arith.ori %24, %26 : vector<18x144xi1>
    %c16_i32 = arith.constant 16 : i32
    %28 = vector.broadcast %c16_i32 : i32 to vector<18x144xi32>
    %29 = arith.cmpi sle, %22, %28 : vector<18x144xi32>
    %c0_i32_13 = arith.constant 0 : i32
    %30 = arith.cmpi slt, %arg1, %c0_i32_13 : i32
    %31 = vector.broadcast %30 : i1 to vector<18x144xi1>
    %32 = arith.ori %29, %31 : vector<18x144xi1>
    %33 = arith.andi %27, %32 : vector<18x144xi1>
    %cst_14 = arith.constant 0.000000e+00 : f32
    %34 = vector.broadcast %cst_14 : f32 to vector<18x144xf32>
    %35 = arith.select %33, %21, %34 : vector<18x144xi1>, vector<18x144xf32>
    %c0_15 = arith.constant 0 : index
    %c0_16 = arith.constant 0 : index
    %36 = vector.load %arg5[%c0_15, %c0_16] : memref<9x128xf32, #tpu.memory_space<vmem>>, vector<9x128xf32>
    %37 = vector.extract_strided_slice %35 {offsets = [0, 0], sizes = [16, 128], strides = [1, 1]} : vector<18x144xf32> to vector<16x128xf32>
    %38 = vector.extract_strided_slice %36 {offsets = [0, 0], sizes = [1, 128], strides = [1, 1]} : vector<9x128xf32> to vector<1x128xf32>
    %39 = vector.broadcast %38 : vector<1x128xf32> to vector<16x128xf32>
    %40 = arith.mulf %37, %39 : vector<16x128xf32>
    %41 = vector.extract_strided_slice %35 {offsets = [0, 8], sizes = [16, 128], strides = [1, 1]} : vector<18x144xf32> to vector<16x128xf32>
    %42 = vector.extract_strided_slice %36 {offsets = [1, 0], sizes = [1, 128], strides = [1, 1]} : vector<9x128xf32> to vector<1x128xf32>
    %43 = vector.broadcast %42 : vector<1x128xf32> to vector<16x128xf32>
    %44 = arith.mulf %41, %43 : vector<16x128xf32>
    %45 = arith.addf %40, %44 : vector<16x128xf32>
    %46 = vector.extract_strided_slice %35 {offsets = [0, 16], sizes = [16, 128], strides = [1, 1]} : vector<18x144xf32> to vector<16x128xf32>
    %47 = vector.extract_strided_slice %36 {offsets = [2, 0], sizes = [1, 128], strides = [1, 1]} : vector<9x128xf32> to vector<1x128xf32>
    %48 = vector.broadcast %47 : vector<1x128xf32> to vector<16x128xf32>
    %49 = arith.mulf %46, %48 : vector<16x128xf32>
    %50 = arith.addf %45, %49 : vector<16x128xf32>
    %51 = vector.extract_strided_slice %35 {offsets = [1, 0], sizes = [16, 128], strides = [1, 1]} : vector<18x144xf32> to vector<16x128xf32>
    %52 = vector.extract_strided_slice %36 {offsets = [3, 0], sizes = [1, 128], strides = [1, 1]} : vector<9x128xf32> to vector<1x128xf32>
    %53 = vector.broadcast %52 : vector<1x128xf32> to vector<16x128xf32>
    %54 = arith.mulf %51, %53 : vector<16x128xf32>
    %55 = arith.addf %50, %54 : vector<16x128xf32>
    %56 = vector.extract_strided_slice %35 {offsets = [1, 8], sizes = [16, 128], strides = [1, 1]} : vector<18x144xf32> to vector<16x128xf32>
    %57 = vector.extract_strided_slice %36 {offsets = [4, 0], sizes = [1, 128], strides = [1, 1]} : vector<9x128xf32> to vector<1x128xf32>
    %58 = vector.broadcast %57 : vector<1x128xf32> to vector<16x128xf32>
    %59 = arith.mulf %56, %58 : vector<16x128xf32>
    %60 = arith.addf %55, %59 : vector<16x128xf32>
    %61 = vector.extract_strided_slice %35 {offsets = [1, 16], sizes = [16, 128], strides = [1, 1]} : vector<18x144xf32> to vector<16x128xf32>
    %62 = vector.extract_strided_slice %36 {offsets = [5, 0], sizes = [1, 128], strides = [1, 1]} : vector<9x128xf32> to vector<1x128xf32>
    %63 = vector.broadcast %62 : vector<1x128xf32> to vector<16x128xf32>
    %64 = arith.mulf %61, %63 : vector<16x128xf32>
    %65 = arith.addf %60, %64 : vector<16x128xf32>
    %66 = vector.extract_strided_slice %35 {offsets = [2, 0], sizes = [16, 128], strides = [1, 1]} : vector<18x144xf32> to vector<16x128xf32>
    %67 = vector.extract_strided_slice %36 {offsets = [6, 0], sizes = [1, 128], strides = [1, 1]} : vector<9x128xf32> to vector<1x128xf32>
    %68 = vector.broadcast %67 : vector<1x128xf32> to vector<16x128xf32>
    %69 = arith.mulf %66, %68 : vector<16x128xf32>
    %70 = arith.addf %65, %69 : vector<16x128xf32>
    %71 = vector.extract_strided_slice %35 {offsets = [2, 8], sizes = [16, 128], strides = [1, 1]} : vector<18x144xf32> to vector<16x128xf32>
    %72 = vector.extract_strided_slice %36 {offsets = [7, 0], sizes = [1, 128], strides = [1, 1]} : vector<9x128xf32> to vector<1x128xf32>
    %73 = vector.broadcast %72 : vector<1x128xf32> to vector<16x128xf32>
    %74 = arith.mulf %71, %73 : vector<16x128xf32>
    %75 = arith.addf %70, %74 : vector<16x128xf32>
    %76 = vector.extract_strided_slice %35 {offsets = [2, 16], sizes = [16, 128], strides = [1, 1]} : vector<18x144xf32> to vector<16x128xf32>
    %77 = vector.extract_strided_slice %36 {offsets = [8, 0], sizes = [1, 128], strides = [1, 1]} : vector<9x128xf32> to vector<1x128xf32>
    %78 = vector.broadcast %77 : vector<1x128xf32> to vector<16x128xf32>
    %79 = arith.mulf %76, %78 : vector<16x128xf32>
    %80 = arith.addf %75, %79 : vector<16x128xf32>
    %81 = vector.shape_cast %80 : vector<16x128xf32> to vector<1x16x128xf32>
    %c0_17 = arith.constant 0 : index
    %c0_18 = arith.constant 0 : index
    %c0_19 = arith.constant 0 : index
    %82 = vector.load %arg7[%c0_17, %c0_18, %c0_19] : memref<1x16x128xf32, #tpu.memory_space<vmem>>, vector<1x16x128xf32>
    tpu.vector_store %arg7[%c0_17, %c0_18, %c0_19], %81 {strides = array<i32>} : memref<1x16x128xf32, #tpu.memory_space<vmem>>, vector<1x16x128xf32>,
    %cst_20 = arith.constant dense<0.000000e+00> : vector<128xf32>
    %83 = vector.multi_reduction <add>, %80, %cst_20 [0] : vector<16x128xf32> to vector<128xf32>
    %84 = vector.shape_cast %83 : vector<128xf32> to vector<1x128xf32>
    %85 = arith.mulf %80, %80 : vector<16x128xf32>
    %cst_21 = arith.constant dense<0.000000e+00> : vector<128xf32>
    %86 = vector.multi_reduction <add>, %85, %cst_21 [0] : vector<16x128xf32> to vector<128xf32>
    %87 = vector.shape_cast %86 : vector<128xf32> to vector<1x128xf32>
    %88 = tpu.concatenate %84, %87 in 0 : vector<1x128xf32>, vector<1x128xf32> -> vector<2x128xf32>
    %89 = vector.shape_cast %88 : vector<2x128xf32> to vector<1x1x2x128xf32>
    %c0_22 = arith.constant 0 : index
    %c0_23 = arith.constant 0 : index
    %c0_24 = arith.constant 0 : index
    %c0_25 = arith.constant 0 : index
    %90 = vector.load %arg8[%c0_22, %c0_23, %c0_24, %c0_25] : memref<1x1x2x128xf32, #tpu.memory_space<vmem>>, vector<1x1x2x128xf32>
    tpu.vector_store %arg8[%c0_22, %c0_23, %c0_24, %c0_25], %89 {strides = array<i32>} : memref<1x1x2x128xf32, #tpu.memory_space<vmem>>, vector<1x1x2x128xf32>,
    return
  }
  func.func @transform_0(%arg0: i32, %arg1: i32) -> (i32, i32, i32, i32) {
    %c0_i32 = arith.constant 0 : i32
    %c0_i32_0 = arith.constant 0 : i32
    %c0_i32_1 = arith.constant 0 : i32
    return %arg0, %arg1, %c0_i32, %c0_i32_0 : i32, i32, i32, i32
  }
  func.func @transform_1(%arg0: i32, %arg1: i32) -> (i32, i32) {
    %c0_i32 = arith.constant 0 : i32
    %c0_i32_0 = arith.constant 0 : i32
    %c0_i32_1 = arith.constant 0 : i32
    return %c0_i32, %c0_i32_0 : i32, i32
  }
  func.func @transform_2(%arg0: i32, %arg1: i32) -> (i32, i32) {
    %c0_i32 = arith.constant 0 : i32
    %c0_i32_0 = arith.constant 0 : i32
    %c0_i32_1 = arith.constant 0 : i32
    return %c0_i32, %c0_i32_0 : i32, i32
  }
  func.func @transform_3(%arg0: i32, %arg1: i32) -> (i32, i32) {
    %c0_i32 = arith.constant 0 : i32
    %c0_i32_0 = arith.constant 0 : i32
    %c0_i32_1 = arith.constant 0 : i32
    return %c0_i32, %c0_i32_0 : i32, i32
  }
  func.func @transform_4(%arg0: i32, %arg1: i32) -> (i32, i32) {
    %c0_i32 = arith.constant 0 : i32
    %c0_i32_0 = arith.constant 0 : i32
    %c0_i32_1 = arith.constant 0 : i32
    return %c0_i32, %c0_i32_0 : i32, i32
  }
  func.func @transform_5(%arg0: i32, %arg1: i32) -> (i32, i32, i32) {
    %c0_i32 = arith.constant 0 : i32
    %c0_i32_0 = arith.constant 0 : i32
    return %arg0, %arg1, %c0_i32 : i32, i32, i32
  }
  func.func @transform_6(%arg0: i32, %arg1: i32) -> (i32, i32, i32, i32) {
    %c0_i32 = arith.constant 0 : i32
    %c0_i32_0 = arith.constant 0 : i32
    %c0_i32_1 = arith.constant 0 : i32
    return %arg0, %arg1, %c0_i32, %c0_i32_0 : i32, i32, i32, i32
  }
}

module attributes {stable_mosaic.version = 11 : i64} {
  func.func @_stage3_stats_kernel(%arg0: i32, %arg1: i32, %arg2: memref<1x1x18x18x8xf32, #tpu.memory_space<vmem>>, %arg3: memref<1x16x16x4xf32, #tpu.memory_space<vmem>>, %arg4: memref<2x8xf32, #tpu.memory_space<vmem>>, %arg5: memref<76x16xbf16, #tpu.memory_space<vmem>>, %arg6: memref<1x2xf32, #tpu.memory_space<vmem>>, %arg7: memref<1x1x2x16xf32, #tpu.memory_space<vmem>>) attributes {dimension_semantics = [#tpu.dimension_semantics<parallel>, #tpu.dimension_semantics<parallel>], iteration_bounds = array<i64: 2, 1>, scalar_prefetch = 0 : i64, scratch_operands = 0 : i64, tpu.core_type = #tpu.core_type<tc>, window_params = [{transform_indices = @transform_0, window_bounds = array<i64: 1, 1, 18, 18, 8>}, {transform_indices = @transform_1, window_bounds = array<i64: 1, 16, 16, 4>}, {pipeline_mode = #tpu.pipeline_mode<synchronous>, transform_indices = @transform_2, window_bounds = array<i64: 2, 8>}, {pipeline_mode = #tpu.pipeline_mode<synchronous>, transform_indices = @transform_3, window_bounds = array<i64: 76, 16>}, {pipeline_mode = #tpu.pipeline_mode<synchronous>, transform_indices = @transform_4, window_bounds = array<i64: 1, 2>}, {transform_indices = @transform_5, window_bounds = array<i64: 1, 1, 2, 16>}]} {
    %c0 = arith.constant 0 : index
    %c0_0 = arith.constant 0 : index
    %c0_1 = arith.constant 0 : index
    %c0_2 = arith.constant 0 : index
    %c0_3 = arith.constant 0 : index
    %0 = vector.load %arg2[%c0, %c0_0, %c0_1, %c0_2, %c0_3] : memref<1x1x18x18x8xf32, #tpu.memory_space<vmem>>, vector<1x1x18x18x8xf32>
    %1 = vector.shape_cast %0 : vector<1x1x18x18x8xf32> to vector<18x18x8xf32>
    %c0_4 = arith.constant 0 : index
    %c0_5 = arith.constant 0 : index
    %2 = vector.load %arg4[%c0_4, %c0_5] : memref<2x8xf32, #tpu.memory_space<vmem>>, vector<1x8xf32>
    %3 = vector.shape_cast %2 : vector<1x8xf32> to vector<1x1x8xf32>
    %c1 = arith.constant 1 : index
    %c0_6 = arith.constant 0 : index
    %4 = vector.load %arg4[%c1, %c0_6] : memref<2x8xf32, #tpu.memory_space<vmem>>, vector<1x8xf32>
    %5 = vector.shape_cast %4 : vector<1x8xf32> to vector<1x1x8xf32>
    %c0_7 = arith.constant 0 : index
    %c0_8 = arith.constant 0 : index
    %6 = vector.load %arg6[%c0_7, %c0_8] : memref<1x2xf32, #tpu.memory_space<vmem>>, vector<1x1xf32>
    %7 = vector.shape_cast %6 : vector<1x1xf32> to vector<1x1x1xf32>
    %c0_9 = arith.constant 0 : index
    %c1_10 = arith.constant 1 : index
    %8 = vector.load %arg6[%c0_9, %c1_10] : memref<1x2xf32, #tpu.memory_space<vmem>>, vector<1x1xf32>
    %9 = vector.shape_cast %8 : vector<1x1xf32> to vector<1x1x1xf32>
    %10 = vector.broadcast %3 : vector<1x1x8xf32> to vector<18x18x8xf32>
    %11 = arith.mulf %1, %10 : vector<18x18x8xf32>
    %12 = vector.broadcast %5 : vector<1x1x8xf32> to vector<18x18x8xf32>
    %13 = arith.addf %11, %12 : vector<18x18x8xf32>
    %cst = arith.constant 0.000000e+00 : f32
    %cst_11 = arith.constant 6.000000e+00 : f32
    %14 = vector.broadcast %cst : f32 to vector<18x18x8xf32>
    %15 = arith.maximumf %14, %13 : vector<18x18x8xf32>
    %16 = vector.broadcast %cst_11 : f32 to vector<18x18x8xf32>
    %17 = arith.minimumf %16, %15 : vector<18x18x8xf32>
    %18 = vector.broadcast %7 : vector<1x1x1xf32> to vector<18x18x8xf32>
    %19 = arith.mulf %18, %17 : vector<18x18x8xf32>
    %20 = arith.mulf %19, %17 : vector<18x18x8xf32>
    %21 = vector.broadcast %9 : vector<1x1x1xf32> to vector<18x18x8xf32>
    %22 = arith.addf %20, %21 : vector<18x18x8xf32>
    %23 = tpu.iota {dimensions = array<i32: 0>} : vector<18x18x1xi32>
    %24 = tpu.iota {dimensions = array<i32: 1>} : vector<18x18x1xi32>
    %c1_i32 = arith.constant 1 : i32
    %25 = vector.broadcast %c1_i32 : i32 to vector<18x18x1xi32>
    %26 = arith.cmpi sge, %24, %25 : vector<18x18x1xi32>
    %c16_i32 = arith.constant 16 : i32
    %27 = vector.broadcast %c16_i32 : i32 to vector<18x18x1xi32>
    %28 = arith.cmpi sle, %24, %27 : vector<18x18x1xi32>
    %29 = arith.andi %26, %28 : vector<18x18x1xi1>
    %c1_i32_12 = arith.constant 1 : i32
    %30 = vector.broadcast %c1_i32_12 : i32 to vector<18x18x1xi32>
    %31 = arith.cmpi sge, %23, %30 : vector<18x18x1xi32>
    %c0_i32 = arith.constant 0 : i32
    %32 = arith.cmpi sgt, %arg1, %c0_i32 : i32
    %33 = vector.broadcast %32 : i1 to vector<18x18x1xi1>
    %34 = arith.ori %31, %33 : vector<18x18x1xi1>
    %35 = arith.andi %29, %34 : vector<18x18x1xi1>
    %c16_i32_13 = arith.constant 16 : i32
    %36 = vector.broadcast %c16_i32_13 : i32 to vector<18x18x1xi32>
    %37 = arith.cmpi sle, %23, %36 : vector<18x18x1xi32>
    %c0_i32_14 = arith.constant 0 : i32
    %38 = arith.cmpi slt, %arg1, %c0_i32_14 : i32
    %39 = vector.broadcast %38 : i1 to vector<18x18x1xi1>
    %40 = arith.ori %37, %39 : vector<18x18x1xi1>
    %41 = arith.andi %35, %40 : vector<18x18x1xi1>
    %cst_15 = arith.constant 0.000000e+00 : f32
    %42 = vector.shape_cast %41 : vector<18x18x1xi1> to vector<18x18x1xi1>
    %43 = vector.broadcast %42 : vector<18x18x1xi1> to vector<18x18x8xi1>
    %44 = vector.broadcast %cst_15 : f32 to vector<18x18x8xf32>
    %45 = arith.select %43, %22, %44 : vector<18x18x8xi1>, vector<18x18x8xf32>
    %46 = vector.extract_strided_slice %45 {offsets = [0, 0, 0], sizes = [16, 16, 8], strides = [1, 1, 1]} : vector<18x18x8xf32> to vector<16x16x8xf32>
    %47 = vector.shape_cast %46 : vector<16x16x8xf32> to vector<256x8xf32>
    %48 = vector.extract_strided_slice %45 {offsets = [0, 1, 0], sizes = [16, 16, 8], strides = [1, 1, 1]} : vector<18x18x8xf32> to vector<16x16x8xf32>
    %49 = vector.shape_cast %48 : vector<16x16x8xf32> to vector<256x8xf32>
    %50 = vector.extract_strided_slice %45 {offsets = [0, 2, 0], sizes = [16, 16, 8], strides = [1, 1, 1]} : vector<18x18x8xf32> to vector<16x16x8xf32>
    %51 = vector.shape_cast %50 : vector<16x16x8xf32> to vector<256x8xf32>
    %52 = vector.extract_strided_slice %45 {offsets = [1, 0, 0], sizes = [16, 16, 8], strides = [1, 1, 1]} : vector<18x18x8xf32> to vector<16x16x8xf32>
    %53 = vector.shape_cast %52 : vector<16x16x8xf32> to vector<256x8xf32>
    %54 = vector.extract_strided_slice %45 {offsets = [1, 1, 0], sizes = [16, 16, 8], strides = [1, 1, 1]} : vector<18x18x8xf32> to vector<16x16x8xf32>
    %55 = vector.shape_cast %54 : vector<16x16x8xf32> to vector<256x8xf32>
    %56 = vector.extract_strided_slice %45 {offsets = [1, 2, 0], sizes = [16, 16, 8], strides = [1, 1, 1]} : vector<18x18x8xf32> to vector<16x16x8xf32>
    %57 = vector.shape_cast %56 : vector<16x16x8xf32> to vector<256x8xf32>
    %58 = vector.extract_strided_slice %45 {offsets = [2, 0, 0], sizes = [16, 16, 8], strides = [1, 1, 1]} : vector<18x18x8xf32> to vector<16x16x8xf32>
    %59 = vector.shape_cast %58 : vector<16x16x8xf32> to vector<256x8xf32>
    %60 = vector.extract_strided_slice %45 {offsets = [2, 1, 0], sizes = [16, 16, 8], strides = [1, 1, 1]} : vector<18x18x8xf32> to vector<16x16x8xf32>
    %61 = vector.shape_cast %60 : vector<16x16x8xf32> to vector<256x8xf32>
    %62 = vector.extract_strided_slice %45 {offsets = [2, 2, 0], sizes = [16, 16, 8], strides = [1, 1, 1]} : vector<18x18x8xf32> to vector<16x16x8xf32>
    %63 = vector.shape_cast %62 : vector<16x16x8xf32> to vector<256x8xf32>
    %c0_16 = arith.constant 0 : index
    %c0_17 = arith.constant 0 : index
    %c0_18 = arith.constant 0 : index
    %c0_19 = arith.constant 0 : index
    %64 = vector.load %arg3[%c0_16, %c0_17, %c0_18, %c0_19] : memref<1x16x16x4xf32, #tpu.memory_space<vmem>>, vector<1x16x16x4xf32>
    %65 = vector.shape_cast %64 : vector<1x16x16x4xf32> to vector<256x4xf32>
    %66 = tpu.concatenate %47, %49, %51, %53, %55, %57, %59, %61, %63, %65 in 1 : vector<256x8xf32>, vector<256x8xf32>, vector<256x8xf32>, vector<256x8xf32>, vector<256x8xf32>, vector<256x8xf32>, vector<256x8xf32>, vector<256x8xf32>, vector<256x8xf32>, vector<256x4xf32> -> vector<256x76xf32>
    %67 = arith.truncf %66 : vector<256x76xf32> to vector<256x76xbf16>
    %c0_20 = arith.constant 0 : index
    %c0_21 = arith.constant 0 : index
    %68 = vector.load %arg5[%c0_20, %c0_21] : memref<76x16xbf16, #tpu.memory_space<vmem>>, vector<76x16xbf16>
    %cst_22 = arith.constant dense<0.000000e+00> : vector<256x16xf32>
    %69 = tpu.matmul %67, %68, %cst_22 {dimension_numbers = #tpu.dot_dimension_numbers<[1], [0], [0], [1], [0, 0, 1, 1], [], []>} : vector<256x76xbf16>, vector<76x16xbf16>, vector<256x16xf32> -> vector<256x16xf32>
    %cst_23 = arith.constant dense<0.000000e+00> : vector<16xf32>
    %70 = vector.multi_reduction <add>, %69, %cst_23 [0] : vector<256x16xf32> to vector<16xf32>
    %71 = vector.shape_cast %70 : vector<16xf32> to vector<1x16xf32>
    %72 = arith.mulf %69, %69 : vector<256x16xf32>
    %cst_24 = arith.constant dense<0.000000e+00> : vector<16xf32>
    %73 = vector.multi_reduction <add>, %72, %cst_24 [0] : vector<256x16xf32> to vector<16xf32>
    %74 = vector.shape_cast %73 : vector<16xf32> to vector<1x16xf32>
    %75 = tpu.concatenate %71, %74 in 0 : vector<1x16xf32>, vector<1x16xf32> -> vector<2x16xf32>
    %76 = vector.shape_cast %75 : vector<2x16xf32> to vector<1x1x2x16xf32>
    %c0_25 = arith.constant 0 : index
    %c0_26 = arith.constant 0 : index
    %c0_27 = arith.constant 0 : index
    %c0_28 = arith.constant 0 : index
    %77 = vector.load %arg7[%c0_25, %c0_26, %c0_27, %c0_28] : memref<1x1x2x16xf32, #tpu.memory_space<vmem>>, vector<1x1x2x16xf32>
    tpu.vector_store %arg7[%c0_25, %c0_26, %c0_27, %c0_28], %76 {strides = array<i32>} : memref<1x1x2x16xf32, #tpu.memory_space<vmem>>, vector<1x1x2x16xf32>,
    return
  }
  func.func @transform_0(%arg0: i32, %arg1: i32) -> (i32, i32, i32, i32, i32) {
    %c0_i32 = arith.constant 0 : i32
    %c0_i32_0 = arith.constant 0 : i32
    %c0_i32_1 = arith.constant 0 : i32
    %c0_i32_2 = arith.constant 0 : i32
    return %arg0, %arg1, %c0_i32, %c0_i32_0, %c0_i32_1 : i32, i32, i32, i32, i32
  }
  func.func @transform_1(%arg0: i32, %arg1: i32) -> (i32, i32, i32, i32) {
    %c0_i32 = arith.constant 0 : i32
    %c0_i32_0 = arith.constant 0 : i32
    %c0_i32_1 = arith.constant 0 : i32
    return %arg0, %arg1, %c0_i32, %c0_i32_0 : i32, i32, i32, i32
  }
  func.func @transform_2(%arg0: i32, %arg1: i32) -> (i32, i32) {
    %c0_i32 = arith.constant 0 : i32
    %c0_i32_0 = arith.constant 0 : i32
    %c0_i32_1 = arith.constant 0 : i32
    return %c0_i32, %c0_i32_0 : i32, i32
  }
  func.func @transform_3(%arg0: i32, %arg1: i32) -> (i32, i32) {
    %c0_i32 = arith.constant 0 : i32
    %c0_i32_0 = arith.constant 0 : i32
    %c0_i32_1 = arith.constant 0 : i32
    return %c0_i32, %c0_i32_0 : i32, i32
  }
  func.func @transform_4(%arg0: i32, %arg1: i32) -> (i32, i32) {
    %c0_i32 = arith.constant 0 : i32
    %c0_i32_0 = arith.constant 0 : i32
    %c0_i32_1 = arith.constant 0 : i32
    return %c0_i32, %c0_i32_0 : i32, i32
  }
  func.func @transform_5(%arg0: i32, %arg1: i32) -> (i32, i32, i32, i32) {
    %c0_i32 = arith.constant 0 : i32
    %c0_i32_0 = arith.constant 0 : i32
    %c0_i32_1 = arith.constant 0 : i32
    return %arg0, %arg1, %c0_i32, %c0_i32_0 : i32, i32, i32, i32
  }
}

module attributes {stable_mosaic.version = 11 : i64} {
  func.func @_stage3_apply_kernel(%arg0: i32, %arg1: i32, %arg2: memref<1x1x18x18x8xf32, #tpu.memory_space<vmem>>, %arg3: memref<1x16x16x4xf32, #tpu.memory_space<vmem>>, %arg4: memref<2x8xf32, #tpu.memory_space<vmem>>, %arg5: memref<76x8xbf16, #tpu.memory_space<vmem>>, %arg6: memref<1x8xf32, #tpu.memory_space<vmem>>, %arg7: memref<1x2xf32, #tpu.memory_space<vmem>>, %arg8: memref<1x2xf32, #tpu.memory_space<vmem>>, %arg9: memref<1x16x16x8xf32, #tpu.memory_space<vmem>>) attributes {dimension_semantics = [#tpu.dimension_semantics<parallel>, #tpu.dimension_semantics<parallel>], iteration_bounds = array<i64: 2, 1>, scalar_prefetch = 0 : i64, scratch_operands = 0 : i64, tpu.core_type = #tpu.core_type<tc>, window_params = [{transform_indices = @transform_0, window_bounds = array<i64: 1, 1, 18, 18, 8>}, {transform_indices = @transform_1, window_bounds = array<i64: 1, 16, 16, 4>}, {pipeline_mode = #tpu.pipeline_mode<synchronous>, transform_indices = @transform_2, window_bounds = array<i64: 2, 8>}, {pipeline_mode = #tpu.pipeline_mode<synchronous>, transform_indices = @transform_3, window_bounds = array<i64: 76, 8>}, {pipeline_mode = #tpu.pipeline_mode<synchronous>, transform_indices = @transform_4, window_bounds = array<i64: 1, 8>}, {pipeline_mode = #tpu.pipeline_mode<synchronous>, transform_indices = @transform_5, window_bounds = array<i64: 1, 2>}, {pipeline_mode = #tpu.pipeline_mode<synchronous>, transform_indices = @transform_6, window_bounds = array<i64: 1, 2>}, {transform_indices = @transform_7, window_bounds = array<i64: 1, 16, 16, 8>}]} {
    %c0 = arith.constant 0 : index
    %c0_0 = arith.constant 0 : index
    %c0_1 = arith.constant 0 : index
    %c0_2 = arith.constant 0 : index
    %c0_3 = arith.constant 0 : index
    %0 = vector.load %arg2[%c0, %c0_0, %c0_1, %c0_2, %c0_3] : memref<1x1x18x18x8xf32, #tpu.memory_space<vmem>>, vector<1x1x18x18x8xf32>
    %1 = vector.shape_cast %0 : vector<1x1x18x18x8xf32> to vector<18x18x8xf32>
    %c0_4 = arith.constant 0 : index
    %c0_5 = arith.constant 0 : index
    %2 = vector.load %arg4[%c0_4, %c0_5] : memref<2x8xf32, #tpu.memory_space<vmem>>, vector<1x8xf32>
    %3 = vector.shape_cast %2 : vector<1x8xf32> to vector<1x1x8xf32>
    %c1 = arith.constant 1 : index
    %c0_6 = arith.constant 0 : index
    %4 = vector.load %arg4[%c1, %c0_6] : memref<2x8xf32, #tpu.memory_space<vmem>>, vector<1x8xf32>
    %5 = vector.shape_cast %4 : vector<1x8xf32> to vector<1x1x8xf32>
    %c0_7 = arith.constant 0 : index
    %c0_8 = arith.constant 0 : index
    %6 = vector.load %arg7[%c0_7, %c0_8] : memref<1x2xf32, #tpu.memory_space<vmem>>, vector<1x1xf32>
    %7 = vector.shape_cast %6 : vector<1x1xf32> to vector<1x1x1xf32>
    %c0_9 = arith.constant 0 : index
    %c1_10 = arith.constant 1 : index
    %8 = vector.load %arg7[%c0_9, %c1_10] : memref<1x2xf32, #tpu.memory_space<vmem>>, vector<1x1xf32>
    %9 = vector.shape_cast %8 : vector<1x1xf32> to vector<1x1x1xf32>
    %10 = vector.broadcast %3 : vector<1x1x8xf32> to vector<18x18x8xf32>
    %11 = arith.mulf %1, %10 : vector<18x18x8xf32>
    %12 = vector.broadcast %5 : vector<1x1x8xf32> to vector<18x18x8xf32>
    %13 = arith.addf %11, %12 : vector<18x18x8xf32>
    %cst = arith.constant 0.000000e+00 : f32
    %cst_11 = arith.constant 6.000000e+00 : f32
    %14 = vector.broadcast %cst : f32 to vector<18x18x8xf32>
    %15 = arith.maximumf %14, %13 : vector<18x18x8xf32>
    %16 = vector.broadcast %cst_11 : f32 to vector<18x18x8xf32>
    %17 = arith.minimumf %16, %15 : vector<18x18x8xf32>
    %18 = vector.broadcast %7 : vector<1x1x1xf32> to vector<18x18x8xf32>
    %19 = arith.mulf %18, %17 : vector<18x18x8xf32>
    %20 = arith.mulf %19, %17 : vector<18x18x8xf32>
    %21 = vector.broadcast %9 : vector<1x1x1xf32> to vector<18x18x8xf32>
    %22 = arith.addf %20, %21 : vector<18x18x8xf32>
    %23 = tpu.iota {dimensions = array<i32: 0>} : vector<18x18x1xi32>
    %24 = tpu.iota {dimensions = array<i32: 1>} : vector<18x18x1xi32>
    %c1_i32 = arith.constant 1 : i32
    %25 = vector.broadcast %c1_i32 : i32 to vector<18x18x1xi32>
    %26 = arith.cmpi sge, %24, %25 : vector<18x18x1xi32>
    %c16_i32 = arith.constant 16 : i32
    %27 = vector.broadcast %c16_i32 : i32 to vector<18x18x1xi32>
    %28 = arith.cmpi sle, %24, %27 : vector<18x18x1xi32>
    %29 = arith.andi %26, %28 : vector<18x18x1xi1>
    %c1_i32_12 = arith.constant 1 : i32
    %30 = vector.broadcast %c1_i32_12 : i32 to vector<18x18x1xi32>
    %31 = arith.cmpi sge, %23, %30 : vector<18x18x1xi32>
    %c0_i32 = arith.constant 0 : i32
    %32 = arith.cmpi sgt, %arg1, %c0_i32 : i32
    %33 = vector.broadcast %32 : i1 to vector<18x18x1xi1>
    %34 = arith.ori %31, %33 : vector<18x18x1xi1>
    %35 = arith.andi %29, %34 : vector<18x18x1xi1>
    %c16_i32_13 = arith.constant 16 : i32
    %36 = vector.broadcast %c16_i32_13 : i32 to vector<18x18x1xi32>
    %37 = arith.cmpi sle, %23, %36 : vector<18x18x1xi32>
    %c0_i32_14 = arith.constant 0 : i32
    %38 = arith.cmpi slt, %arg1, %c0_i32_14 : i32
    %39 = vector.broadcast %38 : i1 to vector<18x18x1xi1>
    %40 = arith.ori %37, %39 : vector<18x18x1xi1>
    %41 = arith.andi %35, %40 : vector<18x18x1xi1>
    %cst_15 = arith.constant 0.000000e+00 : f32
    %42 = vector.shape_cast %41 : vector<18x18x1xi1> to vector<18x18x1xi1>
    %43 = vector.broadcast %42 : vector<18x18x1xi1> to vector<18x18x8xi1>
    %44 = vector.broadcast %cst_15 : f32 to vector<18x18x8xf32>
    %45 = arith.select %43, %22, %44 : vector<18x18x8xi1>, vector<18x18x8xf32>
    %46 = vector.extract_strided_slice %45 {offsets = [0, 0, 0], sizes = [16, 16, 8], strides = [1, 1, 1]} : vector<18x18x8xf32> to vector<16x16x8xf32>
    %47 = vector.shape_cast %46 : vector<16x16x8xf32> to vector<256x8xf32>
    %48 = vector.extract_strided_slice %45 {offsets = [0, 1, 0], sizes = [16, 16, 8], strides = [1, 1, 1]} : vector<18x18x8xf32> to vector<16x16x8xf32>
    %49 = vector.shape_cast %48 : vector<16x16x8xf32> to vector<256x8xf32>
    %50 = vector.extract_strided_slice %45 {offsets = [0, 2, 0], sizes = [16, 16, 8], strides = [1, 1, 1]} : vector<18x18x8xf32> to vector<16x16x8xf32>
    %51 = vector.shape_cast %50 : vector<16x16x8xf32> to vector<256x8xf32>
    %52 = vector.extract_strided_slice %45 {offsets = [1, 0, 0], sizes = [16, 16, 8], strides = [1, 1, 1]} : vector<18x18x8xf32> to vector<16x16x8xf32>
    %53 = vector.shape_cast %52 : vector<16x16x8xf32> to vector<256x8xf32>
    %54 = vector.extract_strided_slice %45 {offsets = [1, 1, 0], sizes = [16, 16, 8], strides = [1, 1, 1]} : vector<18x18x8xf32> to vector<16x16x8xf32>
    %55 = vector.shape_cast %54 : vector<16x16x8xf32> to vector<256x8xf32>
    %56 = vector.extract_strided_slice %45 {offsets = [1, 2, 0], sizes = [16, 16, 8], strides = [1, 1, 1]} : vector<18x18x8xf32> to vector<16x16x8xf32>
    %57 = vector.shape_cast %56 : vector<16x16x8xf32> to vector<256x8xf32>
    %58 = vector.extract_strided_slice %45 {offsets = [2, 0, 0], sizes = [16, 16, 8], strides = [1, 1, 1]} : vector<18x18x8xf32> to vector<16x16x8xf32>
    %59 = vector.shape_cast %58 : vector<16x16x8xf32> to vector<256x8xf32>
    %60 = vector.extract_strided_slice %45 {offsets = [2, 1, 0], sizes = [16, 16, 8], strides = [1, 1, 1]} : vector<18x18x8xf32> to vector<16x16x8xf32>
    %61 = vector.shape_cast %60 : vector<16x16x8xf32> to vector<256x8xf32>
    %62 = vector.extract_strided_slice %45 {offsets = [2, 2, 0], sizes = [16, 16, 8], strides = [1, 1, 1]} : vector<18x18x8xf32> to vector<16x16x8xf32>
    %63 = vector.shape_cast %62 : vector<16x16x8xf32> to vector<256x8xf32>
    %c0_16 = arith.constant 0 : index
    %c0_17 = arith.constant 0 : index
    %c0_18 = arith.constant 0 : index
    %c0_19 = arith.constant 0 : index
    %64 = vector.load %arg3[%c0_16, %c0_17, %c0_18, %c0_19] : memref<1x16x16x4xf32, #tpu.memory_space<vmem>>, vector<1x16x16x4xf32>
    %65 = vector.shape_cast %64 : vector<1x16x16x4xf32> to vector<256x4xf32>
    %66 = tpu.concatenate %47, %49, %51, %53, %55, %57, %59, %61, %63, %65 in 1 : vector<256x8xf32>, vector<256x8xf32>, vector<256x8xf32>, vector<256x8xf32>, vector<256x8xf32>, vector<256x8xf32>, vector<256x8xf32>, vector<256x8xf32>, vector<256x8xf32>, vector<256x4xf32> -> vector<256x76xf32>
    %67 = arith.truncf %66 : vector<256x76xf32> to vector<256x76xbf16>
    %c0_20 = arith.constant 0 : index
    %c0_21 = arith.constant 0 : index
    %68 = vector.load %arg5[%c0_20, %c0_21] : memref<76x8xbf16, #tpu.memory_space<vmem>>, vector<76x8xbf16>
    %cst_22 = arith.constant dense<0.000000e+00> : vector<256x8xf32>
    %69 = tpu.matmul %67, %68, %cst_22 {dimension_numbers = #tpu.dot_dimension_numbers<[1], [0], [0], [1], [0, 0, 1, 1], [], []>} : vector<256x76xbf16>, vector<76x8xbf16>, vector<256x8xf32> -> vector<256x8xf32>
    %c0_23 = arith.constant 0 : index
    %c0_24 = arith.constant 0 : index
    %70 = vector.load %arg6[%c0_23, %c0_24] : memref<1x8xf32, #tpu.memory_space<vmem>>, vector<1x8xf32>
    %71 = vector.broadcast %70 : vector<1x8xf32> to vector<256x8xf32>
    %72 = arith.addf %69, %71 : vector<256x8xf32>
    %cst_25 = arith.constant 0.000000e+00 : f32
    %cst_26 = arith.constant 6.000000e+00 : f32
    %73 = vector.broadcast %cst_25 : f32 to vector<256x8xf32>
    %74 = arith.maximumf %73, %72 : vector<256x8xf32>
    %75 = vector.broadcast %cst_26 : f32 to vector<256x8xf32>
    %76 = arith.minimumf %75, %74 : vector<256x8xf32>
    %c0_27 = arith.constant 0 : index
    %c0_28 = arith.constant 0 : index
    %77 = vector.load %arg8[%c0_27, %c0_28] : memref<1x2xf32, #tpu.memory_space<vmem>>, vector<1x1xf32>
    %c0_29 = arith.constant 0 : index
    %c1_30 = arith.constant 1 : index
    %78 = vector.load %arg8[%c0_29, %c1_30] : memref<1x2xf32, #tpu.memory_space<vmem>>, vector<1x1xf32>
    %79 = vector.broadcast %77 : vector<1x1xf32> to vector<256x8xf32>
    %80 = arith.mulf %79, %76 : vector<256x8xf32>
    %81 = arith.mulf %80, %76 : vector<256x8xf32>
    %82 = vector.broadcast %78 : vector<1x1xf32> to vector<256x8xf32>
    %83 = arith.addf %81, %82 : vector<256x8xf32>
    %84 = vector.shape_cast %83 : vector<256x8xf32> to vector<1x16x16x8xf32>
    %c0_31 = arith.constant 0 : index
    %c0_32 = arith.constant 0 : index
    %c0_33 = arith.constant 0 : index
    %c0_34 = arith.constant 0 : index
    %85 = vector.load %arg9[%c0_31, %c0_32, %c0_33, %c0_34] : memref<1x16x16x8xf32, #tpu.memory_space<vmem>>, vector<1x16x16x8xf32>
    tpu.vector_store %arg9[%c0_31, %c0_32, %c0_33, %c0_34], %84 {strides = array<i32>} : memref<1x16x16x8xf32, #tpu.memory_space<vmem>>, vector<1x16x16x8xf32>,
    return
  }
  func.func @transform_0(%arg0: i32, %arg1: i32) -> (i32, i32, i32, i32, i32) {
    %c0_i32 = arith.constant 0 : i32
    %c0_i32_0 = arith.constant 0 : i32
    %c0_i32_1 = arith.constant 0 : i32
    %c0_i32_2 = arith.constant 0 : i32
    return %arg0, %arg1, %c0_i32, %c0_i32_0, %c0_i32_1 : i32, i32, i32, i32, i32
  }
  func.func @transform_1(%arg0: i32, %arg1: i32) -> (i32, i32, i32, i32) {
    %c0_i32 = arith.constant 0 : i32
    %c0_i32_0 = arith.constant 0 : i32
    %c0_i32_1 = arith.constant 0 : i32
    return %arg0, %arg1, %c0_i32, %c0_i32_0 : i32, i32, i32, i32
  }
  func.func @transform_2(%arg0: i32, %arg1: i32) -> (i32, i32) {
    %c0_i32 = arith.constant 0 : i32
    %c0_i32_0 = arith.constant 0 : i32
    %c0_i32_1 = arith.constant 0 : i32
    return %c0_i32, %c0_i32_0 : i32, i32
  }
  func.func @transform_3(%arg0: i32, %arg1: i32) -> (i32, i32) {
    %c0_i32 = arith.constant 0 : i32
    %c0_i32_0 = arith.constant 0 : i32
    %c0_i32_1 = arith.constant 0 : i32
    return %c0_i32, %c0_i32_0 : i32, i32
  }
  func.func @transform_4(%arg0: i32, %arg1: i32) -> (i32, i32) {
    %c0_i32 = arith.constant 0 : i32
    %c0_i32_0 = arith.constant 0 : i32
    %c0_i32_1 = arith.constant 0 : i32
    return %c0_i32, %c0_i32_0 : i32, i32
  }
  func.func @transform_5(%arg0: i32, %arg1: i32) -> (i32, i32) {
    %c0_i32 = arith.constant 0 : i32
    %c0_i32_0 = arith.constant 0 : i32
    %c0_i32_1 = arith.constant 0 : i32
    return %c0_i32, %c0_i32_0 : i32, i32
  }
  func.func @transform_6(%arg0: i32, %arg1: i32) -> (i32, i32) {
    %c0_i32 = arith.constant 0 : i32
    %c0_i32_0 = arith.constant 0 : i32
    %c0_i32_1 = arith.constant 0 : i32
    return %c0_i32, %c0_i32_0 : i32, i32
  }
  func.func @transform_7(%arg0: i32, %arg1: i32) -> (i32, i32, i32, i32) {
    %c0_i32 = arith.constant 0 : i32
    %c0_i32_0 = arith.constant 0 : i32
    %c0_i32_1 = arith.constant 0 : i32
    return %arg0, %arg1, %c0_i32, %c0_i32_0 : i32, i32, i32, i32
  }
}

</mosaic_0001>

<bundles_post_ra>
// kernel: tile.23
= control target key start
LH: loop header
LB: loop body
LE: loop exit
PB: predicated region body
PF: predicated region fallthrough
CT: control target
= control target key end

     0   :  { %s34_s0 = inlined_call_operand.vmem [shape: f32[8], index: 0, kind: input, shape index: {}]   ;;  %s35_s1 = inlined_call_operand.vmem [shape: f32[18,8], index: 1, kind: output, shape index: {}]  }
   0x1   :  { %v4_v0 = vld [vmem:[%s34_s0] ss:$0 sm:$0xff] }
   0x2   :  { %5 = vst [vmem:[%s35_s1] sm:$0xff] %v4_v0 }
   0x3   :  { %10 = vst [vmem:[%s35_s1 + $0x8] sm:$0xff] %v4_v0 }
   0x4   :  { %11 = vst [vmem:[%s35_s1 + $0x10] sm:$0xff] %v4_v0 }

// kernel: tile.28
= control target key start
LH: loop header
LB: loop body
LE: loop exit
PB: predicated region body
PF: predicated region fallthrough
CT: control target
= control target key end

     0   :  { %s140_s10 = smov 120   ;;  %s141_s11 = smov 104   ;;  %vm4_vm0 = vcmask 64512   ;;  %vm10_vm1 = vcmask 1048512   ;;  %vm16_vm2 = vcmask 982912   ;;  %vm22_vm3 = vcmask 917312   ;;  %s219_s0 = inlined_call_operand.vmem [shape: f32[18,8], index: 0, kind: input, shape index: {}]   ;;  %s220_s1 = inlined_call_operand.vmem [shape: f32[1,144], index: 1, kind: output, shape index: {}]  }
   0x1   :  { %v109_v0 = vld [vmem:[%s219_s0 + $0xf] sm:$0x1]   ;;  %v111_v1 = vld [vmem:[%s219_s0 + $0xd] sm:$0x1]   ;;  %v113_v2 = vld [vmem:[%s219_s0 + $0xb] sm:$0x1]  }
   0x2   :  { %8 = vrot.lane.b32.xlu0 %v109_v0, %s140_s10  ;;  %20 = vrot.lane.b32.xlu1 %v111_v1, %s141_s11  ;;  %s142_s14 = smov 88   ;;  %v110_v3 = vld [vmem:[%s219_s0 + $0xe] sm:$0x1]   ;;  %v112_v4 = vld [vmem:[%s219_s0 + $0xc] sm:$0x1]   ;;  %s143_s19 = smov 112  }
   0x3   :  { %32 = vrot.lane.b32.xlu2 %v113_v2, %s142_s14  ;;  %s144_s20 = smov 96   ;;  %v114_v5 = vld [vmem:[%s219_s0 + $0xa] sm:$0x1]   ;;  %s145_s23 = smov 80   ;;  %v115_v6 = vld [vmem:[%s219_s0 + $0x9] sm:$0x1]  }
   0x4   :  { %v116_v7 = vld [vmem:[%s219_s0 + $0x8] sm:$0x1]   ;;  %s146_s28 = smov 72   ;;  %s147_s29 = smov 64   ;;  %v117_v8 = vld [vmem:[%s219_s0 + $0x7] sm:$0x1]  }
   0x5   :  { %s148_s3 = smov 56   ;;  %v118_v9 = vld [vmem:[%s219_s0 + $0x6] sm:$0x1]   ;;  %v119_v10 = vld [vmem:[%s219_s0 + $0x5] sm:$0x1]   ;;  %s149_s8 = smov 48  }
   0x6   :  { %s150_s9 = smov 40   ;;  %v120_v11 = vld [vmem:[%s219_s0 + $0x4] sm:$0x1]   ;;  %s151_s12 = smov 32   ;;  %v121_v12 = vld [vmem:[%s219_s0 + $0x3] sm:$0x1]  }
   0x7   :  { %v122_v13 = vld [vmem:[%s219_s0 + $0x2] sm:$0x1]   ;;  %s91_s17 = smov 3  ;;  %s152_s18 = smov 24   ;;  %vm28_vm4 = vcmask 851712   ;;  %vm34_vm5 = vcmask 786112  }
   0x8   :  { %v123_v14 = vld [vmem:[%s219_s0 + $0x1] ss:$16 sm:%s91_s17]   ;;  %s154_s22 = smov 8   ;;  %vm40_vm6 = vcmask 720512   ;;  %vm46_vm7 = vcmask 654912   ;;  %vm52_vm8 = vcmask 589312  }
   0x9   :  { %vm58_vm9 = vcmask 523712   ;;  %vm64_vm10 = vcmask 458112   ;;  %vm70_vm11 = vcmask 392512   ;;  %vm76_vm12 = vcmask 326912  }
   0xa   :  { %14 = vrot.lane.b32.xlu0 %v110_v3, %s143_s19  ;;  %26 = vrot.lane.b32.xlu1 %v112_v4, %s144_s20  ;;  %s153_s19 = smov 16   ;;  %vm82_vm13 = vcmask 261312   ;;  %vm88_vm14 = vcmask 195712   ;;  %vm95_vm15 = vcmask 130112  }
   0xb   :  { %38 = vrot.lane.b32.xlu2 %v114_v5, %s145_s23  ;;  %s2_s23 = smov 3 }
   0xc   :  { %v3_v15 = vld [vmem:[%s219_s0] ss:$16 sm:%s2_s23]  }
   0xd   :  { %5 = vst.msk [vmem:[#allocation0] ss:$8 sm:$0x3] %vm4_vm0, %v3_v15  }
  0x12   :  { %44 = vrot.lane.b32.xlu0 %v115_v6, %s146_s28  ;;  %50 = vrot.lane.b32.xlu1 %v116_v7, %s147_s29 }
  0x13   :  { %56 = vrot.lane.b32.xlu2 %v117_v8, %s148_s3 }
  0x1a   :  { %62 = vrot.lane.b32.xlu0 %v118_v9, %s149_s8  ;;  %68 = vrot.lane.b32.xlu1 %v119_v10, %s150_s9 }
  0x1b   :  { %74 = vrot.lane.b32.xlu2 %v120_v11, %s151_s12 }
  0x22   :  { %80 = vrot.lane.b32.xlu0 %v121_v12, %s152_s18  ;;  %86 = vrot.lane.b32.xlu1 %v122_v13, %s153_s19 }
  0x23   :  { %93 = vrot.lane.b32.xlu2 %v123_v14, %s154_s22 }
  0x5d   :  { %v33_v16 = vpop.permute.xlu2 %32  }
  0x65   :  { %v39_v17 = vpop.permute.xlu2 %38  }
  0x6d   :  { %v57_v18 = vpop.permute.xlu2 %56  }
  0x74   :  { %v9_v19 = vpop.permute.xlu0 %8   ;;  %v21_v20 = vpop.permute.xlu1 %20  }
  0x75   :  { %11 = vst.msk [vmem:[#allocation0] sm:$0x1] %vm10_vm1, %v9_v19   ;;  %v75_v21 = vpop.permute.xlu2 %74  }
  0x7c   :  { %v15_v22 = vpop.permute.xlu0 %14   ;;  %v27_v23 = vpop.permute.xlu1 %26  }
  0x7d   :  { %17 = vst.msk [vmem:[#allocation0] sm:$0x1] %vm16_vm2, %v15_v22   ;;  %v94_v24 = vpop.permute.xlu2 %93  }
  0x7e   :  { %23 = vst.msk [vmem:[#allocation0] sm:$0x1] %vm22_vm3, %v21_v20  }
  0x7f   :  { %29 = vst.msk [vmem:[#allocation0] sm:$0x1] %vm28_vm4, %v27_v23  }
  0x80   :  { %35 = vst.msk [vmem:[#allocation0] sm:$0x1] %vm34_vm5, %v33_v16  }
  0x81   :  { %41 = vst.msk [vmem:[#allocation0] sm:$0x1] %vm40_vm6, %v39_v17  }
  0x84   :  { %v45_v25 = vpop.permute.xlu0 %44   ;;  %v51_v26 = vpop.permute.xlu1 %50  }
  0x85   :  { %47 = vst.msk [vmem:[#allocation0] sm:$0x1] %vm46_vm7, %v45_v25  }
  0x86   :  { %53 = vst.msk [vmem:[#allocation0] sm:$0x1] %vm52_vm8, %v51_v26  }
  0x87   :  { %59 = vst.msk [vmem:[#allocation0] sm:$0x1] %vm58_vm9, %v57_v18  }
  0x8c   :  { %v63_v27 = vpop.permute.xlu0 %62   ;;  %v69_v28 = vpop.permute.xlu1 %68  }
  0x8d   :  { %65 = vst.msk [vmem:[#allocation0] sm:$0x1] %vm64_vm10, %v63_v27  }
  0x8e   :  { %71 = vst.msk [vmem:[#allocation0] sm:$0x1] %vm70_vm11, %v69_v28  }
  0x8f   :  { %77 = vst.msk [vmem:[#allocation0] sm:$0x1] %vm76_vm12, %v75_v21  }
  0x94   :  { %v81_v29 = vpop.permute.xlu0 %80   ;;  %v87_v30 = vpop.permute.xlu1 %86  }
  0x95   :  { %83 = vst.msk [vmem:[#allocation0] sm:$0x1] %vm82_vm13, %v81_v29  }
  0x96   :  { %89 = vst.msk [vmem:[#allocation0] sm:$0x1] %vm88_vm14, %v87_v30  }
  0x97   :  { %96 = vst.msk [vmem:[#allocation0] ss:$8 sm:$0x3] %vm95_vm15, %v94_v24  }
  0x9e   :  { %v99_v31 = vld [vmem:[#allocation0] sm:$0x1]  ;;  %v104_v32 = vld [vmem:[#allocation0 + $0x8] sm:$0x1] }
  0x9f   :  { %102 = vst [vmem:[%s220_s1] sm:$0x1] %v99_v31 }
  0xa0   :  { %124 = vst [vmem:[%s220_s1 + $0x1] sm:$0x1] %v104_v32 }

// kernel: squeeze.13
= control target key start
LH: loop header
LB: loop body
LE: loop exit
PB: predicated region body
PF: predicated region fallthrough
CT: control target
= control target key end

     0   :  { %vm15_vm0 = vcmask 64512   ;;  %s59_s0 = inlined_call_operand.vmem [shape: f32[8,3,3], index: 0, kind: input, shape index: {}]   ;;  %s60_s1 = inlined_call_operand.vmem [shape: f32[8,9], index: 1, kind: output, shape index: {}]  }
   0x1   :  { %v27_v0 = vld [vmem:[%s59_s0 + $0x8] sm:$0xf]  ;;  %v28_v1 = vld [vmem:[%s59_s0 + $0x4] sm:$0xf]  ;;  %v12_v2 = vld [vmem:[%s59_s0] sm:$0xf] }
   0x2   :  { %7 = vst [vmem:[#allocation0] sm:$0xf] %v27_v0 }
   0x3   :  { %11 = vst [vmem:[#allocation0 + $0x10] sm:$0xf] %v28_v1 }
   0x4   :  { %13 = vst [vmem:[#allocation0 + $0x8] sm:$0xf] %v12_v2 }
   0x9   :  { %v23_v3 = vld [vmem:[#allocation0] sm:$0x7]  }
   0xa   :  { %v18_v4 = vld [vmem:[#allocation0 + $0x10] sm:$0x7]   ;;  %30 = vst.msk [vmem:[%s60_s1 + $0x6] sm:$0x7] %vm15_vm0, %v23_v3  }
   0xb   :  { %v14_v5 = vld [vmem:[#allocation0 + $0x8] sm:$0x7]   ;;  %29 = vst.msk [vmem:[%s60_s1 + $0x3] sm:$0x7] %vm15_vm0, %v18_v4  }
   0xc   :  { %16 = vst.msk [vmem:[%s60_s1] sm:$0x7] %vm15_vm0, %v14_v5  }

// kernel: tile.19
= control target key start
LH: loop header
LB: loop body
LE: loop exit
PB: predicated region body
PF: predicated region fallthrough
CT: control target
= control target key end

     0   :  { %vm6_vm0 = vcmask 1043458   ;;  %vm10_vm1 = vcmask 1045508   ;;  %vm14_vm2 = vcmask 1047558   ;;  %s24_s6 = smov 3  ;;  %s27_s7 = smov 12  ;;  %vm16_vm3 = vcmask 64512   ;;  %s974_s0 = inlined_call_operand.vmem [shape: f32[9,16,8], index: 0, kind: input, shape index: {}]   ;;  %s975_s1 = inlined_call_operand.vmem [shape: f32[9,128], index: 1, kind: output, shape index: {}]  }
   0x1   :  { %v460_v0 = vld [vmem:[%s974_s0 + $0xf] ss:$16 sm:%s24_s6]   ;;  %s32_s12 = smov 48  ;;  %s37_s13 = smov 192  ;;  %v470_v26 = vld [vmem:[%s974_s0 + $0x8e] sm:$0x1]  }
   0x2   :  { %v461_v1 = vld [vmem:[%s974_s0 + $0xf] ss:$16 sm:%s27_s7]   ;;  %s53_s18 = smov 3  ;;  %s56_s21 = smov 12  ;;  %v476_v32 = vld [vmem:[%s974_s0 + $0x8d] sm:$0x1]  }
   0x3   :  { %v30_v2 = vsel %vm6_vm0, %v461_v1, %v460_v0  ;;  %v462_v3 = vld [vmem:[%s974_s0 + $0xf] ss:$16 sm:%s32_s12]   ;;  %v466_v6 = vld [vmem:[%s974_s0 + $0xe] ss:$16 sm:%s53_s18]   ;;  %s61_s22 = smov 48  ;;  %s66_s27 = smov 192 }
   0x4   :  { %v463_v4 = vld [vmem:[%s974_s0 + $0xf] ss:$16 sm:%s37_s13]   ;;  %v35_v5 = vsel %vm10_vm1, %v462_v3, %v30_v2  ;;  %v467_v8 = vld [vmem:[%s974_s0 + $0xe] ss:$16 sm:%s56_s21]   ;;  %s565_s28 = smov 120   ;;  %s111_s2 = smov 3 }
   0x5   :  { %v40_v7 = vsel %vm14_vm2, %v463_v4, %v35_v5  ;;  %v468_v9 = vld [vmem:[%s974_s0 + $0xe] ss:$16 sm:%s61_s22]   ;;  %v59_v10 = vsel %vm6_vm0, %v467_v8, %v466_v6  ;;  %s114_s3 = smov 12  ;;  %v478_v14 = vld [vmem:[%s974_s0 + $0xc] ss:$16 sm:%s111_s2]   ;;  %s119_s6 = smov 48 }
   0x6   :  { %41 = vrot.lane.b32.xlu0 %v40_v7, %s565_s28  ;;  %v469_v11 = vld [vmem:[%s974_s0 + $0xe] ss:$16 sm:%s66_s27]   ;;  %v64_v12 = vsel %vm10_vm1, %v468_v9, %v59_v10  ;;  %s566_s7 = smov 112   ;;  %v464_v15 = vld [vmem:[%s974_s0 + $0x8f] sm:$0x1]   ;;  %s82_s12 = smov 3 }
   0x7   :  { %v69_v13 = vsel %vm14_vm2, %v469_v11, %v64_v12  ;;  %v479_v16 = vld [vmem:[%s974_s0 + $0xc] ss:$16 sm:%s114_s3]   ;;  %s85_s13 = smov 12  ;;  %v472_v17 = vld [vmem:[%s974_s0 + $0xd] ss:$16 sm:%s82_s12]   ;;  %s90_s18 = smov 48 }
   0x8   :  { %70 = vrot.lane.b32.xlu1 %v69_v13, %s566_s7  ;;  %v473_v18 = vld [vmem:[%s974_s0 + $0xd] ss:$16 sm:%s85_s13]   ;;  %s95_s19 = smov 192  ;;  %v117_v23 = vsel %vm6_vm0, %v479_v16, %v478_v14  ;;  %s124_s26 = smov 192  ;;  %v482_v37 = vld [vmem:[%s974_s0 + $0x8c] sm:$0x1]  }
   0x9   :  { %v88_v19 = vsel %vm6_vm0, %v473_v18, %v472_v17  ;;  %v474_v20 = vld [vmem:[%s974_s0 + $0xd] ss:$16 sm:%s90_s18]   ;;  %v480_v24 = vld [vmem:[%s974_s0 + $0xc] ss:$16 sm:%s119_s6]   ;;  %s567_s29 = smov 104   ;;  %s169_s3 = smov 3 }
   0xa   :  { %v475_v21 = vld [vmem:[%s974_s0 + $0xd] ss:$16 sm:%s95_s19]   ;;  %v93_v22 = vsel %vm10_vm1, %v474_v20, %v88_v19  ;;  %v122_v27 = vsel %vm10_vm1, %v480_v24, %v117_v23  ;;  %v481_v28 = vld [vmem:[%s974_s0 + $0xc] ss:$16 sm:%s124_s26]   ;;  %s140_s4 = smov 3  ;;  %s143_s5 = smov 12 }
   0xb   :  { %v98_v25 = vsel %vm14_vm2, %v475_v21, %v93_v22  ;;  %s172_s6 = smov 12  ;;  %v484_v29 = vld [vmem:[%s974_s0 + $0xb] ss:$16 sm:%s140_s4]   ;;  %s148_s11 = smov 48  ;;  %v127_v31 = vsel %vm14_vm2, %v481_v28, %v122_v27  ;;  %v490_v33 = vld [vmem:[%s974_s0 + $0xa] ss:$16 sm:%s169_s3]  }
   0xc   :  { %99 = vrot.lane.b32.xlu2 %v98_v25, %s567_s29  ;;  %v485_v30 = vld [vmem:[%s974_s0 + $0xb] ss:$16 sm:%s143_s5]   ;;  %s177_s18 = smov 48  ;;  %s153_s21 = smov 192  ;;  %v494_v56 = vld [vmem:[%s974_s0 + $0x8a] sm:$0x1]  }
   0xd   :  { %v491_v34 = vld [vmem:[%s974_s0 + $0xa] ss:$16 sm:%s172_s6]   ;;  %v146_v35 = vsel %vm6_vm0, %v485_v30, %v484_v29  ;;  %v486_v36 = vld [vmem:[%s974_s0 + $0xb] ss:$16 sm:%s148_s11]   ;;  %s568_s22 = smov 96   ;;  %s198_s25 = smov 3 }
   0xe   :  { %47 = vrot.lane.b32.xlu0 %v464_v15, %s565_s28  ;;  %s201_s26 = smov 12  ;;  %v175_v38 = vsel %vm6_vm0, %v491_v34, %v490_v33  ;;  %v492_v39 = vld [vmem:[%s974_s0 + $0xa] ss:$16 sm:%s177_s18]   ;;  %v151_v40 = vsel %vm10_vm1, %v486_v36, %v146_v35  ;;  %v488_v44 = vld [vmem:[%s974_s0 + $0x8b] sm:$0x1]   ;;  %s211_s14 = smov 192 }
   0xf   :  { %v487_v41 = vld [vmem:[%s974_s0 + $0xb] ss:$16 sm:%s153_s21]   ;;  %v496_v42 = vld [vmem:[%s974_s0 + $0x9] ss:$16 sm:%s198_s25]   ;;  %v180_v45 = vsel %vm10_vm1, %v492_v39, %v175_v38  ;;  %s569_s15 = smov 88   ;;  %s227_s16 = smov 3 }
  0x10   :  { %76 = vrot.lane.b32.xlu1 %v470_v26, %s566_s7  ;;  %v497_v43 = vld [vmem:[%s974_s0 + $0x9] ss:$16 sm:%s201_s26]   ;;  %s206_s7 = smov 48  ;;  %v156_v47 = vsel %vm14_vm2, %v487_v41, %v151_v40  ;;  %s230_s17 = smov 12  ;;  %v506_v4 = vld [vmem:[%s974_s0 + $0x88] sm:$0x1]  }
  0x11   :  { %v204_v48 = vsel %vm6_vm0, %v497_v43, %v496_v42  ;;  %v498_v49 = vld [vmem:[%s974_s0 + $0x9] ss:$16 sm:%s206_s7]   ;;  %s570_s20 = smov 80   ;;  %s256_s21 = smov 3  ;;  %v502_v53 = vld [vmem:[%s974_s0 + $0x8] ss:$16 sm:%s227_s16]  }
  0x12   :  { %v209_v51 = vsel %vm10_vm1, %v498_v49, %v204_v48  ;;  %v499_v52 = vld [vmem:[%s974_s0 + $0x9] ss:$16 sm:%s211_s14]   ;;  %v503_v54 = vld [vmem:[%s974_s0 + $0x8] ss:$16 sm:%s230_s17]   ;;  %s235_s27 = smov 48  ;;  %s264_s5 = smov 48 }
  0x13   :  { %v214_v55 = vsel %vm14_vm2, %v499_v52, %v209_v51  ;;  %v508_v57 = vld [vmem:[%s974_s0 + $0x7] ss:$16 sm:%s256_s21]   ;;  %v233_v59 = vsel %vm6_vm0, %v503_v54, %v502_v53  ;;  %v504_v60 = vld [vmem:[%s974_s0 + $0x8] ss:$16 sm:%s235_s27]   ;;  %s240_s8 = smov 192  ;;  %s571_s9 = smov 72  }
  0x14   :  { %105 = vrot.lane.b32.xlu2 %v476_v32, %s567_s29  ;;  %s182_s29 = smov 192  ;;  %v500_v61 = vld [vmem:[%s974_s0 + $0x89] sm:$0x1]   ;;  %s285_s12 = smov 3  ;;  %v510_v63 = vld [vmem:[%s974_s0 + $0x7] ss:$16 sm:%s264_s5]   ;;  %v238_v0 = vsel %vm10_vm1, %v504_v60, %v233_v59 }
  0x15   :  { %v493_v46 = vld [vmem:[%s974_s0 + $0xa] ss:$16 sm:%s182_s29]   ;;  %s288_s13 = smov 12  ;;  %s269_s16 = smov 192  ;;  %v505_v1 = vld [vmem:[%s974_s0 + $0x8] ss:$16 sm:%s240_s8]  }
  0x16   :  { %128 = vrot.lane.b32.xlu0 %v127_v31, %s568_s22  ;;  %v185_v50 = vsel %vm14_vm2, %v493_v46, %v180_v45  ;;  %v514_v2 = vld [vmem:[%s974_s0 + $0x6] ss:$16 sm:%s285_s12]   ;;  %s293_s23 = smov 48  ;;  %v243_v7 = vsel %vm14_vm2, %v505_v1, %v238_v0  ;;  %s298_s30 = smov 192  ;;  %v512_v16 = vld [vmem:[%s974_s0 + $0x87] sm:$0x1]  }
  0x17   :  { %v515_v3 = vld [vmem:[%s974_s0 + $0x6] ss:$16 sm:%s288_s13]   ;;  %v511_v6 = vld [vmem:[%s974_s0 + $0x7] ss:$16 sm:%s269_s16]   ;;  %s572_s2 = smov 64   ;;  %s314_s3 = smov 3 }
  0x18   :  { %134 = vrot.lane.b32.xlu1 %v482_v37, %s568_s22  ;;  %s259_s22 = smov 12  ;;  %v291_v8 = vsel %vm6_vm0, %v515_v3, %v514_v2  ;;  %v516_v9 = vld [vmem:[%s974_s0 + $0x6] ss:$16 sm:%s293_s23]   ;;  %s317_s4 = smov 12  ;;  %v524_v28 = vld [vmem:[%s974_s0 + $0x85] sm:$0x1]  }
  0x19   :  { %v509_v58 = vld [vmem:[%s974_s0 + $0x7] ss:$16 sm:%s259_s22]   ;;  %v296_v11 = vsel %vm10_vm1, %v516_v9, %v291_v8  ;;  %v517_v12 = vld [vmem:[%s974_s0 + $0x6] ss:$16 sm:%s298_s30]   ;;  %s573_s7 = smov 56   ;;  %s343_s8 = smov 3 }
  0x1a   :  { %v262_v62 = vsel %vm6_vm0, %v509_v58, %v508_v57  ;;  %v520_v13 = vld [vmem:[%s974_s0 + $0x5] ss:$16 sm:%s314_s3]   ;;  %s322_s14 = smov 48  ;;  %v301_v15 = vsel %vm14_vm2, %v517_v12, %v296_v11  ;;  %v526_v17 = vld [vmem:[%s974_s0 + $0x4] ss:$16 sm:%s343_s8]   ;;  %s351_s21 = smov 48 }
  0x1b   :  { %v267_v5 = vsel %vm10_vm1, %v510_v63, %v262_v62  ;;  %v521_v14 = vld [vmem:[%s974_s0 + $0x5] ss:$16 sm:%s317_s4]   ;;  %s327_s24 = smov 192  ;;  %s574_s25 = smov 48   ;;  %v518_v21 = vld [vmem:[%s974_s0 + $0x86] sm:$0x1]  }
  0x1c   :  { %157 = vrot.lane.b32.xlu2 %v156_v47, %s569_s15  ;;  %v272_v10 = vsel %vm14_vm2, %v511_v6, %v267_v5  ;;  %v320_v19 = vsel %vm6_vm0, %v521_v14, %v520_v13  ;;  %v522_v20 = vld [vmem:[%s974_s0 + $0x5] ss:$16 sm:%s322_s14]   ;;  %s372_s28 = smov 3  ;;  %s375_s29 = smov 12  ;;  %v530_v40 = vld [vmem:[%s974_s0 + $0x84] sm:$0x1]  }
  0x1d   :  { %v528_v23 = vld [vmem:[%s974_s0 + $0x4] ss:$16 sm:%s351_s21]   ;;  %s356_s3 = smov 192  ;;  %v325_v24 = vsel %vm10_vm1, %v522_v20, %v320_v19  ;;  %v523_v25 = vld [vmem:[%s974_s0 + $0x5] ss:$16 sm:%s327_s24]   ;;  %s380_s10 = smov 48 }
  0x1e   :  { %163 = vrot.lane.b32.xlu0 %v488_v44, %s569_s15  ;;  %v532_v26 = vld [vmem:[%s974_s0 + $0x3] ss:$16 sm:%s372_s28]   ;;  %v330_v31 = vsel %vm14_vm2, %v523_v25, %v325_v24  ;;  %s385_s17 = smov 192  ;;  %s575_s18 = smov 40   ;;  %v458_v63 = vld [vmem:[%s974_s0 + $0x80] sm:$0x1]  }
  0x1f   :  { %v533_v27 = vld [vmem:[%s974_s0 + $0x3] ss:$16 sm:%s375_s29]   ;;  %v529_v30 = vld [vmem:[%s974_s0 + $0x4] ss:$16 sm:%s356_s3]   ;;  %s401_s19 = smov 3  ;;  %s576_s23 = smov 32  }
  0x20   :  { %186 = vrot.lane.b32.xlu1 %v185_v50, %s570_s20  ;;  %v378_v32 = vsel %vm6_vm0, %v533_v27, %v532_v26  ;;  %v534_v33 = vld [vmem:[%s974_s0 + $0x3] ss:$16 sm:%s380_s10]   ;;  %s430_s24 = smov 3  ;;  %s409_s30 = smov 48  ;;  %v542_v50 = vld [vmem:[%s974_s0 + $0x82] sm:$0x1]  }
  0x21   :  { %v383_v35 = vsel %vm10_vm1, %v534_v33, %v378_v32  ;;  %v535_v36 = vld [vmem:[%s974_s0 + $0x3] ss:$16 sm:%s385_s17]   ;;  %v538_v37 = vld [vmem:[%s974_s0 + $0x2] ss:$16 sm:%s401_s19]   ;;  %s438_s8 = smov 48  ;;  %s414_s11 = smov 192 }
  0x22   :  { %v388_v39 = vsel %vm14_vm2, %v535_v36, %v383_v35  ;;  %v544_v41 = vld [vmem:[%s974_s0 + $0x1] ss:$16 sm:%s430_s24]   ;;  %v540_v44 = vld [vmem:[%s974_s0 + $0x2] ss:$16 sm:%s409_s30]   ;;  %s577_s12 = smov 24   ;;  %s443_s17 = smov 192 }
  0x23   :  { %v536_v45 = vld [vmem:[%s974_s0 + $0x83] sm:$0x1]   ;;  %v546_v47 = vld [vmem:[%s974_s0 + $0x1] ss:$16 sm:%s438_s8]   ;;  %s578_s24 = smov 16   ;;  %s2_s28 = smov 3 }
  0x24   :  { %192 = vrot.lane.b32.xlu2 %v494_v56, %s570_s20  ;;  %s404_s20 = smov 12  ;;  %v541_v49 = vld [vmem:[%s974_s0 + $0x2] ss:$16 sm:%s414_s11]   ;;  %s4_s29 = smov 12  ;;  %459 = vst.msk [vmem:[%s975_s1 + $0x8] sm:$0x1] %vm16_vm3, %v458_v63  }
  0x25   :  { %v539_v38 = vld [vmem:[%s974_s0 + $0x2] ss:$16 sm:%s404_s20]   ;;  %v547_v52 = vld [vmem:[%s974_s0 + $0x1] ss:$16 sm:%s443_s17]   ;;  %s8_s30 = smov 48  ;;  %vm43_vm4 = vcmask 1048512  }
  0x26   :  { %215 = vrot.lane.b32.xlu0 %v214_v55, %s571_s9  ;;  %v407_v43 = vsel %vm6_vm0, %v539_v38, %v538_v37  ;;  %v548_v55 = vld [vmem:[%s974_s0 + $0x81] sm:$0x1]   ;;  %v3_v56 = vld [vmem:[%s974_s0] ss:$16 sm:%s2_s28]   ;;  %vm72_vm5 = vcmask 982912   ;;  %vm101_vm6 = vcmask 917312  }
  0x27   :  { %v412_v48 = vsel %vm10_vm1, %v540_v44, %v407_v43  ;;  %v5_v57 = vld [vmem:[%s974_s0] ss:$16 sm:%s4_s29]   ;;  %vm130_vm7 = vcmask 851712   ;;  %vm159_vm8 = vcmask 786112   ;;  %vm188_vm9 = vcmask 720512  }
  0x28   :  { %221 = vrot.lane.b32.xlu1 %v500_v61, %s571_s9  ;;  %s346_s9 = smov 12  ;;  %v417_v53 = vsel %vm14_vm2, %v541_v49, %v412_v48  ;;  %v9_v58 = vld [vmem:[%s974_s0] ss:$16 sm:%s8_s30]   ;;  %v7_v59 = vsel %vm6_vm0, %v5_v57, %v3_v56  ;;  %vm217_vm10 = vcmask 654912   ;;  %vm246_vm11 = vcmask 589312  }
  0x29   :  { %v527_v18 = vld [vmem:[%s974_s0 + $0x4] ss:$16 sm:%s346_s9]   ;;  %v11_v61 = vsel %vm10_vm1, %v9_v58, %v7_v59  ;;  %vm275_vm12 = vcmask 523712   ;;  %vm304_vm13 = vcmask 458112   ;;  %vm333_vm14 = vcmask 392512  }
  0x2a   :  { %v349_v22 = vsel %vm6_vm0, %v527_v18, %v526_v17  ;;  %vm362_vm15 = vcmask 326912  }
  0x2b   :  { %v354_v29 = vsel %vm10_vm1, %v528_v23, %v349_v22 }
  0x2c   :  { %244 = vrot.lane.b32.xlu2 %v243_v7, %s572_s2  ;;  %v359_v34 = vsel %vm14_vm2, %v529_v30, %v354_v29 }
  0x2e   :  { %250 = vrot.lane.b32.xlu0 %v506_v4, %s572_s2  ;;  %s12_s2 = smov 192 }
  0x2f   :  { %v13_v60 = vld [vmem:[%s974_s0] ss:$16 sm:%s12_s2]  }
  0x30   :  { %273 = vrot.lane.b32.xlu1 %v272_v10, %s573_s7  ;;  %v15_v62 = vsel %vm14_vm2, %v13_v60, %v11_v61 }
  0x31   :  { %17 = vst.msk [vmem:[%s975_s1] sm:$0xff] %vm16_vm3, %v15_v62  }
  0x34   :  { %279 = vrot.lane.b32.xlu2 %v512_v16, %s573_s7 }
  0x36   :  { %302 = vrot.lane.b32.xlu0 %v301_v15, %s574_s25 }
  0x38   :  { %308 = vrot.lane.b32.xlu1 %v518_v21, %s574_s25  ;;  %s433_s25 = smov 12 }
  0x39   :  { %v545_v42 = vld [vmem:[%s974_s0 + $0x1] ss:$16 sm:%s433_s25]   ;;  %s579_s25 = smov 8  }
  0x3a   :  { %v436_v46 = vsel %vm6_vm0, %v545_v42, %v544_v41  ;;  %vm391_vm0 = vcmask 261312  }
  0x3b   :  { %v441_v51 = vsel %vm10_vm1, %v546_v47, %v436_v46  ;;  %vm420_vm1 = vcmask 195712  }
  0x3c   :  { %331 = vrot.lane.b32.xlu2 %v330_v31, %s575_s18  ;;  %v446_v54 = vsel %vm14_vm2, %v547_v52, %v441_v51  ;;  %vm449_vm2 = vcmask 130112  }
  0x3e   :  { %337 = vrot.lane.b32.xlu0 %v524_v28, %s575_s18 }
  0x40   :  { %360 = vrot.lane.b32.xlu1 %v359_v34, %s576_s23 }
  0x44   :  { %366 = vrot.lane.b32.xlu2 %v530_v40, %s576_s23 }
  0x46   :  { %389 = vrot.lane.b32.xlu0 %v388_v39, %s577_s12 }
  0x48   :  { %395 = vrot.lane.b32.xlu1 %v536_v45, %s577_s12 }
  0x4c   :  { %418 = vrot.lane.b32.xlu2 %v417_v53, %s578_s24 }
  0x4e   :  { %424 = vrot.lane.b32.xlu0 %v542_v50, %s578_s24 }
  0x50   :  { %447 = vrot.lane.b32.xlu1 %v446_v54, %s579_s25 }
  0x54   :  { %453 = vrot.lane.b32.xlu2 %v548_v55, %s579_s25 }
  0x66   :  { %v100_v0 = vpop.permute.xlu2 %99  }
  0x6e   :  { %v106_v1 = vpop.permute.xlu2 %105  }
  0x76   :  { %v158_v3 = vpop.permute.xlu2 %157  }
  0x78   :  { %v42_v2 = vpop.permute.xlu0 %41  }
  0x79   :  { %44 = vst.msk [vmem:[%s975_s1] sm:$0xff] %vm43_vm4, %v42_v2  }
  0x7a   :  { %v71_v4 = vpop.permute.xlu1 %70  }
  0x7b   :  { %73 = vst.msk [vmem:[%s975_s1] sm:$0xff] %vm72_vm5, %v71_v4  }
  0x7c   :  { %102 = vst.msk [vmem:[%s975_s1] sm:$0xff] %vm101_vm6, %v100_v0  }
  0x7e   :  { %v193_v6 = vpop.permute.xlu2 %192  }
  0x80   :  { %v48_v5 = vpop.permute.xlu0 %47  }
  0x81   :  { %465 = vst.msk [vmem:[%s975_s1 + $0x8] sm:$0x1] %vm43_vm4, %v48_v5  }
  0x82   :  { %v77_v7 = vpop.permute.xlu1 %76  }
  0x83   :  { %471 = vst.msk [vmem:[%s975_s1 + $0x8] sm:$0x1] %vm72_vm5, %v77_v7  }
  0x84   :  { %477 = vst.msk [vmem:[%s975_s1 + $0x8] sm:$0x1] %vm101_vm6, %v106_v1  }
  0x86   :  { %v245_v9 = vpop.permute.xlu2 %244  }
  0x88   :  { %v129_v8 = vpop.permute.xlu0 %128  }
  0x89   :  { %131 = vst.msk [vmem:[%s975_s1] sm:$0xff] %vm130_vm7, %v129_v8  }
  0x8a   :  { %160 = vst.msk [vmem:[%s975_s1] sm:$0xff] %vm159_vm8, %v158_v3   ;;  %v135_v10 = vpop.permute.xlu1 %134  }
  0x8b   :  { %483 = vst.msk [vmem:[%s975_s1 + $0x8] sm:$0x1] %vm130_vm7, %v135_v10  }
  0x8e   :  { %v280_v12 = vpop.permute.xlu2 %279  }
  0x90   :  { %v164_v11 = vpop.permute.xlu0 %163  }
  0x91   :  { %489 = vst.msk [vmem:[%s975_s1 + $0x8] sm:$0x1] %vm159_vm8, %v164_v11  }
  0x92   :  { %495 = vst.msk [vmem:[%s975_s1 + $0x8] sm:$0x1] %vm188_vm9, %v193_v6   ;;  %v187_v13 = vpop.permute.xlu1 %186  }
  0x93   :  { %189 = vst.msk [vmem:[%s975_s1] sm:$0xff] %vm188_vm9, %v187_v13  }
  0x96   :  { %v332_v15 = vpop.permute.xlu2 %331  }
  0x98   :  { %v216_v14 = vpop.permute.xlu0 %215  }
  0x99   :  { %218 = vst.msk [vmem:[%s975_s1] sm:$0xff] %vm217_vm10, %v216_v14  }
  0x9a   :  { %247 = vst.msk [vmem:[%s975_s1] sm:$0xff] %vm246_vm11, %v245_v9   ;;  %v222_v16 = vpop.permute.xlu1 %221  }
  0x9b   :  { %501 = vst.msk [vmem:[%s975_s1 + $0x8] sm:$0x1] %vm217_vm10, %v222_v16  }
  0x9e   :  { %v367_v18 = vpop.permute.xlu2 %366  }
  0xa0   :  { %v251_v17 = vpop.permute.xlu0 %250  }
  0xa1   :  { %507 = vst.msk [vmem:[%s975_s1 + $0x8] sm:$0x1] %vm246_vm11, %v251_v17  }
  0xa2   :  { %513 = vst.msk [vmem:[%s975_s1 + $0x8] sm:$0x1] %vm275_vm12, %v280_v12   ;;  %v274_v19 = vpop.permute.xlu1 %273  }
  0xa3   :  { %276 = vst.msk [vmem:[%s975_s1] sm:$0xff] %vm275_vm12, %v274_v19  }
  0xa6   :  { %v419_v21 = vpop.permute.xlu2 %418  }
  0xa8   :  { %v303_v20 = vpop.permute.xlu0 %302  }
  0xa9   :  { %305 = vst.msk [vmem:[%s975_s1] sm:$0xff] %vm304_vm13, %v303_v20  }
  0xaa   :  { %334 = vst.msk [vmem:[%s975_s1] sm:$0xff] %vm333_vm14, %v332_v15   ;;  %v309_v22 = vpop.permute.xlu1 %308  }
  0xab   :  { %519 = vst.msk [vmem:[%s975_s1 + $0x8] sm:$0x1] %vm304_vm13, %v309_v22  }
  0xae   :  { %v454_v24 = vpop.permute.xlu2 %453  }
  0xb0   :  { %v338_v23 = vpop.permute.xlu0 %337  }
  0xb1   :  { %525 = vst.msk [vmem:[%s975_s1 + $0x8] sm:$0x1] %vm333_vm14, %v338_v23  }
  0xb2   :  { %531 = vst.msk [vmem:[%s975_s1 + $0x8] sm:$0x1] %vm362_vm15, %v367_v18   ;;  %v361_v25 = vpop.permute.xlu1 %360  }
  0xb3   :  { %363 = vst.msk [vmem:[%s975_s1] sm:$0xff] %vm362_vm15, %v361_v25  }
  0xb8   :  { %v390_v26 = vpop.permute.xlu0 %389  }
  0xb9   :  { %392 = vst.msk [vmem:[%s975_s1] sm:$0xff] %vm391_vm0, %v390_v26  }
  0xba   :  { %421 = vst.msk [vmem:[%s975_s1] sm:$0xff] %vm420_vm1, %v419_v21   ;;  %v396_v27 = vpop.permute.xlu1 %395  }
  0xbb   :  { %537 = vst.msk [vmem:[%s975_s1 + $0x8] sm:$0x1] %vm391_vm0, %v396_v27  }
  0xc0   :  { %v425_v28 = vpop.permute.xlu0 %424  }
  0xc1   :  { %543 = vst.msk [vmem:[%s975_s1 + $0x8] sm:$0x1] %vm420_vm1, %v425_v28  }
  0xc2   :  { %549 = vst.msk [vmem:[%s975_s1 + $0x8] sm:$0x1] %vm449_vm2, %v454_v24   ;;  %v448_v29 = vpop.permute.xlu1 %447  }
  0xc3   :  { %450 = vst.msk [vmem:[%s975_s1] sm:$0xff] %vm449_vm2, %v448_v29  }

// kernel: cnn_block_forward.4
= control target key start
LH: loop header
LB: loop body
LE: loop exit
PB: predicated region body
PF: predicated region fallthrough
CT: control target
= control target key end

     0   :  { %s1485_s12 = smov 0   ;;  %s1487_s13 = smov 0   ;;  %s2396_s0 = inlined_call_operand.vmem [shape: f32[2,16,16,4], index: 0, kind: input, shape index: {}]   ;;  %s2397_s1 = inlined_call_operand.vmem [shape: f32[4,8], index: 1, kind: input, shape index: {}]   ;;  %s2398_s2 = inlined_call_operand.vmem [shape: f32[2,16,16,8], index: 2, kind: output, shape index: {0}]   ;;  %s2399_s3 = inlined_call_operand.vmem [shape: f32[2,1,2,8], index: 3, kind: output, shape index: {1}]  }
   0x1   :  { %s1489_s14 = smov 0  }
   0x2 LB: > { %s26_s15 = sadd.s32 1, %s1455_s13  ;;  %p1387_p0 = scmp.ge.s32.totalorder %s1459_s14, 1  ;;  %s1459_s14 = sphi %s1489_s14, %s14_s14   ;;  %s1455_s13 = sphi %s1487_s13, %s2458_s13   ;;  %s1451_s12 = sphi %s1485_s12, %s2457_s12  }
   0x3   : > { %p28_p1 = scmp.ge.s32.totalorder %s26_s15, 2  ;;  %p164_p2 = scmp.lt.s32.totalorder %s1459_s14, 3 }
   0x5   : > { %s2460_s15 = smov (%p28_p1, %s26_s15), 0  ;;  %p165_p3 = pnand %p1387_p0, %p164_p2 }
   0x7   : > { %168 = sbr.rel (%p165_p3) target bundleno = 503 (0x1f7), region = 28 }
   0xc   : > { %p206_p4 = scmp.lt.s32.totalorder %s1451_s12, 1  ;;  %v1461_v0 = vmov 0   ;;  %v1462_v33 = vmov 1   ;;  %v1719_v58 = vld [vmem:[%s2397_s1] sm:$0xf]  ;;  %v1463_v61 = vmov 2  }
   0xd   : > { %1427 = vset.pattern.permute.xlu2 %v1461_v0  ;;  %1426 = vset.pattern.permute.xlu1 %v1461_v0  ;;  %2428 = vst [vmem:[#allocation15_spill] sm:$0xff] %v1719_v58  ;;  %v1722_v59 = vperm.slane %v1719_v58, 1  ;;  %v1726_v60 = vperm.slane %v1719_v58, 0  ;;  %vm1039_vm0 = vcmask 64512   ;;  %vm1242_vm1 = vcmask 1040384  }
   0xe   : > { %1425 = vset.pattern.permute.xlu0 %v1461_v0  ;;  %s2462_s12 = smov (!%p206_p4, %s1451_s12), 1  ;;  %vm1244_vm2 = vcmask 58368  }
   0xf   : > { %s1395_s16 = sshll.u32 %s2462_s12, 8  ;;  %s1392_s25 = sshll.u32 %s2462_s12, 1 }
  0x10   : > { %s1511_s19 = scalar_lea.vmem %s2396_s0, %s1395_s16  ;;  %s2087_s24 = scalar_lea.vmem %s2398_s2, %s1395_s16 }
  0x11   : > { %v1514_v1 = vld [vmem:[%s1511_s19 + $0x20] sm:$0xff]  ;;  %v1517_v2 = vld [vmem:[%s1511_s19 + $0x10] sm:$0xff]  ;;  %v1526_v4 = vld [vmem:[%s1511_s19 + $0x28] sm:$0xff]  ;;  %s233_s28 = scalar_lea.vmem %s2399_s3, %s1392_s25 }
  0x12   : > { %v1520_v3 = vld [vmem:[%s1511_s19] sm:$0xff]  ;;  %289 = vperm.xlu2 %1427, %v1514_v1   ;;  %279 = vperm.xlu1 %1426, %v1517_v2   ;;  %2416 = vst [vmem:[#allocation3_spill] sm:$0xff] %v1526_v4  ;;  %v1529_v5 = vld [vmem:[%s1511_s19 + $0x18] sm:$0xff]  ;;  %v1532_v6 = vld [vmem:[%s1511_s19 + $0x8] sm:$0xff] }
  0x13   : > { %2415 = vst [vmem:[#allocation2_spill] sm:$0xff] %v1520_v3  ;;  %269 = vperm.xlu0 %1425, %v1520_v3   ;;  %v1538_v7 = vld [vmem:[%s1511_s19 + $0x40] sm:$0xff]  ;;  %v1541_v8 = vld [vmem:[%s1511_s19 + $0x38] sm:$0xff]  ;;  %v1544_v9 = vld [vmem:[%s1511_s19 + $0x30] sm:$0xff] }
  0x14   : > { %2417 = vst [vmem:[#allocation4_spill] sm:$0xff] %v1529_v5  ;;  %v1550_v10 = vld [vmem:[%s1511_s19 + $0x58] sm:$0xff]  ;;  %v1553_v11 = vld [vmem:[%s1511_s19 + $0x50] sm:$0xff]  ;;  %v1556_v12 = vld [vmem:[%s1511_s19 + $0x48] sm:$0xff] }
  0x15   : > { %2418 = vst [vmem:[#allocation5_spill] sm:$0xff] %v1532_v6  ;;  %v1562_v13 = vld [vmem:[%s1511_s19 + $0x70] sm:$0xff]  ;;  %v1565_v14 = vld [vmem:[%s1511_s19 + $0x68] sm:$0xff]  ;;  %v1568_v15 = vld [vmem:[%s1511_s19 + $0x60] sm:$0xff] }
  0x16   : > { %2419 = vst [vmem:[#allocation6_spill] sm:$0xff] %v1538_v7  ;;  %v1574_v16 = vld [vmem:[%s1511_s19 + $0x88] sm:$0xff]  ;;  %v1577_v17 = vld [vmem:[%s1511_s19 + $0x80] sm:$0xff]  ;;  %v1580_v18 = vld [vmem:[%s1511_s19 + $0x78] sm:$0xff] }
  0x17   : > { %2420 = vst [vmem:[#allocation7_spill] sm:$0xff] %v1550_v10  ;;  %v1586_v19 = vld [vmem:[%s1511_s19 + $0xa0] sm:$0xff]  ;;  %v1589_v20 = vld [vmem:[%s1511_s19 + $0x98] sm:$0xff]  ;;  %v1592_v21 = vld [vmem:[%s1511_s19 + $0x90] sm:$0xff] }
  0x18   : > { %2421 = vst [vmem:[#allocation8_spill] sm:$0xff] %v1553_v11  ;;  %v1598_v22 = vld [vmem:[%s1511_s19 + $0xb8] sm:$0xff]  ;;  %v1601_v23 = vld [vmem:[%s1511_s19 + $0xb0] sm:$0xff]  ;;  %v1604_v24 = vld [vmem:[%s1511_s19 + $0xa8] sm:$0xff] }
  0x19   : > { %v1610_v25 = vld [vmem:[%s1511_s19 + $0xd0] sm:$0xff]  ;;  %v1613_v26 = vld [vmem:[%s1511_s19 + $0xc8] sm:$0xff]  ;;  %v1616_v27 = vld [vmem:[%s1511_s19 + $0xc0] sm:$0xff] }
  0x1a   : > { %294 = vperm.xlu2 %1427, %v1526_v4   ;;  %284 = vperm.xlu1 %1426, %v1529_v5   ;;  %2422 = vst [vmem:[#allocation9_spill] sm:$0xff] %v1610_v25  ;;  %v1622_v28 = vld [vmem:[%s1511_s19 + $0xe8] sm:$0xff]  ;;  %v1625_v29 = vld [vmem:[%s1511_s19 + $0xe0] sm:$0xff]  ;;  %v1628_v30 = vld [vmem:[%s1511_s19 + $0xd8] sm:$0xff] }
  0x1b   : > { %274 = vperm.xlu0 %1425, %v1532_v6   ;;  %2423 = vst [vmem:[#allocation10_spill] sm:$0xff] %v1613_v26  ;;  %v1634_v31 = vld [vmem:[%s1511_s19 + $0xf8] sm:$0xff]  ;;  %v1637_v32 = vld [vmem:[%s1511_s19 + $0xf0] sm:$0xff] }
  0x1c   : > { %2424 = vst [vmem:[#allocation11_spill] sm:$0xff] %v1622_v28 }
  0x1d   : > { %2425 = vst [vmem:[#allocation12_spill] sm:$0xff] %v1625_v29 }
  0x1e   : > { %2426 = vst [vmem:[#allocation13_spill] sm:$0xff] %v1634_v31 }
  0x22   : > { %309 = vperm.xlu2 %1427, %v1538_v7   ;;  %304 = vperm.xlu1 %1426, %v1541_v8  }
  0x23   : > { %299 = vperm.xlu0 %1425, %v1544_v9  }
  0x2a   : > { %324 = vperm.xlu2 %1427, %v1550_v10   ;;  %319 = vperm.xlu1 %1426, %v1553_v11  }
  0x2b   : > { %314 = vperm.xlu0 %1425, %v1556_v12  }
  0x32   : > { %339 = vperm.xlu2 %1427, %v1562_v13   ;;  %334 = vperm.xlu1 %1426, %v1565_v14  }
  0x33   : > { %329 = vperm.xlu0 %1425, %v1568_v15  }
  0x3a   : > { %354 = vperm.xlu2 %1427, %v1574_v16   ;;  %349 = vperm.xlu1 %1426, %v1577_v17  }
  0x3b   : > { %344 = vperm.xlu0 %1425, %v1580_v18  }
  0x42   : > { %369 = vperm.xlu2 %1427, %v1586_v19   ;;  %364 = vperm.xlu1 %1426, %v1589_v20  }
  0x43   : > { %359 = vperm.xlu0 %1425, %v1592_v21  }
  0x4a   : > { %384 = vperm.xlu2 %1427, %v1598_v22   ;;  %379 = vperm.xlu1 %1426, %v1601_v23  }
  0x4b   : > { %374 = vperm.xlu0 %1425, %v1604_v24  }
  0x52   : > { %399 = vperm.xlu2 %1427, %v1610_v25   ;;  %394 = vperm.xlu1 %1426, %v1613_v26  }
  0x53   : > { %389 = vperm.xlu0 %1425, %v1616_v27  }
  0x5a   : > { %414 = vperm.xlu2 %1427, %v1622_v28   ;;  %409 = vperm.xlu1 %1426, %v1625_v29  }
  0x5b   : > { %404 = vperm.xlu0 %1425, %v1628_v30  }
  0x62   : > { %1428 = vset.pattern.permute.xlu2 %v1462_v33  ;;  %424 = vperm.xlu1 %1426, %v1634_v31  }
  0x63   : > { %419 = vperm.xlu0 %1425, %v1637_v32   ;;  %461 = vperm.xlu2 %1428, %v1520_v3  }
  0x6a   : > { %1430 = vset.pattern.permute.xlu1 %v1462_v33 }
  0x6b   : > { %1429 = vset.pattern.permute.xlu0 %v1462_v33  ;;  %469 = vperm.xlu1 %1430, %v1517_v2  }
  0x6c   : > { %473 = vperm.xlu2 %1428, %v1529_v5   ;;  %465 = vperm.xlu0 %1429, %v1532_v6   ;;  %v1645_v34 = vpop.permute.xlu2 %289 }
  0x73   : > { %477 = vperm.xlu1 %1430, %v1514_v1  }
  0x74   : > { %481 = vperm.xlu2 %1428, %v1526_v4   ;;  %485 = vperm.xlu0 %1429, %v1544_v9   ;;  %v1650_v35 = vpop.permute.xlu2 %294 }
  0x7b   : > { %489 = vperm.xlu1 %1430, %v1541_v8  }
  0x7c   : > { %493 = vperm.xlu2 %1428, %v1538_v7   ;;  %497 = vperm.xlu0 %1429, %v1556_v12   ;;  %v1655_v36 = vpop.permute.xlu2 %309 }
  0x83   : > { %501 = vperm.xlu1 %1430, %v1553_v11  }
  0x84   : > { %505 = vperm.xlu2 %1428, %v1550_v10   ;;  %509 = vperm.xlu0 %1429, %v1568_v15   ;;  %v1660_v37 = vpop.permute.xlu2 %324  ;;  %v1662_v38 = vpop.permute.xlu1 %279 }
  0x85   : > { %v270_v39 = vpop.permute.xlu0 %269 }
  0x86   : > { %v428_v33 = vmul.f32 %v1726_v60, %v270_v39 }
  0x8b   : > { %513 = vperm.xlu1 %1430, %v1565_v14  }
  0x8c   : > { %517 = vperm.xlu2 %1428, %v1562_v13   ;;  %521 = vperm.xlu0 %1429, %v1580_v18   ;;  %v1667_v40 = vpop.permute.xlu2 %339  ;;  %v285_v41 = vpop.permute.xlu1 %284 }
  0x8d   : > { %v1669_v42 = vpop.permute.xlu0 %274 }
  0x93   : > { %525 = vperm.xlu1 %1430, %v1577_v17  }
  0x94   : > { %529 = vperm.xlu2 %1428, %v1574_v16   ;;  %533 = vperm.xlu0 %1429, %v1592_v21   ;;  %v1674_v43 = vpop.permute.xlu2 %354  ;;  %v1676_v44 = vpop.permute.xlu1 %304 }
  0x95   : > { %v1678_v45 = vpop.permute.xlu0 %299 }
  0x9b   : > { %537 = vperm.xlu1 %1430, %v1589_v20  }
  0x9c   : > { %541 = vperm.xlu2 %1428, %v1586_v19   ;;  %545 = vperm.xlu0 %1429, %v1604_v24   ;;  %v1683_v46 = vpop.permute.xlu2 %369  ;;  %v1685_v47 = vpop.permute.xlu1 %319 }
  0x9d   : > { %v1687_v48 = vpop.permute.xlu0 %314 }
  0xa3   : > { %549 = vperm.xlu1 %1430, %v1601_v23  }
  0xa4   : > { %553 = vperm.xlu2 %1428, %v1598_v22   ;;  %557 = vperm.xlu0 %1429, %v1616_v27   ;;  %v1692_v49 = vpop.permute.xlu2 %384  ;;  %v1694_v50 = vpop.permute.xlu1 %334 }
  0xa5   : > { %v1696_v51 = vpop.permute.xlu0 %329 }
  0xab   : > { %561 = vperm.xlu1 %1430, %v1613_v26  }
  0xac   : > { %565 = vperm.xlu2 %1428, %v1610_v25   ;;  %569 = vperm.xlu0 %1429, %v1628_v30   ;;  %v1701_v52 = vpop.permute.xlu2 %399  ;;  %v1703_v53 = vpop.permute.xlu1 %349 }
  0xad   : > { %v1705_v54 = vpop.permute.xlu0 %344 }
  0xb3   : > { %573 = vperm.xlu1 %1430, %v1625_v29  }
  0xb4   : > { %577 = vperm.xlu2 %1428, %v1622_v28   ;;  %581 = vperm.xlu0 %1429, %v1637_v32   ;;  %v1710_v55 = vpop.permute.xlu2 %414  ;;  %v1712_v56 = vpop.permute.xlu1 %364 }
  0xb5   : > { %2427 = vst [vmem:[#allocation14_spill] sm:$0xff] %v1710_v55  ;;  %v1714_v57 = vpop.permute.xlu0 %359 }
  0xbb   : > { %585 = vperm.xlu1 %1430, %v1634_v31  }
  0xbc   : > { %1431 = vset.pattern.permute.xlu2 %v1463_v61  ;;  %1432 = vset.pattern.permute.xlu0 %v1463_v61  ;;  %v1728_v62 = vpop.permute.xlu1 %379 }
  0xbd   : > { %2429 = vst [vmem:[#allocation16_spill] sm:$0xff] %v1728_v62  ;;  %654 = vperm.xlu2 %1431, %v1520_v3   ;;  %658 = vperm.xlu0 %1432, %v1532_v6   ;;  %v1732_v63 = vpop.permute.xlu0 %374  ;;  %v462_v0 = vpop.permute.xlu2 %461 }
  0xbe   : > { %2430 = vst [vmem:[#allocation17_spill] sm:$0xff] %v1732_v63  ;;  %v589_v55 = vmul.f32 %v1722_v59, %v462_v0  ;;  %v431_v63 = vmul.f32 %v1726_v60, %v285_v41 }
  0xc0   : > { %v1736_v31 = vadd.f32 %v589_v55, %v428_v33  ;;  %v433_v33 = vmul.f32 %v1726_v60, %v1650_v35 }
  0xc3   : > { %1433 = vset.pattern.permute.xlu1 %v1463_v61 }
  0xc4   : > { %662 = vperm.xlu1 %1433, %v1517_v2   ;;  %v1739_v58 = vpop.permute.xlu1 %394 }
  0xc5   : > { %666 = vperm.xlu2 %1431, %v1529_v5   ;;  %678 = vperm.xlu0 %1432, %v1544_v9   ;;  %v1743_v3 = vpop.permute.xlu0 %389 }
  0xc6   : > { %v474_v62 = vpop.permute.xlu2 %473 }
  0xc7   : > { %v592_v39 = vmul.f32 %v1722_v59, %v474_v62 }
  0xc9   : > { %v1747_v6 = vadd.f32 %v592_v39, %v431_v63 }
  0xcc   : > { %670 = vperm.xlu1 %1433, %v1514_v1   ;;  %v1750_v55 = vpop.permute.xlu1 %409 }
  0xcd   : > { %2431 = vst [vmem:[#allocation18_spill] sm:$0xff] %v1750_v55  ;;  %674 = vperm.xlu2 %1431, %v1526_v4   ;;  %690 = vperm.xlu0 %1432, %v1556_v12   ;;  %v1754_v61 = vpop.permute.xlu0 %404  ;;  %v436_v4 = vmul.f32 %v1726_v60, %v1655_v36  ;;  %v439_v36 = vmul.f32 %v1726_v60, %v1660_v37 }
  0xce   : > { %v482_v0 = vpop.permute.xlu2 %481 }
  0xcf   : > { %v594_v41 = vmul.f32 %v1722_v59, %v482_v0 }
  0xd1   : > { %v1759_v5 = vadd.f32 %v594_v41, %v433_v33  ;;  %v430_v33 = vmul.f32 %v1726_v60, %v1662_v38  ;;  %v432_v38 = vmul.f32 %v1726_v60, %v1645_v34 }
  0xd4   : > { %682 = vperm.xlu1 %1433, %v1541_v8   ;;  %v1762_v62 = vpop.permute.xlu1 %424 }
  0xd5   : > { %2432 = vst [vmem:[#allocation19_spill] sm:$0xff] %v1762_v62  ;;  %686 = vperm.xlu2 %1431, %v1538_v7   ;;  %702 = vperm.xlu0 %1432, %v1568_v15   ;;  %v1766_v63 = vpop.permute.xlu0 %419 }
  0xd6   : > { %v494_v39 = vpop.permute.xlu2 %493 }
  0xd7   : > { %v597_v35 = vmul.f32 %v1722_v59, %v494_v39 }
  0xd9   : > { %v1771_v55 = vadd.f32 %v597_v35, %v436_v4  ;;  %v429_v4 = vmul.f32 %v1726_v60, %v1669_v42 }
  0xdb   : > { %2433 = vst [vmem:[#allocation20_spill] sm:$0xff] %v1771_v55 }
  0xdc   : > { %694 = vperm.xlu1 %1433, %v1553_v11  }
  0xdd   : > { %698 = vperm.xlu2 %1431, %v1550_v10   ;;  %714 = vperm.xlu0 %1432, %v1580_v18   ;;  %v470_v0 = vpop.permute.xlu1 %469 }
  0xde   : > { %v591_v41 = vmul.f32 %v1722_v59, %v470_v0  ;;  %v506_v7 = vpop.permute.xlu2 %505  ;;  %v466_v62 = vpop.permute.xlu0 %465  ;;  %v442_v0 = vmul.f32 %v1726_v60, %v1667_v40  ;;  %v435_v40 = vmul.f32 %v1726_v60, %v1676_v44  ;;  %v438_v44 = vmul.f32 %v1726_v60, %v1685_v47 }
  0xdf   : > { %v600_v39 = vmul.f32 %v1722_v59, %v506_v7  ;;  %v590_v35 = vmul.f32 %v1722_v59, %v466_v62  ;;  %v441_v47 = vmul.f32 %v1726_v60, %v1694_v50  ;;  %v444_v50 = vmul.f32 %v1726_v60, %v1703_v53 }
  0xe0   : > { %v1785_v10 = vadd.f32 %v591_v41, %v430_v33  ;;  %v434_v33 = vmul.f32 %v1726_v60, %v1678_v45  ;;  %v1464_v53 = vmov 3  }
  0xe1   : > { %v1787_v11 = vadd.f32 %v600_v39, %v439_v36  ;;  %v1789_v55 = vadd.f32 %v590_v35, %v429_v4 }
  0xe4   : > { %706 = vperm.xlu1 %1433, %v1565_v14  }
  0xe5   : > { %710 = vperm.xlu2 %1431, %v1562_v13   ;;  %726 = vperm.xlu0 %1432, %v1592_v21   ;;  %v478_v37 = vpop.permute.xlu1 %477 }
  0xe6   : > { %v593_v7 = vmul.f32 %v1722_v59, %v478_v37  ;;  %v518_v42 = vpop.permute.xlu2 %517  ;;  %v486_v62 = vpop.permute.xlu0 %485 }
  0xe7   : > { %v603_v41 = vmul.f32 %v1722_v59, %v518_v42  ;;  %v595_v36 = vmul.f32 %v1722_v59, %v486_v62 }
  0xe8   : > { %v1803_v4 = vadd.f32 %v593_v7, %v432_v38  ;;  %v445_v38 = vmul.f32 %v1726_v60, %v1674_v43  ;;  %v437_v7 = vmul.f32 %v1726_v60, %v1687_v48 }
  0xe9   : > { %v1805_v39 = vadd.f32 %v603_v41, %v442_v0  ;;  %v1807_v35 = vadd.f32 %v595_v36, %v434_v33 }
  0xec   : > { %718 = vperm.xlu1 %1433, %v1577_v17  }
  0xed   : > { %722 = vperm.xlu2 %1431, %v1574_v16   ;;  %738 = vperm.xlu0 %1432, %v1604_v24   ;;  %v490_v34 = vpop.permute.xlu1 %489 }
  0xee   : > { %v596_v45 = vmul.f32 %v1722_v59, %v490_v34  ;;  %v530_v37 = vpop.permute.xlu2 %529  ;;  %v498_v42 = vpop.permute.xlu0 %497 }
  0xef   : > { %v606_v62 = vmul.f32 %v1722_v59, %v530_v37  ;;  %v598_v0 = vmul.f32 %v1722_v59, %v498_v42 }
  0xf0   : > { %v1821_v33 = vadd.f32 %v596_v45, %v435_v40  ;;  %v448_v40 = vmul.f32 %v1726_v60, %v1683_v46  ;;  %v440_v45 = vmul.f32 %v1726_v60, %v1696_v51 }
  0xf1   : > { %v1823_v41 = vadd.f32 %v606_v62, %v445_v38  ;;  %v1825_v36 = vadd.f32 %v598_v0, %v437_v7 }
  0xf4   : > { %730 = vperm.xlu1 %1433, %v1589_v20  }
  0xf5   : > { %734 = vperm.xlu2 %1431, %v1586_v19   ;;  %750 = vperm.xlu0 %1432, %v1616_v27   ;;  %v502_v43 = vpop.permute.xlu1 %501 }
  0xf6   : > { %v599_v48 = vmul.f32 %v1722_v59, %v502_v43  ;;  %v542_v34 = vpop.permute.xlu2 %541  ;;  %v510_v37 = vpop.permute.xlu0 %509 }
  0xf7   : > { %v609_v42 = vmul.f32 %v1722_v59, %v542_v34  ;;  %v601_v38 = vmul.f32 %v1722_v59, %v510_v37 }
  0xf8   : > { %v1839_v7 = vadd.f32 %v599_v48, %v438_v44  ;;  %v451_v44 = vmul.f32 %v1726_v60, %v1692_v49  ;;  %v443_v48 = vmul.f32 %v1726_v60, %v1705_v54 }
  0xf9   : > { %v1841_v62 = vadd.f32 %v609_v42, %v448_v40  ;;  %v1843_v0 = vadd.f32 %v601_v38, %v440_v45 }
  0xfc   : > { %742 = vperm.xlu1 %1433, %v1601_v23  }
  0xfd   : > { %746 = vperm.xlu2 %1431, %v1598_v22   ;;  %762 = vperm.xlu0 %1432, %v1628_v30   ;;  %v514_v46 = vpop.permute.xlu1 %513 }
  0xfe   : > { %v602_v51 = vmul.f32 %v1722_v59, %v514_v46  ;;  %v554_v43 = vpop.permute.xlu2 %553  ;;  %v522_v34 = vpop.permute.xlu0 %521 }
  0xff   : > { %v612_v37 = vmul.f32 %v1722_v59, %v554_v43  ;;  %v604_v40 = vmul.f32 %v1722_v59, %v522_v34 }
 0x100   : > { %v1857_v45 = vadd.f32 %v602_v51, %v441_v47  ;;  %v454_v47 = vmul.f32 %v1726_v60, %v1701_v52  ;;  %v446_v51 = vmul.f32 %v1726_v60, %v1714_v57  ;;  %v447_v57 = vmul.f32 %v1726_v60, %v1712_v56 }
 0x101   : > { %v1859_v42 = vadd.f32 %v612_v37, %v451_v44  ;;  %v1861_v38 = vadd.f32 %v604_v40, %v443_v48 }
 0x104   : > { %754 = vperm.xlu1 %1433, %v1613_v26   ;;  %v2442_v26 = vld [vmem:[#allocation2_spill] sm:$0xff] }
 0x105   : > { %758 = vperm.xlu2 %1431, %v1610_v25   ;;  %774 = vperm.xlu0 %1432, %v1637_v32   ;;  %v526_v49 = vpop.permute.xlu1 %525  ;;  %v2441_v25 = vld [vmem:[#allocation16_spill] sm:$0xff] }
 0x106   : > { %v605_v54 = vmul.f32 %v1722_v59, %v526_v49  ;;  %v566_v46 = vpop.permute.xlu2 %565  ;;  %v534_v43 = vpop.permute.xlu0 %533 }
 0x107   : > { %v615_v34 = vmul.f32 %v1722_v59, %v566_v46  ;;  %v607_v44 = vmul.f32 %v1722_v59, %v534_v43  ;;  %v2436_v43 = vld [vmem:[#allocation5_spill] sm:$0xff] }
 0x108   : > { %v1875_v48 = vadd.f32 %v605_v54, %v444_v50  ;;  %v2437_v54 = vld [vmem:[#allocation14_spill] sm:$0xff] }
 0x109   : > { %v1877_v37 = vadd.f32 %v615_v34, %v454_v47  ;;  %v1879_v40 = vadd.f32 %v607_v44, %v446_v51  ;;  %v457_v47 = vmul.f32 %v1726_v60, %v2437_v54  ;;  %v2438_v51 = vld [vmem:[#allocation17_spill] sm:$0xff] }
 0x10a   : > { %2434 = vst [vmem:[#allocation21_spill] sm:$0xff] %v1875_v48  ;;  %v449_v34 = vmul.f32 %v1726_v60, %v2438_v51  ;;  %v450_v51 = vmul.f32 %v1726_v60, %v2441_v25 }
 0x10b   : > { %2435 = vst [vmem:[#allocation22_spill] sm:$0xff] %v1877_v37 }
 0x10c   : > { %766 = vperm.xlu1 %1433, %v1625_v29  }
 0x10d   : > { %770 = vperm.xlu2 %1431, %v1622_v28   ;;  %1435 = vset.pattern.permute.xlu0 %v1464_v53  ;;  %v538_v52 = vpop.permute.xlu1 %537 }
 0x10e   : > { %v608_v49 = vmul.f32 %v1722_v59, %v538_v52  ;;  %v578_v46 = vpop.permute.xlu2 %577  ;;  %851 = vperm.xlu0 %1435, %v2436_v43   ;;  %v546_v50 = vpop.permute.xlu0 %545  ;;  %v2439_v52 = vld [vmem:[#allocation13_spill] sm:$0xff]  ;;  %v2440_v43 = vld [vmem:[#allocation15_spill] sm:$0xff] }
 0x10f   : > { %v618_v44 = vmul.f32 %v1722_v59, %v578_v46  ;;  %v610_v28 = vmul.f32 %v1722_v59, %v546_v50  ;;  %v1901_v48 = vperm.slane %v2440_v43, 2 }
 0x110   : > { %v1893_v29 = vadd.f32 %v608_v49, %v447_v57 }
 0x111   : > { %v1895_v37 = vadd.f32 %v618_v44, %v457_v47  ;;  %v1897_v56 = vadd.f32 %v610_v28, %v449_v34  ;;  %v452_v28 = vmul.f32 %v1726_v60, %v1743_v3 }
 0x114   : > { %778 = vperm.xlu1 %1433, %v2439_v52  }
 0x115   : > { %1434 = vset.pattern.permute.xlu2 %v1464_v53  ;;  %v550_v54 = vpop.permute.xlu1 %549 }
 0x116   : > { %v611_v46 = vmul.f32 %v1722_v59, %v550_v54  ;;  %847 = vperm.xlu2 %1434, %v2442_v26   ;;  %871 = vperm.xlu0 %1435, %v1544_v9   ;;  %v558_v57 = vpop.permute.xlu0 %557  ;;  %v453_v26 = vmul.f32 %v1726_v60, %v1739_v58  ;;  %v2443_v54 = vld [vmem:[#allocation4_spill] sm:$0xff] }
 0x117   : > { %v613_v49 = vmul.f32 %v1722_v59, %v558_v57  ;;  %v655_v50 = vpop.permute.xlu2 %654 }
 0x118   : > { %v1911_v47 = vadd.f32 %v611_v46, %v450_v51  ;;  %v782_v34 = vmul.f32 %v1901_v48, %v655_v50  ;;  %v455_v46 = vmul.f32 %v1726_v60, %v1754_v61 }
 0x119   : > { %v1914_v44 = vadd.f32 %v613_v49, %v452_v28 }
 0x11a   : > { %v1917_v25 = vadd.f32 %v782_v34, %v1736_v31  ;;  %v2445_v34 = vld [vmem:[#allocation3_spill] sm:$0xff] }
 0x11c   : > { %1436 = vset.pattern.permute.xlu1 %v1464_v53 }
 0x11d   : > { %855 = vperm.xlu1 %1436, %v1517_v2   ;;  %v562_v9 = vpop.permute.xlu1 %561 }
 0x11e   : > { %v614_v3 = vmul.f32 %v1722_v59, %v562_v9  ;;  %859 = vperm.xlu2 %1434, %v2443_v54   ;;  %883 = vperm.xlu0 %1435, %v1556_v12   ;;  %v570_v51 = vpop.permute.xlu0 %569  ;;  %v2444_v12 = vld [vmem:[#allocation18_spill] sm:$0xff] }
 0x11f   : > { %v616_v31 = vmul.f32 %v1722_v59, %v570_v51  ;;  %v667_v57 = vpop.permute.xlu2 %666  ;;  %v456_v50 = vmul.f32 %v1726_v60, %v2444_v12 }
 0x120   : > { %v1928_v53 = vadd.f32 %v614_v3, %v453_v26  ;;  %v785_v2 = vmul.f32 %v1901_v48, %v667_v57  ;;  %v458_v26 = vmul.f32 %v1726_v60, %v1766_v63 }
 0x121   : > { %v1931_v28 = vadd.f32 %v616_v31, %v455_v46 }
 0x122   : > { %v1934_v58 = vadd.f32 %v785_v2, %v1747_v6  ;;  %v2447_v2 = vld [vmem:[#allocation6_spill] sm:$0xff] }
 0x125   : > { %863 = vperm.xlu1 %1436, %v1514_v1   ;;  %v574_v49 = vpop.permute.xlu1 %573 }
 0x126   : > { %v617_v61 = vmul.f32 %v1722_v59, %v574_v49  ;;  %867 = vperm.xlu2 %1434, %v2445_v34   ;;  %895 = vperm.xlu0 %1435, %v1568_v15   ;;  %v582_v9 = vpop.permute.xlu0 %581  ;;  %v2446_v15 = vld [vmem:[#allocation19_spill] sm:$0xff]  ;;  %v2448_v34 = vld [vmem:[#allocation20_spill] sm:$0xff] }
 0x127   : > { %v619_v3 = vmul.f32 %v1722_v59, %v582_v9  ;;  %v675_v6 = vpop.permute.xlu2 %674  ;;  %v459_v57 = vmul.f32 %v1726_v60, %v2446_v15  ;;  %v2449_v60 = vld [vmem:[#allocation8_spill] sm:$0xff] }
 0x128   : > { %v1945_v54 = vadd.f32 %v617_v61, %v456_v50  ;;  %v787_v1 = vmul.f32 %v1901_v48, %v675_v6 }
 0x129   : > { %v1948_v51 = vadd.f32 %v619_v3, %v458_v26 }
 0x12a   : > { %v1951_v46 = vadd.f32 %v787_v1, %v1759_v5 }
 0x12d   : > { %875 = vperm.xlu1 %1436, %v1541_v8   ;;  %v586_v31 = vpop.permute.xlu1 %585 }
 0x12e   : > { %v620_v63 = vmul.f32 %v1722_v59, %v586_v31  ;;  %879 = vperm.xlu2 %1434, %v2447_v2   ;;  %907 = vperm.xlu0 %1435, %v1580_v18   ;;  %v2450_v59 = vld [vmem:[#allocation7_spill] sm:$0xff] }
 0x12f   : > { %v687_v49 = vpop.permute.xlu2 %686  ;;  %v659_v12 = vpop.permute.xlu0 %658 }
 0x130   : > { %v1959_v50 = vadd.f32 %v620_v63, %v459_v57  ;;  %v790_v61 = vmul.f32 %v1901_v48, %v687_v49  ;;  %v783_v5 = vmul.f32 %v1901_v48, %v659_v12 }
 0x132   : > { %v1964_v8 = vadd.f32 %v790_v61, %v2448_v34  ;;  %v1967_v9 = vadd.f32 %v783_v5, %v1789_v55 }
 0x135   : > { %887 = vperm.xlu1 %1436, %v2449_v60  }
 0x136   : > { %891 = vperm.xlu2 %1434, %v2450_v59   ;;  %919 = vperm.xlu0 %1435, %v1592_v21   ;;  %v663_v18 = vpop.permute.xlu1 %662 }
 0x137   : > { %v784_v26 = vmul.f32 %v1901_v48, %v663_v18  ;;  %v699_v3 = vpop.permute.xlu2 %698  ;;  %v679_v6 = vpop.permute.xlu0 %678 }
 0x138   : > { %v793_v1 = vmul.f32 %v1901_v48, %v699_v3  ;;  %v788_v31 = vmul.f32 %v1901_v48, %v679_v6 }
 0x139   : > { %v1976_v15 = vadd.f32 %v784_v26, %v1785_v10 }
 0x13a   : > { %v1979_v55 = vadd.f32 %v793_v1, %v1787_v11  ;;  %v1982_v57 = vadd.f32 %v788_v31, %v1807_v35 }
 0x13d   : > { %899 = vperm.xlu1 %1436, %v1565_v14  }
 0x13e   : > { %903 = vperm.xlu2 %1434, %v1562_v13   ;;  %931 = vperm.xlu0 %1435, %v1604_v24   ;;  %v671_v21 = vpop.permute.xlu1 %670 }
 0x13f   : > { %v786_v63 = vmul.f32 %v1901_v48, %v671_v21  ;;  %v711_v2 = vpop.permute.xlu2 %710  ;;  %v691_v49 = vpop.permute.xlu0 %690 }
 0x140   : > { %v796_v10 = vmul.f32 %v1901_v48, %v711_v2  ;;  %v791_v12 = vmul.f32 %v1901_v48, %v691_v49  ;;  %v2453_v49 = vld [vmem:[#allocation21_spill] sm:$0xff] }
 0x141   : > { %v1991_v11 = vadd.f32 %v786_v63, %v1803_v4 }
 0x142   : > { %v1994_v35 = vadd.f32 %v796_v10, %v1805_v39  ;;  %v1997_v14 = vadd.f32 %v791_v12, %v1825_v36 }
 0x145   : > { %911 = vperm.xlu1 %1436, %v1577_v17  }
 0x146   : > { %915 = vperm.xlu2 %1434, %v1574_v16   ;;  %943 = vperm.xlu0 %1435, %v1616_v27   ;;  %v683_v13 = vpop.permute.xlu1 %682 }
 0x147   : > { %v789_v24 = vmul.f32 %v1901_v48, %v683_v13  ;;  %v723_v61 = vpop.permute.xlu2 %722  ;;  %v703_v5 = vpop.permute.xlu0 %702  ;;  %v2455_v13 = vld [vmem:[#allocation12_spill] sm:$0xff] }
 0x148   : > { %v799_v4 = vmul.f32 %v1901_v48, %v723_v61  ;;  %v794_v34 = vmul.f32 %v1901_v48, %v703_v5 }
 0x149   : > { %v2006_v39 = vadd.f32 %v789_v24, %v1821_v33  ;;  %v2456_v24 = vld [vmem:[#allocation11_spill] sm:$0xff] }
 0x14a   : > { %v2009_v36 = vadd.f32 %v799_v4, %v1823_v41  ;;  %v2012_v17 = vadd.f32 %v794_v34, %v1843_v0 }
 0x14d   : > { %923 = vperm.xlu1 %1436, %v1589_v20  }
 0x14e   : > { %927 = vperm.xlu2 %1434, %v1586_v19   ;;  %955 = vperm.xlu0 %1435, %v1628_v30   ;;  %v695_v16 = vpop.permute.xlu1 %694 }
 0x14f   : > { %v792_v27 = vmul.f32 %v1901_v48, %v695_v16  ;;  %v735_v60 = vpop.permute.xlu2 %734  ;;  %v715_v59 = vpop.permute.xlu0 %714 }
 0x150   : > { %v802_v33 = vmul.f32 %v1901_v48, %v735_v60  ;;  %v797_v18 = vmul.f32 %v1901_v48, %v715_v59 }
 0x151   : > { %v2021_v41 = vadd.f32 %v792_v27, %v1839_v7 }
 0x152   : > { %v2024_v0 = vadd.f32 %v802_v33, %v1841_v62  ;;  %v2027_v20 = vadd.f32 %v797_v18, %v1861_v38  ;;  %v2074_v33 = vperm.slane %v2440_v43, 3 }
 0x155   : > { %935 = vperm.xlu1 %1436, %v1601_v23  }
 0x156   : > { %939 = vperm.xlu2 %1434, %v1598_v22   ;;  %967 = vperm.xlu0 %1435, %v1637_v32   ;;  %v707_v19 = vpop.permute.xlu1 %706  ;;  %v2451_v22 = vld [vmem:[#allocation10_spill] sm:$0xff]  ;;  %v2452_v32 = vld [vmem:[#allocation9_spill] sm:$0xff] }
 0x157   : > { %v795_v30 = vmul.f32 %v1901_v48, %v707_v19  ;;  %v747_v26 = vpop.permute.xlu2 %746  ;;  %v727_v3 = vpop.permute.xlu0 %726 }
 0x158   : > { %v805_v7 = vmul.f32 %v1901_v48, %v747_v26  ;;  %v800_v6 = vmul.f32 %v1901_v48, %v727_v3 }
 0x159   : > { %v2036_v62 = vadd.f32 %v795_v30, %v1857_v45 }
 0x15a   : > { %v2039_v38 = vadd.f32 %v805_v7, %v1859_v42  ;;  %v2042_v23 = vadd.f32 %v800_v6, %v1879_v40  ;;  %v2454_v42 = vld [vmem:[#allocation22_spill] sm:$0xff] }
 0x15d   : > { %947 = vperm.xlu1 %1436, %v2451_v22  }
 0x15e   : > { %951 = vperm.xlu2 %1434, %v2452_v32   ;;  %v719_v1 = vpop.permute.xlu1 %718 }
 0x15f   : > { %v798_v31 = vmul.f32 %v1901_v48, %v719_v1  ;;  %v759_v21 = vpop.permute.xlu2 %758  ;;  %v739_v63 = vpop.permute.xlu0 %738 }
 0x160   : > { %v808_v2 = vmul.f32 %v1901_v48, %v759_v21  ;;  %v803_v45 = vmul.f32 %v1901_v48, %v739_v63 }
 0x161   : > { %v2050_v10 = vadd.f32 %v798_v31, %v2453_v49 }
 0x162   : > { %v2053_v12 = vadd.f32 %v808_v2, %v2454_v42  ;;  %v2056_v40 = vadd.f32 %v803_v45, %v1897_v56 }
 0x165   : > { %959 = vperm.xlu1 %1436, %v2455_v13  }
 0x166   : > { %963 = vperm.xlu2 %1434, %v2456_v24   ;;  %v731_v61 = vpop.permute.xlu1 %730 }
 0x167   : > { %v801_v5 = vmul.f32 %v1901_v48, %v731_v61  ;;  %v771_v4 = vpop.permute.xlu2 %770  ;;  %v751_v34 = vpop.permute.xlu0 %750 }
 0x168   : > { %v811_v16 = vmul.f32 %v1901_v48, %v771_v4  ;;  %v806_v27 = vmul.f32 %v1901_v48, %v751_v34 }
 0x169   : > { %v2064_v60 = vadd.f32 %v801_v5, %v1893_v29 }
 0x16a   : > { %v2067_v56 = vadd.f32 %v811_v16, %v1895_v37  ;;  %v2070_v59 = vadd.f32 %v806_v27, %v1914_v44 }
 0x16d   : > { %971 = vperm.xlu1 %1436, %v2439_v52  }
 0x16e   : > { %v743_v18 = vpop.permute.xlu1 %742 }
 0x16f   : > { %v804_v19 = vmul.f32 %v1901_v48, %v743_v18  ;;  %v763_v30 = vpop.permute.xlu0 %762 }
 0x170   : > { %v809_v26 = vmul.f32 %v1901_v48, %v763_v30  ;;  %v848_v3 = vpop.permute.xlu2 %847 }
 0x171   : > { %v2079_v29 = vadd.f32 %v804_v19, %v1911_v47  ;;  %v975_v37 = vmul.f32 %v2074_v33, %v848_v3 }
 0x172   : > { %v2090_v52 = vadd.f32 %v809_v26, %v1931_v28 }
 0x173   : > { %v1007_v43 = vadd.f32 %v975_v37, %v1917_v25 }
 0x175   : > { %1040 = vst.msk [vmem:[%s2087_s24] sm:$0xff] %vm1039_vm0, %v1007_v43  ;;  %v1141_v42 = vmul.f32 %v1007_v43, %v1007_v43  ;;  %v1072_v13 = vsel %vm1039_vm0, %v1007_v43, 0.0 }
 0x176   : > { %v755_v47 = vpop.permute.xlu1 %754 }
 0x177   : > { %v807_v44 = vmul.f32 %v1901_v48, %v755_v47  ;;  %v775_v7 = vpop.permute.xlu0 %774  ;;  %v1173_v4 = vsel %vm1039_vm0, %v1141_v42, 0.0 }
 0x178   : > { %v812_v6 = vmul.f32 %v1901_v48, %v775_v7  ;;  %v860_v22 = vpop.permute.xlu2 %859 }
 0x179   : > { %v2098_v32 = vadd.f32 %v807_v44, %v1928_v53  ;;  %v978_v1 = vmul.f32 %v2074_v33, %v860_v22 }
 0x17a   : > { %v2102_v28 = vadd.f32 %v812_v6, %v1948_v51 }
 0x17b   : > { %v1010_v25 = vadd.f32 %v978_v1, %v1934_v58 }
 0x17d   : > { %1043 = vst.msk [vmem:[%s2087_s24 + $0x18] sm:$0xff] %vm1039_vm0, %v1010_v25  ;;  %v1144_v6 = vmul.f32 %v1010_v25, %v1010_v25 }
 0x17e   : > { %v767_v31 = vpop.permute.xlu1 %766 }
 0x17f   : > { %v810_v21 = vmul.f32 %v1901_v48, %v767_v31 }
 0x180   : > { %v868_v63 = vpop.permute.xlu2 %867  ;;  %v852_v2 = vpop.permute.xlu0 %851 }
 0x181   : > { %v2109_v45 = vadd.f32 %v810_v21, %v1945_v54  ;;  %v980_v53 = vmul.f32 %v2074_v33, %v868_v63  ;;  %v976_v49 = vmul.f32 %v2074_v33, %v852_v2  ;;  %v1077_v21 = vsel %vm1039_vm0, %v1010_v25, 0.0 }
 0x182   : > { %v1178_v2 = vsel %vm1039_vm0, %v1144_v6, 0.0 }
 0x183   : > { %v1012_v51 = vadd.f32 %v980_v53, %v1951_v46  ;;  %v1008_v58 = vadd.f32 %v976_v49, %v1967_v9 }
 0x185   : > { %1045 = vst.msk [vmem:[%s2087_s24 + $0x28] sm:$0xff] %vm1039_vm0, %v1012_v51  ;;  %v1073_v24 = vsel %vm1039_vm0, %v1008_v58, 0.0  ;;  %v1142_v61 = vmul.f32 %v1008_v58, %v1008_v58 }
 0x186   : > { %1041 = vst.msk [vmem:[%s2087_s24 + $0x8] sm:$0xff] %vm1039_vm0, %v1008_v58  ;;  %v1074_v54 = vadd.f32 %v1073_v24, %v1072_v13  ;;  %v779_v5 = vpop.permute.xlu1 %778 }
 0x187   : > { %v1174_v34 = vsel %vm1039_vm0, %v1142_v61, 0.0  ;;  %v813_v46 = vmul.f32 %v1901_v48, %v779_v5  ;;  %v1146_v5 = vmul.f32 %v1012_v51, %v1012_v51 }
 0x188   : > { %v1175_v9 = vadd.f32 %v1174_v34, %v1173_v4  ;;  %v880_v16 = vpop.permute.xlu2 %879  ;;  %v872_v27 = vpop.permute.xlu0 %871 }
 0x189   : > { %v2125_v18 = vadd.f32 %v813_v46, %v1959_v50  ;;  %v983_v19 = vmul.f32 %v2074_v33, %v880_v16  ;;  %v981_v30 = vmul.f32 %v2074_v33, %v872_v27 }
 0x18b   : > { %v2130_v26 = vadd.f32 %v983_v19, %v1964_v8  ;;  %v1013_v3 = vadd.f32 %v981_v30, %v1982_v57  ;;  %v1182_v19 = vsel %vm1039_vm0, %v1146_v5, 0.0 }
 0x18d   : > { %1048 = vst.msk [vmem:[%s2087_s24 + $0x40] sm:$0xff] %vm1039_vm0, %v2130_v26  ;;  %v1147_v16 = vmul.f32 %v1013_v3, %v1013_v3  ;;  %v1083_v30 = vsel %vm1039_vm0, %v1013_v3, 0.0 }
 0x18e   : > { %1046 = vst.msk [vmem:[%s2087_s24 + $0x30] sm:$0xff] %vm1039_vm0, %v1013_v3 }
 0x18f   : > { %v856_v48 = vpop.permute.xlu1 %855 }
 0x190   : > { %v977_v50 = vmul.f32 %v2074_v33, %v856_v48  ;;  %v892_v37 = vpop.permute.xlu2 %891  ;;  %v884_v43 = vpop.permute.xlu0 %883 }
 0x191   : > { %v986_v47 = vmul.f32 %v2074_v33, %v892_v37  ;;  %v984_v44 = vmul.f32 %v2074_v33, %v884_v43 }
 0x192   : > { %v1009_v8 = vadd.f32 %v977_v50, %v1976_v15 }
 0x193   : > { %v2143_v57 = vadd.f32 %v986_v47, %v1979_v55  ;;  %v2146_v7 = vadd.f32 %v984_v44, %v1997_v14 }
 0x194   : > { %1042 = vst.msk [vmem:[%s2087_s24 + $0x10] sm:$0xff] %vm1039_vm0, %v1009_v8  ;;  %v1075_v22 = vsel %vm1039_vm0, %v1009_v8, 0.0  ;;  %v1143_v1 = vmul.f32 %v1009_v8, %v1009_v8  ;;  %v1184_v8 = vsel %vm1039_vm0, %v1147_v16, 0.0 }
 0x195   : > { %v1076_v31 = vadd.f32 %v1075_v22, %v1074_v54  ;;  %1051 = vst.msk [vmem:[%s2087_s24 + $0x58] sm:$0xff] %vm1039_vm0, %v2143_v57  ;;  %v1152_v16 = vmul.f32 %v2143_v57, %v2143_v57 }
 0x196   : > { %v1176_v15 = vsel %vm1039_vm0, %v1143_v1, 0.0  ;;  %1049 = vst.msk [vmem:[%s2087_s24 + $0x48] sm:$0xff] %vm1039_vm0, %v2146_v7 }
 0x197   : > { %v1177_v55 = vadd.f32 %v1176_v15, %v1175_v9  ;;  %v864_v14 = vpop.permute.xlu1 %863  ;;  %v1078_v63 = vadd.f32 %v1077_v21, %v1076_v31  ;;  %v1081_v9 = vsel %vm1039_vm0, %v1012_v51, 0.0  ;;  %v1149_v31 = vmul.f32 %v2130_v26, %v2130_v26 }
 0x198   : > { %v979_v53 = vmul.f32 %v2074_v33, %v864_v14  ;;  %v904_v49 = vpop.permute.xlu2 %903  ;;  %v896_v42 = vpop.permute.xlu0 %895 }
 0x199   : > { %v1179_v58 = vadd.f32 %v1178_v2, %v1177_v55  ;;  %v989_v25 = vmul.f32 %v2074_v33, %v904_v49  ;;  %v987_v13 = vmul.f32 %v2074_v33, %v896_v42  ;;  %v1089_v49 = vsel %vm1039_vm0, %v2146_v7, 0.0 }
 0x19a   : > { %v1011_v24 = vadd.f32 %v979_v53, %v1991_v11  ;;  %v1188_v53 = vsel %vm1039_vm0, %v1149_v31, 0.0 }
 0x19b   : > { %v2165_v61 = vadd.f32 %v989_v25, %v1994_v35  ;;  %v2168_v54 = vadd.f32 %v987_v13, %v2012_v17 }
 0x19c   : > { %1044 = vst.msk [vmem:[%s2087_s24 + $0x20] sm:$0xff] %vm1039_vm0, %v1011_v24  ;;  %v1079_v4 = vsel %vm1039_vm0, %v1011_v24, 0.0  ;;  %v1145_v34 = vmul.f32 %v1011_v24, %v1011_v24 }
 0x19d   : > { %v1080_v46 = vadd.f32 %v1079_v4, %v1078_v63  ;;  %1054 = vst.msk [vmem:[%s2087_s24 + $0x70] sm:$0xff] %vm1039_vm0, %v2165_v61 }
 0x19e   : > { %v1180_v11 = vsel %vm1039_vm0, %v1145_v34, 0.0  ;;  %1052 = vst.msk [vmem:[%s2087_s24 + $0x60] sm:$0xff] %vm1039_vm0, %v2168_v54 }
 0x19f   : > { %v1082_v35 = vadd.f32 %v1081_v9, %v1080_v46  ;;  %v1181_v17 = vadd.f32 %v1180_v11, %v1179_v58  ;;  %v876_v27 = vpop.permute.xlu1 %875 }
 0x1a0   : > { %v982_v48 = vmul.f32 %v2074_v33, %v876_v27  ;;  %v916_v50 = vpop.permute.xlu2 %915  ;;  %v908_v37 = vpop.permute.xlu0 %907 }
 0x1a1   : > { %v1183_v51 = vadd.f32 %v1182_v19, %v1181_v17  ;;  %v1084_v43 = vadd.f32 %v1083_v30, %v1082_v35  ;;  %v992_v47 = vmul.f32 %v2074_v33, %v916_v50  ;;  %v990_v44 = vmul.f32 %v2074_v33, %v908_v37 }
 0x1a2   : > { %v1014_v6 = vadd.f32 %v982_v48, %v2006_v39  ;;  %v1087_v39 = vsel %vm1039_vm0, %v2130_v26, 0.0  ;;  %v1194_v48 = vsel %vm1039_vm0, %v1152_v16, 0.0  ;;  %v1095_v50 = vsel %vm1039_vm0, %v2168_v54, 0.0 }
 0x1a3   : > { %v1185_v22 = vadd.f32 %v1184_v8, %v1183_v51  ;;  %v2189_v1 = vadd.f32 %v992_v47, %v2009_v36  ;;  %v2192_v3 = vadd.f32 %v990_v44, %v2027_v20  ;;  %v1150_v36 = vmul.f32 %v2146_v7, %v2146_v7 }
 0x1a4   : > { %1047 = vst.msk [vmem:[%s2087_s24 + $0x38] sm:$0xff] %vm1039_vm0, %v1014_v6  ;;  %v1085_v21 = vsel %vm1039_vm0, %v1014_v6, 0.0  ;;  %v1148_v15 = vmul.f32 %v1014_v6, %v1014_v6 }
 0x1a5   : > { %v1086_v55 = vadd.f32 %v1085_v21, %v1084_v43  ;;  %1057 = vst.msk [vmem:[%s2087_s24 + $0x88] sm:$0xff] %vm1039_vm0, %v2189_v1  ;;  %v1190_v4 = vsel %vm1039_vm0, %v1150_v36, 0.0 }
 0x1a6   : > { %v1186_v20 = vsel %vm1039_vm0, %v1148_v15, 0.0  ;;  %1055 = vst.msk [vmem:[%s2087_s24 + $0x78] sm:$0xff] %vm1039_vm0, %v2192_v3  ;;  %v1155_v15 = vmul.f32 %v2165_v61, %v2165_v61 }
 0x1a7   : > { %v1088_v14 = vadd.f32 %v1087_v39, %v1086_v55  ;;  %v1187_v63 = vadd.f32 %v1186_v20, %v1185_v22  ;;  %v888_v2 = vpop.permute.xlu1 %887 }
 0x1a8   : > { %v985_v42 = vmul.f32 %v2074_v33, %v888_v2  ;;  %v928_v26 = vpop.permute.xlu2 %927  ;;  %v920_v58 = vpop.permute.xlu0 %919  ;;  %v1200_v2 = vsel %vm1039_vm0, %v1155_v15, 0.0 }
 0x1a9   : > { %v1189_v25 = vadd.f32 %v1188_v53, %v1187_v63  ;;  %v1090_v13 = vadd.f32 %v1089_v49, %v1088_v14  ;;  %v995_v24 = vmul.f32 %v2074_v33, %v928_v26  ;;  %v993_v5 = vmul.f32 %v2074_v33, %v920_v58 }
 0x1aa   : > { %v1017_v34 = vadd.f32 %v985_v42, %v2021_v41  ;;  %v1093_v41 = vsel %vm1039_vm0, %v2143_v57, 0.0  ;;  %v1101_v53 = vsel %vm1039_vm0, %v2192_v3, 0.0 }
 0x1ab   : > { %v1191_v46 = vadd.f32 %v1190_v4, %v1189_v25  ;;  %v2219_v9 = vadd.f32 %v995_v24, %v2024_v0  ;;  %v2222_v7 = vadd.f32 %v993_v5, %v2042_v23  ;;  %v1153_v0 = vmul.f32 %v2168_v54, %v2168_v54 }
 0x1ac   : > { %1050 = vst.msk [vmem:[%s2087_s24 + $0x50] sm:$0xff] %vm1039_vm0, %v1017_v34  ;;  %v1091_v11 = vsel %vm1039_vm0, %v1017_v34, 0.0  ;;  %v1151_v35 = vmul.f32 %v1017_v34, %v1017_v34 }
 0x1ad   : > { %v1092_v17 = vadd.f32 %v1091_v11, %v1090_v13  ;;  %1060 = vst.msk [vmem:[%s2087_s24 + $0xa0] sm:$0xff] %vm1039_vm0, %v2219_v9  ;;  %v1196_v6 = vsel %vm1039_vm0, %v1153_v0, 0.0 }
 0x1ae   : > { %v1192_v23 = vsel %vm1039_vm0, %v1151_v35, 0.0  ;;  %1058 = vst.msk [vmem:[%s2087_s24 + $0x90] sm:$0xff] %vm1039_vm0, %v2222_v7 }
 0x1af   : > { %v1094_v27 = vadd.f32 %v1093_v41, %v1092_v17  ;;  %v1193_v19 = vadd.f32 %v1192_v23, %v1191_v46  ;;  %v900_v30 = vpop.permute.xlu1 %899  ;;  %v1158_v46 = vmul.f32 %v2189_v1, %v2189_v1 }
 0x1b0   : > { %v988_v37 = vmul.f32 %v2074_v33, %v900_v30  ;;  %v940_v57 = vpop.permute.xlu2 %939  ;;  %v932_v51 = vpop.permute.xlu0 %931 }
 0x1b1   : > { %v1195_v43 = vadd.f32 %v1194_v48, %v1193_v19  ;;  %v1096_v47 = vadd.f32 %v1095_v50, %v1094_v27  ;;  %v998_v44 = vmul.f32 %v2074_v33, %v940_v57  ;;  %v996_v8 = vmul.f32 %v2074_v33, %v932_v51 }
 0x1b2   : > { %v1020_v22 = vadd.f32 %v988_v37, %v2036_v62  ;;  %v1099_v62 = vsel %vm1039_vm0, %v2165_v61, 0.0  ;;  %v1206_v23 = vsel %vm1039_vm0, %v1158_v46, 0.0  ;;  %v1107_v27 = vsel %vm1039_vm0, %v2222_v7, 0.0 }
 0x1b3   : > { %v1197_v31 = vadd.f32 %v1196_v6, %v1195_v43  ;;  %v2249_v21 = vadd.f32 %v998_v44, %v2039_v38  ;;  %v2252_v54 = vadd.f32 %v996_v8, %v2056_v40  ;;  %v1156_v38 = vmul.f32 %v2192_v3, %v2192_v3 }
 0x1b4   : > { %1053 = vst.msk [vmem:[%s2087_s24 + $0x68] sm:$0xff] %vm1039_vm0, %v1020_v22  ;;  %v1097_v55 = vsel %vm1039_vm0, %v1020_v22, 0.0  ;;  %v1154_v39 = vmul.f32 %v1020_v22, %v1020_v22  ;;  %v1161_v8 = vmul.f32 %v2219_v9, %v2219_v9 }
 0x1b5   : > { %v1098_v36 = vadd.f32 %v1097_v55, %v1096_v47  ;;  %1063 = vst.msk [vmem:[%s2087_s24 + $0xb8] sm:$0xff] %vm1039_vm0, %v2249_v21  ;;  %v1202_v24 = vsel %vm1039_vm0, %v1156_v38, 0.0 }
 0x1b6   : > { %v1198_v40 = vsel %vm1039_vm0, %v1154_v39, 0.0  ;;  %1061 = vst.msk [vmem:[%s2087_s24 + $0xa8] sm:$0xff] %vm1039_vm0, %v2252_v54 }
 0x1b7   : > { %v1100_v20 = vadd.f32 %v1099_v62, %v1098_v36  ;;  %v1199_v14 = vadd.f32 %v1198_v40, %v1197_v31  ;;  %v912_v63 = vpop.permute.xlu1 %911  ;;  %v1212_v36 = vsel %vm1039_vm0, %v1161_v8, 0.0  ;;  %v1113_v62 = vsel %vm1039_vm0, %v2252_v54, 0.0 }
 0x1b8   : > { %v991_v49 = vmul.f32 %v2074_v33, %v912_v63  ;;  %v952_v61 = vpop.permute.xlu2 %951  ;;  %v944_v42 = vpop.permute.xlu0 %943 }
 0x1b9   : > { %v1201_v26 = vadd.f32 %v1200_v2, %v1199_v14  ;;  %v1102_v58 = vadd.f32 %v1101_v53, %v1100_v20  ;;  %v1001_v25 = vmul.f32 %v2074_v33, %v952_v61  ;;  %v999_v13 = vmul.f32 %v2074_v33, %v944_v42 }
 0x1ba   : > { %v1023_v5 = vadd.f32 %v991_v49, %v2050_v10  ;;  %v1105_v10 = vsel %vm1039_vm0, %v2189_v1, 0.0  ;;  %v1164_v61 = vmul.f32 %v2249_v21, %v2249_v21 }
 0x1bb   : > { %v1203_v4 = vadd.f32 %v1202_v24, %v1201_v26  ;;  %v2279_v34 = vadd.f32 %v1001_v25, %v2053_v12  ;;  %v2282_v3 = vadd.f32 %v999_v13, %v2070_v59  ;;  %v1159_v12 = vmul.f32 %v2222_v7, %v2222_v7 }
 0x1bc   : > { %1056 = vst.msk [vmem:[%s2087_s24 + $0x80] sm:$0xff] %vm1039_vm0, %v1023_v5  ;;  %v1103_v16 = vsel %vm1039_vm0, %v1023_v5, 0.0  ;;  %v1157_v11 = vmul.f32 %v1023_v5, %v1023_v5  ;;  %v1218_v5 = vsel %vm1039_vm0, %v1164_v61, 0.0 }
 0x1bd   : > { %v1104_v35 = vadd.f32 %v1103_v16, %v1102_v58  ;;  %1066 = vst.msk [vmem:[%s2087_s24 + $0xd0] sm:$0xff] %vm1039_vm0, %v2279_v34  ;;  %v1208_v51 = vsel %vm1039_vm0, %v1159_v12, 0.0  ;;  %v1117_v58 = vsel %vm1039_vm0, %v2249_v21, 0.0  ;;  %v1167_v12 = vmul.f32 %v2279_v34, %v2279_v34 }
 0x1be   : > { %v1204_v59 = vsel %vm1039_vm0, %v1157_v11, 0.0  ;;  %1064 = vst.msk [vmem:[%s2087_s24 + $0xc0] sm:$0xff] %vm1039_vm0, %v2282_v3 }
 0x1bf   : > { %v1106_v17 = vadd.f32 %v1105_v10, %v1104_v35  ;;  %v1205_v41 = vadd.f32 %v1204_v59, %v1203_v4  ;;  %v924_v0 = vpop.permute.xlu1 %923  ;;  %v1119_v4 = vsel %vm1039_vm0, %v2282_v3, 0.0 }
 0x1c0   : > { %v994_v19 = vmul.f32 %v2074_v33, %v924_v0  ;;  %v964_v1 = vpop.permute.xlu2 %963  ;;  %v956_v30 = vpop.permute.xlu0 %955 }
 0x1c1   : > { %v1207_v48 = vadd.f32 %v1206_v23, %v1205_v41  ;;  %v1108_v50 = vadd.f32 %v1107_v27, %v1106_v17  ;;  %v1004_v37 = vmul.f32 %v2074_v33, %v964_v1  ;;  %v1002_v57 = vmul.f32 %v2074_v33, %v956_v30 }
 0x1c2   : > { %v1026_v43 = vadd.f32 %v994_v19, %v2064_v60  ;;  %v1111_v60 = vsel %vm1039_vm0, %v2219_v9, 0.0  ;;  %v1224_v1 = vsel %vm1039_vm0, %v1167_v12, 0.0 }
 0x1c3   : > { %v1209_v47 = vadd.f32 %v1208_v51, %v1207_v48  ;;  %v2309_v44 = vadd.f32 %v1004_v37, %v2067_v56  ;;  %v1034_v7 = vadd.f32 %v1002_v57, %v2090_v52  ;;  %v1162_v56 = vmul.f32 %v2252_v54, %v2252_v54 }
 0x1c4   : > { %1059 = vst.msk [vmem:[%s2087_s24 + $0x98] sm:$0xff] %vm1039_vm0, %v1026_v43  ;;  %v1109_v6 = vsel %vm1039_vm0, %v1026_v43, 0.0  ;;  %v1160_v22 = vmul.f32 %v1026_v43, %v1026_v43 }
 0x1c5   : > { %v1110_v31 = vadd.f32 %v1109_v6, %v1108_v50  ;;  %1069 = vst.msk [vmem:[%s2087_s24 + $0xe8] sm:$0xff] %vm1039_vm0, %v2309_v44  ;;  %v1214_v63 = vsel %vm1039_vm0, %v1162_v56, 0.0  ;;  %v1168_v0 = vmul.f32 %v1034_v7, %v1034_v7  ;;  %v1125_v30 = vsel %vm1039_vm0, %v1034_v7, 0.0 }
 0x1c6   : > { %v1210_v52 = vsel %vm1039_vm0, %v1160_v22, 0.0  ;;  %1067 = vst.msk [vmem:[%s2087_s24 + $0xd8] sm:$0xff] %vm1039_vm0, %v1034_v7  ;;  %v1129_v7 = vsel %vm1039_vm0, %v2309_v44, 0.0 }
 0x1c7   : > { %v1112_v15 = vadd.f32 %v1111_v60, %v1110_v31  ;;  %v1211_v55 = vadd.f32 %v1210_v52, %v1209_v47  ;;  %v936_v39 = vpop.permute.xlu1 %935  ;;  %v1226_v57 = vsel %vm1039_vm0, %v1168_v0, 0.0 }
 0x1c8   : > { %v997_v38 = vmul.f32 %v2074_v33, %v936_v39  ;;  %v968_v9 = vpop.permute.xlu0 %967 }
 0x1c9   : > { %v1213_v40 = vadd.f32 %v1212_v36, %v1211_v55  ;;  %v1114_v20 = vadd.f32 %v1113_v62, %v1112_v15  ;;  %v1005_v14 = vmul.f32 %v2074_v33, %v968_v9 }
 0x1ca   : > { %v1029_v2 = vadd.f32 %v997_v38, %v2079_v29  ;;  %v1165_v29 = vmul.f32 %v2282_v3, %v2282_v3  ;;  %v1123_v3 = vsel %vm1039_vm0, %v2279_v34, 0.0  ;;  %v1170_v34 = vmul.f32 %v2309_v44, %v2309_v44 }
 0x1cb   : > { %v1215_v53 = vadd.f32 %v1214_v63, %v1213_v40  ;;  %v1037_v49 = vadd.f32 %v1005_v14, %v2102_v28 }
 0x1cc   : > { %1062 = vst.msk [vmem:[%s2087_s24 + $0xb0] sm:$0xff] %vm1039_vm0, %v1029_v2  ;;  %v1115_v54 = vsel %vm1039_vm0, %v1029_v2, 0.0  ;;  %v1163_v42 = vmul.f32 %v1029_v2, %v1029_v2  ;;  %v1220_v35 = vsel %vm1039_vm0, %v1165_v29, 0.0  ;;  %v1230_v52 = vsel %vm1039_vm0, %v1170_v34, 0.0 }
 0x1cd   : > { %v1116_v26 = vadd.f32 %v1115_v54, %v1114_v20  ;;  %1070 = vst.msk [vmem:[%s2087_s24 + $0xf0] sm:$0xff] %vm1039_vm0, %v1037_v49  ;;  %v1171_v22 = vmul.f32 %v1037_v49, %v1037_v49  ;;  %v1131_v15 = vsel %vm1039_vm0, %v1037_v49, 0.0 }
 0x1ce   : > { %v1216_v28 = vsel %vm1039_vm0, %v1163_v42, 0.0 }
 0x1cf   : > { %v1118_v25 = vadd.f32 %v1117_v58, %v1116_v26  ;;  %v1217_v13 = vadd.f32 %v1216_v28, %v1215_v53  ;;  %v948_v24 = vpop.permute.xlu1 %947  ;;  %v1232_v62 = vsel %vm1039_vm0, %v1171_v22, 0.0 }
 0x1d0   : > { %v1000_v46 = vmul.f32 %v2074_v33, %v948_v24 }
 0x1d1   : > { %v1219_v16 = vadd.f32 %v1218_v5, %v1217_v13  ;;  %v1120_v11 = vadd.f32 %v1119_v4, %v1118_v25 }
 0x1d2   : > { %v1032_v21 = vadd.f32 %v1000_v46, %v2098_v32 }
 0x1d3   : > { %v1221_v10 = vadd.f32 %v1220_v35, %v1219_v16 }
 0x1d4   : > { %1065 = vst.msk [vmem:[%s2087_s24 + $0xc8] sm:$0xff] %vm1039_vm0, %v1032_v21  ;;  %v1121_v59 = vsel %vm1039_vm0, %v1032_v21, 0.0  ;;  %v1166_v17 = vmul.f32 %v1032_v21, %v1032_v21 }
 0x1d5   : > { %v1122_v41 = vadd.f32 %v1121_v59, %v1120_v11 }
 0x1d6   : > { %v1222_v23 = vsel %vm1039_vm0, %v1166_v17, 0.0 }
 0x1d7   : > { %v1124_v27 = vadd.f32 %v1123_v3, %v1122_v41  ;;  %v1223_v19 = vadd.f32 %v1222_v23, %v1221_v10  ;;  %v960_v32 = vpop.permute.xlu1 %959 }
 0x1d8   : > { %v1003_v48 = vmul.f32 %v2074_v33, %v960_v32 }
 0x1d9   : > { %v1225_v50 = vadd.f32 %v1224_v1, %v1223_v19  ;;  %v1126_v37 = vadd.f32 %v1125_v30, %v1124_v27 }
 0x1da   : > { %v1035_v51 = vadd.f32 %v1003_v48, %v2109_v45 }
 0x1db   : > { %v1227_v43 = vadd.f32 %v1226_v57, %v1225_v50 }
 0x1dc   : > { %1068 = vst.msk [vmem:[%s2087_s24 + $0xe0] sm:$0xff] %vm1039_vm0, %v1035_v51  ;;  %v1127_v47 = vsel %vm1039_vm0, %v1035_v51, 0.0  ;;  %v1169_v8 = vmul.f32 %v1035_v51, %v1035_v51 }
 0x1dd   : > { %v1128_v6 = vadd.f32 %v1127_v47, %v1126_v37 }
 0x1de   : > { %v1228_v31 = vsel %vm1039_vm0, %v1169_v8, 0.0 }
 0x1df   : > { %v1130_v60 = vadd.f32 %v1129_v7, %v1128_v6  ;;  %v1229_v56 = vadd.f32 %v1228_v31, %v1227_v43  ;;  %v972_v45 = vpop.permute.xlu1 %971 }
 0x1e0   : > { %v1006_v55 = vmul.f32 %v2074_v33, %v972_v45 }
 0x1e1   : > { %v1231_v39 = vadd.f32 %v1230_v52, %v1229_v56  ;;  %v1132_v36 = vadd.f32 %v1131_v15, %v1130_v60 }
 0x1e2   : > { %v1038_v38 = vadd.f32 %v1006_v55, %v2125_v18 }
 0x1e3   : > { %v1233_v9 = vadd.f32 %v1232_v62, %v1231_v39 }
 0x1e4   : > { %1071 = vst.msk [vmem:[%s2087_s24 + $0xf8] sm:$0xff] %vm1039_vm0, %v1038_v38  ;;  %v1133_v44 = vsel %vm1039_vm0, %v1038_v38, 0.0  ;;  %v1172_v40 = vmul.f32 %v1038_v38, %v1038_v38 }
 0x1e5   : > { %v1134_v20 = vadd.f32 %v1133_v44, %v1132_v36 }
 0x1e6   : > { %v1234_v14 = vsel %vm1039_vm0, %v1172_v40, 0.0 }
 0x1e7   : > { %v1135_v63 = vrot.slane %v1134_v20, 4  ;;  %v1235_v2 = vadd.f32 %v1234_v14, %v1233_v9 }
 0x1e9   : > { %v1136_v53 = vadd.f32 %v1135_v63, %v1134_v20  ;;  %v1236_v33 = vrot.slane %v1235_v2, 4 }
 0x1eb   : > { %v1137_v49 = vrot.slane %v1136_v53, 2  ;;  %v1237_v61 = vadd.f32 %v1236_v33, %v1235_v2 }
 0x1ed   : > { %v1138_v54 = vadd.f32 %v1137_v49, %v1136_v53  ;;  %v1238_v42 = vrot.slane %v1237_v61, 2 }
 0x1ef   : > { %v1139_v26 = vrot.slane %v1138_v54, 1  ;;  %v1239_v18 = vadd.f32 %v1238_v42, %v1237_v61 }
 0x1f1   : > { %v1240_v58 = vrot.slane %v1239_v18, 1  ;;  %v1140_v29 = vadd.f32 %v1139_v26, %v1138_v54 }
 0x1f3   : > { %v1241_v28 = vadd.f32 %v1240_v58, %v1239_v18 }
 0x1f5   : > { %v1243_v25 = vsel %vm1242_vm1, %v1140_v29, %v1241_v28 }
 0x1f6   : > { %1245 = vst.msk [vmem:[%s233_s28] sm:$0x3] %vm1244_vm2, %v1243_v25 }
 0x1f7 PF: > { %s14_s14 = sadd.s32 1, %s1459_s14   ;;  %s2457_s12 = smov %s1455_s13 }
 0x1f8   : > { %p11_p5 = scmp.ge.s32.totalorder %s14_s14, 4   ;;  %s2458_s13 = smov %s2460_s15 }
 0x1fa   :  { %13 = sbr.rel (!%p11_p5) target bundleno = 2 (0x2), region = 70 }

// kernel: cnn_block_forward.5
= control target key start
LH: loop header
LB: loop body
LE: loop exit
PB: predicated region body
PF: predicated region fallthrough
CT: control target
= control target key end

     0   :  { %s949_s21 = smov 0   ;;  %s951_s22 = smov 0   ;;  %s1148_s0 = inlined_call_operand.vmem [shape: f32[2,1,18,144], index: 0, kind: input, shape index: {}]   ;;  %s1149_s1 = inlined_call_operand.vmem [shape: f32[2,144], index: 1, kind: input, shape index: {}]   ;;  %s1150_s2 = inlined_call_operand.vmem [shape: f32[1,144], index: 2, kind: input, shape index: {}]   ;;  %s1151_s3 = inlined_call_operand.vmem [shape: f32[9,128], index: 3, kind: input, shape index: {}]   ;;  %s1152_s4 = inlined_call_operand.vmem [shape: f32[1,2], index: 4, kind: input, shape index: {}]   ;;  %s1153_s5 = inlined_call_operand.vmem [shape: f32[2,16,128], index: 5, kind: output, shape index: {0}]   ;;  %s1154_s6 = inlined_call_operand.vmem [shape: f32[2,1,2,128], index: 6, kind: output, shape index: {1}]  }
   0x1   :  { %s953_s23 = smov 0  }
   0x2 LB: > { %s29_s24 = sadd.s32 1, %s902_s22  ;;  %p840_p0 = scmp.ge.s32.totalorder %s906_s23, 1  ;;  %s906_s23 = sphi %s953_s23, %s17_s23   ;;  %s902_s22 = sphi %s951_s22, %s1156_s22   ;;  %s898_s21 = sphi %s949_s21, %s1155_s21  }
   0x3   : > { %p31_p1 = scmp.ge.s32.totalorder %s29_s24, 2  ;;  %p237_p2 = scmp.lt.s32.totalorder %s906_s23, 3 }
   0x5   : > { %s1158_s24 = smov (%p31_p1, %s29_s24), 0  ;;  %p238_p3 = pnand %p840_p0, %p237_p2 }
   0x6   : > { %s909_s29 = smov (!%p238_p3), 8   ;;  %s910_s30 = smov (!%p238_p3), 16  }
   0x7   : > { %241 = sbr.rel (%p238_p3) target bundleno = 336 (0x150), region = 40  ;;  %p282_p4 = scmp.lt.s32.totalorder (!%p238_p3), %s898_s21, 1 }
   0x8   : > { %s912_s19 = smov (!%p238_p3), 112   ;;  %s913_s20 = smov (!%p238_p3), 120  }
   0xc   : > { %v972_v0 = vld [vmem:[%s1151_s3] sm:$0xff]  ;;  %v908_v1 = vmov 0   ;;  %v911_v7 = vmov 1   ;;  %v883_v9 = vld [vmem:[%s1151_s3 + $0x8] ss:$0 sm:$0xff]  ;;  %s1160_s21 = smov (!%p282_p4, %s898_s21), 1  ;;  %v392_v60 = vlaneseq }
   0xd   : > { %880 = vset.pattern.permute.xlu0 %v908_v1  ;;  %v430_v2 = vperm.slane %v972_v0, 1  ;;  %v882_v3 = vld [vmem:[%s1152_s4] ss:$0 sm:$0xff]  ;;  %v503_v4 = vperm.slane %v972_v0, 4  ;;  %v458_v5 = vperm.slane %v972_v0, 2  ;;  %v544_v6 = vperm.slane %v972_v0, 5 }
   0xe   : > { %355 = vperm.xlu0 %880, %v882_v3   ;;  %v602_v8 = vperm.slane %v972_v0, 7  ;;  %s849_s9 = smul.u32 48, %s1160_s21  ;;  %v314_v10 = vld [vmem:[%s1149_s1] ss:$2 sm:$0x3]  ;;  %vm493_vm2 = vcmask 1046528  }
   0xf   : > { %432 = vrot.lane.b32.xlu1 %v430_v2, %s909_s29  ;;  %505 = vrot.lane.b32.xlu2 %v503_v4, %s909_s29  ;;  %v319_v11 = vperm.slane %v314_v10, 0  ;;  %v320_v12 = vperm.slane %v314_v10, 1  ;;  %v845_v15 = vld [vmem:[%s1149_s1 + $0x1] ss:$2 sm:$0x3]  ;;  %vm592_vm3 = vcmask 1045504  }
  0x10   : > { %s290_s14 = scalar_lea.vmem %s1148_s0, %s849_s9  ;;  %v330_v20 = vperm.slane %v845_v15, 0  ;;  %v331_v21 = vperm.slane %v845_v15, 1  ;;  %v380_v48 = vld [vmem:[%s1150_s2] sm:$0x3]  ;;  %vm451_vm4 = vcmask 982016   ;;  %vm479_vm5 = vcmask 916480  }
  0x11   : > { %v310_v13 = vld [vmem:[%s290_s14 + $0x10] sm:$0xff]  ;;  %v311_v14 = vld [vmem:[%s290_s14 + $0x18] sm:$0xff]  ;;  %v309_v16 = vld [vmem:[%s290_s14 + $0x8] sm:$0xff]  ;;  %v382_v51 = vperm.slane %v380_v48, 0  ;;  %v383_v52 = vperm.slane %v380_v48, 1  ;;  %s848_s25 = sshll.u32 %s1160_s21, 4 }
  0x12   : > { %v308_v17 = vld [vmem:[%s290_s14] sm:$0xff]  ;;  %v325_v18 = vmul.f32 %v319_v11, %v310_v13  ;;  %v326_v19 = vmul.f32 %v320_v12, %v311_v14  ;;  %v324_v22 = vmul.f32 %v320_v12, %v309_v16  ;;  %v313_v29 = vld [vmem:[%s290_s14 + $0x28] sm:$0x3]  ;;  %s299_s28 = scalar_lea.vmem %s1153_s5, %s848_s25  ;;  %vm702_vm6 = vcmask 1040384  }
  0x13   : > { %v323_v23 = vmul.f32 %v319_v11, %v308_v17  ;;  %v312_v27 = vld [vmem:[%s290_s14 + $0x20] sm:$0x3]  ;;  %v328_v34 = vmul.f32 %v320_v12, %v313_v29 }
  0x14   : > { %v336_v24 = vadd.f32 %v330_v20, %v325_v18  ;;  %v337_v25 = vadd.f32 %v331_v21, %v326_v19  ;;  %v335_v26 = vadd.f32 %v331_v21, %v324_v22  ;;  %v327_v32 = vmul.f32 %v319_v11, %v312_v27 }
  0x15   : > { %v334_v28 = vadd.f32 %v330_v20, %v323_v23  ;;  %v339_v42 = vadd.f32 %v331_v21, %v328_v34 }
  0x16   : > { %881 = vset.pattern.permute.xlu0 %v911_v7  ;;  %v342_v30 = vmax.f32 %v336_v24, 0.0  ;;  %v343_v31 = vmax.f32 %v337_v25, 0.0  ;;  %v341_v33 = vmax.f32 %v335_v26, 0.0  ;;  %v338_v39 = vadd.f32 %v330_v20, %v327_v32 }
  0x17   : > { %460 = vrot.lane.b32.xlu1 %v458_v5, %s910_s30  ;;  %371 = vperm.xlu0 %881, %v882_v3   ;;  %v340_v35 = vmax.f32 %v334_v28, 0.0  ;;  %v345_v49 = vmax.f32 %v339_v42, 0.0 }
  0x18   : > { %546 = vrot.lane.b32.xlu2 %v544_v6, %s910_s30  ;;  %v348_v37 = vmin.f32 %v342_v30, 6.0  ;;  %v349_v38 = vmin.f32 %v343_v31, 6.0  ;;  %v347_v40 = vmin.f32 %v341_v33, 6.0  ;;  %v344_v46 = vmax.f32 %v338_v39, 0.0 }
  0x19   : > { %v346_v43 = vmin.f32 %v340_v35, 6.0  ;;  %v351_v61 = vmin.f32 %v345_v49, 6.0  ;;  %v486_v31 = vperm.slane %v972_v0, 3 }
  0x1a   : > { %v350_v55 = vmin.f32 %v344_v46, 6.0 }
  0x1f   : > { %604 = vrot.lane.b32.xlu1 %v602_v8, %s909_s29  ;;  %s844_s29 = sshll.u32 %s1160_s21, 1 }
  0x20   : > { %645 = vrot.lane.b32.xlu2 %v883_v9, %s910_s30  ;;  %v393_v9 = vshrl.u32 %v392_v60, 7  ;;  %s307_s8 = scalar_lea.vmem %s1154_s6, %s844_s29 }
  0x22   : > { %vm396_vm0 = vcmp.ge.s32.totalorder %v393_v9, 1  ;;  %v395_v17 = vadd.s32 16, %v393_v9 }
  0x24   : > { %vm408_vm1 = vcmp.le.s32.totalorder %v395_v17, 16 }
  0x69   : > { %v506_v22 = vpop.permute.xlu2 %505 }
  0x80   : > { %v356_v36 = vpop.permute.xlu0 %355 }
  0x81   : > { %v999_v41 = vpop.permute.xlu1 %432  ;;  %v360_v44 = vmul.f32 %v356_v36, %v348_v37  ;;  %v361_v45 = vmul.f32 %v356_v36, %v349_v38  ;;  %v359_v47 = vmul.f32 %v356_v36, %v347_v40  ;;  %v358_v50 = vmul.f32 %v356_v36, %v346_v43 }
  0x82   : > { %v362_v3 = vmul.f32 %v356_v36, %v350_v55  ;;  %v363_v10 = vmul.f32 %v356_v36, %v351_v61 }
  0x83   : > { %v366_v53 = vmul.f32 %v360_v44, %v348_v37  ;;  %v367_v54 = vmul.f32 %v361_v45, %v349_v38  ;;  %v365_v57 = vmul.f32 %v359_v47, %v347_v40  ;;  %v364_v62 = vmul.f32 %v358_v50, %v346_v43 }
  0x84   : > { %v368_v12 = vmul.f32 %v362_v3, %v350_v55  ;;  %v369_v14 = vmul.f32 %v363_v10, %v351_v61  ;;  %v585_v37 = vperm.slane %v972_v0, 6 }
  0x89   : > { %v372_v56 = vpop.permute.xlu0 %371  ;;  %v461_v4 = vpop.permute.xlu1 %460 }
  0x8a   : > { %v376_v58 = vadd.f32 %v372_v56, %v366_v53  ;;  %v377_v59 = vadd.f32 %v372_v56, %v367_v54  ;;  %v375_v63 = vadd.f32 %v372_v56, %v365_v57  ;;  %v374_v5 = vadd.f32 %v372_v56, %v364_v62 }
  0x8b   : > { %v378_v15 = vadd.f32 %v372_v56, %v368_v12  ;;  %v379_v18 = vadd.f32 %v372_v56, %v369_v14  ;;  %v547_v56 = vpop.permute.xlu2 %546 }
  0x8c   : > { %v1004_v1 = vmul.f32 %v382_v51, %v376_v58  ;;  %v1006_v2 = vmul.f32 %v383_v52, %v377_v59  ;;  %v387_v11 = vmul.f32 %v383_v52, %v375_v63  ;;  %v386_v13 = vmul.f32 %v382_v51, %v374_v5 }
  0x8d   : > { %v390_v23 = vmul.f32 %v382_v51, %v378_v15  ;;  %v391_v27 = vmul.f32 %v383_v52, %v379_v18 }
  0x8e   : > { %v466_v6 = vmul.f32 %v461_v4, %v1006_v2  ;;  %v438_v7 = vmul.f32 %v999_v41, %v1006_v2  ;;  %v437_v8 = vmul.f32 %v999_v41, %v1004_v1  ;;  %v1016_v16 = vsel %vm396_vm0, %v387_v11, 0.0 }
  0x8f   : > { %v1018_v19 = vsel %vm396_vm0, %v386_v13, 0.0  ;;  %v465_v20 = vmul.f32 %v461_v4, %v1004_v1  ;;  %v436_v21 = vmul.f32 %v999_v41, %v1016_v16  ;;  %v464_v24 = vmul.f32 %v461_v4, %v1016_v16 }
  0x90   : > { %477 = vrot.lane.b32.xlu1 %v466_v6, %s912_s19  ;;  %449 = vrot.lane.b32.xlu0 %v438_v7, %s913_s20  ;;  %v508_v25 = vmul.f32 %v506_v22, %v1018_v19  ;;  %v510_v26 = vmul.f32 %v506_v22, %v1004_v1  ;;  %v1029_v28 = vsel %vm408_vm1, %v390_v23, 0.0  ;;  %v1032_v32 = vsel %vm408_vm1, %v391_v27, 0.0 }
  0x91   : > { %447 = vrot.lane.b32.xlu2 %v437_v8, %s913_s20  ;;  %v511_v33 = vmul.f32 %v506_v22, %v1006_v2  ;;  %v463_v34 = vmul.f32 %v461_v4, %v1018_v19  ;;  %v435_v35 = vmul.f32 %v999_v41, %v1018_v19  ;;  %v512_v36 = vmul.f32 %v506_v22, %v1029_v28  ;;  %v605_v9 = vpop.permute.xlu1 %604 }
  0x92   : > { %v520_v29 = vrot.slane %v508_v25, 1  ;;  %v521_v30 = vrot.slane %v510_v26, 1  ;;  %v509_v38 = vmul.f32 %v506_v22, %v1016_v16  ;;  %v513_v40 = vmul.f32 %v506_v22, %v1032_v32 }
  0x93   : > { %v488_v42 = vmul.f32 %v486_v31, %v1004_v1  ;;  %v524_v43 = vrot.slane %v511_v33, 1  ;;  %v489_v41 = vmul.f32 %v486_v31, %v1029_v28  ;;  %v487_v44 = vmul.f32 %v486_v31, %v1018_v19  ;;  %v646_v31 = vpop.permute.xlu2 %645 }
  0x94   : > { %v522_v39 = vsel %vm493_vm2, %v520_v29, %v521_v30  ;;  %v526_v45 = vrot.slane %v512_v36, 1  ;;  %v586_v47 = vmul.f32 %v585_v37, %v1018_v19  ;;  %v587_v48 = vmul.f32 %v585_v37, %v1004_v1 }
  0x95   : > { %v495_v46 = vrot.slane %v488_v42, 1  ;;  %v523_v49 = vrot.slane %v509_v38, 1  ;;  %v497_v50 = vrot.slane %v489_v41, 1  ;;  %v494_v51 = vrot.slane %v487_v44, 1 }
  0x96   : > { %v588_v52 = vmul.f32 %v585_v37, %v1029_v28  ;;  %v528_v53 = vrot.slane %v513_v40, 1  ;;  %v593_v54 = vrot.slane %v586_v47, 2  ;;  %v594_v55 = vrot.slane %v587_v48, 2 }
  0x97   : > { %v1053_v57 = vsel %vm493_vm2, %v495_v46, %v497_v50  ;;  %v1056_v58 = vsel %vm493_vm2, %v494_v51, %v495_v46  ;;  %v551_v60 = vmul.f32 %v547_v56, %v1004_v1  ;;  %v550_v61 = vmul.f32 %v547_v56, %v1016_v16 }
  0x98   : > { %475 = vrot.lane.b32.xlu0 %v465_v20, %s912_s19  ;;  %445 = vrot.lane.b32.xlu1 %v436_v21, %s913_s20  ;;  %v596_v59 = vrot.slane %v588_v52, 2  ;;  %v552_v62 = vmul.f32 %v547_v56, %v1006_v2  ;;  %v1062_v63 = vsel %vm592_vm3, %v593_v54, %v594_v55  ;;  %v527_v3 = vsel %vm493_vm2, %v521_v30, %v526_v45 }
  0x99   : > { %473 = vrot.lane.b32.xlu2 %v464_v24, %s912_s19  ;;  %v525_v4 = vsel %vm493_vm2, %v523_v49, %v524_v43  ;;  %v549_v5 = vmul.f32 %v547_v56, %v1018_v19  ;;  %v529_v7 = vsel %vm493_vm2, %v524_v43, %v528_v53  ;;  %v553_v8 = vmul.f32 %v547_v56, %v1029_v28 }
  0x9a   : > { %v1068_v6 = vsel %vm592_vm3, %v594_v55, %v596_v59  ;;  %v562_v10 = vrot.slane %v551_v60, 1  ;;  %v564_v11 = vrot.slane %v550_v61, 1  ;;  %v565_v12 = vrot.slane %v552_v62, 1 }
  0x9b   : > { %v561_v13 = vrot.slane %v549_v5, 1  ;;  %v567_v14 = vrot.slane %v553_v8, 1  ;;  %v607_v15 = vmul.f32 %v605_v9, %v1018_v19  ;;  %v609_v20 = vmul.f32 %v605_v9, %v1004_v1 }
  0x9c   : > { %v566_v17 = vsel %vm493_vm2, %v564_v11, %v565_v12  ;;  %v554_v21 = vmul.f32 %v547_v56, %v1032_v32  ;;  %v608_v23 = vmul.f32 %v605_v9, %v1016_v16  ;;  %v610_v24 = vmul.f32 %v605_v9, %v1006_v2 }
  0x9d   : > { %v563_v18 = vsel %vm493_vm2, %v561_v13, %v562_v10  ;;  %v568_v22 = vsel %vm493_vm2, %v562_v10, %v567_v14  ;;  %v619_v25 = vrot.slane %v607_v15, 2  ;;  %v620_v26 = vrot.slane %v609_v20, 2 }
  0x9e   : > { %v569_v27 = vrot.slane %v554_v21, 1  ;;  %v622_v29 = vrot.slane %v608_v23, 2  ;;  %v623_v30 = vrot.slane %v610_v24, 2  ;;  %v611_v36 = vmul.f32 %v605_v9, %v1029_v28 }
  0x9f   : > { %v621_v33 = vsel %vm592_vm3, %v619_v25, %v620_v26  ;;  %v648_v38 = vmul.f32 %v646_v31, %v1018_v19  ;;  %v651_v44 = vmul.f32 %v646_v31, %v1006_v2  ;;  %v652_v47 = vmul.f32 %v646_v31, %v1029_v28 }
  0xa0   : > { %471 = vrot.lane.b32.xlu1 %v463_v34, %s912_s19  ;;  %443 = vrot.lane.b32.xlu0 %v435_v35, %s913_s20  ;;  %v570_v34 = vsel %vm493_vm2, %v565_v12, %v569_v27  ;;  %v612_v35 = vmul.f32 %v605_v9, %v1032_v32  ;;  %v624_v37 = vsel %vm592_vm3, %v622_v29, %v623_v30  ;;  %v625_v42 = vrot.slane %v611_v36, 2 }
  0xa1   : > { %530 = vrot.lane.b32.xlu2 %v522_v39, %s913_s20  ;;  %v650_v39 = vmul.f32 %v646_v31, %v1004_v1  ;;  %v660_v43 = vrot.slane %v648_v38, 2  ;;  %v649_v48 = vmul.f32 %v646_v31, %v1016_v16  ;;  %v653_v50 = vmul.f32 %v646_v31, %v1032_v32 }
  0xa2   : > { %v627_v40 = vrot.slane %v612_v35, 2  ;;  %v626_v46 = vsel %vm592_vm3, %v620_v26, %v625_v42  ;;  %v664_v51 = vrot.slane %v651_v44, 2  ;;  %v666_v2 = vrot.slane %v652_v47, 2 }
  0xa3   : > { %v661_v41 = vrot.slane %v650_v39, 2  ;;  %v663_v52 = vrot.slane %v649_v48, 2  ;;  %v668_v53 = vrot.slane %v653_v50, 2  ;;  %v427_v60 = vperm.slane %v972_v0, 0 }
  0xa4   : > { %v628_v45 = vsel %vm592_vm3, %v623_v30, %v627_v40 }
  0xa5   : > { %v662_v49 = vsel %vm592_vm3, %v660_v43, %v661_v41  ;;  %v667_v54 = vsel %vm592_vm3, %v661_v41, %v666_v2  ;;  %v665_v28 = vsel %vm592_vm3, %v663_v52, %v664_v51  ;;  %v669_v16 = vsel %vm592_vm3, %v664_v51, %v668_v53 }
  0xa6   : > { %v428_v0 = vmul.f32 %v427_v60, %v1018_v19 }
  0xa8   : > { %534 = vrot.lane.b32.xlu1 %v527_v3, %s913_s20  ;;  %532 = vrot.lane.b32.xlu0 %v525_v4, %s913_s20  ;;  %v429_v3 = vmul.f32 %v427_v60, %v1004_v1 }
  0xa9   : > { %536 = vrot.lane.b32.xlu2 %v529_v7, %s913_s20 }
  0xb0   : > { %573 = vrot.lane.b32.xlu1 %v566_v17, %s912_s19  ;;  %571 = vrot.lane.b32.xlu0 %v563_v18, %s912_s19 }
  0xb1   : > { %575 = vrot.lane.b32.xlu2 %v568_v22, %s912_s19 }
  0xb8   : > { %629 = vrot.lane.b32.xlu1 %v621_v33, %s913_s20  ;;  %577 = vrot.lane.b32.xlu0 %v570_v34, %s912_s19 }
  0xb9   : > { %631 = vrot.lane.b32.xlu2 %v624_v37, %s913_s20 }
  0xc0   : > { %635 = vrot.lane.b32.xlu1 %v628_v45, %s913_s20  ;;  %633 = vrot.lane.b32.xlu0 %v626_v46, %s913_s20 }
  0xc1   : > { %670 = vrot.lane.b32.xlu2 %v662_v49, %s912_s19 }
  0xc8   : > { %674 = vrot.lane.b32.xlu1 %v667_v54, %s912_s19  ;;  %672 = vrot.lane.b32.xlu0 %v665_v28, %s912_s19 }
  0xc9   : > { %676 = vrot.lane.b32.xlu2 %v669_v16, %s912_s19 }
  0xeb   : > { %v448_v55 = vpop.permute.xlu2 %447 }
  0xf3   : > { %v474_v32 = vpop.permute.xlu2 %473 }
  0xfb   : > { %v531_v61 = vpop.permute.xlu2 %530 }
 0x102   : > { %v478_v56 = vpop.permute.xlu1 %477  ;;  %v450_v59 = vpop.permute.xlu0 %449 }
 0x103   : > { %v453_v62 = vsel %vm451_vm4, %v448_v55, %v450_v59  ;;  %v537_v11 = vpop.permute.xlu2 %536 }
 0x104   : > { %v457_v4 = vadd.f32 %v453_v62, %v429_v3 }
 0x10a   : > { %v476_v5 = vpop.permute.xlu0 %475  ;;  %v446_v7 = vpop.permute.xlu1 %445 }
 0x10b   : > { %v481_v8 = vsel %vm479_vm5, %v476_v5, %v478_v56  ;;  %v576_v22 = vpop.permute.xlu2 %575 }
 0x10c   : > { %v485_v9 = vadd.f32 %v481_v8, %v457_v4 }
 0x10e   : > { %v502_v10 = vadd.f32 %v1053_v57, %v485_v9 }
 0x112   : > { %v472_v12 = vpop.permute.xlu1 %471  ;;  %v444_v13 = vpop.permute.xlu0 %443 }
 0x113   : > { %v452_v14 = vsel %vm451_vm4, %v444_v13, %v446_v7  ;;  %v480_v17 = vsel %vm479_vm5, %v472_v12, %v474_v32  ;;  %v632_v27 = vpop.permute.xlu2 %631 }
 0x114   : > { %v456_v15 = vadd.f32 %v452_v14, %v428_v0 }
 0x116   : > { %v484_v1 = vadd.f32 %v480_v17, %v456_v15 }
 0x118   : > { %v501_v18 = vadd.f32 %v1056_v58, %v484_v1 }
 0x11a   : > { %v535_v20 = vpop.permute.xlu1 %534  ;;  %v533_v21 = vpop.permute.xlu0 %532 }
 0x11b   : > { %v538_v23 = vsel %vm451_vm4, %v531_v61, %v533_v21  ;;  %v539_v30 = vsel %vm451_vm4, %v535_v20, %v537_v11  ;;  %v671_v37 = vpop.permute.xlu2 %670 }
 0x11c   : > { %v542_v24 = vadd.f32 %v538_v23, %v501_v18  ;;  %v543_v31 = vadd.f32 %v539_v30, %v502_v10 }
 0x122   : > { %v574_v57 = vpop.permute.xlu1 %573  ;;  %v572_v25 = vpop.permute.xlu0 %571 }
 0x123   : > { %v579_v26 = vsel %vm479_vm5, %v572_v25, %v574_v57  ;;  %v677_v43 = vpop.permute.xlu2 %676 }
 0x124   : > { %v583_v19 = vadd.f32 %v579_v26, %v542_v24 }
 0x126   : > { %v600_v29 = vadd.f32 %v1062_v63, %v583_v19 }
 0x12a   : > { %v630_v33 = vpop.permute.xlu1 %629  ;;  %v578_v58 = vpop.permute.xlu0 %577 }
 0x12b   : > { %v580_v34 = vsel %vm479_vm5, %v576_v22, %v578_v58  ;;  %v637_v40 = vsel %vm451_vm4, %v630_v33, %v632_v27 }
 0x12c   : > { %v584_v35 = vadd.f32 %v580_v34, %v543_v31  ;;  %v641_v63 = vadd.f32 %v637_v40, %v600_v29 }
 0x12e   : > { %v601_v36 = vadd.f32 %v1068_v6, %v584_v35 }
 0x132   : > { %v636_v38 = vpop.permute.xlu1 %635  ;;  %v634_v39 = vpop.permute.xlu0 %633 }
 0x133   : > { %v638_v42 = vsel %vm451_vm4, %v634_v39, %v636_v38 }
 0x134   : > { %v642_v41 = vadd.f32 %v638_v42, %v601_v36 }
 0x13a   : > { %v675_v44 = vpop.permute.xlu1 %674  ;;  %v673_v45 = vpop.permute.xlu0 %672 }
 0x13b   : > { %v679_v46 = vsel %vm479_vm5, %v675_v44, %v677_v43  ;;  %v678_v6 = vsel %vm479_vm5, %v671_v37, %v673_v45 }
 0x13c   : > { %v683_v47 = vadd.f32 %v679_v46, %v642_v41  ;;  %v682_v48 = vadd.f32 %v678_v6, %v641_v63 }
 0x13e   : > { %685 = vst [vmem:[%s299_s28 + $0x8] sm:$0xff] %v683_v47  ;;  %v694_v49 = vmul.f32 %v683_v47, %v683_v47  ;;  %v686_v50 = vadd.f32 %v683_v47, %v682_v48  ;;  %v693_v51 = vmul.f32 %v682_v48, %v682_v48 }
 0x13f   : > { %684 = vst [vmem:[%s299_s28] sm:$0xff] %v682_v48 }
 0x140   : > { %v687_v2 = vrot.slane %v686_v50, 4  ;;  %v695_v52 = vadd.f32 %v694_v49, %v693_v51 }
 0x142   : > { %v688_v53 = vadd.f32 %v687_v2, %v686_v50  ;;  %v696_v54 = vrot.slane %v695_v52, 4 }
 0x144   : > { %v689_v28 = vrot.slane %v688_v53, 2  ;;  %v697_v16 = vadd.f32 %v696_v54, %v695_v52 }
 0x146   : > { %v690_v55 = vadd.f32 %v689_v28, %v688_v53  ;;  %v698_v32 = vrot.slane %v697_v16, 2 }
 0x148   : > { %v691_v56 = vrot.slane %v690_v55, 1  ;;  %v699_v59 = vadd.f32 %v698_v32, %v697_v16 }
 0x14a   : > { %v700_v60 = vrot.slane %v699_v59, 1  ;;  %v692_v61 = vadd.f32 %v691_v56, %v690_v55 }
 0x14c   : > { %v701_v62 = vadd.f32 %v700_v60, %v699_v59 }
 0x14e   : > { %v703_v3 = vsel %vm702_vm6, %v692_v61, %v701_v62 }
 0x14f   : > { %704 = vst [vmem:[%s307_s8] sm:$0x3] %v703_v3 }
 0x150 PF: > { %s17_s23 = sadd.s32 1, %s906_s23   ;;  %s1155_s21 = smov %s902_s22 }
 0x151   : > { %p14_p5 = scmp.ge.s32.totalorder %s17_s23, 4   ;;  %s1156_s22 = smov %s1158_s24 }
 0x153   :  { %16 = sbr.rel (!%p14_p5) target bundleno = 2 (0x2), region = 83 }

// kernel: cnn_block_forward.6
= control target key start
LH: loop header
LB: loop body
LE: loop exit
PB: predicated region body
PF: predicated region fallthrough
CT: control target
= control target key end

     0   :  { %s3679_s18 = smov 0   ;;  %s3681_s19 = smov 0   ;;  %s5888_s0 = inlined_call_operand.vmem [shape: f32[2,1,18,18,8], index: 0, kind: input, shape index: {}]   ;;  %s5889_s1 = inlined_call_operand.vmem [shape: f32[2,16,16,4], index: 1, kind: input, shape index: {}]   ;;  %s5890_s2 = inlined_call_operand.vmem [shape: f32[2,8], index: 2, kind: input, shape index: {}]   ;;  %s5891_s3 = inlined_call_operand.vmem [shape: bf16[76,16], index: 3, kind: input, shape index: {}]   ;;  %s5892_s4 = inlined_call_operand.vmem [shape: f32[1,2], index: 4, kind: input, shape index: {}]   ;;  %s5893_s5 = inlined_call_operand.vmem [shape: f32[2,1,2,16], index: 5, kind: output, shape index: {}]  }
   0x1   :  { %s3683_s20 = smov 0  }
   0x2 LB: > { %s27_s21 = sadd.s32 1, %s3631_s19  ;;  %p2785_p0 = scmp.ge.s32.totalorder %s3635_s20, 1  ;;  %s3635_s20 = sphi %s3683_s20, %s15_s20   ;;  %s3631_s19 = sphi %s3681_s19, %s6138_s19   ;;  %s3627_s18 = sphi %s3679_s18, %s6137_s18  }
   0x3   : > { %p29_p1 = scmp.ge.s32.totalorder %s27_s21, 2  ;;  %p225_p2 = scmp.lt.s32.totalorder %s3635_s20, 3 }
   0x5   : > { %s6140_s21 = smov (%p29_p1, %s27_s21), 0  ;;  %p226_p3 = pnand %p2785_p0, %p225_p2 }
   0x7   : > { %229 = sbr.rel (%p226_p3) target bundleno = 800 (0x320), region = 40 }
   0xc   : > { %v3608_v0 = vld [vmem:[%s5892_s4] ss:$0 sm:$0xff]  ;;  %v3637_v1 = vmov 0   ;;  %v5894_v2 = vmov 0.0   ;;  %s3639_s24 = smov 8   ;;  %v3640_v6 = vmov 1  }
   0xd   : > { %2886 = vset.pattern.permute.xlu0 %v3637_v1  ;;  %v898_v3 = vrot.slane %v5894_v2, 1  ;;  %v979_v5 = vrot.slane %v5894_v2, 2  ;;  %s3641_s25 = smov 16   ;;  %p269_p4 = scmp.lt.s32.totalorder %s3627_s18, 1  ;;  %v3721_v8 = vld [vmem:[%s5890_s2] ss:$0 sm:$0xff] }
   0xe   : > { %575 = vperm.xlu0 %2886, %v3608_v0   ;;  %v3731_v14 = vld [vmem:[%s5890_s2 + $0x1] ss:$0 sm:$0xff]  ;;  %s3642_s9 = smov 24   ;;  %vm897_vm2 = vcmask 1046528   ;;  %vm978_vm3 = vcmask 1045504   ;;  %vm2013_vm4 = vcmask 64512  }
   0xf   : > { %v3701_v4 = vpack.i.bf16 %v898_v3, %v898_v3  ;;  %v3706_v7 = vpack.i.bf16 %v979_v5, %v979_v5  ;;  %s6142_s18 = smov (!%p269_p4, %s3627_s18), 1  ;;  %vm2046_vm5 = vcmask 130048   ;;  %vm2079_vm6 = vcmask 195584   ;;  %s3643_s14 = smov 32  }
  0x10   : > { %s2849_s26 = smul.u32 432, %s6142_s18  ;;  %s3644_s15 = smov 40   ;;  %vm2112_vm7 = vcmask 261120   ;;  %vm2145_vm8 = vcmask 326656   ;;  %vm2178_vm9 = vcmask 392192   ;;  %vm2211_vm10 = vcmask 457728  }
  0x11   : > { %5976 = vst [vmem:[#allocation2_spill] sm:$0xff] %v3701_v4  ;;  %2889 = vrot.lane.b32.xlu1 %v3701_v4, %s3639_s24  ;;  %s3645_s16 = smov 48   ;;  %s3646_s17 = smov 56   ;;  %vm2244_vm11 = vcmask 523264   ;;  %vm2277_vm12 = vcmask 588800   ;;  %vm2365_vm13 = vcmask 621568  }
  0x12   : > { %5977 = vst [vmem:[#allocation3_spill] sm:$0xff] %v3706_v7  ;;  %s3716_s29 = scalar_lea.vmem %s5888_s0, %s2849_s26  ;;  %s3647_s22 = smov 64   ;;  %vm2676_vm14 = vcmask 1040384   ;;  %vm2678_vm15 = vcmask 123904  }
  0x13   : > { %v306_v9 = vld [vmem:[%s3716_s29 + $0x48] sm:$0xff]  ;;  %v307_v10 = vld [vmem:[%s3716_s29 + $0x50] sm:$0xff]  ;;  %v304_v15 = vld [vmem:[%s3716_s29 + $0x38] sm:$0xff]  ;;  %s2828_s23 = sshll.u32 %s6142_s18, 8  ;;  %s3648_s27 = smov 72  }
  0x14   : > { %v303_v11 = vld [vmem:[%s3716_s29 + $0x30] sm:$0xff]  ;;  %v364_v12 = vmul.f32 %v3721_v8, %v306_v9  ;;  %v365_v13 = vmul.f32 %v3721_v8, %v307_v10  ;;  %v300_v16 = vld [vmem:[%s3716_s29 + $0x18] sm:$0xff]  ;;  %v362_v18 = vmul.f32 %v3721_v8, %v304_v15  ;;  %v301_v19 = vld [vmem:[%s3716_s29 + $0x20] sm:$0xff]  ;;  %v744_v15 = vlaneseq  ;;  %s5201_s26 = scalar_lea.vmem %s5889_s1, %s2828_s23 }
  0x15   : > { %v361_v17 = vmul.f32 %v3721_v8, %v303_v11  ;;  %v358_v20 = vmul.f32 %v3721_v8, %v300_v16  ;;  %v315_v23 = vld [vmem:[%s3716_s29 + $0x90] sm:$0xff]  ;;  %v316_v25 = vld [vmem:[%s3716_s29 + $0x98] sm:$0xff]  ;;  %v359_v26 = vmul.f32 %v3721_v8, %v301_v19  ;;  %v313_v28 = vld [vmem:[%s3716_s29 + $0x80] sm:$0xff] }
  0x16   : > { %2887 = vset.pattern.permute.xlu0 %v3640_v6  ;;  %v419_v21 = vadd.f32 %v3731_v14, %v364_v12  ;;  %v420_v22 = vadd.f32 %v3731_v14, %v365_v13  ;;  %v312_v27 = vld [vmem:[%s3716_s29 + $0x78] sm:$0xff]  ;;  %v309_v29 = vld [vmem:[%s3716_s29 + $0x60] sm:$0xff]  ;;  %v417_v30 = vadd.f32 %v3731_v14, %v362_v18  ;;  %v373_v32 = vmul.f32 %v3721_v8, %v315_v23  ;;  %v310_v33 = vld [vmem:[%s3716_s29 + $0x68] sm:$0xff] }
  0x17   : > { %687 = vperm.xlu0 %2887, %v3608_v0   ;;  %v416_v24 = vadd.f32 %v3731_v14, %v361_v17  ;;  %v413_v31 = vadd.f32 %v3731_v14, %v358_v20  ;;  %v374_v36 = vmul.f32 %v3721_v8, %v316_v25  ;;  %v370_v38 = vmul.f32 %v3721_v8, %v312_v27  ;;  %v324_v41 = vld [vmem:[%s3716_s29 + $0xd8] sm:$0xff]  ;;  %v325_v47 = vld [vmem:[%s3716_s29 + $0xe0] sm:$0xff]  ;;  %v322_v53 = vld [vmem:[%s3716_s29 + $0xc8] sm:$0xff] }
  0x18   : > { %v473_v34 = vmax.f32 %v419_v21, 0.0  ;;  %v474_v35 = vmax.f32 %v420_v22, 0.0  ;;  %v371_v39 = vmul.f32 %v3721_v8, %v313_v28  ;;  %v367_v40 = vmul.f32 %v3721_v8, %v309_v29  ;;  %v321_v48 = vld [vmem:[%s3716_s29 + $0xc0] sm:$0xff]  ;;  %v318_v58 = vld [vmem:[%s3716_s29 + $0xa8] sm:$0xff]  ;;  %v319_v59 = vld [vmem:[%s3716_s29 + $0xb0] sm:$0xff] }
  0x19   : > { %2894 = vrot.lane.b32.xlu1 %v3706_v7, %s3641_s25  ;;  %v470_v37 = vmax.f32 %v416_v24, 0.0  ;;  %v414_v42 = vadd.f32 %v3731_v14, %v359_v26  ;;  %v368_v43 = vmul.f32 %v3721_v8, %v310_v33  ;;  %v471_v44 = vmax.f32 %v417_v30, 0.0  ;;  %v333_v12 = vld [vmem:[%s3716_s29 + $0x120] sm:$0xff]  ;;  %v334_v13 = vld [vmem:[%s3716_s29 + $0x128] sm:$0xff] }
  0x1a   : > { %v467_v45 = vmax.f32 %v413_v31, 0.0  ;;  %v428_v46 = vadd.f32 %v3731_v14, %v373_v32  ;;  %v3762_v49 = vmin.f32 %v473_v34, 6.0  ;;  %v3764_v50 = vmin.f32 %v474_v35, 6.0  ;;  %v330_v31 = vld [vmem:[%s3716_s29 + $0x108] sm:$0xff] }
  0x1b   : > { %v429_v51 = vadd.f32 %v3731_v14, %v374_v36  ;;  %v382_v52 = vmul.f32 %v3721_v8, %v324_v41  ;;  %v3769_v54 = vmin.f32 %v470_v37, 6.0  ;;  %v425_v55 = vadd.f32 %v3731_v14, %v370_v38  ;;  %v331_v36 = vld [vmem:[%s3716_s29 + $0x110] sm:$0xff]  ;;  %v328_v41 = vld [vmem:[%s3716_s29 + $0xf8] sm:$0xff] }
  0x1c   : > { %v426_v56 = vadd.f32 %v3731_v14, %v371_v39  ;;  %v422_v57 = vadd.f32 %v3731_v14, %v367_v40  ;;  %v468_v60 = vmax.f32 %v414_v42, 0.0  ;;  %v423_v61 = vadd.f32 %v3731_v14, %v368_v43  ;;  %v327_v37 = vld [vmem:[%s3716_s29 + $0xf0] sm:$0xff]  ;;  %v342_v42 = vld [vmem:[%s3716_s29 + $0x168] sm:$0xff] }
  0x1d   : > { %v383_v62 = vmul.f32 %v3721_v8, %v325_v47  ;;  %v379_v63 = vmul.f32 %v3721_v8, %v321_v48  ;;  %v3779_v0 = vmin.f32 %v471_v44, 6.0  ;;  %v3781_v1 = vmin.f32 %v467_v45, 6.0  ;;  %v343_v43 = vld [vmem:[%s3716_s29 + $0x170] sm:$0xff] }
  0x1e   : > { %v482_v3 = vmax.f32 %v428_v46, 0.0  ;;  %v380_v5 = vmul.f32 %v3721_v8, %v322_v53  ;;  %v483_v6 = vmax.f32 %v429_v51, 0.0  ;;  %v437_v9 = vadd.f32 %v3731_v14, %v382_v52  ;;  %v339_v48 = vld [vmem:[%s3716_s29 + $0x150] sm:$0xff]  ;;  %v340_v51 = vld [vmem:[%s3716_s29 + $0x158] sm:$0xff] }
  0x1f   : > { %v376_v10 = vmul.f32 %v3721_v8, %v318_v58  ;;  %v377_v11 = vmul.f32 %v3721_v8, %v319_v59  ;;  %v479_v16 = vmax.f32 %v425_v55, 0.0  ;;  %v480_v17 = vmax.f32 %v426_v56, 0.0 }
  0x20   : > { %v476_v18 = vmax.f32 %v422_v57, 0.0  ;;  %v3789_v19 = vmin.f32 %v468_v60, 6.0  ;;  %v477_v20 = vmax.f32 %v423_v61, 0.0  ;;  %v438_v21 = vadd.f32 %v3731_v14, %v383_v62 }
  0x21   : > { %v434_v22 = vadd.f32 %v3731_v14, %v379_v63  ;;  %v3793_v23 = vmin.f32 %v482_v3, 6.0  ;;  %v435_v24 = vadd.f32 %v3731_v14, %v380_v5  ;;  %v391_v25 = vmul.f32 %v3721_v8, %v333_v12  ;;  %v336_v5 = vld [vmem:[%s3716_s29 + $0x138] sm:$0xff]  ;;  %v337_v12 = vld [vmem:[%s3716_s29 + $0x140] sm:$0xff] }
  0x22   : > { %v392_v26 = vmul.f32 %v3721_v8, %v334_v13  ;;  %v3798_v27 = vmin.f32 %v483_v6, 6.0  ;;  %v491_v28 = vmax.f32 %v437_v9, 0.0  ;;  %v431_v29 = vadd.f32 %v3731_v14, %v376_v10  ;;  %v317_v13 = vld [vmem:[%s3716_s29 + $0xa0] sm:$0x3] }
  0x23   : > { %v432_v30 = vadd.f32 %v3731_v14, %v377_v11  ;;  %v3803_v32 = vshrl.u32 %v744_v15, 7  ;;  %v3805_v33 = vmin.f32 %v479_v16, 6.0  ;;  %v3807_v34 = vmin.f32 %v480_v17, 6.0 }
  0x24   : > { %v3809_v35 = vmin.f32 %v476_v18, 6.0  ;;  %v3813_v38 = vmin.f32 %v477_v20, 6.0  ;;  %v492_v39 = vmax.f32 %v438_v21, 0.0  ;;  %v488_v40 = vmax.f32 %v434_v22, 0.0  ;;  %v345_v20 = vld [vmem:[%s3716_s29 + $0x180] sm:$0xff]  ;;  %v346_v21 = vld [vmem:[%s3716_s29 + $0x188] sm:$0xff] }
  0x25   : > { %v489_v44 = vmax.f32 %v435_v24, 0.0  ;;  %v446_v45 = vadd.f32 %v3731_v14, %v391_v25  ;;  %v447_v46 = vadd.f32 %v3731_v14, %v392_v26  ;;  %v388_v47 = vmul.f32 %v3721_v8, %v330_v31 }
  0x26   : > { %v485_v52 = vmax.f32 %v431_v29, 0.0  ;;  %v486_v53 = vmax.f32 %v432_v30, 0.0  ;;  %v389_v55 = vmul.f32 %v3721_v8, %v331_v36  ;;  %v385_v56 = vmul.f32 %v3721_v8, %v327_v37  ;;  %v326_v37 = vld [vmem:[%s3716_s29 + $0xe8] sm:$0x3] }
  0x27   : > { %v3825_v57 = vmin.f32 %v491_v28, 6.0  ;;  %v386_v58 = vmul.f32 %v3721_v8, %v328_v41  ;;  %v400_v59 = vmul.f32 %v3721_v8, %v342_v42  ;;  %v401_v60 = vmul.f32 %v3721_v8, %v343_v43  ;;  %v302_v28 = vld [vmem:[%s3716_s29 + $0x28] sm:$0x3] }
  0x28   : > { %v3830_v61 = vmin.f32 %v492_v39, 6.0  ;;  %v3832_v62 = vmin.f32 %v488_v40, 6.0  ;;  %v397_v63 = vmul.f32 %v3721_v8, %v339_v48  ;;  %v398_v3 = vmul.f32 %v3721_v8, %v340_v51 }
  0x29   : > { %v3837_v6 = vmin.f32 %v489_v44, 6.0  ;;  %v500_v9 = vmax.f32 %v446_v45, 0.0  ;;  %v501_v10 = vmax.f32 %v447_v46, 0.0  ;;  %v443_v11 = vadd.f32 %v3731_v14, %v388_v47 }
  0x2a   : > { %v3842_v15 = vmin.f32 %v485_v52, 6.0  ;;  %v3844_v16 = vmin.f32 %v486_v53, 6.0  ;;  %v444_v17 = vadd.f32 %v3731_v14, %v389_v55  ;;  %v440_v18 = vadd.f32 %v3731_v14, %v385_v56 }
  0x2b   : > { %v441_v22 = vadd.f32 %v3731_v14, %v386_v58  ;;  %v455_v24 = vadd.f32 %v3731_v14, %v400_v59  ;;  %v456_v25 = vadd.f32 %v3731_v14, %v401_v60  ;;  %v394_v26 = vmul.f32 %v3721_v8, %v336_v5 }
  0x2c   : > { %v452_v29 = vadd.f32 %v3731_v14, %v397_v63  ;;  %v453_v30 = vadd.f32 %v3731_v14, %v398_v3  ;;  %v395_v31 = vmul.f32 %v3721_v8, %v337_v12  ;;  %v375_v36 = vmul.f32 %v3721_v8, %v317_v13  ;;  %v305_v13 = vld [vmem:[%s3716_s29 + $0x40] sm:$0x3] }
  0x2d   : > { %v3860_v39 = vmin.f32 %v500_v9, 6.0  ;;  %v403_v40 = vmul.f32 %v3721_v8, %v345_v20  ;;  %v404_v41 = vmul.f32 %v3721_v8, %v346_v21  ;;  %v360_v42 = vmul.f32 %v3721_v8, %v302_v28 }
  0x2e   : > { %v497_v43 = vmax.f32 %v443_v11, 0.0  ;;  %v498_v44 = vmax.f32 %v444_v17, 0.0  ;;  %v494_v45 = vmax.f32 %v440_v18, 0.0  ;;  %v384_v46 = vmul.f32 %v3721_v8, %v326_v37 }
  0x2f   : > { %v495_v47 = vmax.f32 %v441_v22, 0.0  ;;  %v509_v48 = vmax.f32 %v455_v24, 0.0  ;;  %v510_v51 = vmax.f32 %v456_v25, 0.0  ;;  %v449_v52 = vadd.f32 %v3731_v14, %v394_v26 }
  0x30   : > { %v506_v53 = vmax.f32 %v452_v29, 0.0  ;;  %v507_v55 = vmax.f32 %v453_v30, 0.0  ;;  %v450_v56 = vadd.f32 %v3731_v14, %v395_v31  ;;  %v430_v58 = vadd.f32 %v3731_v14, %v375_v36 }
  0x31   : > { %v3869_v59 = vmin.f32 %v501_v10, 6.0  ;;  %v458_v60 = vadd.f32 %v3731_v14, %v403_v40  ;;  %v459_v63 = vadd.f32 %v3731_v14, %v404_v41  ;;  %v415_v3 = vadd.f32 %v3731_v14, %v360_v42 }
  0x32   : > { %v3874_v5 = vmin.f32 %v497_v43, 6.0  ;;  %v3876_v9 = vmin.f32 %v498_v44, 6.0  ;;  %v3878_v11 = vmin.f32 %v494_v45, 6.0  ;;  %v439_v12 = vadd.f32 %v3731_v14, %v384_v46 }
  0x33   : > { %v3882_v17 = vmin.f32 %v495_v47, 6.0  ;;  %v3884_v18 = vmin.f32 %v509_v48, 6.0  ;;  %v3886_v10 = vmin.f32 %v510_v51, 6.0  ;;  %v503_v20 = vmax.f32 %v449_v52, 0.0 }
  0x34   : > { %v3890_v22 = vmin.f32 %v506_v53, 6.0  ;;  %v3892_v24 = vmin.f32 %v507_v55, 6.0  ;;  %v504_v25 = vmax.f32 %v450_v56, 0.0  ;;  %v484_v26 = vmax.f32 %v430_v58, 0.0 }
  0x35   : > { %vm748_vm0 = vcmp.ge.s32.totalorder %v3803_v32, 1  ;;  %v512_v28 = vmax.f32 %v458_v60, 0.0  ;;  %v513_v29 = vmax.f32 %v459_v63, 0.0  ;;  %v469_v30 = vmax.f32 %v415_v3, 0.0 }
  0x36   : > { %v363_v31 = vmul.f32 %v3721_v8, %v305_v13  ;;  %v493_v41 = vmax.f32 %v439_v12, 0.0  ;;  %v3908_v45 = vmin.f32 %v503_v20, 6.0  ;;  %v3914_v48 = vmin.f32 %v504_v25, 6.0 }
  0x37   : > { %v3916_v51 = vmin.f32 %v484_v26, 6.0  ;;  %v3918_v52 = vmin.f32 %v512_v28, 6.0  ;;  %v3920_v53 = vmin.f32 %v513_v29, 6.0  ;;  %v3922_v55 = vmin.f32 %v469_v30, 6.0 }
  0x38   : > { %v3925_v56 = vadd.f32 %v3731_v14, %v363_v31  ;;  %v3930_v3 = vmin.f32 %v493_v41, 6.0 }
  0x80   : > { %v3888_v21 = vpop.permute.xlu0 %575 }
  0x81   : > { %v587_v36 = vmul.f32 %v3888_v21, %v3762_v49  ;;  %v588_v37 = vmul.f32 %v3888_v21, %v3764_v50  ;;  %v584_v40 = vmul.f32 %v3888_v21, %v3769_v54  ;;  %v585_v42 = vmul.f32 %v3888_v21, %v3779_v0 }
  0x82   : > { %v581_v43 = vmul.f32 %v3888_v21, %v3781_v1  ;;  %v582_v44 = vmul.f32 %v3888_v21, %v3789_v19  ;;  %v596_v46 = vmul.f32 %v3888_v21, %v3793_v23  ;;  %v597_v47 = vmul.f32 %v3888_v21, %v3798_v27 }
  0x83   : > { %v641_v58 = vmul.f32 %v587_v36, %v3762_v49  ;;  %v642_v60 = vmul.f32 %v588_v37, %v3764_v50  ;;  %v638_v63 = vmul.f32 %v584_v40, %v3769_v54  ;;  %v639_v12 = vmul.f32 %v585_v42, %v3779_v0 }
  0x84   : > { %v635_v13 = vmul.f32 %v581_v43, %v3781_v1  ;;  %v636_v20 = vmul.f32 %v582_v44, %v3789_v19  ;;  %v593_v25 = vmul.f32 %v3888_v21, %v3805_v33  ;;  %v650_v26 = vmul.f32 %v596_v46, %v3793_v23 }
  0x85   : > { %v651_v28 = vmul.f32 %v597_v47, %v3798_v27  ;;  %v594_v49 = vmul.f32 %v3888_v21, %v3807_v34  ;;  %v590_v50 = vmul.f32 %v3888_v21, %v3809_v35  ;;  %v591_v0 = vmul.f32 %v3888_v21, %v3813_v38 }
  0x86   : > { %v605_v1 = vmul.f32 %v3888_v21, %v3825_v57  ;;  %v606_v19 = vmul.f32 %v3888_v21, %v3830_v61  ;;  %v602_v23 = vmul.f32 %v3888_v21, %v3832_v62  ;;  %v647_v41 = vmul.f32 %v593_v25, %v3805_v33 }
  0x87   : > { %v644_v44 = vmul.f32 %v590_v50, %v3809_v35  ;;  %v603_v46 = vmul.f32 %v3888_v21, %v3837_v6  ;;  %v618_v4 = vmul.f32 %v3888_v21, %v3914_v48 }
  0x88   : > { %v659_v50 = vmul.f32 %v605_v1, %v3825_v57  ;;  %v611_v1 = vmul.f32 %v3888_v21, %v3874_v5 }
  0x89   : > { %v3943_v54 = vpop.permute.xlu0 %687 }
  0x8a   : > { %v699_v27 = vadd.f32 %v3943_v54, %v641_v58  ;;  %v3955_v29 = vadd.f32 %v3943_v54, %v642_v60  ;;  %v696_v30 = vadd.f32 %v3943_v54, %v638_v63  ;;  %v3959_v31 = vadd.f32 %v3943_v54, %v639_v12 }
  0x8b   : > { %v693_v36 = vadd.f32 %v3943_v54, %v635_v13  ;;  %v3963_v37 = vadd.f32 %v3943_v54, %v636_v20  ;;  %v708_v40 = vadd.f32 %v3943_v54, %v650_v26  ;;  %v705_v60 = vadd.f32 %v3943_v54, %v647_v41 }
  0x8c   : > { %5978 = vst [vmem:[#allocation4_spill] sm:$0xff] %v3955_v29  ;;  %v3969_v42 = vsel %vm748_vm0, %v699_v27, 0.0  ;;  %v3973_v43 = vsel %vm748_vm0, %v696_v30, 0.0  ;;  %v3994_v63 = vadd.f32 %v3943_v54, %v651_v28  ;;  %v648_v12 = vmul.f32 %v594_v49, %v3807_v34 }
  0x8d   : > { %5979 = vst [vmem:[#allocation5_spill] sm:$0xff] %v3959_v31  ;;  %v3980_v47 = vpack.i.bf16 %v3955_v29, %v3969_v42  ;;  %v3984_v33 = vpack.i.bf16 %v3959_v31, %v3973_v43  ;;  %v3988_v58 = vsel %vm748_vm0, %v693_v36, 0.0  ;;  %v599_v13 = vmul.f32 %v3888_v21, %v3842_v15 }
  0x8e   : > { %5980 = vst [vmem:[#allocation6_spill] sm:$0xff] %v3969_v42  ;;  %v2898_v35 = vpack.i.bf16 %v3963_v37, %v3988_v58  ;;  %v4005_v20 = vsel %vm748_vm0, %v708_v40, 0.0  ;;  %v702_v25 = vadd.f32 %v3943_v54, %v644_v44  ;;  %v614_v26 = vmul.f32 %v3888_v21, %v3860_v39 }
  0x8f   : > { %5981 = vst [vmem:[#allocation7_spill] sm:$0xff] %v3973_v43  ;;  %2909 = vrot.lane.b32.xlu1 %v3980_v47, %s3642_s9  ;;  %2904 = vrot.lane.b32.xlu0 %v3984_v33, %s3642_s9  ;;  %v4013_v28 = vadd.f32 %v3943_v54, %v648_v12  ;;  %v645_v49 = vmul.f32 %v591_v0, %v3813_v38  ;;  %v4020_v30 = vsel %vm748_vm0, %v705_v60, 0.0  ;;  %v4058_v12 = vadd.s32 16, %v3803_v32 }
  0x90   : > { %5982 = vst [vmem:[#allocation8_spill] sm:$0xff] %v3980_v47  ;;  %2899 = vrot.lane.b32.xlu2 %v2898_v35, %s3642_s9  ;;  %v660_v27 = vmul.f32 %v606_v19, %v3830_v61  ;;  %v656_v36 = vmul.f32 %v602_v23, %v3832_v62  ;;  %v657_v40 = vmul.f32 %v603_v46, %v3837_v6  ;;  %v4038_v62 = vsel %vm748_vm0, %v702_v25, 0.0  ;;  %v320_v47 = vld [vmem:[%s3716_s29 + $0xb8] sm:$0x3] }
  0x91   : > { %5983 = vst [vmem:[#allocation9_spill] sm:$0xff] %v3984_v33  ;;  %v600_v41 = vmul.f32 %v3888_v21, %v3844_v16  ;;  %v4028_v44 = vpack.i.bf16 %v3994_v63, %v4005_v20  ;;  %v4031_v38 = vadd.f32 %v3943_v54, %v645_v49  ;;  %v653_v57 = vmul.f32 %v599_v13, %v3842_v15 }
  0x92   : > { %5984 = vst [vmem:[#allocation10_spill] sm:$0xff] %v3994_v63  ;;  %v615_v61 = vmul.f32 %v3888_v21, %v3869_v59  ;;  %v717_v6 = vadd.f32 %v3943_v54, %v659_v50  ;;  %v668_v0 = vmul.f32 %v614_v26, %v3860_v39  ;;  %v4046_v19 = vpack.i.bf16 %v4013_v28, %v4020_v30 }
  0x93   : > { %5985 = vst [vmem:[#allocation11_spill] sm:$0xff] %v4005_v20  ;;  %v714_v15 = vadd.f32 %v3943_v54, %v656_v36  ;;  %v711_v23 = vadd.f32 %v3943_v54, %v653_v57  ;;  %v608_v46 = vmul.f32 %v3888_v21, %v3878_v11  ;;  %v4053_v60 = vadd.f32 %v3943_v54, %v660_v27 }
  0x94   : > { %5986 = vst [vmem:[#allocation12_spill] sm:$0xff] %v4013_v28  ;;  %v654_v35 = vmul.f32 %v600_v41, %v3844_v16  ;;  %v726_v39 = vadd.f32 %v3943_v54, %v668_v0  ;;  %v4062_v13 = vpack.i.bf16 %v4031_v38, %v4038_v62  ;;  %v4065_v25 = vadd.f32 %v3943_v54, %v657_v40 }
  0x95   : > { %5987 = vst [vmem:[#allocation13_spill] sm:$0xff] %v4020_v30  ;;  %v669_v26 = vmul.f32 %v615_v61, %v3869_v59  ;;  %v612_v49 = vmul.f32 %v3888_v21, %v3876_v9  ;;  %v4076_v16 = vsel %vm748_vm0, %v717_v6, 0.0  ;;  %v665_v27 = vmul.f32 %v611_v1, %v3874_v5 }
  0x96   : > { %5988 = vst [vmem:[#allocation14_spill] sm:$0xff] %v4028_v44  ;;  %v4079_v50 = vadd.f32 %v3943_v54, %v654_v35  ;;  %v609_v59 = vmul.f32 %v3888_v21, %v3882_v17  ;;  %v4088_v36 = vsel %vm748_vm0, %v714_v15, 0.0  ;;  %v4092_v40 = vsel %vm748_vm0, %v711_v23, 0.0 }
  0x97   : > { %5989 = vst [vmem:[#allocation15_spill] sm:$0xff] %v4031_v38  ;;  %2924 = vrot.lane.b32.xlu1 %v4028_v44, %s3642_s9  ;;  %2919 = vrot.lane.b32.xlu0 %v4046_v19, %s3642_s9  ;;  %v4095_v41 = vadd.f32 %v3943_v54, %v669_v26  ;;  %v662_v57 = vmul.f32 %v608_v46, %v3878_v11  ;;  %v4100_v5 = vsel %vm748_vm0, %v726_v39, 0.0  ;;  %vm753_vm1 = vcmp.le.s32.totalorder %v4058_v12, 16 }
  0x98   : > { %5990 = vst [vmem:[#allocation16_spill] sm:$0xff] %v4046_v19  ;;  %2914 = vrot.lane.b32.xlu2 %v4062_v13, %s3642_s9  ;;  %v723_v61 = vadd.f32 %v3943_v54, %v665_v27  ;;  %v623_v6 = vmul.f32 %v3888_v21, %v3884_v18  ;;  %v620_v0 = vmul.f32 %v3888_v21, %v3890_v22 }
  0x99   : > { %5991 = vst [vmem:[#allocation17_spill] sm:$0xff] %v4053_v60  ;;  %v4109_v1 = vpack.i.bf16 %v4053_v60, %v4076_v16  ;;  %v666_v15 = vmul.f32 %v612_v49, %v3876_v9  ;;  %v720_v11 = vadd.f32 %v3943_v54, %v662_v57  ;;  %v624_v23 = vmul.f32 %v3888_v21, %v3886_v10 }
  0x9a   : > { %5992 = vst [vmem:[#allocation18_spill] sm:$0xff] %v4062_v13  ;;  %v4117_v46 = vpack.i.bf16 %v4065_v25, %v4088_v36  ;;  %v4121_v35 = vpack.i.bf16 %v4079_v50, %v4092_v40  ;;  %v663_v39 = vmul.f32 %v609_v59, %v3882_v17  ;;  %v617_v26 = vmul.f32 %v3888_v21, %v3908_v45 }
  0x9b   : > { %5993 = vst [vmem:[#allocation19_spill] sm:$0xff] %v4065_v25  ;;  %v4128_v9 = vpack.i.bf16 %v4095_v41, %v4100_v5  ;;  %v4131_v49 = vadd.f32 %v3943_v54, %v666_v15  ;;  %v621_v27 = vmul.f32 %v3888_v21, %v3892_v24  ;;  %v598_v57 = vmul.f32 %v3888_v21, %v3916_v51 }
  0x9c   : > { %5994 = vst [vmem:[#allocation20_spill] sm:$0xff] %v4076_v16  ;;  %v4139_v2 = vsel %vm748_vm0, %v723_v61, 0.0  ;;  %v4142_v17 = vadd.f32 %v3943_v54, %v663_v39  ;;  %v677_v59 = vmul.f32 %v623_v6, %v3884_v18  ;;  %v674_v34 = vmul.f32 %v620_v0, %v3890_v22 }
  0x9d   : > { %5995 = vst [vmem:[#allocation21_spill] sm:$0xff] %v4088_v36  ;;  %v4148_v15 = vsel %vm748_vm0, %v720_v11, 0.0  ;;  %v678_v7 = vmul.f32 %v624_v23, %v3886_v10  ;;  %v652_v19 = vmul.f32 %v598_v57, %v3916_v51  ;;  %v671_v61 = vmul.f32 %v617_v26, %v3908_v45 }
  0x9e   : > { %5996 = vst [vmem:[#allocation22_spill] sm:$0xff] %v4100_v5  ;;  %v735_v18 = vadd.f32 %v3943_v54, %v677_v59  ;;  %v732_v22 = vadd.f32 %v3943_v54, %v674_v34  ;;  %v4166_v10 = vpack.i.bf16 %v4131_v49, %v4139_v2  ;;  %v675_v51 = vmul.f32 %v621_v27, %v3892_v24 }
  0x9f   : > { %5997 = vst [vmem:[#allocation23_spill] sm:$0xff] %v4109_v1  ;;  %2939 = vrot.lane.b32.xlu1 %v4109_v1, %s3642_s9  ;;  %2934 = vrot.lane.b32.xlu0 %v4117_v46, %s3642_s9  ;;  %v710_v6 = vadd.f32 %v3943_v54, %v652_v19  ;;  %v626_v0 = vmul.f32 %v3888_v21, %v3918_v52  ;;  %v928_v57 = vrot.slane %v4005_v20, 1  ;;  %v929_v59 = vrot.slane %v3994_v63, 1 }
  0xa0   : > { %5998 = vst [vmem:[#allocation24_spill] sm:$0xff] %v4117_v46  ;;  %2929 = vrot.lane.b32.xlu2 %v4121_v35, %s3642_s9  ;;  %v4174_v34 = vpack.i.bf16 %v4142_v17, %v4148_v15  ;;  %v4177_v45 = vadd.f32 %v3943_v54, %v678_v7  ;;  %v729_v11 = vadd.f32 %v3943_v54, %v671_v61  ;;  %v4194_v7 = vsel %vm748_vm0, %v735_v18, 0.0 }
  0xa1   : > { %5999 = vst [vmem:[#allocation25_spill] sm:$0xff] %v4121_v35  ;;  %v583_v23 = vmul.f32 %v3888_v21, %v3922_v55  ;;  %v4183_v39 = vadd.f32 %v3943_v54, %v675_v51  ;;  %v672_v24 = vmul.f32 %v618_v4, %v3914_v48  ;;  %v4188_v19 = vsel %vm753_vm1, %v710_v6, 0.0 }
  0xa2   : > { %6000 = vst [vmem:[#allocation26_spill] sm:$0xff] %v4128_v9  ;;  %v627_v26 = vmul.f32 %v3888_v21, %v3920_v53  ;;  %v4198_v27 = vsel %vm748_vm0, %v732_v22, 0.0  ;;  %v680_v61 = vmul.f32 %v626_v0, %v3918_v52  ;;  %v607_v18 = vmul.f32 %v3888_v21, %v3930_v3 }
  0xa3   : > { %6001 = vst [vmem:[#allocation27_spill] sm:$0xff] %v4131_v49  ;;  %v637_v4 = vmul.f32 %v583_v23, %v3922_v55  ;;  %v4203_v48 = vadd.f32 %v3943_v54, %v672_v24  ;;  %v4211_v51 = vsel %vm748_vm0, %v729_v11, 0.0  ;;  %v931_v22 = vrot.slane %v4188_v19, 1  ;;  %v311_v55 = vld [vmem:[%s3716_s29 + $0x70] sm:$0x3] }
  0xa4   : > { %6002 = vst [vmem:[#allocation28_spill] sm:$0xff] %v4139_v2  ;;  %v4218_v23 = vpack.i.bf16 %v4177_v45, %v4194_v7  ;;  %v4222_v52 = vpack.i.bf16 %v4183_v39, %v4198_v27  ;;  %v681_v0 = vmul.f32 %v627_v26, %v3920_v53  ;;  %v738_v24 = vadd.f32 %v3943_v54, %v680_v61  ;;  %v335_v11 = vld [vmem:[%s3716_s29 + $0x130] sm:$0x3] }
  0xa5   : > { %6003 = vst [vmem:[#allocation29_spill] sm:$0xff] %v4166_v10  ;;  %v695_v6 = vadd.f32 %v3943_v54, %v637_v4  ;;  %v903_v46 = vrot.slane %v3988_v58, 1  ;;  %v904_v35 = vrot.slane %v3963_v37, 1  ;;  %v6011_v53 = vmax.f32 %v3925_v56, 0.0 }
  0xa6   : > { %6004 = vst [vmem:[#allocation30_spill] sm:$0xff] %v4174_v34  ;;  %v4243_v61 = vpack.i.bf16 %v4203_v48, %v4211_v51  ;;  %v932_v33 = vsel %vm897_vm2, %v929_v59, %v931_v22  ;;  %v4250_v1 = vadd.f32 %v3943_v54, %v681_v0  ;;  %v4257_v13 = vsel %vm748_vm0, %v738_v24, 0.0 }
  0xa7   : > { %6005 = vst [vmem:[#allocation31_spill] sm:$0xff] %v4177_v45  ;;  %2954 = vrot.lane.b32.xlu1 %v4128_v9, %s3642_s9  ;;  %2949 = vrot.lane.b32.xlu0 %v4166_v10, %s3642_s9  ;;  %v4233_v4 = vsel %vm753_vm1, %v695_v6, 0.0  ;;  %v526_v26 = vmin.f32 %v6011_v53, 6.0  ;;  %v930_v10 = vsel %vm897_vm2, %v928_v57, %v929_v59  ;;  %v661_v9 = vmul.f32 %v607_v18, %v3930_v3 }
  0xa8   : > { %6006 = vst [vmem:[#allocation32_spill] sm:$0xff] %v4194_v7  ;;  %2944 = vrot.lane.b32.xlu2 %v4174_v34, %s3642_s9  ;;  %v369_v6 = vmul.f32 %v3721_v8, %v311_v55  ;;  %v393_v53 = vmul.f32 %v3721_v8, %v335_v11  ;;  %v308_v34 = vld [vmem:[%s3716_s29 + $0x58] sm:$0x3]  ;;  %v906_v57 = vrot.slane %v4233_v4, 1  ;;  %v905_v59 = vsel %vm897_vm2, %v903_v46, %v904_v35 }
  0xa9   : > { %6007 = vst [vmem:[#allocation33_spill] sm:$0xff] %v4198_v27  ;;  %v586_v56 = vmul.f32 %v3888_v21, %v526_v26  ;;  %v719_v3 = vadd.f32 %v3943_v54, %v661_v9  ;;  %v943_v22 = vrot.slane %v4076_v16, 1  ;;  %v944_v55 = vrot.slane %v4053_v60, 1 }
  0xaa   : > { %6008 = vst [vmem:[#allocation34_spill] sm:$0xff] %v4218_v23  ;;  %v424_v18 = vadd.f32 %v3731_v14, %v369_v6  ;;  %v908_v0 = vrot.slane %v3973_v43, 1  ;;  %v448_v24 = vadd.f32 %v3731_v14, %v393_v53  ;;  %v366_v44 = vmul.f32 %v3721_v8, %v308_v34 }
  0xab   : > { %6009 = vst [vmem:[#allocation35_spill] sm:$0xff] %v4222_v52  ;;  %v4270_v9 = vpack.i.bf16 %v932_v33, %v930_v10  ;;  %v4274_v46 = vpack.i.bf16 %v4250_v1, %v4257_v13  ;;  %v640_v6 = vmul.f32 %v586_v56, %v526_v26  ;;  %v918_v16 = vrot.slane %v4038_v62, 1 }
  0xac   : > { %6010 = vst [vmem:[#allocation36_spill] sm:$0xff] %v4233_v4  ;;  %v478_v32 = vmax.f32 %v424_v18, 0.0  ;;  %v907_v60 = vsel %vm897_vm2, %v904_v35, %v906_v57  ;;  %v4280_v11 = vsel %vm753_vm1, %v719_v3, 0.0  ;;  %v502_v53 = vmax.f32 %v448_v24, 0.0  ;;  %v344_v4 = vld [vmem:[%s3716_s29 + $0x178] sm:$0x3] }
  0xad   : > { %6012 = vst [vmem:[#allocation37_spill] sm:$0xff] %v4243_v61  ;;  %v698_v33 = vadd.f32 %v3943_v54, %v640_v6  ;;  %v919_v10 = vrot.slane %v4031_v38, 1  ;;  %v421_v35 = vadd.f32 %v3731_v14, %v366_v44  ;;  %v378_v34 = vmul.f32 %v3721_v8, %v320_v47 }
  0xae   : > { %6013 = vst [vmem:[#allocation38_spill] sm:$0xff] %v4250_v1  ;;  %v532_v18 = vmin.f32 %v478_v32, 6.0  ;;  %v945_v26 = vsel %vm897_vm2, %v943_v22, %v944_v55  ;;  %v6017_v56 = vrot.slane %v3959_v31, 1  ;;  %v556_v32 = vmin.f32 %v502_v53, 6.0  ;;  %v314_v1 = vld [vmem:[%s3716_s29 + $0x88] sm:$0x3] }
  0xaf   : > { %6014 = vst [vmem:[#allocation39_spill] sm:$0xff] %v4257_v13  ;;  %2969 = vrot.lane.b32.xlu1 %v4218_v23, %s3642_s9  ;;  %2964 = vrot.lane.b32.xlu0 %v4222_v52, %s3642_s9  ;;  %v946_v24 = vrot.slane %v4280_v11, 1  ;;  %v475_v6 = vmax.f32 %v421_v35, 0.0  ;;  %v433_v52 = vadd.f32 %v3731_v14, %v378_v34  ;;  %v402_v44 = vmul.f32 %v3721_v8, %v344_v4 }
  0xb0   : > { %6015 = vst [vmem:[#allocation40_spill] sm:$0xff] %v4270_v9  ;;  %2959 = vrot.lane.b32.xlu2 %v4243_v61, %s3642_s9  ;;  %v910_v57 = vsel %vm897_vm2, %v908_v0, %v6017_v56  ;;  %v592_v3 = vmul.f32 %v3888_v21, %v532_v18  ;;  %v4301_v47 = vpack.i.bf16 %v907_v60, %v905_v59  ;;  %v958_v61 = vrot.slane %v4100_v5, 1 }
  0xb1   : > { %6016 = vst [vmem:[#allocation41_spill] sm:$0xff] %v4274_v46  ;;  %v616_v22 = vmul.f32 %v3888_v21, %v556_v32  ;;  %v4308_v0 = vsel %vm753_vm1, %v698_v33, 0.0  ;;  %v920_v53 = vsel %vm897_vm2, %v918_v16, %v919_v10  ;;  %v529_v35 = vmin.f32 %v475_v6, 6.0  ;;  %v329_v33 = vld [vmem:[%s3716_s29 + $0x100] sm:$0x3] }
  0xb2   : > { %6018 = vst [vmem:[#allocation42_spill] sm:$0xff] %v4301_v47  ;;  %v646_v23 = vmul.f32 %v592_v3, %v532_v18  ;;  %v487_v56 = vmax.f32 %v433_v52, 0.0  ;;  %v959_v60 = vrot.slane %v4095_v41, 1  ;;  %v457_v59 = vadd.f32 %v3731_v14, %v402_v44 }
  0xb3   : > { %v670_v4 = vmul.f32 %v616_v22, %v556_v32  ;;  %v947_v18 = vsel %vm897_vm2, %v944_v55, %v946_v24  ;;  %v589_v3 = vmul.f32 %v3888_v21, %v529_v35  ;;  %v372_v5 = vmul.f32 %v3721_v8, %v314_v1 }
  0xb4   : > { %v704_v34 = vadd.f32 %v3943_v54, %v646_v23  ;;  %v541_v13 = vmin.f32 %v487_v56, 6.0  ;;  %v911_v38 = vrot.slane %v4308_v0, 1  ;;  %v511_v52 = vmax.f32 %v457_v59, 0.0 }
  0xb5   : > { %v728_v23 = vadd.f32 %v3943_v54, %v670_v4  ;;  %v643_v32 = vmul.f32 %v589_v3, %v529_v35  ;;  %v427_v24 = vadd.f32 %v3731_v14, %v372_v5  ;;  %v913_v6 = vrot.slane %v3969_v42, 1 }
  0xb6   : > { %v4321_v16 = vsel %vm753_vm1, %v704_v34, 0.0  ;;  %v601_v1 = vmul.f32 %v3888_v21, %v541_v13  ;;  %v914_v44 = vrot.slane %v3955_v29, 1  ;;  %v565_v22 = vmin.f32 %v511_v52, 6.0 }
  0xb7   : > { %3004 = vrot.lane.b32.xlu0 %v4270_v9, %s3639_s24  ;;  %2979 = vrot.lane.b32.xlu1 %v4301_v47, %s3639_s24  ;;  %v921_v55 = vrot.slane %v4321_v16, 1  ;;  %v387_v56 = vmul.f32 %v3721_v8, %v329_v33  ;;  %v4336_v34 = vpack.i.bf16 %v947_v18, %v945_v26  ;;  %v4340_v4 = vsel %vm753_vm1, %v728_v23, 0.0 }
  0xb8   : > { %2974 = vrot.lane.b32.xlu2 %v4274_v46, %s3642_s9  ;;  %v701_v35 = vadd.f32 %v3943_v54, %v643_v32  ;;  %v655_v59 = vmul.f32 %v601_v1, %v541_v13  ;;  %v933_v3 = vrot.slane %v4092_v40, 1  ;;  %v625_v46 = vmul.f32 %v3888_v21, %v565_v22 }
  0xb9   : > { %6019 = vst [vmem:[#allocation43_spill] sm:$0xff] %v4336_v34  ;;  %v922_v5 = vsel %vm897_vm2, %v919_v10, %v921_v55  ;;  %v481_v9 = vmax.f32 %v427_v24, 0.0  ;;  %v6020_v52 = vrot.slane %v3959_v31, 1  ;;  %v442_v23 = vadd.f32 %v3731_v14, %v387_v56 }
  0xba   : > { %v4351_v26 = vsel %vm753_vm1, %v701_v35, 0.0  ;;  %v713_v18 = vadd.f32 %v3943_v54, %v655_v59  ;;  %v961_v13 = vrot.slane %v4340_v4, 1  ;;  %v934_v10 = vrot.slane %v4079_v50, 1 }
  0xbb   : > { %v912_v33 = vsel %vm897_vm2, %v6020_v52, %v911_v38  ;;  %v679_v55 = vmul.f32 %v625_v46, %v565_v22  ;;  %v535_v32 = vmin.f32 %v481_v9, 6.0  ;;  %v4357_v1 = vpack.i.bf16 %v922_v5, %v920_v53  ;;  %v323_v22 = vld [vmem:[%s3716_s29 + $0xd0] sm:$0x3] }
  0xbc   : > { %v916_v24 = vrot.slane %v4351_v26, 1  ;;  %v4362_v38 = vsel %vm753_vm1, %v713_v18, 0.0  ;;  %v496_v35 = vmax.f32 %v442_v23, 0.0  ;;  %v4364_v52 = vpack.i.bf16 %v912_v33, %v910_v57 }
  0xbd   : > { %6021 = vst [vmem:[#allocation44_spill] sm:$0xff] %v4357_v1  ;;  %v936_v56 = vrot.slane %v4362_v38, 1  ;;  %v737_v59 = vadd.f32 %v3943_v54, %v679_v55  ;;  %v595_v47 = vmul.f32 %v3888_v21, %v535_v32  ;;  %v960_v9 = vsel %vm897_vm2, %v958_v61, %v959_v60 }
  0xbe   : > { %6022 = vst [vmem:[#allocation45_spill] sm:$0xff] %v4364_v52  ;;  %v915_v46 = vsel %vm897_vm2, %v913_v6, %v914_v44  ;;  %v973_v53 = vrot.slane %v4194_v7, 1  ;;  %v550_v57 = vmin.f32 %v496_v35, 6.0  ;;  %v962_v5 = vsel %vm897_vm2, %v959_v60, %v961_v13 }
  0xbf   : > { %3019 = vrot.lane.b32.xlu0 %v4336_v34, %s3639_s24  ;;  %2994 = vrot.lane.b32.xlu1 %v4357_v1, %s3639_s24  ;;  %v935_v33 = vsel %vm897_vm2, %v933_v3, %v934_v10  ;;  %v974_v18 = vrot.slane %v4177_v45, 1  ;;  %v649_v23 = vmul.f32 %v595_v47, %v535_v32  ;;  %v917_v55 = vsel %vm897_vm2, %v914_v44, %v916_v24  ;;  %v338_v24 = vld [vmem:[%s3716_s29 + $0x148] sm:$0x3] }
  0xc0   : > { %2984 = vrot.lane.b32.xlu2 %v4364_v52, %s3639_s24  ;;  %v923_v61 = vrot.slane %v4020_v30, 1  ;;  %v924_v6 = vrot.slane %v4013_v28, 1  ;;  %v610_v35 = vmul.f32 %v3888_v21, %v550_v57  ;;  %v937_v34 = vsel %vm897_vm2, %v934_v10, %v936_v56 }
  0xc1   : > { %v4389_v52 = vsel %vm753_vm1, %v737_v59, 0.0  ;;  %v707_v60 = vadd.f32 %v3943_v54, %v649_v23  ;;  %v381_v3 = vmul.f32 %v3721_v8, %v323_v22  ;;  %v4393_v13 = vpack.i.bf16 %v962_v5, %v960_v9 }
  0xc2   : > { %v664_v47 = vmul.f32 %v610_v35, %v550_v57  ;;  %v948_v44 = vrot.slane %v4148_v15, 1  ;;  %v949_v32 = vrot.slane %v4142_v17, 1  ;;  %v4398_v1 = vpack.i.bf16 %v917_v55, %v915_v46  ;;  %v332_v35 = vld [vmem:[%s3716_s29 + $0x118] sm:$0x3] }
  0xc3   : > { %6023 = vst [vmem:[#allocation46_spill] sm:$0xff] %v4393_v13  ;;  %v812_v10 = vsel %vm753_vm1, %v707_v60, 0.0  ;;  %v989_v56 = vrot.slane %v3973_v43, 2  ;;  %v436_v59 = vadd.f32 %v3731_v14, %v381_v3  ;;  %v4404_v23 = vpack.i.bf16 %v937_v34, %v935_v33 }
  0xc4   : > { %6024 = vst [vmem:[#allocation47_spill] sm:$0xff] %v4398_v1  ;;  %v976_v9 = vrot.slane %v4389_v52, 1  ;;  %v722_v57 = vadd.f32 %v3943_v54, %v664_v47  ;;  %v990_v22 = vrot.slane %v3959_v31, 2  ;;  %v992_v5 = vrot.slane %v4308_v0, 2 }
  0xc5   : > { %6025 = vst [vmem:[#allocation48_spill] sm:$0xff] %v4404_v23  ;;  %v490_v46 = vmax.f32 %v436_v59, 0.0  ;;  %v396_v55 = vmul.f32 %v3721_v8, %v338_v24  ;;  %v975_v34 = vsel %vm897_vm2, %v973_v53, %v974_v18  ;;  %v926_v33 = vrot.slane %v812_v10, 1 }
  0xc6   : > { %v4419_v60 = vsel %vm753_vm1, %v722_v57, 0.0  ;;  %v925_v0 = vsel %vm897_vm2, %v923_v61, %v924_v6  ;;  %v977_v59 = vsel %vm897_vm2, %v974_v18, %v976_v9  ;;  %v950_v43 = vsel %vm897_vm2, %v948_v44, %v949_v32 }
  0xc7   : > { %3034 = vrot.lane.b32.xlu0 %v4393_v13, %s3639_s24  ;;  %3009 = vrot.lane.b32.xlu1 %v4404_v23, %s3639_s24  ;;  %v951_v3 = vrot.slane %v4419_v60, 1  ;;  %v544_v47 = vmin.f32 %v490_v46, 6.0  ;;  %v451_v24 = vadd.f32 %v3731_v14, %v396_v55  ;;  %v991_v53 = vsel %vm978_vm3, %v989_v56, %v990_v22 }
  0xc8   : > { %2989 = vrot.lane.b32.xlu2 %v4398_v1, %s3639_s24  ;;  %v390_v31 = vmul.f32 %v3721_v8, %v332_v35  ;;  %v993_v13 = vsel %vm978_vm3, %v990_v22, %v992_v5  ;;  %v927_v23 = vsel %vm897_vm2, %v924_v6, %v926_v33  ;;  %v1004_v46 = vrot.slane %v4020_v30, 2 }
  0xc9   : > { %v952_v57 = vsel %vm897_vm2, %v949_v32, %v951_v3  ;;  %v604_v1 = vmul.f32 %v3888_v21, %v544_v47  ;;  %v505_v61 = vmax.f32 %v451_v24, 0.0  ;;  %v1005_v55 = vrot.slane %v4013_v28, 2  ;;  %v2890_v32 = vpop.permute.xlu1 %2889 }
  0xca   : > { %v445_v18 = vadd.f32 %v3731_v14, %v390_v31  ;;  %v938_v56 = vrot.slane %v4088_v36, 1  ;;  %v1007_v8 = vrot.slane %v812_v10, 2  ;;  %v4438_v35 = vpack.i.bf16 %v977_v59, %v975_v34  ;;  %v341_v34 = vld [vmem:[%s3716_s29 + $0x160] sm:$0x3] }
  0xcb   : > { %v658_v44 = vmul.f32 %v604_v1, %v544_v47  ;;  %v559_v9 = vmin.f32 %v505_v61, 6.0  ;;  %v4440_v22 = vpack.i.bf16 %v952_v57, %v950_v43  ;;  %v939_v5 = vrot.slane %v4065_v25, 1 }
  0xcc   : > { %6026 = vst [vmem:[#allocation49_spill] sm:$0xff] %v4438_v35  ;;  %v499_v6 = vmax.f32 %v445_v18, 0.0  ;;  %v4443_v33 = vpack.i.bf16 %v927_v23, %v925_v0  ;;  %v4445_v3 = vpack.i.bf16 %v993_v13, %v991_v53  ;;  %v963_v43 = vrot.slane %v4211_v51, 1 }
  0xcd   : > { %6027 = vst [vmem:[#allocation50_spill] sm:$0xff] %v4440_v22  ;;  %v716_v14 = vadd.f32 %v3943_v54, %v658_v44  ;;  %v619_v31 = vmul.f32 %v3888_v21, %v559_v9  ;;  %v964_v1 = vrot.slane %v4203_v48, 1  ;;  %v1006_v10 = vsel %vm978_vm3, %v1004_v46, %v1005_v55 }
  0xce   : > { %6028 = vst [vmem:[#allocation51_spill] sm:$0xff] %v4443_v33  ;;  %v553_v23 = vmin.f32 %v499_v6, 6.0  ;;  %v1008_v47 = vsel %vm978_vm3, %v1005_v55, %v1007_v8  ;;  %v953_v24 = vrot.slane %v4139_v2, 1  ;;  %v954_v57 = vrot.slane %v4131_v49, 1  ;;  %v4475_v55 = vld [vmem:[%s5890_s2] ss:$0 sm:$0xff] }
  0xcf   : > { %6029 = vst [vmem:[#allocation52_spill] sm:$0xff] %v4445_v3  ;;  %3049 = vrot.lane.b32.xlu0 %v4438_v35, %s3639_s24  ;;  %3024 = vrot.lane.b32.xlu1 %v4440_v22, %s3639_s24  ;;  %v4461_v13 = vsel %vm753_vm1, %v716_v14, 0.0  ;;  %v673_v0 = vmul.f32 %v619_v31, %v559_v9  ;;  %v994_v61 = vrot.slane %v3969_v42, 2  ;;  %v995_v18 = vrot.slane %v3955_v29, 2 }
  0xd0   : > { %2999 = vrot.lane.b32.xlu2 %v4443_v33, %s3639_s24  ;;  %v941_v59 = vrot.slane %v4461_v13, 1  ;;  %v613_v53 = vmul.f32 %v3888_v21, %v553_v23  ;;  %v997_v44 = vrot.slane %v4351_v26, 2  ;;  %v399_v9 = vmul.f32 %v4475_v55, %v341_v34 }
  0xd1   : > { %v731_v46 = vadd.f32 %v3943_v54, %v673_v0  ;;  %v940_v8 = vsel %vm897_vm2, %v938_v56, %v939_v5  ;;  %v2892_v31 = vunpack.i.h.bf16 %v2890_v32  ;;  %v965_v42 = vsel %vm897_vm2, %v963_v43, %v964_v1  ;;  %v4492_v56 = vld [vmem:[%s5890_s2 + $0x1] ss:$0 sm:$0xff] }
  0xd2   : > { %v942_v6 = vsel %vm897_vm2, %v939_v5, %v941_v59  ;;  %v667_v14 = vmul.f32 %v613_v53, %v553_v23  ;;  %v2891_v26 = vunpack.i.l.bf16 %v2890_v32  ;;  %v4486_v30 = vpack.i.bf16 %v1008_v47, %v1006_v10  ;;  %v2895_v53 = vpop.permute.xlu1 %2894 }
  0xd3   : > { %v4482_v0 = vsel %vm753_vm1, %v731_v46, 0.0  ;;  %v454_v5 = vadd.f32 %v4492_v56, %v399_v9  ;;  %v4495_v23 = vpack.i.bf16 %v942_v6, %v940_v8  ;;  %v955_v59 = vsel %vm897_vm2, %v953_v24, %v954_v57 }
  0xd4   : > { %v966_v29 = vrot.slane %v4482_v0, 1  ;;  %6030 = vst [vmem:[#allocation53_spill] sm:$0xff] %v4486_v30  ;;  %v725_v34 = vadd.f32 %v3943_v54, %v667_v14  ;;  %v996_v43 = vsel %vm978_vm3, %v994_v61, %v995_v18  ;;  %v998_v32 = vsel %vm978_vm3, %v995_v18, %v997_v44 }
  0xd5   : > { %6031 = vst [vmem:[#allocation54_spill] sm:$0xff] %v4495_v23  ;;  %v2015_v46 = vsel %vm2013_vm4, 0.0, %v2892_v31  ;;  %v508_v9 = vmax.f32 %v454_v5, 0.0  ;;  %v2014_v18 = vsel %vm2013_vm4, 0.0, %v2891_v26  ;;  %v4511_v44 = vpack.i.bf16 %v998_v32, %v996_v43 }
  0xd6   : > { %v967_v10 = vsel %vm897_vm2, %v964_v1, %v966_v29  ;;  %v830_v47 = vsel %vm753_vm1, %v725_v34, 0.0  ;;  %v2897_v6 = vunpack.i.h.bf16 %v2895_v53  ;;  %v2896_v29 = vunpack.i.l.bf16 %v2895_v53 }
  0xd7   : > { %3059 = vrot.lane.b32.xlu0 %v4445_v3, %s3641_s25  ;;  %v4508_v24 = vpack.i.bf16 %v967_v10, %v965_v42  ;;  %v956_v61 = vrot.slane %v830_v47, 1  ;;  %6033 = vst [vmem:[#allocation56_spill] sm:$0xff] %v4511_v44  ;;  %v562_v8 = vmin.f32 %v508_v9, 6.0  ;;  %v1019_v1 = vrot.slane %v4088_v36, 2 }
  0xd8   : > { %3014 = vrot.lane.b32.xlu2 %v4495_v23, %s3639_s24  ;;  %v1020_v14 = vrot.slane %v4065_v25, 2  ;;  %v1022_v31 = vrot.slane %v4461_v13, 2  ;;  %v968_v42 = vrot.slane %v4198_v27, 1  ;;  %v4522_v5 = vsel %vm2046_vm5, %v2014_v18, %v2896_v29 }
  0xd9   : > { %6032 = vst [vmem:[#allocation55_spill] sm:$0xff] %v4508_v24  ;;  %3039 = vrot.lane.b32.xlu1 %v4508_v24, %s3639_s24  ;;  %v957_v34 = vsel %vm897_vm2, %v954_v57, %v956_v61  ;;  %v622_v26 = vmul.f32 %v3888_v21, %v562_v8  ;;  %v4525_v43 = vsel %vm2046_vm5, %v2015_v46, %v2897_v6  ;;  %v969_v32 = vrot.slane %v4183_v39, 1  ;;  %v6035_v6 = vld [vmem:[#allocation36_spill] sm:$0xff] }
  0xda   : > { %v1009_v53 = vrot.slane %v4005_v20, 2  ;;  %v1010_v10 = vrot.slane %v3994_v63, 2  ;;  %v1012_v13 = vrot.slane %v4188_v19, 2  ;;  %v1034_v36 = vrot.slane %v4139_v2, 2  ;;  %v6036_v19 = vld [vmem:[#allocation20_spill] sm:$0xff] }
  0xdb   : > { %v676_v9 = vmul.f32 %v622_v26, %v562_v8  ;;  %v1035_v57 = vrot.slane %v4131_v49, 2  ;;  %v1037_v61 = vrot.slane %v830_v47, 2  ;;  %v4533_v25 = vpack.i.bf16 %v957_v34, %v955_v59  ;;  %v6037_v26 = vld [vmem:[#allocation17_spill] sm:$0xff] }
  0xdc   : > { %v984_v18 = vrot.slane %v3988_v58, 2  ;;  %v985_v46 = vrot.slane %v3963_v37, 2  ;;  %v987_v29 = vrot.slane %v6035_v6, 2  ;;  %v1024_v8 = vrot.slane %v6036_v19, 2 }
  0xdd   : > { %6034 = vst [vmem:[#allocation57_spill] sm:$0xff] %v4533_v25  ;;  %v734_v20 = vadd.f32 %v3943_v54, %v676_v9  ;;  %v1025_v2 = vrot.slane %v6037_v26, 2  ;;  %v1027_v49 = vrot.slane %v4280_v11, 2  ;;  %v1021_v59 = vsel %vm978_vm3, %v1019_v1, %v1020_v14 }
  0xde   : > { %v1023_v47 = vsel %vm978_vm3, %v1020_v14, %v1022_v31  ;;  %v970_v34 = vsel %vm897_vm2, %v968_v42, %v969_v32  ;;  %v1011_v6 = vsel %vm978_vm3, %v1009_v53, %v1010_v10  ;;  %v1013_v19 = vsel %vm978_vm3, %v1010_v10, %v1012_v13 }
  0xdf   : > { %3074 = vrot.lane.b32.xlu0 %v4486_v30, %s3641_s25  ;;  %v839_v9 = vsel %vm753_vm1, %v734_v20, 0.0  ;;  %v1036_v26 = vsel %vm978_vm3, %v1034_v36, %v1035_v57  ;;  %v1038_v11 = vsel %vm978_vm3, %v1035_v57, %v1037_v61  ;;  %v986_v1 = vsel %vm978_vm3, %v984_v18, %v985_v46  ;;  %v6038_v57 = vld [vmem:[#allocation15_spill] sm:$0xff] }
  0xe0   : > { %3029 = vrot.lane.b32.xlu2 %v4533_v25, %s3639_s24  ;;  %v971_v63 = vrot.slane %v839_v9, 1  ;;  %v988_v14 = vsel %vm978_vm3, %v985_v46, %v987_v29  ;;  %v1049_v31 = vrot.slane %v4198_v27, 2  ;;  %v1026_v42 = vsel %vm978_vm3, %v1024_v8, %v1025_v2  ;;  %v6039_v46 = vld [vmem:[#allocation22_spill] sm:$0xff] }
  0xe1   : > { %3064 = vrot.lane.b32.xlu1 %v4511_v44, %s3641_s25  ;;  %v1028_v20 = vsel %vm978_vm3, %v1025_v2, %v1027_v49  ;;  %v1050_v53 = vrot.slane %v4183_v39, 2  ;;  %v999_v36 = vrot.slane %v4038_v62, 2  ;;  %v1052_v13 = vrot.slane %v839_v9, 2 }
  0xe2   : > { %v972_v10 = vsel %vm897_vm2, %v969_v32, %v971_v63  ;;  %v1000_v61 = vrot.slane %v6038_v57, 2  ;;  %v1002_v28 = vrot.slane %v4321_v16, 2  ;;  %v4567_v18 = vpack.i.bf16 %v1023_v47, %v1021_v59 }
  0xe3   : > { %v1039_v29 = vrot.slane %v6039_v46, 2  ;;  %v1040_v27 = vrot.slane %v4095_v41, 2  ;;  %v4571_v8 = vpack.i.bf16 %v972_v10, %v970_v34  ;;  %v4573_v2 = vpack.i.bf16 %v1013_v19, %v1011_v6 }
  0xe4   : > { %v4577_v63 = vpack.i.bf16 %v1038_v11, %v1036_v26  ;;  %v4579_v49 = vpack.i.bf16 %v988_v14, %v986_v1  ;;  %v4581_v32 = vpack.i.bf16 %v1028_v20, %v1026_v42  ;;  %v1051_v16 = vsel %vm978_vm3, %v1049_v31, %v1050_v53 }
  0xe5   : > { %6040 = vst [vmem:[#allocation36_spill] sm:$0xff] %v4571_v8  ;;  %v1053_v59 = vsel %vm978_vm3, %v1050_v53, %v1052_v13  ;;  %v1001_v19 = vsel %vm978_vm3, %v999_v36, %v1000_v61  ;;  %v1003_v47 = vsel %vm978_vm3, %v1000_v61, %v1002_v28  ;;  %v1042_v34 = vrot.slane %v4340_v4, 2 }
  0xe6   : > { %6041 = vst [vmem:[#allocation15_spill] sm:$0xff] %v4573_v2  ;;  %v1041_v26 = vsel %vm978_vm3, %v1039_v29, %v1040_v27  ;;  %v1014_v6 = vrot.slane %v4092_v40, 2  ;;  %v1015_v9 = vrot.slane %v4079_v50, 2  ;;  %v1017_v11 = vrot.slane %v4362_v38, 2 }
  0xe7   : > { %3089 = vrot.lane.b32.xlu0 %v4567_v18, %s3641_s25  ;;  %6042 = vst [vmem:[#allocation22_spill] sm:$0xff] %v4581_v32  ;;  %v1054_v14 = vrot.slane %v4194_v7, 2  ;;  %v1055_v31 = vrot.slane %v4177_v45, 2  ;;  %v1057_v28 = vrot.slane %v4389_v52, 2  ;;  %v1029_v4 = vrot.slane %v4148_v15, 2 }
  0xe8   : > { %3044 = vrot.lane.b32.xlu2 %v4571_v8, %s3639_s24  ;;  %v1030_v53 = vrot.slane %v4142_v17, 2  ;;  %v1032_v36 = vrot.slane %v4419_v60, 2  ;;  %v1044_v38 = vrot.slane %v4211_v51, 2  ;;  %v1045_v10 = vrot.slane %v4203_v48, 2  ;;  %v347_v52 = vld [vmem:[%s3716_s29 + $0x190] sm:$0x3] }
  0xe9   : > { %3079 = vrot.lane.b32.xlu1 %v4573_v2, %s3641_s25  ;;  %v1043_v29 = vsel %vm978_vm3, %v1040_v27, %v1042_v34  ;;  %v1047_v7 = vrot.slane %v4482_v0, 2  ;;  %v1018_v60 = vsel %vm978_vm3, %v1015_v9, %v1017_v11  ;;  %v1056_v45 = vsel %vm978_vm3, %v1054_v14, %v1055_v31 }
  0xea   : > { %v2900_v1 = vpop.permute.xlu2 %2899  ;;  %v405_v27 = vmul.f32 %v4475_v55, %v347_v52  ;;  %v1033_v34 = vsel %vm978_vm3, %v1030_v53, %v1032_v36  ;;  %v1046_v0 = vsel %vm978_vm3, %v1044_v38, %v1045_v10  ;;  %v4633_v14 = vpack.i.bf16 %v1003_v47, %v1001_v19  ;;  %v6051_v47 = vld [vmem:[#allocation38_spill] sm:$0xff] }
  0xeb   : > { %v2902_v42 = vunpack.i.h.bf16 %v2900_v1  ;;  %v2901_v20 = vunpack.i.l.bf16 %v2900_v1  ;;  %v1016_v1 = vsel %vm978_vm3, %v1014_v6, %v1015_v9  ;;  %v1048_v9 = vsel %vm978_vm3, %v1045_v10, %v1047_v7 }
  0xec   : > { %v460_v11 = vadd.f32 %v4492_v56, %v405_v27  ;;  %6044 = vst [vmem:[#allocation59_spill] sm:$0xff] %v4633_v14  ;;  %v4639_v55 = vpack.i.bf16 %v1043_v29, %v1041_v26  ;;  %v1063_v26 = vrot.slane %v6051_v47, 1  ;;  %v1068_v52 = vrot.slane %v6051_v47, 2 }
  0xed   : > { %v4606_v13 = vsel %vm2079_vm6, %v4525_v43, %v2902_v42  ;;  %v4610_v61 = vsel %vm2079_vm6, %v4522_v5, %v2901_v20  ;;  %v1058_v5 = vsel %vm978_vm3, %v1055_v31, %v1057_v28  ;;  %v1031_v43 = vsel %vm978_vm3, %v1029_v4, %v1030_v53 }
  0xee   : > { %6043 = vst [vmem:[#allocation58_spill] sm:$0xff] %v4610_v61  ;;  %v4635_v31 = vpack.i.bf16 %v1053_v59, %v1051_v16  ;;  %v514_v28 = vmax.f32 %v460_v11, 0.0  ;;  %v4637_v4 = vpack.i.bf16 %v1018_v60, %v1016_v1  ;;  %v4641_v42 = vpack.i.bf16 %v1033_v34, %v1031_v43  ;;  %v6050_v59 = vld [vmem:[#allocation39_spill] sm:$0xff]  ;;  %v6054_v11 = vld [vmem:[#allocation44_spill] sm:$0xff] }
  0xef   : > { %3104 = vrot.lane.b32.xlu0 %v4577_v63, %s3641_s25  ;;  %6046 = vst [vmem:[#allocation61_spill] sm:$0xff] %v4639_v55  ;;  %v4643_v20 = vpack.i.bf16 %v1058_v5, %v1056_v45  ;;  %v4645_v53 = vpack.i.bf16 %v1048_v9, %v1046_v0  ;;  %v1062_v19 = vrot.slane %v6050_v59, 1  ;;  %v1067_v38 = vrot.slane %v6050_v59, 2 }
  0xf0   : > { %3054 = vrot.lane.b32.xlu2 %v4579_v49, %s3641_s25  ;;  %6045 = vst [vmem:[#allocation60_spill] sm:$0xff] %v4637_v4  ;;  %v568_v36 = vmin.f32 %v514_v28, 6.0 }
  0xf1   : > { %3094 = vrot.lane.b32.xlu1 %v4581_v32, %s3641_s25  ;;  %6047 = vst [vmem:[#allocation62_spill] sm:$0xff] %v4641_v42  ;;  %v1064_v5 = vsel %vm897_vm2, %v1062_v19, %v1063_v26  ;;  %v1069_v27 = vsel %vm978_vm3, %v1067_v38, %v1068_v52 }
  0xf2   : > { %v4629_v6 = vpop.permute.xlu2 %2914  ;;  %6048 = vst [vmem:[#allocation63_spill] sm:$0xff] %v4643_v20  ;;  %v628_v7 = vmul.f32 %v3888_v21, %v568_v36  ;;  %v6052_v21 = vld [vmem:[#allocation42_spill] sm:$0xff] }
  0xf3   : > { %6049 = vst [vmem:[#allocation64_spill] sm:$0xff] %v4645_v53 }
  0xf4   : > { %v682_v16 = vmul.f32 %v628_v7, %v568_v36  ;;  %v6055_v7 = vld [vmem:[#allocation45_spill] sm:$0xff] }
  0xf6   : > { %v740_v45 = vadd.f32 %v3943_v54, %v682_v16 }
  0xf7   : > { %3119 = vrot.lane.b32.xlu0 %v4635_v31, %s3641_s25 }
  0xf8   : > { %3069 = vrot.lane.b32.xlu2 %v4633_v14, %s3641_s25  ;;  %v845_v10 = vsel %vm753_vm1, %v740_v45, 0.0  ;;  %v6056_v45 = vld [vmem:[#allocation48_spill] sm:$0xff] }
  0xf9   : > { %3109 = vrot.lane.b32.xlu1 %v4639_v55, %s3641_s25  ;;  %v1065_v29 = vrot.slane %v845_v10, 1  ;;  %v1070_v1 = vrot.slane %v845_v10, 2 }
  0xfa   : > { %v4654_v56 = vpop.permute.xlu2 %2929 }
  0xfb   : > { %v1066_v43 = vsel %vm897_vm2, %v1063_v26, %v1065_v29  ;;  %v1071_v34 = vsel %vm978_vm3, %v1068_v52, %v1070_v1  ;;  %v6058_v26 = vld [vmem:[#allocation47_spill] sm:$0xff] }
  0xfc   : > { %v4679_v0 = vpack.i.bf16 %v1071_v34, %v1069_v27  ;;  %v4681_v9 = vpack.i.bf16 %v1066_v43, %v1064_v5  ;;  %v6061_v43 = vld [vmem:[#allocation43_spill] sm:$0xff] }
  0xfe   : > { %6053 = vst [vmem:[#allocation39_spill] sm:$0xff] %v4681_v9 }
  0xff   : > { %3129 = vrot.lane.b32.xlu0 %v6052_v21, %s3643_s14  ;;  %v6059_v21 = vld [vmem:[#allocation40_spill] sm:$0xff] }
 0x100   : > { %3084 = vrot.lane.b32.xlu2 %v4637_v4, %s3641_s25 }
 0x101   : > { %v4667_v54 = vpop.permute.xlu1 %2909  ;;  %v4669_v60 = vpop.permute.xlu0 %2904  ;;  %3124 = vrot.lane.b32.xlu1 %v4643_v20, %s3641_s25 }
 0x102   : > { %v4673_v12 = vpop.permute.xlu2 %2944 }
 0x107   : > { %3144 = vrot.lane.b32.xlu0 %v6054_v11, %s3643_s14 }
 0x108   : > { %3099 = vrot.lane.b32.xlu2 %v4641_v42, %s3641_s25 }
 0x109   : > { %v4687_v28 = vpop.permute.xlu1 %2924  ;;  %v4689_v36 = vpop.permute.xlu0 %2919  ;;  %3134 = vrot.lane.b32.xlu1 %v6055_v7, %s3643_s14  ;;  %v6064_v7 = vld [vmem:[#allocation7_spill] sm:$0xff] }
 0x10a   : > { %v4693_v16 = vpop.permute.xlu2 %2959 }
 0x10f   : > { %3159 = vrot.lane.b32.xlu0 %v6056_v45, %s3643_s14 }
 0x110   : > { %3114 = vrot.lane.b32.xlu2 %v4645_v53, %s3641_s25 }
 0x111   : > { %v4699_v59 = vpop.permute.xlu1 %2939  ;;  %v4701_v19 = vpop.permute.xlu0 %2934  ;;  %3149 = vrot.lane.b32.xlu1 %v4443_v33, %s3643_s14 }
 0x112   : > { %v4705_v47 = vpop.permute.xlu2 %2974 }
 0x113   : > { %6057 = vst [vmem:[#allocation38_spill] sm:$0xff] %v4705_v47 }
 0x117   : > { %3174 = vrot.lane.b32.xlu0 %v4440_v22, %s3643_s14 }
 0x118   : > { %3139 = vrot.lane.b32.xlu2 %v6058_v26, %s3643_s14 }
 0x119   : > { %v4711_v38 = vpop.permute.xlu1 %2954  ;;  %v4713_v10 = vpop.permute.xlu0 %2949  ;;  %3164 = vrot.lane.b32.xlu1 %v4495_v23, %s3643_s14  ;;  %v6062_v23 = vld [vmem:[#allocation46_spill] sm:$0xff] }
 0x11a   : > { %v2985_v52 = vpop.permute.xlu2 %2984 }
 0x11b   : > { %v2986_v11 = vunpack.i.l.bf16 %v2985_v52 }
 0x11f   : > { %3189 = vrot.lane.b32.xlu0 %v4508_v24, %s3643_s14 }
 0x120   : > { %3154 = vrot.lane.b32.xlu2 %v6059_v21, %s3643_s14 }
 0x121   : > { %v4721_v29 = vpop.permute.xlu1 %2969  ;;  %v4723_v1 = vpop.permute.xlu0 %2964  ;;  %3179 = vrot.lane.b32.xlu1 %v4533_v25, %s3643_s14 }
 0x122   : > { %6060 = vst [vmem:[#allocation42_spill] sm:$0xff] %v4723_v1  ;;  %v4727_v5 = vpop.permute.xlu2 %2989 }
 0x127   : > { %3204 = vrot.lane.b32.xlu0 %v4681_v9, %s3643_s14 }
 0x128   : > { %3169 = vrot.lane.b32.xlu2 %v6061_v43, %s3643_s14 }
 0x129   : > { %v4733_v27 = vpop.permute.xlu0 %3004  ;;  %v2980_v34 = vpop.permute.xlu1 %2979  ;;  %3194 = vrot.lane.b32.xlu1 %v4571_v8, %s3643_s14 }
 0x12a   : > { %v4737_v24 = vpop.permute.xlu2 %2999  ;;  %v2982_v22 = vunpack.i.h.bf16 %v2980_v34  ;;  %v2981_v21 = vunpack.i.l.bf16 %v2980_v34 }
 0x12c   : > { %v2017_v34 = vsel %vm2013_vm4, %v3963_v37, %v2982_v22  ;;  %v2912_v37 = vunpack.i.h.bf16 %v4667_v54  ;;  %v6066_v22 = vld [vmem:[#allocation13_spill] sm:$0xff] }
 0x12f   : > { %3219 = vrot.lane.b32.xlu0 %v4511_v44, %s3644_s15  ;;  %v6063_v44 = vld [vmem:[#allocation5_spill] sm:$0xff] }
 0x130   : > { %3184 = vrot.lane.b32.xlu2 %v6062_v23, %s3643_s14 }
 0x131   : > { %v4743_v33 = vpop.permute.xlu0 %3019  ;;  %v4745_v9 = vpop.permute.xlu1 %2994  ;;  %3209 = vrot.lane.b32.xlu1 %v4579_v49, %s3644_s15 }
 0x132   : > { %v4749_v43 = vpop.permute.xlu2 %3014 }
 0x137   : > { %3234 = vrot.lane.b32.xlu0 %v4573_v2, %s3644_s15 }
 0x138   : > { %3199 = vrot.lane.b32.xlu2 %v4438_v35, %s3643_s14 }
 0x139   : > { %v4755_v8 = vpop.permute.xlu0 %3034  ;;  %v4757_v25 = vpop.permute.xlu1 %3009  ;;  %3224 = vrot.lane.b32.xlu1 %v4633_v14, %s3644_s15  ;;  %v2987_v14 = vunpack.i.h.bf16 %v2985_v52 }
 0x13a   : > { %v4761_v23 = vpop.permute.xlu2 %3029 }
 0x13b   : > { %v2019_v52 = vsel %vm2013_vm4, %v6063_v44, %v2987_v14 }
 0x13f   : > { %3249 = vrot.lane.b32.xlu0 %v4581_v32, %s3644_s15 }
 0x140   : > { %3214 = vrot.lane.b32.xlu2 %v4445_v3, %s3644_s15 }
 0x141   : > { %v4767_v49 = vpop.permute.xlu0 %3049  ;;  %3239 = vrot.lane.b32.xlu1 %v4637_v4, %s3644_s15  ;;  %v4773_v45 = vpop.permute.xlu1 %3024 }
 0x142   : > { %v4771_v35 = vpop.permute.xlu2 %3044 }
 0x147   : > { %3264 = vrot.lane.b32.xlu0 %v4639_v55, %s3644_s15  ;;  %v2018_v55 = vsel %vm2013_vm4, %v6064_v7, %v2986_v11  ;;  %v2997_v7 = vunpack.i.h.bf16 %v4745_v9  ;;  %v6065_v11 = vld [vmem:[#allocation12_spill] sm:$0xff] }
 0x148   : > { %3229 = vrot.lane.b32.xlu2 %v4486_v30, %s3644_s15  ;;  %v2016_v30 = vsel %vm2013_vm4, %v3988_v58, %v2981_v21  ;;  %v2911_v58 = vunpack.i.l.bf16 %v4667_v54  ;;  %v2992_v54 = vunpack.i.h.bf16 %v4727_v5  ;;  %v2991_v21 = vunpack.i.l.bf16 %v4727_v5 }
 0x149   : > { %v3060_v2 = vpop.permute.xlu0 %3059  ;;  %3254 = vrot.lane.b32.xlu1 %v4641_v42, %s3644_s15 }
 0x14a   : > { %v3062_v4 = vunpack.i.h.bf16 %v3060_v2  ;;  %v3061_v3 = vunpack.i.l.bf16 %v3060_v2  ;;  %v3055_v26 = vpop.permute.xlu2 %3054 }
 0x14b   : > { %v3057_v1 = vunpack.i.h.bf16 %v3055_v26  ;;  %v3056_v32 = vunpack.i.l.bf16 %v3055_v26  ;;  %v4793_v2 = vpop.permute.xlu1 %3039  ;;  %v2996_v26 = vunpack.i.l.bf16 %v4745_v9 }
 0x14c   : > { %v2051_v47 = vsel %vm2046_vm5, %v2018_v55, %v3061_v3  ;;  %v2052_v42 = vsel %vm2046_vm5, %v2019_v52, %v3062_v4  ;;  %v3002_v55 = vunpack.i.h.bf16 %v4737_v24 }
 0x14d   : > { %v4797_v44 = vsel %vm2046_vm5, %v2016_v30, %v3056_v32  ;;  %v4800_v14 = vsel %vm2046_vm5, %v2017_v34, %v3057_v1  ;;  %v3001_v30 = vunpack.i.l.bf16 %v4737_v24  ;;  %v3007_v1 = vunpack.i.h.bf16 %v4733_v27 }
 0x14e   : > { %v3006_v24 = vunpack.i.l.bf16 %v4733_v27  ;;  %v4824_v9 = vsel %vm2079_vm6, %v2051_v47, %v2911_v58  ;;  %v4827_v61 = vsel %vm2079_vm6, %v2052_v42, %v2912_v37  ;;  %v2025_v5 = vsel %vm2013_vm4, %v6065_v11, %v3002_v55 }
 0x14f   : > { %3279 = vrot.lane.b32.xlu0 %v4643_v20, %s3644_s15  ;;  %v2024_v3 = vsel %vm2013_vm4, %v6066_v22, %v3001_v30  ;;  %v2927_v30 = vunpack.i.h.bf16 %v4687_v28 }
 0x150   : > { %3244 = vrot.lane.b32.xlu2 %v4567_v18, %s3644_s15 }
 0x151   : > { %v3075_v52 = vpop.permute.xlu0 %3074  ;;  %3269 = vrot.lane.b32.xlu1 %v4645_v53, %s3644_s15  ;;  %v2023_v53 = vsel %vm2013_vm4, %v6038_v57, %v2997_v7  ;;  %v2926_v57 = vunpack.i.l.bf16 %v4687_v28  ;;  %v6068_v7 = vld [vmem:[#allocation6_spill] sm:$0xff] }
 0x152   : > { %v3077_v34 = vunpack.i.h.bf16 %v3075_v52  ;;  %v3076_v4 = vunpack.i.l.bf16 %v3075_v52  ;;  %v3070_v32 = vpop.permute.xlu2 %3069  ;;  %v2022_v52 = vsel %vm2013_vm4, %v4038_v62, %v2996_v26 }
 0x153   : > { %v3072_v27 = vunpack.i.h.bf16 %v3070_v32  ;;  %v3071_v20 = vunpack.i.l.bf16 %v3070_v32  ;;  %v3065_v42 = vpop.permute.xlu1 %3064  ;;  %v6067_v32 = vld [vmem:[#allocation4_spill] sm:$0xff] }
 0x154   : > { %v2057_v47 = vsel %vm2046_vm5, %v2024_v3, %v3076_v4  ;;  %v2058_v58 = vsel %vm2046_vm5, %v2025_v5, %v3077_v34  ;;  %v3067_v22 = vunpack.i.h.bf16 %v3065_v42  ;;  %v3066_v55 = vunpack.i.l.bf16 %v3065_v42  ;;  %v6069_v34 = vld [vmem:[#allocation8_spill] sm:$0xff] }
 0x155   : > { %v4840_v37 = vsel %vm2046_vm5, %v2022_v52, %v3071_v20  ;;  %v4843_v11 = vsel %vm2046_vm5, %v2023_v53, %v3072_v27  ;;  %v2021_v62 = vsel %vm2013_vm4, %v6067_v32, %v2992_v54  ;;  %v2020_v3 = vsel %vm2013_vm4, %v6068_v7, %v2991_v21  ;;  %v6071_v52 = vld [vmem:[#allocation11_spill] sm:$0xff] }
 0x156   : > { %v3017_v4 = vunpack.i.h.bf16 %v4749_v43  ;;  %v3016_v20 = vunpack.i.l.bf16 %v4749_v43  ;;  %v2054_v26 = vsel %vm2046_vm5, %v2021_v62, %v3067_v22  ;;  %v2053_v53 = vsel %vm2046_vm5, %v2020_v3, %v3066_v55  ;;  %v6070_v43 = vld [vmem:[#allocation10_spill] sm:$0xff] }
 0x157   : > { %3294 = vrot.lane.b32.xlu0 %v6069_v34, %s3645_s16  ;;  %v3012_v54 = vunpack.i.h.bf16 %v4757_v25  ;;  %v3011_v21 = vunpack.i.l.bf16 %v4757_v25  ;;  %v2027_v27 = vsel %vm2013_vm4, %v6070_v43, %v3007_v1  ;;  %v2026_v42 = vsel %vm2013_vm4, %v6071_v52, %v3006_v24  ;;  %v6072_v1 = vld [vmem:[#allocation19_spill] sm:$0xff]  ;;  %v6073_v43 = vld [vmem:[#allocation21_spill] sm:$0xff] }
 0x158   : > { %3259 = vrot.lane.b32.xlu2 %v4577_v63, %s3644_s15  ;;  %v3022_v22 = vunpack.i.h.bf16 %v4743_v33  ;;  %v3021_v55 = vunpack.i.l.bf16 %v4743_v33  ;;  %v4872_v3 = vsel %vm2079_vm6, %v2057_v47, %v2926_v57  ;;  %v4875_v34 = vsel %vm2079_vm6, %v2058_v58, %v2927_v30 }
 0x159   : > { %v3090_v32 = vpop.permute.xlu0 %3089  ;;  %3284 = vrot.lane.b32.xlu1 %v4679_v0, %s3644_s15  ;;  %v2031_v24 = vsel %vm2013_vm4, %v6072_v1, %v3017_v4  ;;  %v2030_v52 = vsel %vm2013_vm4, %v6073_v43, %v3016_v20  ;;  %v2029_v5 = vsel %vm2013_vm4, %v4079_v50, %v3012_v54  ;;  %v2941_v43 = vunpack.i.l.bf16 %v4699_v59 }
 0x15a   : > { %v3092_v62 = vunpack.i.h.bf16 %v3090_v32  ;;  %v3091_v7 = vunpack.i.l.bf16 %v3090_v32  ;;  %v3085_v25 = vpop.permute.xlu2 %3084  ;;  %v2028_v32 = vsel %vm2013_vm4, %v4092_v40, %v3011_v21  ;;  %v6075_v40 = vunpack.i.h.bf16 %v4629_v6 }
 0x15b   : > { %v3087_v33 = vunpack.i.h.bf16 %v3085_v25  ;;  %v3086_v28 = vunpack.i.l.bf16 %v3085_v25  ;;  %v3080_v58 = vpop.permute.xlu1 %3079  ;;  %v6074_v25 = vunpack.i.l.bf16 %v4629_v6  ;;  %v6076_v21 = vunpack.i.l.bf16 %v4669_v60 }
 0x15c   : > { %v2063_v47 = vsel %vm2046_vm5, %v2030_v52, %v3091_v7  ;;  %v2064_v57 = vsel %vm2046_vm5, %v2031_v24, %v3092_v62  ;;  %v3082_v20 = vunpack.i.h.bf16 %v3080_v58  ;;  %v3081_v1 = vunpack.i.l.bf16 %v3080_v58  ;;  %v6078_v24 = vld [vmem:[#allocation14_spill] sm:$0xff]  ;;  %v6079_v52 = vld [vmem:[#allocation17_spill] sm:$0xff] }
 0x15d   : > { %v4888_v30 = vsel %vm2046_vm5, %v2028_v32, %v3086_v28  ;;  %v4891_v4 = vsel %vm2046_vm5, %v2029_v5, %v3087_v33  ;;  %v4896_v50 = vsel %vm2079_vm6, %v2053_v53, %v6074_v25  ;;  %v4901_v54 = vsel %vm2079_vm6, %v2054_v26, %v6075_v40 }
 0x15e   : > { %v4907_v28 = vsel %vm2079_vm6, %v4797_v44, %v6076_v21  ;;  %v6077_v5 = vunpack.i.h.bf16 %v4669_v60  ;;  %v3032_v53 = vunpack.i.h.bf16 %v4761_v23  ;;  %v3031_v7 = vunpack.i.l.bf16 %v4761_v23  ;;  %v6083_v21 = vld [vmem:[#allocation28_spill] sm:$0xff] }
 0x15f   : > { %v2060_v6 = vsel %vm2046_vm5, %v2027_v27, %v3082_v20  ;;  %v2059_v26 = vsel %vm2046_vm5, %v2026_v42, %v3081_v1  ;;  %3309 = vrot.lane.b32.xlu0 %v6078_v24, %s3645_s16  ;;  %v2942_v44 = vunpack.i.h.bf16 %v4699_v59  ;;  %v3027_v60 = vunpack.i.h.bf16 %v4773_v45  ;;  %v6080_v27 = vld [vmem:[#allocation20_spill] sm:$0xff]  ;;  %v6081_v59 = vld [vmem:[#allocation18_spill] sm:$0xff] }
 0x160   : > { %v4913_v62 = vsel %vm2079_vm6, %v4800_v14, %v6077_v5  ;;  %v3026_v14 = vunpack.i.l.bf16 %v4773_v45  ;;  %3274 = vrot.lane.b32.xlu2 %v4635_v31, %s3644_s15  ;;  %v2033_v23 = vsel %vm2013_vm4, %v6079_v52, %v3022_v22  ;;  %v2032_v42 = vsel %vm2013_vm4, %v6080_v27, %v3021_v55  ;;  %v6082_v22 = vld [vmem:[#allocation27_spill] sm:$0xff]  ;;  %s2789_s15 = sshll.u32 %s6142_s18, 1 }
 0x161   : > { %v3037_v33 = vunpack.i.h.bf16 %v4755_v8  ;;  %v3036_v32 = vunpack.i.l.bf16 %v4755_v8  ;;  %v3105_v58 = vpop.permute.xlu0 %3104  ;;  %3299 = vrot.lane.b32.xlu1 %v6081_v59, %s3645_s16  ;;  %v4936_v25 = vsel %vm2079_vm6, %v2063_v47, %v2941_v43  ;;  %v4939_v40 = vsel %vm2079_vm6, %v2064_v57, %v2942_v44 }
 0x162   : > { %v3107_v20 = vunpack.i.h.bf16 %v3105_v58  ;;  %v3106_v1 = vunpack.i.l.bf16 %v3105_v58  ;;  %v3100_v45 = vpop.permute.xlu2 %3099  ;;  %v2037_v55 = vsel %vm2013_vm4, %v6082_v22, %v3032_v53  ;;  %v2036_v5 = vsel %vm2013_vm4, %v6083_v21, %v3031_v7 }
 0x163   : > { %v3102_v8 = vunpack.i.h.bf16 %v3100_v45  ;;  %v3101_v24 = vunpack.i.l.bf16 %v3100_v45  ;;  %v2035_v52 = vsel %vm2013_vm4, %v4142_v17, %v3027_v60  ;;  %v2034_v27 = vsel %vm2013_vm4, %v4148_v15, %v3026_v14  ;;  %v3095_v57 = vpop.permute.xlu1 %3094 }
 0x164   : > { %v2069_v47 = vsel %vm2046_vm5, %v2036_v5, %v3106_v1  ;;  %v2070_v43 = vsel %vm2046_vm5, %v2037_v55, %v3107_v20  ;;  %v3097_v7 = vunpack.i.h.bf16 %v3095_v57  ;;  %v3096_v58 = vunpack.i.l.bf16 %v3095_v57  ;;  %v6088_v55 = vld [vmem:[#allocation23_spill] sm:$0xff]  ;;  %v6089_v5 = vld [vmem:[#allocation9_spill] sm:$0xff] }
 0x165   : > { %v4952_v44 = vsel %vm2046_vm5, %v2034_v27, %v3101_v24  ;;  %v4955_v53 = vsel %vm2046_vm5, %v2035_v52, %v3102_v8  ;;  %v6084_v59 = vunpack.i.l.bf16 %v4654_v56  ;;  %v6085_v15 = vunpack.i.h.bf16 %v4654_v56 }
 0x166   : > { %v6086_v14 = vunpack.i.l.bf16 %v4689_v36  ;;  %v6087_v1 = vunpack.i.h.bf16 %v4689_v36  ;;  %v3046_v22 = vunpack.i.l.bf16 %v4771_v35  ;;  %v2066_v56 = vsel %vm2046_vm5, %v2033_v23, %v3097_v7 }
 0x167   : > { %v4960_v17 = vsel %vm2079_vm6, %v2059_v26, %v6084_v59  ;;  %v4965_v60 = vsel %vm2079_vm6, %v2060_v6, %v6085_v15  ;;  %v3047_v26 = vunpack.i.h.bf16 %v4771_v35  ;;  %v2065_v6 = vsel %vm2046_vm5, %v2032_v42, %v3096_v58  ;;  %3324 = vrot.lane.b32.xlu0 %v6088_v55, %s3645_s16 }
 0x168   : > { %v4971_v20 = vsel %vm2079_vm6, %v4840_v37, %v6086_v14  ;;  %v4977_v45 = vsel %vm2079_vm6, %v4843_v11, %v6087_v1  ;;  %v2957_v37 = vunpack.i.h.bf16 %v4711_v38  ;;  %v2956_v21 = vunpack.i.l.bf16 %v4711_v38  ;;  %3289 = vrot.lane.b32.xlu2 %v6089_v5, %s3645_s16  ;;  %v6090_v38 = vld [vmem:[#allocation25_spill] sm:$0xff] }
 0x169   : > { %v3042_v36 = vunpack.i.h.bf16 %v4793_v2  ;;  %v3041_v11 = vunpack.i.l.bf16 %v4793_v2  ;;  %v2937_v35 = vunpack.i.h.bf16 %v4701_v19  ;;  %v2936_v23 = vunpack.i.l.bf16 %v4701_v19  ;;  %v3120_v24 = vpop.permute.xlu0 %3119  ;;  %3314 = vrot.lane.b32.xlu1 %v6090_v38, %s3645_s16 }
 0x16a   : > { %v2039_v42 = vsel %vm2013_vm4, %v4095_v41, %v3037_v33  ;;  %v2038_v8 = vsel %vm2013_vm4, %v6039_v46, %v3036_v32  ;;  %v3122_v52 = vunpack.i.h.bf16 %v3120_v24  ;;  %v3121_v27 = vunpack.i.l.bf16 %v3120_v24  ;;  %v3115_v2 = vpop.permute.xlu2 %3114  ;;  %v6091_v41 = vld [vmem:[#allocation33_spill] sm:$0xff] }
 0x16b   : > { %v5000_v57 = vsel %vm2079_vm6, %v2069_v47, %v2956_v21  ;;  %v5003_v7 = vsel %vm2079_vm6, %v2070_v43, %v2957_v37  ;;  %v2043_v19 = vsel %vm2013_vm4, %v4183_v39, %v3047_v26  ;;  %v2042_v33 = vsel %vm2013_vm4, %v6091_v41, %v3046_v22  ;;  %v3110_v43 = vpop.permute.xlu1 %3109  ;;  %v6097_v41 = vld [vmem:[#allocation31_spill] sm:$0xff] }
 0x16c   : > { %v3117_v46 = vunpack.i.h.bf16 %v3115_v2  ;;  %v3116_v32 = vunpack.i.l.bf16 %v3115_v2  ;;  %v2041_v58 = vsel %vm2013_vm4, %v4203_v48, %v3042_v36  ;;  %v2040_v59 = vsel %vm2013_vm4, %v4211_v51, %v3041_v11 }
 0x16d   : > { %v2075_v47 = vsel %vm2046_vm5, %v2042_v33, %v3121_v27  ;;  %v2076_v15 = vsel %vm2046_vm5, %v2043_v19, %v3122_v52  ;;  %v3112_v1 = vunpack.i.h.bf16 %v3110_v43  ;;  %v3111_v26 = vunpack.i.l.bf16 %v3110_v43 }
 0x16e   : > { %v5016_v14 = vsel %vm2046_vm5, %v2040_v59, %v3116_v32  ;;  %v5019_v39 = vsel %vm2046_vm5, %v2041_v58, %v3117_v46  ;;  %v6092_v22 = vunpack.i.l.bf16 %v4673_v12  ;;  %v6093_v51 = vunpack.i.h.bf16 %v4673_v12  ;;  %v6098_v46 = vld [vmem:[#allocation32_spill] sm:$0xff]  ;;  %v6099_v59 = vld [vmem:[#allocation58_spill] sm:$0xff] }
 0x16f   : > { %v5033_v37 = vsel %vm2079_vm6, %v4888_v30, %v2936_v23  ;;  %v5037_v21 = vsel %vm2079_vm6, %v4891_v4, %v2937_v35  ;;  %v2072_v36 = vsel %vm2046_vm5, %v2039_v42, %v3112_v1  ;;  %v2071_v11 = vsel %vm2046_vm5, %v2038_v8, %v3111_v26  ;;  %v6095_v23 = vld [vmem:[#allocation16_spill] sm:$0xff]  ;;  %v6096_v8 = vld [vmem:[#allocation30_spill] sm:$0xff] }
 0x170   : > { %v5024_v48 = vsel %vm2079_vm6, %v2065_v6, %v6092_v22  ;;  %v5029_v55 = vsel %vm2079_vm6, %v2066_v56, %v6093_v51  ;;  %v6094_v6 = vld [vmem:[#allocation26_spill] sm:$0xff]  ;;  %v2972_v12 = vunpack.i.h.bf16 %v4721_v29  ;;  %v2971_v56 = vunpack.i.l.bf16 %v4721_v29  ;;  %3304 = vrot.lane.b32.xlu2 %v6095_v23, %s3645_s16 }
 0x171   : > { %3339 = vrot.lane.b32.xlu0 %v6094_v6, %s3645_s16  ;;  %v3052_v5 = vunpack.i.h.bf16 %v4767_v49  ;;  %v3051_v30 = vunpack.i.l.bf16 %v4767_v49  ;;  %v2962_v4 = vunpack.i.h.bf16 %v4693_v16  ;;  %v2961_v35 = vunpack.i.l.bf16 %v4693_v16  ;;  %v3130_v42 = vpop.permute.xlu0 %3129  ;;  %3329 = vrot.lane.b32.xlu1 %v6096_v8, %s3645_s16  ;;  %v6103_v23 = vld [vmem:[#allocation38_spill] sm:$0xff] }
 0x172   : > { %v3140_v24 = vpop.permute.xlu2 %3139  ;;  %v3132_v38 = vunpack.i.h.bf16 %v3130_v42  ;;  %v3131_v52 = vunpack.i.l.bf16 %v3130_v42  ;;  %v5054_v29 = vsel %vm2079_vm6, %v2075_v47, %v2971_v56  ;;  %v5057_v49 = vsel %vm2079_vm6, %v2076_v15, %v2972_v12  ;;  %v6100_v12 = vld [vmem:[#allocation34_spill] sm:$0xff]  ;;  %v6102_v56 = vld [vmem:[#allocation37_spill] sm:$0xff] }
 0x173   : > { %v2952_v27 = vunpack.i.h.bf16 %v4713_v10  ;;  %v2951_v2 = vunpack.i.l.bf16 %v4713_v10  ;;  %v3142_v19 = vunpack.i.h.bf16 %v3140_v24  ;;  %v3141_v16 = vunpack.i.l.bf16 %v3140_v24  ;;  %v3125_v15 = vpop.permute.xlu1 %3124  ;;  %v6104_v8 = vld [vmem:[#allocation42_spill] sm:$0xff] }
 0x174   : > { %v2045_v33 = vsel %vm2013_vm4, %v6097_v41, %v3052_v5  ;;  %v2044_v32 = vsel %vm2013_vm4, %v6098_v46, %v3051_v30  ;;  %v5067_v58 = vsel %vm2112_vm7, %v4606_v13, %v3132_v38  ;;  %v5071_v47 = vsel %vm2112_vm7, %v6099_v59, %v3131_v52  ;;  %v6105_v59 = vld [vmem:[#allocation45_spill] sm:$0xff] }
 0x175   : > { %v5075_v10 = vsel %vm2112_vm7, %v4827_v61, %v3142_v19  ;;  %v5079_v43 = vsel %vm2112_vm7, %v4824_v9, %v3141_v16  ;;  %v3127_v1 = vunpack.i.h.bf16 %v3125_v15  ;;  %v3126_v26 = vunpack.i.l.bf16 %v3125_v15  ;;  %v6106_v15 = vld [vmem:[#allocation29_spill] sm:$0xff] }
 0x176   : > { %v5082_v22 = vsel %vm2079_vm6, %v2071_v11, %v2961_v35  ;;  %v5085_v13 = vsel %vm2079_vm6, %v2072_v36, %v2962_v4  ;;  %v5089_v51 = vsel %vm2079_vm6, %v4952_v44, %v2951_v2  ;;  %v5093_v61 = vsel %vm2079_vm6, %v4955_v53, %v2952_v27  ;;  %v6101_v11 = vld [vmem:[#allocation24_spill] sm:$0xff] }
 0x177   : > { %v2078_v6 = vsel %vm2046_vm5, %v2045_v33, %v3127_v1  ;;  %v2077_v9 = vsel %vm2046_vm5, %v2044_v32, %v3126_v26  ;;  %v2977_v53 = vunpack.i.h.bf16 %v6103_v23  ;;  %v2976_v4 = vunpack.i.l.bf16 %v6103_v23  ;;  %v6107_v1 = vld [vmem:[#allocation41_spill] sm:$0xff] }
 0x178   : > { %3319 = vrot.lane.b32.xlu2 %v6101_v11, %s3645_s16  ;;  %v2967_v24 = vunpack.i.h.bf16 %v6104_v8  ;;  %v2966_v38 = vunpack.i.l.bf16 %v6104_v8 }
 0x179   : > { %3354 = vrot.lane.b32.xlu0 %v6100_v12, %s3645_s16  ;;  %v3145_v36 = vpop.permute.xlu0 %3144  ;;  %3344 = vrot.lane.b32.xlu1 %v6102_v56, %s3645_s16  ;;  %v5124_v46 = vsel %vm2079_vm6, %v2077_v9, %v2976_v4 }
 0x17a   : > { %v3155_v44 = vpop.permute.xlu2 %3154  ;;  %v3147_v5 = vunpack.i.h.bf16 %v3145_v36  ;;  %v3146_v30 = vunpack.i.l.bf16 %v3145_v36 }
 0x17b   : > { %v3157_v35 = vunpack.i.h.bf16 %v3155_v44  ;;  %v3156_v42 = vunpack.i.l.bf16 %v3155_v44  ;;  %v3135_v2 = vpop.permute.xlu1 %3134 }
 0x17c   : > { %v5109_v52 = vsel %vm2112_vm7, %v4896_v50, %v3146_v30  ;;  %v5113_v27 = vsel %vm2112_vm7, %v4901_v54, %v3147_v5  ;;  %v3137_v41 = vunpack.i.h.bf16 %v3135_v2  ;;  %v3136_v33 = vunpack.i.l.bf16 %v3135_v2  ;;  %v6108_v30 = vld [vmem:[#allocation47_spill] sm:$0xff] }
 0x17d   : > { %v5117_v19 = vsel %vm2112_vm7, %v4875_v34, %v3157_v35  ;;  %v5121_v16 = vsel %vm2112_vm7, %v4872_v3, %v3156_v42  ;;  %v5127_v50 = vsel %vm2079_vm6, %v2078_v6, %v2977_v53  ;;  %v5131_v54 = vsel %vm2079_vm6, %v5016_v14, %v2966_v38 }
 0x17e   : > { %v5135_v34 = vsel %vm2079_vm6, %v5019_v39, %v2967_v24  ;;  %v5139_v3 = vsel %vm2112_vm7, %v4907_v28, %v3136_v33  ;;  %v5143_v32 = vsel %vm2112_vm7, %v4913_v62, %v3137_v41 }
 0x180   : > { %3334 = vrot.lane.b32.xlu2 %v6106_v15, %s3645_s16  ;;  %v1085_v15 = vld [vmem:[%s5201_s26] sm:$0xff] }
 0x181   : > { %3369 = vrot.lane.b32.xlu0 %v6105_v59, %s3646_s17  ;;  %v3160_v14 = vpop.permute.xlu0 %3159  ;;  %3359 = vrot.lane.b32.xlu1 %v6107_v1, %s3645_s16  ;;  %v6113_v1 = vld [vmem:[#allocation40_spill] sm:$0xff] }
 0x182   : > { %v3170_v39 = vpop.permute.xlu2 %3169  ;;  %v3162_v26 = vunpack.i.h.bf16 %v3160_v14  ;;  %v3161_v6 = vunpack.i.l.bf16 %v3160_v14  ;;  %v1086_v14 = vld [vmem:[%s5201_s26 + $0x8] sm:$0xff] }
 0x183   : > { %v3172_v28 = vunpack.i.h.bf16 %v3170_v39  ;;  %v3171_v9 = vunpack.i.l.bf16 %v3170_v39  ;;  %v3150_v11 = vpop.permute.xlu1 %3149 }
 0x184   : > { %v5153_v62 = vsel %vm2112_vm7, %v4960_v17, %v3161_v6  ;;  %v5157_v12 = vsel %vm2112_vm7, %v4965_v60, %v3162_v26  ;;  %v3152_v44 = vunpack.i.h.bf16 %v3150_v11  ;;  %v3151_v5 = vunpack.i.l.bf16 %v3150_v11 }
 0x185   : > { %v5161_v36 = vsel %vm2112_vm7, %v4939_v40, %v3172_v28  ;;  %v5165_v56 = vsel %vm2112_vm7, %v4936_v25, %v3171_v9  ;;  %v6109_v40 = vld [vmem:[#allocation35_spill] sm:$0xff]  ;;  %v6110_v25 = vld [vmem:[#allocation52_spill] sm:$0xff] }
 0x186   : > { %v5169_v17 = vsel %vm2112_vm7, %v4971_v20, %v3151_v5  ;;  %v5173_v60 = vsel %vm2112_vm7, %v4977_v45, %v3152_v44  ;;  %v1087_v9 = vld [vmem:[%s5201_s26 + $0x10] sm:$0xff] }
 0x188   : > { %3349 = vrot.lane.b32.xlu2 %v6109_v40, %s3645_s16 }
 0x189   : > { %3384 = vrot.lane.b32.xlu0 %v6108_v30, %s3646_s17  ;;  %v3175_v23 = vpop.permute.xlu0 %3174  ;;  %3374 = vrot.lane.b32.xlu1 %v6110_v25, %s3647_s22  ;;  %v3378_v30 = vpack.i.bf16 %v1086_v14, %v1085_v15 }
 0x18a   : > { %v3185_v53 = vpop.permute.xlu2 %3184  ;;  %v3177_v4 = vunpack.i.h.bf16 %v3175_v23  ;;  %v3176_v35 = vunpack.i.l.bf16 %v3175_v23 }
 0x18b   : > { %v3187_v20 = vunpack.i.h.bf16 %v3185_v53  ;;  %v3186_v42 = vunpack.i.l.bf16 %v3185_v53  ;;  %v3165_v24 = vpop.permute.xlu1 %3164 }
 0x18c   : > { %v5184_v45 = vsel %vm2112_vm7, %v5024_v48, %v3176_v35  ;;  %v5188_v8 = vsel %vm2112_vm7, %v5029_v55, %v3177_v4  ;;  %v3167_v41 = vunpack.i.h.bf16 %v3165_v24  ;;  %v3166_v33 = vunpack.i.l.bf16 %v3165_v24  ;;  %v6114_v35 = vld [vmem:[#allocation50_spill] sm:$0xff] }
 0x18d   : > { %v5192_v38 = vsel %vm2112_vm7, %v5003_v7, %v3187_v20  ;;  %v5196_v2 = vsel %vm2112_vm7, %v5000_v57, %v3186_v42  ;;  %v6111_v57 = vld [vmem:[#allocation15_spill] sm:$0xff]  ;;  %v6112_v55 = vmov 0.0  }
 0x18e   : > { %v5205_v48 = vsel %vm2112_vm7, %v5033_v37, %v3166_v33  ;;  %v5209_v7 = vsel %vm2112_vm7, %v5037_v21, %v3167_v41  ;;  %v1088_v21 = vld [vmem:[%s5201_s26 + $0x18] sm:$0xff] }
 0x18f   : > { %v3403_v4 = vpack.i.bf16 %v1088_v21, %v1087_v9 }
 0x190   : > { %3364 = vrot.lane.b32.xlu2 %v6112_v55, %s3645_s16 }
 0x191   : > { %3399 = vrot.lane.b32.xlu0 %v6111_v57, %s3647_s22  ;;  %v3190_v59 = vpop.permute.xlu0 %3189  ;;  %3389 = vrot.lane.b32.xlu1 %v6113_v1, %s3646_s17 }
 0x192   : > { %v3200_v39 = vpop.permute.xlu2 %3199  ;;  %v3192_v26 = vunpack.i.h.bf16 %v3190_v59  ;;  %v3191_v37 = vunpack.i.l.bf16 %v3190_v59 }
 0x193   : > { %v3202_v6 = vunpack.i.h.bf16 %v3200_v39  ;;  %v3201_v28 = vunpack.i.l.bf16 %v3200_v39  ;;  %v3180_v5 = vpop.permute.xlu1 %3179  ;;  %v1093_v39 = vld [vmem:[%s5201_s26 + $0x40] sm:$0xff] }
 0x194   : > { %v5223_v11 = vsel %vm2112_vm7, %v5082_v22, %v3191_v37  ;;  %v5227_v44 = vsel %vm2112_vm7, %v5085_v13, %v3192_v26  ;;  %v3182_v25 = vunpack.i.h.bf16 %v3180_v5  ;;  %v3181_v53 = vunpack.i.l.bf16 %v3180_v5  ;;  %v6117_v26 = vld [vmem:[#allocation62_spill] sm:$0xff] }
 0x195   : > { %v5231_v40 = vsel %vm2112_vm7, %v5057_v49, %v3202_v6  ;;  %v5235_v23 = vsel %vm2112_vm7, %v5054_v29, %v3201_v28 }
 0x196   : > { %v5239_v22 = vsel %vm2112_vm7, %v5089_v51, %v3181_v53  ;;  %v5243_v13 = vsel %vm2112_vm7, %v5093_v61, %v3182_v25 }
 0x198   : > { %3379 = vrot.lane.b32.xlu2 %v3378_v30, %s3648_s27 }
 0x199   : > { %3414 = vrot.lane.b32.xlu0 %v6114_v35, %s3646_s17  ;;  %v3205_v49 = vpop.permute.xlu0 %3204  ;;  %3404 = vrot.lane.b32.xlu1 %v3403_v4, %s3648_s27 }
 0x19a   : > { %v3215_v29 = vpop.permute.xlu2 %3214  ;;  %v3207_v20 = vunpack.i.h.bf16 %v3205_v49  ;;  %v3206_v42 = vunpack.i.l.bf16 %v3205_v49  ;;  %v6118_v49 = vld [vmem:[#allocation60_spill] sm:$0xff] }
 0x19b   : > { %v3217_v51 = vunpack.i.h.bf16 %v3215_v29  ;;  %v3216_v24 = vunpack.i.l.bf16 %v3215_v29  ;;  %v3195_v33 = vpop.permute.xlu1 %3194  ;;  %v1102_v29 = vld [vmem:[%s5201_s26 + $0x88] sm:$0xff] }
 0x19c   : > { %v5251_v61 = vsel %vm2112_vm7, %v5124_v46, %v3206_v42  ;;  %v5255_v41 = vsel %vm2112_vm7, %v5127_v50, %v3207_v20  ;;  %v3197_v59 = vunpack.i.h.bf16 %v3195_v33  ;;  %v3196_v15 = vunpack.i.l.bf16 %v3195_v33  ;;  %v6115_v50 = vld [vmem:[#allocation44_spill] sm:$0xff] }
 0x19d   : > { %v5259_v57 = vsel %vm2145_vm8, %v5139_v3, %v3216_v24  ;;  %v5263_v55 = vsel %vm2145_vm8, %v5143_v32, %v3217_v51  ;;  %v6116_v3 = vld [vmem:[#allocation56_spill] sm:$0xff]  ;;  %v1094_v32 = vld [vmem:[%s5201_s26 + $0x48] sm:$0xff] }
 0x19e   : > { %v5267_v14 = vsel %vm2112_vm7, %v5131_v54, %v3196_v15  ;;  %v5271_v46 = vsel %vm2112_vm7, %v5135_v34, %v3197_v59  ;;  %v3408_v30 = vpack.i.bf16 %v1094_v32, %v1093_v39  ;;  %v6119_v20 = vld [vmem:[#allocation48_spill] sm:$0xff]  ;;  %v1089_v59 = vld [vmem:[%s5201_s26 + $0x20] sm:$0xff]  ;;  %v1090_v15 = vld [vmem:[%s5201_s26 + $0x28] sm:$0xff] }
 0x1a0   : > { %3394 = vrot.lane.b32.xlu2 %v6116_v3, %s3647_s22 }
 0x1a1   : > { %3429 = vrot.lane.b32.xlu0 %v6115_v50, %s3646_s17  ;;  %v3220_v1 = vpop.permute.xlu0 %3219  ;;  %3419 = vrot.lane.b32.xlu1 %v6117_v26, %s3647_s22 }
 0x1a2   : > { %v3230_v37 = vpop.permute.xlu2 %3229  ;;  %v3222_v6 = vunpack.i.h.bf16 %v3220_v1  ;;  %v3221_v54 = vunpack.i.l.bf16 %v3220_v1 }
 0x1a3   : > { %v3232_v28 = vunpack.i.h.bf16 %v3230_v37  ;;  %v3231_v34 = vunpack.i.l.bf16 %v3230_v37  ;;  %v3210_v5 = vpop.permute.xlu1 %3209 }
 0x1a4   : > { %v5283_v9 = vsel %vm2145_vm8, %v5075_v10, %v3222_v6  ;;  %v5287_v21 = vsel %vm2145_vm8, %v5079_v43, %v3221_v54  ;;  %v3212_v4 = vunpack.i.h.bf16 %v3210_v5  ;;  %v3211_v35 = vunpack.i.l.bf16 %v3210_v5  ;;  %v6120_v54 = vld [vmem:[#allocation57_spill] sm:$0xff] }
 0x1a5   : > { %v5291_v25 = vsel %vm2145_vm8, %v5169_v17, %v3231_v34  ;;  %v5295_v53 = vsel %vm2145_vm8, %v5173_v60, %v3232_v28  ;;  %v1101_v60 = vld [vmem:[%s5201_s26 + $0x80] sm:$0xff]  ;;  %v3448_v6 = vpack.i.bf16 %v1090_v15, %v1089_v59  ;;  %v1103_v59 = vld [vmem:[%s5201_s26 + $0x90] sm:$0xff] }
 0x1a6   : > { %v5299_v10 = vsel %vm2145_vm8, %v5067_v58, %v3212_v4  ;;  %v5303_v43 = vsel %vm2145_vm8, %v5071_v47, %v3211_v35  ;;  %v3423_v1 = vpack.i.bf16 %v1102_v29, %v1101_v60  ;;  %v1095_v29 = vld [vmem:[%s5201_s26 + $0x50] sm:$0xff] }
 0x1a8   : > { %3409 = vrot.lane.b32.xlu2 %v3408_v30, %s3648_s27 }
 0x1a9   : > { %3444 = vrot.lane.b32.xlu0 %v6118_v49, %s3647_s22  ;;  %v3235_v17 = vpop.permute.xlu0 %3234  ;;  %3434 = vrot.lane.b32.xlu1 %v6119_v20, %s3646_s17  ;;  %v1096_v20 = vld [vmem:[%s5201_s26 + $0x58] sm:$0xff] }
 0x1aa   : > { %v3245_v42 = vpop.permute.xlu2 %3244  ;;  %v3237_v51 = vunpack.i.h.bf16 %v3235_v17  ;;  %v3236_v24 = vunpack.i.l.bf16 %v3235_v17 }
 0x1ab   : > { %v3247_v58 = vunpack.i.h.bf16 %v3245_v42  ;;  %v3246_v33 = vunpack.i.l.bf16 %v3245_v42  ;;  %v3225_v3 = vpop.permute.xlu1 %3224  ;;  %v6122_v42 = vld [vmem:[#allocation36_spill] sm:$0xff] }
 0x1ac   : > { %v5316_v47 = vsel %vm2145_vm8, %v5117_v19, %v3237_v51  ;;  %v5320_v50 = vsel %vm2145_vm8, %v5121_v16, %v3236_v24  ;;  %v3227_v26 = vunpack.i.h.bf16 %v3225_v3  ;;  %v3226_v37 = vunpack.i.l.bf16 %v3225_v3 }
 0x1ad   : > { %v5324_v39 = vsel %vm2145_vm8, %v5205_v48, %v3246_v33  ;;  %v5328_v32 = vsel %vm2145_vm8, %v5209_v7, %v3247_v58 }
 0x1ae   : > { %v5332_v19 = vsel %vm2145_vm8, %v5109_v52, %v3226_v37  ;;  %v5336_v16 = vsel %vm2145_vm8, %v5113_v27, %v3227_v26 }
 0x1b0   : > { %3424 = vrot.lane.b32.xlu2 %v3423_v1, %s3648_s27  ;;  %v3453_v1 = vpack.i.bf16 %v1096_v20, %v1095_v29 }
 0x1b1   : > { %3459 = vrot.lane.b32.xlu0 %v6120_v54, %s3646_s17  ;;  %v3250_v48 = vpop.permute.xlu0 %3249  ;;  %3449 = vrot.lane.b32.xlu1 %v3448_v6, %s3648_s27 }
 0x1b2   : > { %v3260_v7 = vpop.permute.xlu2 %3259  ;;  %v3252_v28 = vunpack.i.h.bf16 %v3250_v48  ;;  %v3251_v34 = vunpack.i.l.bf16 %v3250_v48 }
 0x1b3   : > { %v3262_v5 = vunpack.i.h.bf16 %v3260_v7  ;;  %v3261_v52 = vunpack.i.l.bf16 %v3260_v7  ;;  %v3240_v4 = vpop.permute.xlu1 %3239  ;;  %v6123_v7 = vld [vmem:[#allocation51_spill] sm:$0xff] }
 0x1b4   : > { %v5344_v30 = vsel %vm2145_vm8, %v5161_v36, %v3252_v28  ;;  %v5348_v27 = vsel %vm2145_vm8, %v5165_v56, %v3251_v34  ;;  %v3242_v17 = vunpack.i.h.bf16 %v3240_v4  ;;  %v3241_v60 = vunpack.i.l.bf16 %v3240_v4 }
 0x1b5   : > { %v5352_v35 = vsel %vm2145_vm8, %v5239_v22, %v3261_v52  ;;  %v5356_v49 = vsel %vm2145_vm8, %v5243_v13, %v3262_v5  ;;  %v6121_v22 = vld [vmem:[#allocation59_spill] sm:$0xff] }
 0x1b6   : > { %v5360_v36 = vsel %vm2145_vm8, %v5153_v62, %v3241_v60  ;;  %v5364_v56 = vsel %vm2145_vm8, %v5157_v12, %v3242_v17  ;;  %v1104_v12 = vld [vmem:[%s5201_s26 + $0x98] sm:$0xff] }
 0x1b7   : > { %v3478_v48 = vpack.i.bf16 %v1104_v12, %v1103_v59 }
 0x1b8   : > { %3439 = vrot.lane.b32.xlu2 %v6121_v22, %s3647_s22  ;;  %v1110_v22 = vld [vmem:[%s5201_s26 + $0xc8] sm:$0xff] }
 0x1b9   : > { %3474 = vrot.lane.b32.xlu0 %v4635_v31, %s3647_s22  ;;  %v3265_v13 = vpop.permute.xlu0 %3264  ;;  %3464 = vrot.lane.b32.xlu1 %v6122_v42, %s3646_s17  ;;  %v1091_v42 = vld [vmem:[%s5201_s26 + $0x30] sm:$0xff] }
 0x1ba   : > { %v3275_v51 = vpop.permute.xlu2 %3274  ;;  %v3267_v24 = vunpack.i.h.bf16 %v3265_v13  ;;  %v3266_v62 = vunpack.i.l.bf16 %v3265_v13  ;;  %v6124_v13 = vld [vmem:[#allocation54_spill] sm:$0xff] }
 0x1bb   : > { %v3277_v58 = vunpack.i.h.bf16 %v3275_v51  ;;  %v3276_v33 = vunpack.i.l.bf16 %v3275_v51  ;;  %v3255_v3 = vpop.permute.xlu1 %3254  ;;  %v1092_v51 = vld [vmem:[%s5201_s26 + $0x38] sm:$0xff] }
 0x1bc   : > { %v5378_v15 = vsel %vm2145_vm8, %v5192_v38, %v3267_v24  ;;  %v5382_v31 = vsel %vm2145_vm8, %v5196_v2, %v3266_v62  ;;  %v3257_v6 = vunpack.i.h.bf16 %v3255_v3  ;;  %v3256_v54 = vunpack.i.l.bf16 %v3255_v3  ;;  %v6125_v3 = vld [vmem:[#allocation46_spill] sm:$0xff] }
 0x1bd   : > { %v5386_v26 = vsel %vm2145_vm8, %v5267_v14, %v3276_v33  ;;  %v5390_v37 = vsel %vm2145_vm8, %v5271_v46, %v3277_v58  ;;  %v3508_v33 = vpack.i.bf16 %v1092_v51, %v1091_v42 }
 0x1be   : > { %v5394_v38 = vsel %vm2145_vm8, %v5184_v45, %v3256_v54  ;;  %v5398_v2 = vsel %vm2145_vm8, %v5188_v8, %v3257_v6 }
 0x1c0   : > { %3454 = vrot.lane.b32.xlu2 %v3453_v1, %s3648_s27 }
 0x1c1   : > { %3489 = vrot.lane.b32.xlu0 %v6123_v7, %s3646_s17  ;;  %v3280_v14 = vpop.permute.xlu0 %3279  ;;  %3479 = vrot.lane.b32.xlu1 %v3478_v48, %s3648_s27  ;;  %v2832_v7 = vld [vmem:[%s5891_s3 + $0x18] sm:$0xff] }
 0x1c2   : > { %v5404_v46 = vpop.permute.xlu2 %3289  ;;  %v3282_v28 = vunpack.i.h.bf16 %v3280_v14  ;;  %v3281_v34 = vunpack.i.l.bf16 %v3280_v14 }
 0x1c3   : > { %v3270_v5 = vpop.permute.xlu1 %3269 }
 0x1c4   : > { %v5408_v45 = vsel %vm2145_vm8, %v5231_v40, %v3282_v28  ;;  %v5412_v8 = vsel %vm2145_vm8, %v5235_v23, %v3281_v34  ;;  %v3272_v52 = vunpack.i.h.bf16 %v3270_v5  ;;  %v3271_v4 = vunpack.i.l.bf16 %v3270_v5  ;;  %v1109_v23 = vld [vmem:[%s5201_s26 + $0xc0] sm:$0xff] }
 0x1c5   : > { %v3483_v24 = vpack.i.bf16 %v1110_v22, %v1109_v23  ;;  %v6126_v22 = vld [vmem:[#allocation63_spill] sm:$0xff] }
 0x1c6   : > { %v5416_v17 = vsel %vm2145_vm8, %v5223_v11, %v3271_v4  ;;  %v5420_v60 = vsel %vm2145_vm8, %v5227_v44, %v3272_v52 }
 0x1c8   : > { %3469 = vrot.lane.b32.xlu2 %v4577_v63, %s3647_s22 }
 0x1c9   : > { %3504 = vrot.lane.b32.xlu0 %v4567_v18, %s3647_s22  ;;  %v5426_v40 = vpop.permute.xlu0 %3294  ;;  %3494 = vrot.lane.b32.xlu1 %v6124_v13, %s3646_s17  ;;  %v1097_v13 = vld [vmem:[%s5201_s26 + $0x60] sm:$0xff] }
 0x1ca   : > { %v3305_v29 = vpop.permute.xlu2 %3304 }
 0x1cb   : > { %v3307_v11 = vunpack.i.h.bf16 %v3305_v29  ;;  %v3306_v20 = vunpack.i.l.bf16 %v3305_v29  ;;  %v3285_v44 = vpop.permute.xlu1 %3284  ;;  %v1098_v29 = vld [vmem:[%s5201_s26 + $0x68] sm:$0xff] }
 0x1cc   : > { %v3287_v62 = vunpack.i.h.bf16 %v3285_v44  ;;  %v3286_v58 = vunpack.i.l.bf16 %v3285_v44 }
 0x1cd   : > { %v5436_v18 = vsel %vm2178_vm9, %v5332_v19, %v3306_v20  ;;  %v5440_v63 = vsel %vm2178_vm9, %v5336_v16, %v3307_v11  ;;  %v2808_v19 = vld [vmem:[%s5891_s3 + $0x20] sm:$0xf]  ;;  %v2833_v16 = vld [vmem:[%s5891_s3 + $0x20] sm:$0x30] }
 0x1ce   : > { %v5444_v59 = vsel %vm2145_vm8, %v5251_v61, %v3286_v58  ;;  %v5448_v12 = vsel %vm2145_vm8, %v5255_v41, %v3287_v62  ;;  %v2809_v1 = vor.u32 %v2833_v16, %v2808_v19  ;;  %v1106_v62 = vld [vmem:[%s5201_s26 + $0xa8] sm:$0xff]  ;;  %v3513_v16 = vpack.i.bf16 %v1098_v29, %v1097_v13  ;;  %v1111_v13 = vld [vmem:[%s5201_s26 + $0xd0] sm:$0xff]  ;;  %v1112_v29 = vld [vmem:[%s5201_s26 + $0xd8] sm:$0xff] }
 0x1cf   : > { %v2830_v58 = vld [vmem:[%s5891_s3 + $0x8] sm:$0xff] }
 0x1d0   : > { %3484 = vrot.lane.b32.xlu2 %v3483_v24, %s3648_s27  ;;  %v2415_v6 = vsel %vm978_vm3, %v2809_v1, 0  ;;  %v1105_v24 = vld [vmem:[%s5201_s26 + $0xa0] sm:$0xff] }
 0x1d1   : > { %3519 = vrot.lane.b32.xlu0 %v6125_v3, %s3646_s17  ;;  %v5459_v61 = vpop.permute.xlu0 %3309  ;;  %3509 = vrot.lane.b32.xlu1 %v3508_v33, %s3648_s27 }
 0x1d2   : > { %v3320_v41 = vpop.permute.xlu2 %3319  ;;  %2420 = vmatpush.bf16.msra.mxu0 %v2415_v6  ;;  %2834 = vmatpush.bf16.msra.mxu1 %v2415_v6 }
 0x1d3   : > { %v3322_v54 = vunpack.i.h.bf16 %v3320_v41  ;;  %v3321_v48 = vunpack.i.l.bf16 %v3320_v41  ;;  %v3300_v14 = vpop.permute.xlu1 %3299  ;;  %2835 = vmatpush.bf16.msra.mxu2 %v2415_v6  ;;  %2836 = vmatpush.bf16.msra.mxu3 %v2415_v6  ;;  %v6129_v6 = vld [vmem:[#allocation43_spill] sm:$0xff] }
 0x1d4   : > { %v3302_v5 = vunpack.i.h.bf16 %v3300_v14  ;;  %v3301_v52 = vunpack.i.l.bf16 %v3300_v14 }
 0x1d5   : > { %v5468_v28 = vsel %vm2178_vm9, %v5360_v36, %v3321_v48  ;;  %v5472_v34 = vsel %vm2178_vm9, %v5364_v56, %v3322_v54  ;;  %v2831_v36 = vld [vmem:[%s5891_s3 + $0x10] sm:$0xff]  ;;  %v6127_v56 = vld [vmem:[#allocation53_spill] sm:$0xff] }
 0x1d6   : > { %v5476_v4 = vsel %vm2178_vm9, %v5283_v9, %v3302_v5  ;;  %v5480_v23 = vsel %vm2178_vm9, %v5287_v21, %v3301_v52  ;;  %2421 = vmatpush.bf16.msra.mxu0 %v2832_v7  ;;  %2837 = vmatpush.bf16.msra.mxu1 %v2832_v7  ;;  %v6128_v21 = vld [vmem:[#allocation49_spill] sm:$0xff] }
 0x1d7   : > { %2838 = vmatpush.bf16.msra.mxu2 %v2832_v7  ;;  %2839 = vmatpush.bf16.msra.mxu3 %v2832_v7 }
 0x1d8   : > { %3499 = vrot.lane.b32.xlu2 %v6127_v56, %s3647_s22 }
 0x1d9   : > { %3534 = vrot.lane.b32.xlu0 %v6126_v22, %s3647_s22  ;;  %v3325_v9 = vpop.permute.xlu0 %3324  ;;  %3524 = vrot.lane.b32.xlu1 %v6128_v21, %s3646_s17  ;;  %v6132_v21 = vld [vmem:[#allocation22_spill] sm:$0xff] }
 0x1da   : > { %v3335_v11 = vpop.permute.xlu2 %3334  ;;  %v3327_v20 = vunpack.i.h.bf16 %v3325_v9  ;;  %v3326_v42 = vunpack.i.l.bf16 %v3325_v9  ;;  %2422 = vmatpush.bf16.msra.mxu0 %v2831_v36  ;;  %2840 = vmatpush.bf16.msra.mxu1 %v2831_v36  ;;  %v6131_v9 = vld [vmem:[#allocation61_spill] sm:$0xff] }
 0x1db   : > { %v3337_v51 = vunpack.i.h.bf16 %v3335_v11  ;;  %v3336_v44 = vunpack.i.l.bf16 %v3335_v11  ;;  %v5506_v19 = vpop.permute.xlu1 %3314  ;;  %2841 = vmatpush.bf16.msra.mxu2 %v2831_v36  ;;  %2842 = vmatpush.bf16.msra.mxu3 %v2831_v36 }
 0x1dc   : > { %v5500_v33 = vsel %vm2178_vm9, %v5324_v39, %v3326_v42  ;;  %v5504_v3 = vsel %vm2178_vm9, %v5328_v32, %v3327_v20  ;;  %v3538_v39 = vpack.i.bf16 %v1106_v62, %v1105_v24  ;;  %v2829_v32 = vld [vmem:[%s5891_s3] sm:$0xff]  ;;  %v3543_v62 = vpack.i.bf16 %v1112_v29, %v1111_v13 }
 0x1dd   : > { %v5510_v1 = vsel %vm2178_vm9, %v5394_v38, %v3336_v44  ;;  %v5514_v41 = vsel %vm2178_vm9, %v5398_v2, %v3337_v51  ;;  %v3291_v13 = vunpack.i.l.bf16 %v5404_v46  ;;  %v3292_v29 = vunpack.i.h.bf16 %v5404_v46 }
 0x1de   : > { %2423 = vmatpush.bf16.msra.mxu0 %v2830_v58  ;;  %2843 = vmatpush.bf16.msra.mxu1 %v2830_v58 }
 0x1df   : > { %2844 = vmatpush.bf16.msra.mxu2 %v2830_v58  ;;  %2845 = vmatpush.bf16.msra.mxu3 %v2830_v58  ;;  %v2180_v46 = vsel %vm2178_vm9, %v5299_v10, %v3292_v29 }
 0x1e0   : > { %3514 = vrot.lane.b32.xlu2 %v3513_v16, %s3648_s27 }
 0x1e1   : > { %3549 = vrot.lane.b32.xlu0 %v6129_v6, %s3646_s17  ;;  %3539 = vrot.lane.b32.xlu1 %v3538_v39, %s3648_s27 }
 0x1e2   : > { %v3350_v2 = vpop.permute.xlu2 %3349  ;;  %2424 = vmatpush.bf16.msra.mxu0 %v2829_v32  ;;  %2846 = vmatpush.bf16.msra.mxu1 %v2829_v32 }
 0x1e3   : > { %v3340_v38 = vpop.permute.xlu0 %3339  ;;  %v3352_v7 = vunpack.i.h.bf16 %v3350_v2  ;;  %v3351_v14 = vunpack.i.l.bf16 %v3350_v2  ;;  %v5531_v22 = vpop.permute.xlu1 %3329  ;;  %2847 = vmatpush.bf16.msra.mxu2 %v2829_v32  ;;  %2848 = vmatpush.bf16.msra.mxu3 %v2829_v32  ;;  %v1099_v32 = vld [vmem:[%s5201_s26 + $0x70] sm:$0xff] }
 0x1e4   : > { %v3342_v54 = vunpack.i.h.bf16 %v3340_v38  ;;  %v3341_v48 = vunpack.i.l.bf16 %v3340_v38  ;;  %v1100_v38 = vld [vmem:[%s5201_s26 + $0x78] sm:$0xff] }
 0x1e5   : > { %v5535_v36 = vsel %vm2178_vm9, %v5416_v17, %v3351_v14  ;;  %v5539_v56 = vsel %vm2178_vm9, %v5420_v60, %v3352_v7  ;;  %v3558_v7 = vpack.i.bf16 %v1100_v38, %v1099_v32  ;;  %v6135_v32 = vld [vmem:[#allocation64_spill] sm:$0xff] }
 0x1e6   : > { %v5525_v5 = vsel %vm2178_vm9, %v5352_v35, %v3341_v48  ;;  %v5529_v52 = vsel %vm2178_vm9, %v5356_v49, %v3342_v54  ;;  %v6130_v35 = vld [vmem:[#allocation55_spill] sm:$0xff]  ;;  %v1107_v54 = vld [vmem:[%s5201_s26 + $0xb0] sm:$0xff]  ;;  %v1108_v48 = vld [vmem:[%s5201_s26 + $0xb8] sm:$0xff] }
 0x1e8   : > { %3529 = vrot.lane.b32.xlu2 %v6131_v9, %s3647_s22 }
 0x1e9   : > { %3564 = vrot.lane.b32.xlu0 %v6130_v35, %s3646_s17  ;;  %3554 = vrot.lane.b32.xlu1 %v6132_v21, %s3647_s22 }
 0x1ea   : > { %v3365_v17 = vpop.permute.xlu2 %3364 }
 0x1eb   : > { %v3355_v49 = vpop.permute.xlu0 %3354  ;;  %v3367_v60 = vunpack.i.h.bf16 %v3365_v17  ;;  %v3366_v42 = vunpack.i.l.bf16 %v3365_v17  ;;  %v3345_v24 = vpop.permute.xlu1 %3344 }
 0x1ec   : > { %v3357_v11 = vunpack.i.h.bf16 %v3355_v49  ;;  %v3356_v20 = vunpack.i.l.bf16 %v3355_v49  ;;  %v3347_v39 = vunpack.i.h.bf16 %v3345_v24  ;;  %v3346_v6 = vunpack.i.l.bf16 %v3345_v24  ;;  %v6134_v49 = vld [vmem:[#allocation2_spill] sm:$0xff] }
 0x1ed   : > { %v5559_v58 = vsel %vm2178_vm9, %v5444_v59, %v3366_v42  ;;  %v5563_v16 = vsel %vm2178_vm9, %v5448_v12, %v3367_v60  ;;  %v6133_v12 = vld [vmem:[#allocation39_spill] sm:$0xff] }
 0x1ee   : > { %v5551_v51 = vsel %vm2178_vm9, %v5386_v26, %v3356_v20  ;;  %v5555_v44 = vsel %vm2178_vm9, %v5390_v37, %v3357_v11  ;;  %v5567_v26 = vsel %vm2178_vm9, %v5378_v15, %v3347_v39  ;;  %v5571_v37 = vsel %vm2178_vm9, %v5382_v31, %v3346_v6 }
 0x1ef   : > { %v3583_v31 = vpack.i.bf16 %v1108_v48, %v1107_v54  ;;  %v1113_v54 = vld [vmem:[%s5201_s26 + $0xe0] sm:$0xff]  ;;  %v1114_v48 = vld [vmem:[%s5201_s26 + $0xe8] sm:$0xff] }
 0x1f0   : > { %3544 = vrot.lane.b32.xlu2 %v3543_v62, %s3648_s27 }
 0x1f1   : > { %3579 = vrot.lane.b32.xlu0 %v4679_v0, %s3647_s22  ;;  %3569 = vrot.lane.b32.xlu1 %v6133_v12, %s3646_s17 }
 0x1f2   : > { %v3380_v2 = vpop.permute.xlu2 %3379 }
 0x1f3   : > { %v3370_v59 = vpop.permute.xlu0 %3369  ;;  %v3360_v15 = vpop.permute.xlu1 %3359  ;;  %v3382_v20 = vunpack.i.h.bf16 %v3380_v2  ;;  %v3381_v60 = vunpack.i.l.bf16 %v3380_v2 }
 0x1f4   : > { %v3362_v14 = vunpack.i.h.bf16 %v3360_v15  ;;  %v3361_v35 = vunpack.i.l.bf16 %v3360_v15  ;;  %v3372_v17 = vunpack.i.h.bf16 %v3370_v59  ;;  %v3371_v11 = vunpack.i.l.bf16 %v3370_v59 }
 0x1f5   : > { %v3312_v15 = vunpack.i.h.bf16 %v5459_v61 }
 0x1f6   : > { %v5584_v9 = vsel %vm2178_vm9, %v5408_v45, %v3362_v14  ;;  %v5588_v0 = vsel %vm2178_vm9, %v5412_v8, %v3361_v35  ;;  %v2179_v8 = vsel %vm2178_vm9, %v5303_v43, %v3291_v13  ;;  %v2213_v6 = vsel %vm2211_vm10, %v2180_v46, %v3372_v17  ;;  %v6136_v14 = vld [vmem:[#allocation3_spill] sm:$0xff] }
 0x1f7   : > { %v2212_v39 = vsel %vm2211_vm10, %v2179_v8, %v3371_v11  ;;  %v3588_v17 = vpack.i.bf16 %v1114_v48, %v1113_v54  ;;  %v2188_v46 = vsel %vm2178_vm9, %v5295_v53, %v3312_v15 }
 0x1f8   : > { %3559 = vrot.lane.b32.xlu2 %v3558_v7, %s3648_s27  ;;  %v3311_v7 = vunpack.i.l.bf16 %v5459_v61  ;;  %v3297_v61 = vunpack.i.h.bf16 %v5426_v40 }
 0x1f9   : > { %3594 = vrot.lane.b32.xlu0 %v6134_v49, %s3646_s17  ;;  %3584 = vrot.lane.b32.xlu1 %v3583_v31, %s3648_s27  ;;  %v3296_v31 = vunpack.i.l.bf16 %v5426_v40 }
 0x1fa   : > { %v5598_v45 = vpop.permute.xlu2 %3394 }
 0x1fb   : > { %v5595_v21 = vpop.permute.xlu0 %3384  ;;  %v3375_v42 = vpop.permute.xlu1 %3374 }
 0x1fc   : > { %v3377_v24 = vunpack.i.h.bf16 %v3375_v42  ;;  %v3376_v62 = vunpack.i.l.bf16 %v3375_v42  ;;  %v2187_v42 = vsel %vm2178_vm9, %v5291_v25, %v3311_v7  ;;  %v2181_v25 = vsel %vm2178_vm9, %v5259_v57, %v3296_v31 }
 0x1fe   : > { %v2245_v59 = vsel %vm2244_vm11, %v2212_v39, %v3376_v62  ;;  %v2246_v43 = vsel %vm2244_vm11, %v2213_v6, %v3377_v24  ;;  %v3387_v24 = vunpack.i.h.bf16 %v5595_v21  ;;  %v3386_v62 = vunpack.i.l.bf16 %v5595_v21  ;;  %v1116_v21 = vld [vmem:[%s5201_s26 + $0xf8] sm:$0xff] }
 0x1ff   : > { %v2278_v38 = vsel %vm2277_vm12, %v2245_v59, %v3381_v60  ;;  %v2279_v12 = vsel %vm2277_vm12, %v2246_v43, %v3382_v20 }
 0x200   : > { %3574 = vrot.lane.b32.xlu2 %v6135_v32, %s3647_s22  ;;  %v2310_v10 = vpack.c.bf16 %v2279_v12, %v2278_v38  ;;  %v1115_v38 = vld [vmem:[%s5201_s26 + $0xf0] sm:$0xff]  ;;  %v2182_v12 = vsel %vm2178_vm9, %v5263_v55, %v3297_v61  ;;  %v2214_v15 = vsel %vm2211_vm10, %v2181_v25, %v3386_v62 }
 0x201   : > { %3599 = vrot.lane.b32.xlu1 %v6136_v14, %s3647_s22  ;;  %v2215_v57 = vsel %vm2211_vm10, %v2182_v12, %v3387_v24  ;;  %v3603_v14 = vpack.i.bf16 %v1116_v21, %v1115_v38  ;;  %s295_s22 = scalar_lea.vmem %s5893_s5, %s2789_s15 }
 0x202   : > { %v3410_v35 = vpop.permute.xlu2 %3409  ;;  %2810 = vmatmul.msk.bf16.vlgmr.msra.gmra.mxu0 %vm2365_vm13, %v2310_v10  ;;  %v3397_v10 = vunpack.i.h.bf16 %v5598_v45 }
 0x203   : > { %v3400_v2 = vpop.permute.xlu0 %3399  ;;  %v3390_v29 = vpop.permute.xlu1 %3389  ;;  %v3412_v11 = vunpack.i.h.bf16 %v3410_v35  ;;  %v3411_v8 = vunpack.i.l.bf16 %v3410_v35 }
 0x204   : > { %v3402_v49 = vunpack.i.h.bf16 %v3400_v2  ;;  %v3401_v13 = vunpack.i.l.bf16 %v3400_v2  ;;  %v3392_v20 = vunpack.i.h.bf16 %v3390_v29  ;;  %v3391_v60 = vunpack.i.l.bf16 %v3390_v29 }
 0x205   : > { %v3396_v2 = vunpack.i.l.bf16 %v5598_v45  ;;  %v2248_v55 = vsel %vm2244_vm11, %v2215_v57, %v3397_v10 }
 0x206   : > { %v2220_v39 = vsel %vm2211_vm10, %v2187_v42, %v3391_v60  ;;  %v2221_v6 = vsel %vm2211_vm10, %v2188_v46, %v3392_v20 }
 0x207   : > { %v2253_v59 = vsel %vm2244_vm11, %v2220_v39, %v3401_v13  ;;  %v2254_v40 = vsel %vm2244_vm11, %v2221_v6, %v3402_v49  ;;  %v2247_v49 = vsel %vm2244_vm11, %v2214_v15, %v3396_v2 }
 0x208   : > { %3589 = vrot.lane.b32.xlu2 %v3588_v17, %s3648_s27  ;;  %v2286_v53 = vsel %vm2277_vm12, %v2253_v59, %v3411_v8  ;;  %v2287_v32 = vsel %vm2277_vm12, %v2254_v40, %v3412_v11  ;;  %v3332_v17 = vunpack.i.h.bf16 %v5531_v22  ;;  %v3331_v11 = vunpack.i.l.bf16 %v5531_v22 }
 0x209   : > { %v2314_v48 = vpack.c.bf16 %v2287_v32, %v2286_v53 }
 0x20a   : > { %v3425_v54 = vpop.permute.xlu2 %3424  ;;  %v2196_v62 = vsel %vm2178_vm9, %v5344_v30, %v3332_v17  ;;  %v2195_v39 = vsel %vm2178_vm9, %v5348_v27, %v3331_v11  ;;  %v3317_v30 = vunpack.i.h.bf16 %v5506_v19  ;;  %v3316_v27 = vunpack.i.l.bf16 %v5506_v19 }
 0x20b   : > { %v3415_v43 = vpop.permute.xlu0 %3414  ;;  %v3405_v7 = vpop.permute.xlu1 %3404  ;;  %2814 = vmatmul.msk.bf16.vlgmr.msra.gmra.mxu1 %vm2365_vm13, %v2314_v48  ;;  %v3427_v42 = vunpack.i.h.bf16 %v3425_v54  ;;  %v3426_v46 = vunpack.i.l.bf16 %v3425_v54 }
 0x20c   : > { %v3407_v35 = vunpack.i.h.bf16 %v3405_v7  ;;  %v3406_v31 = vunpack.i.l.bf16 %v3405_v7  ;;  %v3417_v20 = vunpack.i.h.bf16 %v3415_v43  ;;  %v3416_v60 = vunpack.i.l.bf16 %v3415_v43 }
 0x20e   : > { %v2280_v13 = vsel %vm2277_vm12, %v2247_v49, %v3406_v31  ;;  %v2281_v45 = vsel %vm2277_vm12, %v2248_v55, %v3407_v35  ;;  %v2228_v40 = vsel %vm2211_vm10, %v2195_v39, %v3416_v60  ;;  %v2229_v22 = vsel %vm2211_vm10, %v2196_v62, %v3417_v20 }
 0x20f   : > { %v2311_v29 = vpack.c.bf16 %v2281_v45, %v2280_v13  ;;  %v2189_v35 = vsel %vm2178_vm9, %v5320_v50, %v3316_v27 }
 0x210   : > { %3604 = vrot.lane.b32.xlu2 %v3603_v14, %s3648_s27  ;;  %v2190_v14 = vsel %vm2178_vm9, %v5316_v47, %v3317_v30 }
 0x212   : > { %v3440_v61 = vpop.permute.xlu2 %3439  ;;  %2811 = vmatmul.msk.bf16.gmra.mxu0 %vm2365_vm13, %v2311_v29 }
 0x213   : > { %v3430_v8 = vpop.permute.xlu0 %3429  ;;  %v3420_v24 = vpop.permute.xlu1 %3419  ;;  %v3442_v20 = vunpack.i.h.bf16 %v3440_v61  ;;  %v3441_v47 = vunpack.i.l.bf16 %v3440_v61 }
 0x214   : > { %v3422_v6 = vunpack.i.h.bf16 %v3420_v24  ;;  %v3421_v59 = vunpack.i.l.bf16 %v3420_v24  ;;  %v3432_v31 = vunpack.i.h.bf16 %v3430_v8  ;;  %v3431_v49 = vunpack.i.l.bf16 %v3430_v8 }
 0x216   : > { %v2261_v25 = vsel %vm2244_vm11, %v2228_v40, %v3421_v59  ;;  %v2262_v43 = vsel %vm2244_vm11, %v2229_v22, %v3422_v6  ;;  %v2216_v50 = vsel %vm2211_vm10, %v5480_v23, %v3431_v49  ;;  %v2217_v8 = vsel %vm2211_vm10, %v5476_v4, %v3432_v31 }
 0x217   : > { %v2294_v53 = vsel %vm2277_vm12, %v2261_v25, %v3426_v46  ;;  %v2295_v32 = vsel %vm2277_vm12, %v2262_v43, %v3427_v42  ;;  %v2249_v39 = vsel %vm2244_vm11, %v2216_v50, %v3441_v47  ;;  %v2250_v6 = vsel %vm2244_vm11, %v2217_v8, %v3442_v20 }
 0x218   : > { %v2318_v38 = vpack.c.bf16 %v2295_v32, %v2294_v53 }
 0x21a   : > { %v3455_v12 = vpop.permute.xlu2 %3454  ;;  %2818 = vmatmul.msk.bf16.vlgmr.msra.gmra.mxu2 %vm2365_vm13, %v2318_v38 }
 0x21b   : > { %v3445_v21 = vpop.permute.xlu0 %3444  ;;  %v3435_v54 = vpop.permute.xlu1 %3434  ;;  %v3457_v48 = vunpack.i.h.bf16 %v3455_v12  ;;  %v3456_v15 = vunpack.i.l.bf16 %v3455_v12 }
 0x21c   : > { %v3447_v10 = vunpack.i.h.bf16 %v3445_v21  ;;  %v3446_v2 = vunpack.i.l.bf16 %v3445_v21  ;;  %v3437_v57 = vunpack.i.h.bf16 %v3435_v54  ;;  %v3436_v7 = vunpack.i.l.bf16 %v3435_v54 }
 0x21e   : > { %v2222_v19 = vsel %vm2211_vm10, %v2189_v35, %v3436_v7  ;;  %v2223_v55 = vsel %vm2211_vm10, %v2190_v14, %v3437_v57 }
 0x21f   : > { %v2255_v13 = vsel %vm2244_vm11, %v2222_v19, %v3446_v2  ;;  %v2256_v45 = vsel %vm2244_vm11, %v2223_v55, %v3447_v10 }
 0x220   : > { %v2288_v17 = vsel %vm2277_vm12, %v2255_v13, %v3456_v15  ;;  %v2289_v11 = vsel %vm2277_vm12, %v2256_v45, %v3457_v48 }
 0x221   : > { %v2315_v42 = vpack.c.bf16 %v2289_v11, %v2288_v17 }
 0x222   : > { %v3470_v60 = vpop.permute.xlu2 %3469 }
 0x223   : > { %v3460_v29 = vpop.permute.xlu0 %3459  ;;  %v3450_v46 = vpop.permute.xlu1 %3449  ;;  %2815 = vmatmul.msk.bf16.gmra.mxu1 %vm2365_vm13, %v2315_v42  ;;  %v3472_v7 = vunpack.i.h.bf16 %v3470_v60  ;;  %v3471_v14 = vunpack.i.l.bf16 %v3470_v60 }
 0x224   : > { %v3452_v24 = vunpack.i.h.bf16 %v3450_v46  ;;  %v3451_v62 = vunpack.i.l.bf16 %v3450_v46  ;;  %v3462_v30 = vunpack.i.h.bf16 %v3460_v29  ;;  %v3461_v27 = vunpack.i.l.bf16 %v3460_v29 }
 0x226   : > { %v2282_v59 = vsel %vm2277_vm12, %v2249_v39, %v3451_v62  ;;  %v2283_v61 = vsel %vm2277_vm12, %v2250_v6, %v3452_v24  ;;  %v2230_v49 = vsel %vm2211_vm10, %v5510_v1, %v3461_v27 }
 0x227   : > { %v2312_v40 = vpack.c.bf16 %v2283_v61, %v2282_v59  ;;  %v2263_v13 = vsel %vm2244_vm11, %v2230_v49, %v3471_v14 }
 0x229   : > { %2812 = vmatmul.msk.bf16.gmra.mxu0 %vm2365_vm13, %v2312_v40 }
 0x22a   : > { %v3485_v23 = vpop.permute.xlu2 %3484 }
 0x22b   : > { %v3475_v22 = vpop.permute.xlu0 %3474  ;;  %v3465_v43 = vpop.permute.xlu1 %3464  ;;  %v3487_v53 = vunpack.i.h.bf16 %v3485_v23  ;;  %v3486_v32 = vunpack.i.l.bf16 %v3485_v23 }
 0x22c   : > { %v3477_v25 = vunpack.i.h.bf16 %v3475_v22  ;;  %v3476_v4 = vunpack.i.l.bf16 %v3475_v22  ;;  %v3467_v38 = vunpack.i.h.bf16 %v3465_v43  ;;  %v3466_v21 = vunpack.i.l.bf16 %v3465_v43 }
 0x22e   : > { %v2236_v12 = vsel %vm2211_vm10, %v5535_v36, %v3466_v21  ;;  %v2237_v10 = vsel %vm2211_vm10, %v5539_v56, %v3467_v38  ;;  %v2231_v36 = vsel %vm2211_vm10, %v5514_v41, %v3462_v30 }
 0x22f   : > { %v2269_v2 = vsel %vm2244_vm11, %v2236_v12, %v3476_v4  ;;  %v2270_v54 = vsel %vm2244_vm11, %v2237_v10, %v3477_v25  ;;  %v2264_v45 = vsel %vm2244_vm11, %v2231_v36, %v3472_v7 }
 0x230   : > { %v2302_v15 = vsel %vm2277_vm12, %v2269_v2, %v3486_v32  ;;  %v2303_v57 = vsel %vm2277_vm12, %v2270_v54, %v3487_v53 }
 0x231   : > { %v2322_v31 = vpack.c.bf16 %v2303_v57, %v2302_v15 }
 0x232   : > { %v3500_v35 = vpop.permute.xlu2 %3499 }
 0x233   : > { %v3490_v48 = vpop.permute.xlu0 %3489  ;;  %v3480_v56 = vpop.permute.xlu1 %3479  ;;  %2822 = vmatmul.msk.bf16.vlgmr.msra.gmra.mxu3 %vm2365_vm13, %v2322_v31  ;;  %v3502_v25 = vunpack.i.h.bf16 %v3500_v35  ;;  %v3501_v4 = vunpack.i.l.bf16 %v3500_v35 }
 0x234   : > { %v3482_v19 = vunpack.i.h.bf16 %v3480_v56  ;;  %v3481_v55 = vunpack.i.l.bf16 %v3480_v56  ;;  %v3492_v24 = vunpack.i.h.bf16 %v3490_v48  ;;  %v3491_v62 = vunpack.i.l.bf16 %v3490_v48 }
 0x236   : > { %v2296_v29 = vsel %vm2277_vm12, %v2263_v13, %v3481_v55  ;;  %v2297_v17 = vsel %vm2277_vm12, %v2264_v45, %v3482_v19  ;;  %v2218_v32 = vsel %vm2211_vm10, %v5436_v18, %v3491_v62 }
 0x237   : > { %v2319_v11 = vpack.c.bf16 %v2297_v17, %v2296_v29  ;;  %v2251_v30 = vsel %vm2244_vm11, %v2218_v32, %v3501_v4 }
 0x239   : > { %2819 = vmatmul.msk.bf16.gmra.mxu2 %vm2365_vm13, %v2319_v11 }
 0x23a   : > { %v3515_v1 = vpop.permute.xlu2 %3514 }
 0x23b   : > { %v3505_v20 = vpop.permute.xlu0 %3504  ;;  %v3495_v60 = vpop.permute.xlu1 %3494  ;;  %v3517_v42 = vunpack.i.h.bf16 %v3515_v1  ;;  %v3516_v50 = vunpack.i.l.bf16 %v3515_v1 }
 0x23c   : > { %v3507_v47 = vunpack.i.h.bf16 %v3505_v20  ;;  %v3506_v41 = vunpack.i.l.bf16 %v3505_v20  ;;  %v3497_v8 = vunpack.i.h.bf16 %v3495_v60  ;;  %v3496_v46 = vunpack.i.l.bf16 %v3495_v60 }
 0x23e   : > { %v2224_v39 = vsel %vm2211_vm10, %v5468_v28, %v3496_v46  ;;  %v2225_v6 = vsel %vm2211_vm10, %v5472_v34, %v3497_v8  ;;  %v2219_v28 = vsel %vm2211_vm10, %v5440_v63, %v3492_v24 }
 0x23f   : > { %v2257_v59 = vsel %vm2244_vm11, %v2224_v39, %v3506_v41  ;;  %v2258_v61 = vsel %vm2244_vm11, %v2225_v6, %v3507_v47  ;;  %v2252_v27 = vsel %vm2244_vm11, %v2219_v28, %v3502_v25 }
 0x240   : > { %v2290_v22 = vsel %vm2277_vm12, %v2257_v59, %v3516_v50  ;;  %v2291_v23 = vsel %vm2277_vm12, %v2258_v61, %v3517_v42 }
 0x241   : > { %v2316_v53 = vpack.c.bf16 %v2291_v23, %v2290_v22 }
 0x242   : > { %v3530_v43 = vpop.permute.xlu2 %3529 }
 0x243   : > { %v3520_v40 = vpop.permute.xlu0 %3519  ;;  %v3510_v34 = vpop.permute.xlu1 %3509  ;;  %2816 = vmatmul.msk.bf16.gmra.mxu1 %vm2365_vm13, %v2316_v53  ;;  %v3532_v17 = vunpack.i.h.bf16 %v3530_v43  ;;  %v3531_v11 = vunpack.i.l.bf16 %v3530_v43 }
 0x244   : > { %v3512_v38 = vunpack.i.h.bf16 %v3510_v34  ;;  %v3511_v21 = vunpack.i.l.bf16 %v3510_v34  ;;  %v3522_v31 = vunpack.i.h.bf16 %v3520_v40  ;;  %v3521_v49 = vunpack.i.l.bf16 %v3520_v40 }
 0x246   : > { %v2284_v12 = vsel %vm2277_vm12, %v2251_v30, %v3511_v21  ;;  %v2285_v10 = vsel %vm2277_vm12, %v2252_v27, %v3512_v38  ;;  %v2232_v47 = vsel %vm2211_vm10, %v5525_v5, %v3521_v49 }
 0x247   : > { %v2313_v2 = vpack.c.bf16 %v2285_v10, %v2284_v12  ;;  %v2265_v42 = vsel %vm2244_vm11, %v2232_v47, %v3531_v11 }
 0x249   : > { %2813 = vmatmul.msk.bf16.gmra.mxu0 %vm2365_vm13, %v2313_v2 }
 0x24a   : > { %v3545_v18 = vpop.permute.xlu2 %3544 }
 0x24b   : > { %v3535_v54 = vpop.permute.xlu0 %3534  ;;  %v3525_v15 = vpop.permute.xlu1 %3524  ;;  %v3547_v57 = vunpack.i.h.bf16 %v3545_v18  ;;  %v3546_v7 = vunpack.i.l.bf16 %v3545_v18 }
 0x24c   : > { %v3537_v48 = vunpack.i.h.bf16 %v3535_v54  ;;  %v3536_v63 = vunpack.i.l.bf16 %v3535_v54  ;;  %v3527_v14 = vunpack.i.h.bf16 %v3525_v15  ;;  %v3526_v35 = vunpack.i.l.bf16 %v3525_v15 }
 0x24e   : > { %v2238_v36 = vsel %vm2211_vm10, %v5551_v51, %v3526_v35  ;;  %v2239_v56 = vsel %vm2211_vm10, %v5555_v44, %v3527_v14  ;;  %v2233_v51 = vsel %vm2211_vm10, %v5529_v52, %v3522_v31 }
 0x24f   : > { %v2271_v19 = vsel %vm2244_vm11, %v2238_v36, %v3536_v63  ;;  %v2272_v55 = vsel %vm2244_vm11, %v2239_v56, %v3537_v48  ;;  %v2266_v50 = vsel %vm2244_vm11, %v2233_v51, %v3532_v17 }
 0x250   : > { %v2304_v45 = vsel %vm2277_vm12, %v2271_v19, %v3546_v7  ;;  %v2305_v29 = vsel %vm2277_vm12, %v2272_v55, %v3547_v57 }
 0x251   : > { %v2323_v1 = vpack.c.bf16 %v2305_v29, %v2304_v45 }
 0x252   : > { %v3560_v20 = vpop.permute.xlu2 %3559 }
 0x253   : > { %v3550_v13 = vpop.permute.xlu0 %3549  ;;  %v3540_v44 = vpop.permute.xlu1 %3539  ;;  %2823 = vmatmul.msk.bf16.gmra.mxu3 %vm2365_vm13, %v2323_v1  ;;  %v3562_v6 = vunpack.i.h.bf16 %v3560_v20  ;;  %v3561_v59 = vunpack.i.l.bf16 %v3560_v20 }
 0x254   : > { %v3542_v41 = vunpack.i.h.bf16 %v3540_v44  ;;  %v3541_v60 = vunpack.i.l.bf16 %v3540_v44  ;;  %v3552_v39 = vunpack.i.h.bf16 %v3550_v13  ;;  %v3551_v5 = vunpack.i.l.bf16 %v3550_v13 }
 0x256   : > { %v2298_v8 = vsel %vm2277_vm12, %v2265_v42, %v3541_v60  ;;  %v2299_v46 = vsel %vm2277_vm12, %v2266_v50, %v3542_v41  ;;  %v2226_v23 = vsel %vm2211_vm10, %v5500_v33, %v3551_v5  ;;  %v2227_v25 = vsel %vm2211_vm10, %v5504_v3, %v3552_v39 }
 0x257   : > { %v2320_v24 = vpack.c.bf16 %v2299_v46, %v2298_v8 }
 0x259   : > { %2820 = vmatmul.msk.bf16.gmra.mxu2 %vm2365_vm13, %v2320_v24 }
 0x25a   : > { %v3575_v52 = vpop.permute.xlu2 %3574 }
 0x25b   : > { %v3565_v62 = vpop.permute.xlu0 %3564  ;;  %v3555_v61 = vpop.permute.xlu1 %3554  ;;  %v3577_v14 = vunpack.i.h.bf16 %v3575_v52  ;;  %v3576_v35 = vunpack.i.l.bf16 %v3575_v52 }
 0x25c   : > { %v3557_v40 = vunpack.i.h.bf16 %v3555_v61  ;;  %v3556_v22 = vunpack.i.l.bf16 %v3555_v61  ;;  %v3567_v2 = vunpack.i.h.bf16 %v3565_v62  ;;  %v3566_v54 = vunpack.i.l.bf16 %v3565_v62 }
 0x25e   : > { %v2259_v4 = vsel %vm2244_vm11, %v2226_v23, %v3556_v22  ;;  %v2260_v43 = vsel %vm2244_vm11, %v2227_v25, %v3557_v40  ;;  %v2234_v49 = vsel %vm2211_vm10, %v5571_v37, %v3566_v54 }
 0x25f   : > { %v2292_v53 = vsel %vm2277_vm12, %v2259_v4, %v3561_v59  ;;  %v2293_v32 = vsel %vm2277_vm12, %v2260_v43, %v3562_v6  ;;  %v2267_v19 = vsel %vm2244_vm11, %v2234_v49, %v3576_v35 }
 0x260   : > { %v2317_v28 = vpack.c.bf16 %v2293_v32, %v2292_v53 }
 0x262   : > { %v3590_v38 = vpop.permute.xlu2 %3589  ;;  %2817 = vmatmul.msk.bf16.gmra.mxu1 %vm2365_vm13, %v2317_v28 }
 0x263   : > { %v3580_v34 = vpop.permute.xlu0 %3579  ;;  %v3570_v27 = vpop.permute.xlu1 %3569  ;;  %v3592_v10 = vunpack.i.h.bf16 %v3590_v38  ;;  %v3591_v3 = vunpack.i.l.bf16 %v3590_v38 }
 0x264   : > { %v3582_v21 = vunpack.i.h.bf16 %v3580_v34  ;;  %v3581_v30 = vunpack.i.l.bf16 %v3580_v34  ;;  %v3572_v33 = vunpack.i.h.bf16 %v3570_v27  ;;  %v3571_v12 = vunpack.i.l.bf16 %v3570_v27 }
 0x266   : > { %v2240_v18 = vsel %vm2211_vm10, %v5588_v0, %v3571_v12  ;;  %v2241_v48 = vsel %vm2211_vm10, %v5584_v9, %v3572_v33  ;;  %v2235_v0 = vsel %vm2211_vm10, %v5567_v26, %v3567_v2 }
 0x267   : > { %v2273_v63 = vsel %vm2244_vm11, %v2240_v18, %v3581_v30  ;;  %v2274_v15 = vsel %vm2244_vm11, %v2241_v48, %v3582_v21  ;;  %v2268_v55 = vsel %vm2244_vm11, %v2235_v0, %v3577_v14 }
 0x268   : > { %v2306_v57 = vsel %vm2277_vm12, %v2273_v63, %v3591_v3  ;;  %v2307_v7 = vsel %vm2277_vm12, %v2274_v15, %v3592_v10 }
 0x269   : > { %v2324_v31 = vpack.c.bf16 %v2307_v7, %v2306_v57 }
 0x26a   : > { %v3605_v11 = vpop.permute.xlu2 %3604 }
 0x26b   : > { %v3585_v36 = vpop.permute.xlu1 %3584  ;;  %2824 = vmatmul.msk.bf16.gmra.mxu3 %vm2365_vm13, %v2324_v31  ;;  %v3595_v13 = vpop.permute.xlu0 %3594  ;;  %v3607_v1 = vunpack.i.h.bf16 %v3605_v11  ;;  %v3606_v47 = vunpack.i.l.bf16 %v3605_v11 }
 0x26c   : > { %v3587_v9 = vunpack.i.h.bf16 %v3585_v36  ;;  %v3586_v56 = vunpack.i.l.bf16 %v3585_v36  ;;  %v3597_v37 = vunpack.i.h.bf16 %v3595_v13  ;;  %v3596_v20 = vunpack.i.l.bf16 %v3595_v13 }
 0x26e   : > { %v2300_v45 = vsel %vm2277_vm12, %v2267_v19, %v3586_v56  ;;  %v2301_v29 = vsel %vm2277_vm12, %v2268_v55, %v3587_v9  ;;  %v2242_v41 = vsel %vm2211_vm10, %v5559_v58, %v3596_v20  ;;  %v2243_v60 = vsel %vm2211_vm10, %v5563_v16, %v3597_v37 }
 0x26f   : > { %v2321_v17 = vpack.c.bf16 %v2301_v29, %v2300_v45 }
 0x271   : > { %2821 = vmatmul.msk.bf16.gmra.mxu2 %vm2365_vm13, %v2321_v17 }
 0x273   : > { %v3600_v26 = vpop.permute.xlu1 %3599 }
 0x274   : > { %v3602_v51 = vunpack.i.h.bf16 %v3600_v26  ;;  %v3601_v44 = vunpack.i.l.bf16 %v3600_v26 }
 0x276   : > { %v2275_v42 = vsel %vm2244_vm11, %v2242_v41, %v3601_v44  ;;  %v2276_v50 = vsel %vm2244_vm11, %v2243_v60, %v3602_v51 }
 0x277   : > { %v2308_v8 = vsel %vm2277_vm12, %v2275_v42, %v3606_v47  ;;  %v2309_v46 = vsel %vm2277_vm12, %v2276_v50, %v3607_v1 }
 0x278   : > { %v2325_v24 = vpack.c.bf16 %v2309_v46, %v2308_v8 }
 0x27b   : > { %2825 = vmatmul.msk.bf16.gmra.mxu3 %vm2365_vm13, %v2325_v24 }
 0x27f   : > { %v2426_v62 = vpop.f32.mrf.mxu0 }
 0x280   : > { %v2575_v23 = vmul.f32 %v2426_v62, %v2426_v62  ;;  %v2506_v43 = vsel %vm2046_vm5, %v2426_v62, 0.0 }
 0x282   : > { %v2607_v38 = vsel %vm2046_vm5, %v2575_v23, 0.0 }
 0x287   : > { %v2428_v39 = vpop.f32.mrf.mxu0 }
 0x288   : > { %v2446_v52 = vpop.f32.mrf.mxu1  ;;  %v2576_v22 = vmul.f32 %v2428_v39, %v2428_v39  ;;  %v2507_v25 = vsel %vm2046_vm5, %v2428_v39, 0.0 }
 0x289   : > { %v2508_v34 = vadd.f32 %v2507_v25, %v2506_v43  ;;  %v2583_v17 = vmul.f32 %v2446_v52, %v2446_v52  ;;  %v2521_v47 = vsel %vm2046_vm5, %v2446_v52, 0.0 }
 0x28a   : > { %v2608_v53 = vsel %vm2046_vm5, %v2576_v22, 0.0 }
 0x28b   : > { %v2609_v12 = vadd.f32 %v2608_v53, %v2607_v38  ;;  %v2622_v42 = vsel %vm2046_vm5, %v2583_v17, 0.0 }
 0x28f   : > { %v2431_v5 = vpop.f32.mrf.mxu0 }
 0x290   : > { %v2448_v58 = vpop.f32.mrf.mxu1  ;;  %v2577_v4 = vmul.f32 %v2431_v5, %v2431_v5  ;;  %v2509_v32 = vsel %vm2046_vm5, %v2431_v5, 0.0 }
 0x291   : > { %v2510_v10 = vadd.f32 %v2509_v32, %v2508_v34  ;;  %v2584_v44 = vmul.f32 %v2448_v58, %v2448_v58  ;;  %v2523_v50 = vsel %vm2046_vm5, %v2448_v58, 0.0 }
 0x292   : > { %v2610_v21 = vsel %vm2046_vm5, %v2577_v4, 0.0 }
 0x293   : > { %v2611_v48 = vadd.f32 %v2610_v21, %v2609_v12  ;;  %v2624_v62 = vsel %vm2046_vm5, %v2584_v44, 0.0 }
 0x297   : > { %v2433_v6 = vpop.f32.mrf.mxu0 }
 0x298   : > { %v2578_v28 = vmul.f32 %v2433_v6, %v2433_v6  ;;  %v2511_v30 = vsel %vm2046_vm5, %v2433_v6, 0.0 }
 0x299   : > { %v2512_v63 = vadd.f32 %v2511_v30, %v2510_v10 }
 0x29a   : > { %v2612_v2 = vsel %vm2046_vm5, %v2578_v28, 0.0 }
 0x29b   : > { %v2613_v35 = vadd.f32 %v2612_v2, %v2611_v48 }
 0x29d   : > { %v5776_v16 = vpop.f32.mrf.mxu2 }
 0x2a0   : > { %v2451_v61 = vpop.f32.mrf.mxu1 }
 0x2a1   : > { %v2585_v39 = vmul.f32 %v2451_v61, %v2451_v61  ;;  %v2525_v52 = vsel %vm2046_vm5, %v2451_v61, 0.0 }
 0x2a5   : > { %v5787_v15 = vpop.f32.mrf.mxu2 }
 0x2a6   : > { %v2436_v59 = vpop.f32.mrf.mxu0 }
 0x2a7   : > { %v2579_v27 = vmul.f32 %v2436_v59, %v2436_v59  ;;  %v2513_v54 = vsel %vm2046_vm5, %v2436_v59, 0.0 }
 0x2a8   : > { %v2453_v33 = vpop.f32.mrf.mxu1  ;;  %v2514_v31 = vadd.f32 %v2513_v54, %v2512_v63 }
 0x2a9   : > { %v2614_v57 = vsel %vm2046_vm5, %v2579_v27, 0.0  ;;  %v2586_v22 = vmul.f32 %v2453_v33, %v2453_v33  ;;  %v2527_v4 = vsel %vm2046_vm5, %v2453_v33, 0.0 }
 0x2aa   : > { %v2615_v9 = vadd.f32 %v2614_v57, %v2613_v35 }
 0x2ab   : > { %v2628_v53 = vsel %vm2046_vm5, %v2586_v22, 0.0 }
 0x2ae   : > { %v2438_v40 = vpop.f32.mrf.mxu0 }
 0x2af   : > { %v2580_v18 = vmul.f32 %v2438_v40, %v2438_v40  ;;  %v2515_v7 = vsel %vm2046_vm5, %v2438_v40, 0.0  ;;  %v2626_v40 = vsel %vm2046_vm5, %v2585_v39, 0.0 }
 0x2b0   : > { %v2516_v56 = vadd.f32 %v2515_v7, %v2514_v31 }
 0x2b1   : > { %v2616_v0 = vsel %vm2046_vm5, %v2580_v18, 0.0 }
 0x2b2   : > { %v2617_v13 = vadd.f32 %v2616_v0, %v2615_v9  ;;  %v2537_v9 = vsel %vm2046_vm5, %v5776_v16, 0.0 }
 0x2b6   : > { %v5791_v49 = vpop.f32.mrf.mxu3 }
 0x2bc   : > { %v5797_v20 = vpop.f32.mrf.mxu2 }
 0x2bd   : > { %v2593_v17 = vmul.f32 %v5797_v20, %v5797_v20 }
 0x2be   : > { %v5803_v8 = vpop.f32.mrf.mxu3 }
 0x2c0   : > { %v2456_v19 = vpop.f32.mrf.mxu1 }
 0x2c1   : > { %v2587_v32 = vmul.f32 %v2456_v19, %v2456_v19  ;;  %v2529_v38 = vsel %vm2046_vm5, %v2456_v19, 0.0 }
 0x2c3   : > { %v2630_v61 = vsel %vm2046_vm5, %v2587_v32, 0.0 }
 0x2c4   : > { %v2473_v23 = vpop.f32.mrf.mxu2 }
 0x2c6   : > { %v2441_v3 = vpop.f32.mrf.mxu0 }
 0x2c7   : > { %v2581_v14 = vmul.f32 %v2441_v3, %v2441_v3  ;;  %v2517_v36 = vsel %vm2046_vm5, %v2441_v3, 0.0 }
 0x2c8   : > { %v2518_v45 = vadd.f32 %v2517_v36, %v2516_v56  ;;  %v2458_v5 = vpop.f32.mrf.mxu1  ;;  %v2592_v56 = vmul.f32 %v5787_v15, %v5787_v15 }
 0x2c9   : > { %v2618_v55 = vsel %vm2046_vm5, %v2581_v14, 0.0  ;;  %v2588_v30 = vmul.f32 %v2458_v5, %v2458_v5  ;;  %v2531_v3 = vsel %vm2046_vm5, %v2458_v5, 0.0  ;;  %v2591_v14 = vmul.f32 %v5776_v16, %v5776_v16 }
 0x2ca   : > { %v2619_v26 = vadd.f32 %v2618_v55, %v2617_v13  ;;  %v2640_v16 = vsel %vm2046_vm5, %v2592_v56, 0.0 }
 0x2cb   : > { %v2632_v54 = vsel %vm2046_vm5, %v2588_v30, 0.0 }
 0x2ce   : > { %v2443_v29 = vpop.f32.mrf.mxu0 }
 0x2cf   : > { %v2519_v11 = vsel %vm2046_vm5, %v2443_v29, 0.0  ;;  %v2582_v37 = vmul.f32 %v2443_v29, %v2443_v29  ;;  %v2539_v29 = vsel %vm2046_vm5, %v5787_v15, 0.0 }
 0x2d0   : > { %v2520_v1 = vadd.f32 %v2519_v11, %v2518_v45  ;;  %v2638_v45 = vsel %vm2046_vm5, %v2591_v14, 0.0 }
 0x2d1   : > { %v2620_v51 = vsel %vm2046_vm5, %v2582_v37, 0.0 }
 0x2d2   : > { %v2522_v41 = vadd.f32 %v2521_v47, %v2520_v1  ;;  %v2621_v60 = vadd.f32 %v2620_v51, %v2619_v26  ;;  %v2541_v1 = vsel %vm2046_vm5, %v5797_v20, 0.0  ;;  %v2594_v47 = vmul.f32 %v2473_v23, %v2473_v23 }
 0x2d4   : > { %v2623_v46 = vadd.f32 %v2622_v42, %v2621_v60  ;;  %v2524_v24 = vadd.f32 %v2523_v50, %v2522_v41  ;;  %v2642_v60 = vsel %vm2046_vm5, %v2593_v17, 0.0  ;;  %v2543_v42 = vsel %vm2046_vm5, %v2473_v23, 0.0 }
 0x2d6   : > { %v2625_v6 = vadd.f32 %v2624_v62, %v2623_v46  ;;  %v2526_v59 = vadd.f32 %v2525_v52, %v2524_v24  ;;  %v5809_v58 = vpop.f32.mrf.mxu3  ;;  %v2644_v24 = vsel %vm2046_vm5, %v2594_v47, 0.0 }
 0x2d8   : > { %v2627_v25 = vadd.f32 %v2626_v40, %v2625_v6  ;;  %v2528_v43 = vadd.f32 %v2527_v4, %v2526_v59 }
 0x2da   : > { %v2629_v34 = vadd.f32 %v2628_v53, %v2627_v25  ;;  %v2530_v21 = vadd.f32 %v2529_v38, %v2528_v43  ;;  %v2599_v38 = vmul.f32 %v5791_v49, %v5791_v49 }
 0x2dc   : > { %v2476_v27 = vpop.f32.mrf.mxu2  ;;  %v2631_v10 = vadd.f32 %v2630_v61, %v2629_v34  ;;  %v2532_v2 = vadd.f32 %v2531_v3, %v2530_v21  ;;  %v2600_v3 = vmul.f32 %v5803_v8, %v5803_v8 }
 0x2dd   : > { %v2595_v15 = vmul.f32 %v2476_v27, %v2476_v27  ;;  %v2545_v62 = vsel %vm2046_vm5, %v2476_v27, 0.0 }
 0x2de   : > { %v5817_v18 = vpop.f32.mrf.mxu3  ;;  %v2633_v57 = vadd.f32 %v2632_v54, %v2631_v10  ;;  %v2553_v10 = vsel %vm2046_vm5, %v5791_v49, 0.0  ;;  %v2557_v49 = vsel %vm2046_vm5, %v5809_v58, 0.0 }
 0x2df   : > { %v2461_v28 = vpop.f32.mrf.mxu1  ;;  %v2646_v20 = vsel %vm2046_vm5, %v2595_v15, 0.0 }
 0x2e0   : > { %v2589_v12 = vmul.f32 %v2461_v28, %v2461_v28  ;;  %v2533_v33 = vsel %vm2046_vm5, %v2461_v28, 0.0 }
 0x2e1   : > { %v2534_v63 = vadd.f32 %v2533_v33, %v2532_v2 }
 0x2e2   : > { %v2634_v48 = vsel %vm2046_vm5, %v2589_v12, 0.0 }
 0x2e3   : > { %v2635_v0 = vadd.f32 %v2634_v48, %v2633_v57  ;;  %v2654_v48 = vsel %vm2046_vm5, %v2599_v38, 0.0  ;;  %v2601_v57 = vmul.f32 %v5809_v58, %v5809_v58 }
 0x2e4   : > { %v2478_v11 = vpop.f32.mrf.mxu2 }
 0x2e5   : > { %v2596_v52 = vmul.f32 %v2478_v11, %v2478_v11  ;;  %v2547_v22 = vsel %vm2046_vm5, %v2478_v11, 0.0 }
 0x2e7   : > { %v2463_v7 = vpop.f32.mrf.mxu1  ;;  %v2648_v23 = vsel %vm2046_vm5, %v2596_v52, 0.0 }
 0x2e8   : > { %v2535_v35 = vsel %vm2046_vm5, %v2463_v7, 0.0  ;;  %v2590_v31 = vmul.f32 %v2463_v7, %v2463_v7 }
 0x2e9   : > { %v2536_v36 = vadd.f32 %v2535_v35, %v2534_v63  ;;  %v2555_v63 = vsel %vm2046_vm5, %v5803_v8, 0.0  ;;  %v2656_v35 = vsel %vm2046_vm5, %v2600_v3, 0.0  ;;  %v2559_v8 = vsel %vm2046_vm5, %v5817_v18, 0.0 }
 0x2ea   : > { %v2636_v19 = vsel %vm2046_vm5, %v2590_v31, 0.0  ;;  %v2602_v31 = vmul.f32 %v5817_v18, %v5817_v18 }
 0x2eb   : > { %v2538_v55 = vadd.f32 %v2537_v9, %v2536_v36  ;;  %v2637_v13 = vadd.f32 %v2636_v19, %v2635_v0  ;;  %v2658_v9 = vsel %vm2046_vm5, %v2601_v57, 0.0 }
 0x2ed   : > { %v2540_v37 = vadd.f32 %v2539_v29, %v2538_v55  ;;  %v2639_v26 = vadd.f32 %v2638_v45, %v2637_v13  ;;  %v2660_v13 = vsel %vm2046_vm5, %v2602_v31, 0.0 }
 0x2ee   : > { %v2496_v51 = vpop.f32.mrf.mxu3 }
 0x2ef   : > { %v2542_v44 = vadd.f32 %v2541_v1, %v2540_v37  ;;  %v2641_v41 = vadd.f32 %v2640_v16, %v2639_v26  ;;  %v2603_v56 = vmul.f32 %v2496_v51, %v2496_v51  ;;  %v2561_v45 = vsel %vm2046_vm5, %v2496_v51, 0.0 }
 0x2f1   : > { %v2643_v50 = vadd.f32 %v2642_v60, %v2641_v41  ;;  %v2544_v46 = vadd.f32 %v2543_v42, %v2542_v44  ;;  %v2662_v37 = vsel %vm2046_vm5, %v2603_v56, 0.0 }
 0x2f3   : > { %v2645_v39 = vadd.f32 %v2644_v24, %v2643_v50  ;;  %v2546_v6 = vadd.f32 %v2545_v62, %v2544_v46 }
 0x2f4   : > { %v2481_v5 = vpop.f32.mrf.mxu2 }
 0x2f5   : > { %v2647_v59 = vadd.f32 %v2646_v20, %v2645_v39  ;;  %v2597_v25 = vmul.f32 %v2481_v5, %v2481_v5  ;;  %v2548_v4 = vadd.f32 %v2547_v22, %v2546_v6  ;;  %v2549_v43 = vsel %vm2046_vm5, %v2481_v5, 0.0 }
 0x2f6   : > { %v2498_v40 = vpop.f32.mrf.mxu3 }
 0x2f7   : > { %v2649_v53 = vadd.f32 %v2648_v23, %v2647_v59  ;;  %v2650_v32 = vsel %vm2046_vm5, %v2597_v25, 0.0  ;;  %v2550_v28 = vadd.f32 %v2549_v43, %v2548_v4  ;;  %v2604_v29 = vmul.f32 %v2498_v40, %v2498_v40 }
 0x2f8   : > { %v2563_v26 = vsel %vm2046_vm5, %v2498_v40, 0.0 }
 0x2f9   : > { %v2651_v30 = vadd.f32 %v2650_v32, %v2649_v53  ;;  %v2664_v18 = vsel %vm2046_vm5, %v2604_v29, 0.0 }
 0x2fc   : > { %v2483_v34 = vpop.f32.mrf.mxu2 }
 0x2fd   : > { %v2551_v21 = vsel %vm2046_vm5, %v2483_v34, 0.0  ;;  %v2598_v61 = vmul.f32 %v2483_v34, %v2483_v34 }
 0x2fe   : > { %v2552_v27 = vadd.f32 %v2551_v21, %v2550_v28  ;;  %v2501_v12 = vpop.f32.mrf.mxu3 }
 0x2ff   : > { %v2652_v33 = vsel %vm2046_vm5, %v2598_v61, 0.0  ;;  %v2605_v16 = vmul.f32 %v2501_v12, %v2501_v12  ;;  %v2565_v44 = vsel %vm2046_vm5, %v2501_v12, 0.0 }
 0x300   : > { %v2554_v2 = vadd.f32 %v2553_v10, %v2552_v27  ;;  %v2653_v54 = vadd.f32 %v2652_v33, %v2651_v30 }
 0x301   : > { %v2666_v51 = vsel %vm2046_vm5, %v2605_v16, 0.0 }
 0x302   : > { %v2556_v7 = vadd.f32 %v2555_v63, %v2554_v2  ;;  %v2655_v14 = vadd.f32 %v2654_v48, %v2653_v54 }
 0x304   : > { %v2558_v0 = vadd.f32 %v2557_v49, %v2556_v7  ;;  %v2657_v36 = vadd.f32 %v2656_v35, %v2655_v14 }
 0x306   : > { %v2659_v19 = vadd.f32 %v2658_v9, %v2657_v36  ;;  %v2560_v55 = vadd.f32 %v2559_v8, %v2558_v0  ;;  %v2503_v11 = vpop.f32.mrf.mxu3 }
 0x307   : > { %v2606_v41 = vmul.f32 %v2503_v11, %v2503_v11  ;;  %v2567_v15 = vsel %vm2046_vm5, %v2503_v11, 0.0 }
 0x308   : > { %v2562_v17 = vadd.f32 %v2561_v45, %v2560_v55  ;;  %v2661_v58 = vadd.f32 %v2660_v13, %v2659_v19 }
 0x309   : > { %v2668_v24 = vsel %vm2046_vm5, %v2606_v41, 0.0 }
 0x30a   : > { %v2564_v1 = vadd.f32 %v2563_v26, %v2562_v17  ;;  %v2663_v47 = vadd.f32 %v2662_v37, %v2661_v58 }
 0x30c   : > { %v2566_v60 = vadd.f32 %v2565_v44, %v2564_v1  ;;  %v2665_v42 = vadd.f32 %v2664_v18, %v2663_v47 }
 0x30e   : > { %v2667_v50 = vadd.f32 %v2666_v51, %v2665_v42  ;;  %v2568_v46 = vadd.f32 %v2567_v15, %v2566_v60 }
 0x310   : > { %v2569_v62 = vrot.slane %v2568_v46, 4  ;;  %v2669_v39 = vadd.f32 %v2668_v24, %v2667_v50 }
 0x312   : > { %v2570_v5 = vadd.f32 %v2569_v62, %v2568_v46  ;;  %v2670_v6 = vrot.slane %v2669_v39, 4 }
 0x314   : > { %v2571_v20 = vrot.slane %v2570_v5, 2  ;;  %v2671_v52 = vadd.f32 %v2670_v6, %v2669_v39 }
 0x316   : > { %v2572_v59 = vadd.f32 %v2571_v20, %v2570_v5  ;;  %v2672_v40 = vrot.slane %v2671_v52, 2 }
 0x318   : > { %v2573_v22 = vrot.slane %v2572_v59, 1  ;;  %v2673_v25 = vadd.f32 %v2672_v40, %v2671_v52 }
 0x31a   : > { %v2674_v4 = vrot.slane %v2673_v25, 1  ;;  %v2574_v23 = vadd.f32 %v2573_v22, %v2572_v59 }
 0x31c   : > { %v2675_v43 = vadd.f32 %v2674_v4, %v2673_v25 }
 0x31e   : > { %v2677_v53 = vsel %vm2676_vm14, %v2574_v23, %v2675_v43 }
 0x31f   : > { %2679 = vst.msk [vmem:[%s295_s22] sm:$0x3] %vm2678_vm15, %v2677_v53 }
 0x320 PF: > { %s15_s20 = sadd.s32 1, %s3635_s20   ;;  %s6137_s18 = smov %s3631_s19 }
 0x321   : > { %p12_p5 = scmp.ge.s32.totalorder %s15_s20, 4   ;;  %s6138_s19 = smov %s6140_s21 }
 0x323   :  { %14 = sbr.rel (!%p12_p5) target bundleno = 2 (0x2), region = 73 }

// kernel: cnn_block_forward.7
= control target key start
LH: loop header
LB: loop body
LE: loop exit
PB: predicated region body
PF: predicated region fallthrough
CT: control target
= control target key end

     0   :  { %s3805_s24 = smov 0   ;;  %s3807_s25 = smov 0   ;;  %s6161_s0 = inlined_call_operand.vmem [shape: f32[2,1,18,18,8], index: 0, kind: input, shape index: {}]   ;;  %s6162_s1 = inlined_call_operand.vmem [shape: f32[2,16,16,4], index: 1, kind: input, shape index: {}]   ;;  %s6163_s2 = inlined_call_operand.vmem [shape: f32[2,8], index: 2, kind: input, shape index: {}]   ;;  %s6164_s3 = inlined_call_operand.vmem [shape: bf16[76,8], index: 3, kind: input, shape index: {}]   ;;  %s6165_s4 = inlined_call_operand.vmem [shape: f32[1,8], index: 4, kind: input, shape index: {}]   ;;  %s6166_s5 = inlined_call_operand.vmem [shape: f32[1,2], index: 5, kind: input, shape index: {}]   ;;  %s6167_s6 = inlined_call_operand.vmem [shape: f32[1,2], index: 6, kind: input, shape index: {}]   ;;  %s6168_s7 = inlined_call_operand.vmem [shape: f32[2,16,16,8], index: 7, kind: output, shape index: {}]  }
   0x1   :  { %s3809_s26 = smov 0  }
   0x2 LB: > { %s29_s27 = sadd.s32 1, %s3747_s25  ;;  %p2895_p0 = scmp.ge.s32.totalorder %s3751_s26, 1  ;;  %s3751_s26 = sphi %s3809_s26, %s17_s26   ;;  %s3747_s25 = sphi %s3807_s25, %s6428_s25   ;;  %s3743_s24 = sphi %s3805_s24, %s6427_s24  }
   0x3   : > { %p31_p1 = scmp.ge.s32.totalorder %s29_s27, 2  ;;  %p275_p2 = scmp.lt.s32.totalorder %s3751_s26, 3 }
   0x5   : > { %s6430_s27 = smov (%p31_p1, %s29_s27), 0  ;;  %p276_p3 = pnand %p2895_p0, %p275_p2 }
   0x7   : > { %279 = sbr.rel (%p276_p3) target bundleno = 789 (0x315), region = 48 }
   0xc   : > { %v3722_v0 = vld [vmem:[%s6166_s5] ss:$0 sm:$0xff]  ;;  %v6169_v1 = vmov 1   ;;  %v6170_v2 = vmov 0.0   ;;  %s3755_s30 = smov 8   ;;  %v3756_v6 = vmov 0   ;;  %v805_v63 = vlaneseq }
   0xd   : > { %2998 = vset.pattern.permute.xlu0 %v6169_v1  ;;  %3720 = vset.pattern.permute.xlu1 %v6169_v1  ;;  %v959_v3 = vrot.slane %v6170_v2, 1  ;;  %v1040_v5 = vrot.slane %v6170_v2, 2  ;;  %s3757_s8 = smov 16   ;;  %p326_p4 = scmp.lt.s32.totalorder %s3743_s24, 1  ;;  %v3849_v8 = vld [vmem:[%s6163_s2] ss:$0 sm:$0xff] }
   0xe   : > { %748 = vperm.xlu0 %2998, %v3722_v0   ;;  %v3859_v14 = vld [vmem:[%s6163_s2 + $0x1] ss:$0 sm:$0xff]  ;;  %s3758_s17 = smov 24   ;;  %vm958_vm2 = vcmask 1046528   ;;  %vm1039_vm3 = vcmask 1045504   ;;  %vm2074_vm4 = vcmask 64512  }
   0xf   : > { %v3829_v4 = vpack.i.bf16 %v959_v3, %v959_v3  ;;  %v3834_v7 = vpack.i.bf16 %v1040_v5, %v1040_v5  ;;  %s6432_s24 = smov (!%p326_p4, %s3743_s24), 1  ;;  %vm2107_vm5 = vcmask 130048   ;;  %vm2140_vm6 = vcmask 195584   ;;  %s3759_s22 = smov 32  }
  0x10   : > { %s2961_s9 = smul.u32 432, %s6432_s24  ;;  %s3760_s23 = smov 40   ;;  %vm2173_vm7 = vcmask 261120   ;;  %vm2206_vm8 = vcmask 326656   ;;  %vm2239_vm9 = vcmask 392192   ;;  %vm2272_vm10 = vcmask 457728  }
  0x11   : > { %6258 = vst [vmem:[#allocation2_spill] sm:$0xff] %v3829_v4  ;;  %3001 = vrot.lane.b32.xlu1 %v3829_v4, %s3755_s30  ;;  %s3761_s28 = smov 48   ;;  %s3762_s29 = smov 56   ;;  %vm2305_vm11 = vcmask 523264   ;;  %vm2338_vm12 = vcmask 588800   ;;  %vm2430_vm13 = vcmask 621568  }
  0x12   : > { %6259 = vst [vmem:[#allocation3_spill] sm:$0xff] %v3834_v7  ;;  %s3844_s12 = scalar_lea.vmem %s6161_s0, %s2961_s9 }
  0x13   : > { %v367_v9 = vld [vmem:[%s3844_s12 + $0x48] sm:$0xff]  ;;  %v368_v10 = vld [vmem:[%s3844_s12 + $0x50] sm:$0xff]  ;;  %v365_v15 = vld [vmem:[%s3844_s12 + $0x38] sm:$0xff] }
  0x14   : > { %v364_v11 = vld [vmem:[%s3844_s12 + $0x30] sm:$0xff]  ;;  %v425_v12 = vmul.f32 %v3849_v8, %v367_v9  ;;  %v426_v13 = vmul.f32 %v3849_v8, %v368_v10  ;;  %v361_v16 = vld [vmem:[%s3844_s12 + $0x18] sm:$0xff]  ;;  %v423_v18 = vmul.f32 %v3849_v8, %v365_v15  ;;  %v362_v19 = vld [vmem:[%s3844_s12 + $0x20] sm:$0xff] }
  0x15   : > { %v422_v17 = vmul.f32 %v3849_v8, %v364_v11  ;;  %v419_v20 = vmul.f32 %v3849_v8, %v361_v16  ;;  %v376_v23 = vld [vmem:[%s3844_s12 + $0x90] sm:$0xff]  ;;  %v377_v24 = vld [vmem:[%s3844_s12 + $0x98] sm:$0xff]  ;;  %v420_v25 = vmul.f32 %v3849_v8, %v362_v19  ;;  %v374_v27 = vld [vmem:[%s3844_s12 + $0x80] sm:$0xff] }
  0x16   : > { %2999 = vset.pattern.permute.xlu0 %v3756_v6  ;;  %v480_v21 = vadd.f32 %v3859_v14, %v425_v12  ;;  %v481_v22 = vadd.f32 %v3859_v14, %v426_v13  ;;  %v373_v26 = vld [vmem:[%s3844_s12 + $0x78] sm:$0xff]  ;;  %v478_v29 = vadd.f32 %v3859_v14, %v423_v18  ;;  %v370_v31 = vld [vmem:[%s3844_s12 + $0x60] sm:$0xff]  ;;  %v371_v32 = vld [vmem:[%s3844_s12 + $0x68] sm:$0xff]  ;;  %v434_v34 = vmul.f32 %v3849_v8, %v376_v23 }
  0x17   : > { %636 = vperm.xlu0 %2999, %v3722_v0   ;;  %v477_v28 = vadd.f32 %v3859_v14, %v422_v17  ;;  %v474_v30 = vadd.f32 %v3859_v14, %v419_v20  ;;  %v435_v35 = vmul.f32 %v3849_v8, %v377_v24  ;;  %v431_v37 = vmul.f32 %v3849_v8, %v373_v26  ;;  %v385_v39 = vld [vmem:[%s3844_s12 + $0xd8] sm:$0xff]  ;;  %v386_v40 = vld [vmem:[%s3844_s12 + $0xe0] sm:$0xff]  ;;  %v383_v49 = vld [vmem:[%s3844_s12 + $0xc8] sm:$0xff] }
  0x18   : > { %v534_v33 = vmax.f32 %v480_v21, 0.0  ;;  %v535_v36 = vmax.f32 %v481_v22, 0.0  ;;  %v432_v38 = vmul.f32 %v3849_v8, %v374_v27  ;;  %v475_v41 = vadd.f32 %v3859_v14, %v420_v25  ;;  %v382_v44 = vld [vmem:[%s3844_s12 + $0xc0] sm:$0xff]  ;;  %v379_v62 = vld [vmem:[%s3844_s12 + $0xa8] sm:$0xff]  ;;  %v380_v12 = vld [vmem:[%s3844_s12 + $0xb0] sm:$0xff] }
  0x19   : > { %3006 = vrot.lane.b32.xlu1 %v3834_v7, %s3757_s8  ;;  %v428_v42 = vmul.f32 %v3849_v8, %v370_v31  ;;  %v429_v43 = vmul.f32 %v3849_v8, %v371_v32  ;;  %v531_v45 = vmax.f32 %v477_v28, 0.0  ;;  %v532_v46 = vmax.f32 %v478_v29, 0.0  ;;  %v394_v13 = vld [vmem:[%s3844_s12 + $0x120] sm:$0xff]  ;;  %v395_v19 = vld [vmem:[%s3844_s12 + $0x128] sm:$0xff] }
  0x1a   : > { %v528_v47 = vmax.f32 %v474_v30, 0.0  ;;  %v443_v48 = vmul.f32 %v3849_v8, %v385_v39  ;;  %v3891_v50 = vmin.f32 %v534_v33, 6.0  ;;  %v489_v51 = vadd.f32 %v3859_v14, %v434_v34  ;;  %v391_v32 = vld [vmem:[%s3844_s12 + $0x108] sm:$0xff] }
  0x1b   : > { %v490_v52 = vadd.f32 %v3859_v14, %v435_v35  ;;  %v444_v53 = vmul.f32 %v3849_v8, %v386_v40  ;;  %v3896_v54 = vmin.f32 %v535_v36, 6.0  ;;  %v486_v55 = vadd.f32 %v3859_v14, %v431_v37  ;;  %v392_v37 = vld [vmem:[%s3844_s12 + $0x110] sm:$0xff] }
  0x1c   : > { %v487_v56 = vadd.f32 %v3859_v14, %v432_v38  ;;  %v440_v57 = vmul.f32 %v3849_v8, %v382_v44  ;;  %v529_v58 = vmax.f32 %v475_v41, 0.0  ;;  %v483_v59 = vadd.f32 %v3859_v14, %v428_v42  ;;  %v388_v41 = vld [vmem:[%s3844_s12 + $0xf0] sm:$0xff]  ;;  %v389_v42 = vld [vmem:[%s3844_s12 + $0xf8] sm:$0xff] }
  0x1d   : > { %v484_v60 = vadd.f32 %v3859_v14, %v429_v43  ;;  %v441_v61 = vmul.f32 %v3849_v8, %v383_v49  ;;  %v3905_v0 = vmin.f32 %v531_v45, 6.0  ;;  %v3907_v3 = vmin.f32 %v532_v46, 6.0  ;;  %v403_v43 = vld [vmem:[%s3844_s12 + $0x168] sm:$0xff]  ;;  %v400_v49 = vld [vmem:[%s3844_s12 + $0x150] sm:$0xff] }
  0x1e   : > { %v498_v5 = vadd.f32 %v3859_v14, %v443_v48  ;;  %v3910_v6 = vmin.f32 %v528_v47, 6.0  ;;  %v543_v9 = vmax.f32 %v489_v51, 0.0  ;;  %v544_v10 = vmax.f32 %v490_v52, 0.0  ;;  %v404_v48 = vld [vmem:[%s3844_s12 + $0x170] sm:$0xff]  ;;  %v401_v51 = vld [vmem:[%s3844_s12 + $0x158] sm:$0xff] }
  0x1f   : > { %v499_v11 = vadd.f32 %v3859_v14, %v444_v53  ;;  %v540_v15 = vmax.f32 %v486_v55, 0.0  ;;  %v541_v16 = vmax.f32 %v487_v56, 0.0  ;;  %v495_v17 = vadd.f32 %v3859_v14, %v440_v57  ;;  %v397_v57 = vld [vmem:[%s3844_s12 + $0x138] sm:$0xff] }
  0x20   : > { %v437_v18 = vmul.f32 %v3849_v8, %v379_v62  ;;  %v3918_v20 = vmin.f32 %v529_v58, 6.0  ;;  %v537_v21 = vmax.f32 %v483_v59, 0.0  ;;  %v538_v22 = vmax.f32 %v484_v60, 0.0  ;;  %v398_v62 = vld [vmem:[%s3844_s12 + $0x140] sm:$0xff] }
  0x21   : > { %v496_v23 = vadd.f32 %v3859_v14, %v441_v61  ;;  %v3921_v24 = vshrl.u32 %v805_v63, 7  ;;  %v552_v25 = vmax.f32 %v498_v5, 0.0  ;;  %v438_v26 = vmul.f32 %v3849_v8, %v380_v12 }
  0x22   : > { %v452_v27 = vmul.f32 %v3849_v8, %v394_v13  ;;  %v3925_v28 = vmin.f32 %v543_v9, 6.0  ;;  %v553_v29 = vmax.f32 %v499_v11, 0.0  ;;  %v492_v30 = vadd.f32 %v3859_v14, %v437_v18 }
  0x23   : > { %v453_v31 = vmul.f32 %v3849_v8, %v395_v19  ;;  %v3930_v33 = vmin.f32 %v544_v10, 6.0  ;;  %v3932_v34 = vmin.f32 %v540_v15, 6.0  ;;  %v3934_v35 = vmin.f32 %v541_v16, 6.0  ;;  %v378_v16 = vld [vmem:[%s3844_s12 + $0xa0] sm:$0x3] }
  0x24   : > { %v549_v36 = vmax.f32 %v495_v17, 0.0  ;;  %v3937_v38 = vmin.f32 %v537_v21, 6.0  ;;  %v3939_v39 = vmin.f32 %v538_v22, 6.0  ;;  %v550_v40 = vmax.f32 %v496_v23, 0.0  ;;  %v406_v17 = vld [vmem:[%s3844_s12 + $0x180] sm:$0xff] }
  0x25   : > { %v3944_v44 = vmin.f32 %v552_v25, 6.0  ;;  %v493_v45 = vadd.f32 %v3859_v14, %v438_v26  ;;  %v507_v46 = vadd.f32 %v3859_v14, %v452_v27  ;;  %v449_v47 = vmul.f32 %v3849_v8, %v391_v32 }
  0x26   : > { %v3952_v52 = vmin.f32 %v553_v29, 6.0  ;;  %v546_v53 = vmax.f32 %v492_v30, 0.0  ;;  %v508_v55 = vadd.f32 %v3859_v14, %v453_v31  ;;  %v450_v56 = vmul.f32 %v3849_v8, %v392_v37  ;;  %v407_v29 = vld [vmem:[%s3844_s12 + $0x188] sm:$0xff] }
  0x27   : > { %v3957_v58 = vmin.f32 %v549_v36, 6.0  ;;  %v446_v59 = vmul.f32 %v3849_v8, %v388_v41  ;;  %v447_v60 = vmul.f32 %v3849_v8, %v389_v42  ;;  %v461_v61 = vmul.f32 %v3849_v8, %v403_v43  ;;  %v363_v37 = vld [vmem:[%s3844_s12 + $0x28] sm:$0x3] }
  0x28   : > { %v3963_v63 = vmin.f32 %v550_v40, 6.0  ;;  %v462_v5 = vmul.f32 %v3849_v8, %v404_v48  ;;  %v458_v9 = vmul.f32 %v3849_v8, %v400_v49  ;;  %v459_v10 = vmul.f32 %v3849_v8, %v401_v51 }
  0x29   : > { %v547_v11 = vmax.f32 %v493_v45, 0.0  ;;  %v561_v12 = vmax.f32 %v507_v46, 0.0  ;;  %v504_v13 = vadd.f32 %v3859_v14, %v449_v47  ;;  %v455_v15 = vmul.f32 %v3849_v8, %v397_v57  ;;  %v387_v57 = vld [vmem:[%s3844_s12 + $0xe8] sm:$0x3] }
  0x2a   : > { %v3972_v18 = vmin.f32 %v546_v53, 6.0  ;;  %v562_v19 = vmax.f32 %v508_v55, 0.0  ;;  %v505_v21 = vadd.f32 %v3859_v14, %v450_v56  ;;  %v456_v22 = vmul.f32 %v3849_v8, %v398_v62 }
  0x2b   : > { %v501_v23 = vadd.f32 %v3859_v14, %v446_v59  ;;  %v502_v25 = vadd.f32 %v3859_v14, %v447_v60  ;;  %v516_v26 = vadd.f32 %v3859_v14, %v461_v61  ;;  %v436_v27 = vmul.f32 %v3849_v8, %v378_v16 }
  0x2c   : > { %v517_v30 = vadd.f32 %v3859_v14, %v462_v5  ;;  %v513_v31 = vadd.f32 %v3859_v14, %v458_v9  ;;  %v514_v32 = vadd.f32 %v3859_v14, %v459_v10  ;;  %v464_v36 = vmul.f32 %v3849_v8, %v406_v17 }
  0x2d   : > { %v3988_v41 = vmin.f32 %v547_v11, 6.0  ;;  %v510_v42 = vadd.f32 %v3859_v14, %v455_v15  ;;  %v511_v43 = vadd.f32 %v3859_v14, %v456_v22  ;;  %v491_v45 = vadd.f32 %v3859_v14, %v436_v27 }
  0x2e   : > { %v3993_v46 = vmin.f32 %v561_v12, 6.0  ;;  %v558_v47 = vmax.f32 %v504_v13, 0.0  ;;  %v559_v48 = vmax.f32 %v505_v21, 0.0  ;;  %v465_v49 = vmul.f32 %v3849_v8, %v407_v29 }
  0x2f   : > { %v555_v51 = vmax.f32 %v501_v23, 0.0  ;;  %v556_v53 = vmax.f32 %v502_v25, 0.0  ;;  %v519_v55 = vadd.f32 %v3859_v14, %v464_v36  ;;  %v421_v56 = vmul.f32 %v3849_v8, %v363_v37  ;;  %v366_v25 = vld [vmem:[%s3844_s12 + $0x40] sm:$0x3] }
  0x30   : > { %v570_v59 = vmax.f32 %v516_v26, 0.0  ;;  %v571_v60 = vmax.f32 %v517_v30, 0.0  ;;  %v567_v61 = vmax.f32 %v513_v31, 0.0  ;;  %v568_v62 = vmax.f32 %v514_v32, 0.0 }
  0x31   : > { %v564_v5 = vmax.f32 %v510_v42, 0.0  ;;  %v565_v9 = vmax.f32 %v511_v43, 0.0  ;;  %v545_v10 = vmax.f32 %v491_v45, 0.0  ;;  %v520_v11 = vadd.f32 %v3859_v14, %v465_v49 }
  0x32   : > { %vm809_vm0 = vcmp.ge.s32.totalorder %v3921_v24, 1  ;;  %v4001_v12 = vmin.f32 %v562_v19, 6.0  ;;  %v573_v13 = vmax.f32 %v519_v55, 0.0  ;;  %v4004_v15 = vadd.f32 %v3859_v14, %v421_v56 }
  0x33   : > { %v445_v16 = vmul.f32 %v3849_v8, %v387_v57  ;;  %v4007_v17 = vmin.f32 %v558_v47, 6.0  ;;  %v4009_v21 = vmin.f32 %v559_v48, 6.0  ;;  %v4011_v22 = vmin.f32 %v555_v51, 6.0 }
  0x34   : > { %v4013_v23 = vmin.f32 %v556_v53, 6.0  ;;  %v4016_v26 = vmin.f32 %v570_v59, 6.0  ;;  %v4018_v27 = vmin.f32 %v571_v60, 6.0  ;;  %v4020_v19 = vmin.f32 %v567_v61, 6.0 }
  0x35   : > { %v4022_v29 = vmin.f32 %v568_v62, 6.0  ;;  %v4024_v30 = vmin.f32 %v564_v5, 6.0  ;;  %v4026_v31 = vmin.f32 %v565_v9, 6.0  ;;  %v4028_v32 = vmin.f32 %v545_v10, 6.0 }
  0x36   : > { %v574_v36 = vmax.f32 %v520_v11, 0.0  ;;  %v4032_v42 = vmin.f32 %v573_v13, 6.0  ;;  %v530_v43 = vmax.f32 %v4004_v15, 0.0  ;;  %v4036_v45 = vadd.f32 %v3859_v14, %v445_v16 }
  0x37   : > { %v424_v47 = vmul.f32 %v3849_v8, %v366_v25 }
  0x80   : > { %v3986_v40 = vpop.permute.xlu0 %748 }
  0x89   : > { %v4030_v37 = vpop.permute.xlu0 %636 }
  0x8a   : > { %v648_v48 = vmul.f32 %v4030_v37, %v3891_v50  ;;  %v649_v49 = vmul.f32 %v4030_v37, %v3896_v54  ;;  %v645_v51 = vmul.f32 %v4030_v37, %v3905_v0  ;;  %v646_v53 = vmul.f32 %v4030_v37, %v3907_v3 }
  0x8b   : > { %v642_v55 = vmul.f32 %v4030_v37, %v3910_v6  ;;  %v643_v56 = vmul.f32 %v4030_v37, %v3918_v20  ;;  %v657_v57 = vmul.f32 %v4030_v37, %v3925_v28  ;;  %v658_v59 = vmul.f32 %v4030_v37, %v3930_v33 }
  0x8c   : > { %v702_v60 = vmul.f32 %v648_v48, %v3891_v50  ;;  %v703_v61 = vmul.f32 %v649_v49, %v3896_v54  ;;  %v699_v62 = vmul.f32 %v645_v51, %v3905_v0  ;;  %v700_v5 = vmul.f32 %v646_v53, %v3907_v3 }
  0x8d   : > { %v696_v9 = vmul.f32 %v642_v55, %v3910_v6  ;;  %v697_v10 = vmul.f32 %v643_v56, %v3918_v20  ;;  %v711_v11 = vmul.f32 %v657_v57, %v3925_v28  ;;  %v712_v13 = vmul.f32 %v658_v59, %v3930_v33 }
  0x8e   : > { %v760_v16 = vadd.f32 %v3986_v40, %v702_v60  ;;  %v4065_v25 = vadd.f32 %v3986_v40, %v703_v61  ;;  %v757_v50 = vadd.f32 %v3986_v40, %v699_v62  ;;  %v4069_v54 = vadd.f32 %v3986_v40, %v700_v5 }
  0x8f   : > { %v754_v0 = vadd.f32 %v3986_v40, %v696_v9  ;;  %v4073_v3 = vadd.f32 %v3986_v40, %v697_v10  ;;  %v769_v6 = vadd.f32 %v3986_v40, %v711_v11  ;;  %v4076_v20 = vmin.f32 %v574_v36, 6.0 }
  0x90   : > { %6260 = vst [vmem:[#allocation4_spill] sm:$0xff] %v4065_v25  ;;  %v4080_v28 = vsel %vm809_vm0, %v760_v16, 0.0  ;;  %v4084_v33 = vsel %vm809_vm0, %v757_v50, 0.0  ;;  %v654_v48 = vmul.f32 %v4030_v37, %v3932_v34  ;;  %v655_v49 = vmul.f32 %v4030_v37, %v3934_v35 }
  0x91   : > { %6261 = vst [vmem:[#allocation5_spill] sm:$0xff] %v4069_v54  ;;  %v4092_v51 = vpack.i.bf16 %v4065_v25, %v4080_v28  ;;  %v4096_v36 = vpack.i.bf16 %v4069_v54, %v4084_v33  ;;  %v4100_v53 = vsel %vm809_vm0, %v754_v0, 0.0  ;;  %v554_v55 = vmax.f32 %v4036_v45, 0.0 }
  0x92   : > { %6262 = vst [vmem:[#allocation6_spill] sm:$0xff] %v4080_v28  ;;  %v3010_v56 = vpack.i.bf16 %v4073_v3, %v4100_v53  ;;  %v4106_v57 = vadd.f32 %v3986_v40, %v712_v13  ;;  %v708_v59 = vmul.f32 %v654_v48, %v3932_v34  ;;  %v709_v60 = vmul.f32 %v655_v49, %v3934_v35 }
  0x93   : > { %6263 = vst [vmem:[#allocation7_spill] sm:$0xff] %v4084_v33  ;;  %3021 = vrot.lane.b32.xlu1 %v4092_v51, %s3758_s17  ;;  %3016 = vrot.lane.b32.xlu0 %v4096_v36, %s3758_s17  ;;  %v4116_v45 = vsel %vm809_vm0, %v769_v6, 0.0  ;;  %v651_v61 = vmul.f32 %v4030_v37, %v3937_v38  ;;  %v652_v62 = vmul.f32 %v4030_v37, %v3939_v39 }
  0x94   : > { %6264 = vst [vmem:[#allocation8_spill] sm:$0xff] %v4092_v51  ;;  %v666_v34 = vmul.f32 %v4030_v37, %v3944_v44  ;;  %3011 = vrot.lane.b32.xlu2 %v3010_v56, %s3758_s17  ;;  %v766_v35 = vadd.f32 %v3986_v40, %v708_v59  ;;  %v4127_v5 = vadd.f32 %v3986_v40, %v709_v60 }
  0x95   : > { %6265 = vst [vmem:[#allocation9_spill] sm:$0xff] %v4096_v36  ;;  %v667_v9 = vmul.f32 %v4030_v37, %v3952_v52  ;;  %v663_v10 = vmul.f32 %v4030_v37, %v3957_v58  ;;  %v705_v11 = vmul.f32 %v651_v61, %v3937_v38  ;;  %v706_v13 = vmul.f32 %v652_v62, %v3939_v39  ;;  %v396_v36 = vld [vmem:[%s3844_s12 + $0x130] sm:$0x3] }
  0x96   : > { %6266 = vst [vmem:[#allocation10_spill] sm:$0xff] %v4106_v57  ;;  %v720_v16 = vmul.f32 %v666_v34, %v3944_v44  ;;  %v664_v50 = vmul.f32 %v4030_v37, %v3963_v63  ;;  %v4140_v0 = vsel %vm809_vm0, %v766_v35, 0.0  ;;  %v660_v49 = vmul.f32 %v4030_v37, %v3972_v18 }
  0x97   : > { %6267 = vst [vmem:[#allocation11_spill] sm:$0xff] %v4116_v45  ;;  %v721_v6 = vmul.f32 %v667_v9, %v3952_v52  ;;  %v717_v48 = vmul.f32 %v663_v10, %v3957_v58  ;;  %v4148_v38 = vpack.i.bf16 %v4106_v57, %v4116_v45  ;;  %v763_v39 = vadd.f32 %v3986_v40, %v705_v11 }
  0x98   : > { %6268 = vst [vmem:[#allocation12_spill] sm:$0xff] %v4127_v5  ;;  %v4152_v44 = vadd.f32 %v3986_v40, %v706_v13  ;;  %v4155_v56 = vadd.f32 %v3859_v14, %v424_v47  ;;  %v4159_v52 = vpack.i.bf16 %v4127_v5, %v4140_v0  ;;  %v778_v58 = vadd.f32 %v3986_v40, %v720_v16 }
  0x99   : > { %6269 = vst [vmem:[#allocation13_spill] sm:$0xff] %v4140_v0  ;;  %v718_v59 = vmul.f32 %v664_v50, %v3963_v63  ;;  %v661_v60 = vmul.f32 %v4030_v37, %v3988_v41  ;;  %v4167_v61 = vsel %vm809_vm0, %v763_v39, 0.0  ;;  %v775_v62 = vadd.f32 %v3986_v40, %v717_v48 }
  0x9a   : > { %6270 = vst [vmem:[#allocation14_spill] sm:$0xff] %v4148_v38  ;;  %v714_v47 = vmul.f32 %v660_v49, %v3972_v18  ;;  %v675_v34 = vmul.f32 %v4030_v37, %v3993_v46  ;;  %v4175_v35 = vpack.i.bf16 %v4152_v44, %v4167_v61  ;;  %v4178_v63 = vadd.f32 %v3986_v40, %v721_v6 }
  0x9b   : > { %6271 = vst [vmem:[#allocation15_spill] sm:$0xff] %v4152_v44  ;;  %v4181_v9 = vadd.s32 16, %v3921_v24  ;;  %v4185_v10 = vmin.f32 %v530_v43, 6.0  ;;  %3036 = vrot.lane.b32.xlu1 %v4148_v38, %s3758_s17  ;;  %3031 = vrot.lane.b32.xlu0 %v4159_v52, %s3758_s17  ;;  %v715_v18 = vmul.f32 %v661_v60, %v3988_v41  ;;  %v676_v13 = vmul.f32 %v4030_v37, %v4001_v12 }
  0x9c   : > { %6272 = vst [vmem:[#allocation16_spill] sm:$0xff] %v4159_v52  ;;  %v772_v11 = vadd.f32 %v3986_v40, %v714_v47  ;;  %v4195_v16 = vmin.f32 %v554_v55, 6.0  ;;  %3026 = vrot.lane.b32.xlu2 %v4175_v35, %s3758_s17  ;;  %v4201_v15 = vsel %vm809_vm0, %v778_v58, 0.0  ;;  %v729_v43 = vmul.f32 %v675_v34, %v3993_v46 }
  0x9d   : > { %6273 = vst [vmem:[#allocation17_spill] sm:$0xff] %v4167_v61  ;;  %v672_v50 = vmul.f32 %v4030_v37, %v4007_v17  ;;  %v673_v41 = vmul.f32 %v4030_v37, %v4009_v21  ;;  %v4209_v6 = vadd.f32 %v3986_v40, %v718_v59  ;;  %v4213_v55 = vsel %vm809_vm0, %v775_v62, 0.0 }
  0x9e   : > { %6274 = vst [vmem:[#allocation18_spill] sm:$0xff] %v4175_v35  ;;  %v4216_v48 = vadd.f32 %v3986_v40, %v715_v18  ;;  %v669_v49 = vmul.f32 %v4030_v37, %v4011_v22  ;;  %v4222_v46 = vsel %vm809_vm0, %v772_v11, 0.0  ;;  %v730_v39 = vmul.f32 %v676_v13, %v4001_v12 }
  0x9f   : > { %6275 = vst [vmem:[#allocation19_spill] sm:$0xff] %v4178_v63  ;;  %v726_v58 = vmul.f32 %v672_v50, %v4007_v17  ;;  %v670_v59 = vmul.f32 %v4030_v37, %v4013_v23  ;;  %v787_v60 = vadd.f32 %v3986_v40, %v729_v43  ;;  %v727_v62 = vmul.f32 %v673_v41, %v4009_v21 }
  0xa0   : > { %6276 = vst [vmem:[#allocation20_spill] sm:$0xff] %v4201_v15  ;;  %v723_v47 = vmul.f32 %v669_v49, %v4011_v22  ;;  %v684_v34 = vmul.f32 %v4030_v37, %v4016_v26  ;;  %v4235_v18 = vpack.i.bf16 %v4178_v63, %v4201_v15  ;;  %v4242_v13 = vpack.i.bf16 %v4209_v6, %v4213_v55 }
  0xa1   : > { %6277 = vst [vmem:[#allocation21_spill] sm:$0xff] %v4209_v6  ;;  %v784_v12 = vadd.f32 %v3986_v40, %v726_v58  ;;  %v724_v17 = vmul.f32 %v670_v59, %v4013_v23  ;;  %v685_v22 = vmul.f32 %v4030_v37, %v4018_v27  ;;  %v4250_v50 = vpack.i.bf16 %v4216_v48, %v4222_v46 }
  0xa2   : > { %6278 = vst [vmem:[#allocation22_spill] sm:$0xff] %v4213_v55  ;;  %v781_v21 = vadd.f32 %v3986_v40, %v723_v47  ;;  %v738_v43 = vmul.f32 %v684_v34, %v4016_v26  ;;  %v4253_v41 = vadd.f32 %v3986_v40, %v730_v39  ;;  %v681_v23 = vmul.f32 %v4030_v37, %v4020_v19 }
  0xa3   : > { %6279 = vst [vmem:[#allocation23_spill] sm:$0xff] %v4235_v18  ;;  %v682_v49 = vmul.f32 %v4030_v37, %v4022_v29  ;;  %3051 = vrot.lane.b32.xlu1 %v4235_v18, %s3758_s17  ;;  %3046 = vrot.lane.b32.xlu0 %v4242_v13, %s3758_s17  ;;  %v4265_v26 = vsel %vm809_vm0, %v787_v60, 0.0  ;;  %v4268_v58 = vadd.f32 %v3986_v40, %v727_v62  ;;  %v4272_v39 = vsel %vm809_vm0, %v784_v12, 0.0 }
  0xa4   : > { %6280 = vst [vmem:[#allocation24_spill] sm:$0xff] %v4242_v13  ;;  %v4275_v59 = vadd.f32 %v3986_v40, %v724_v17  ;;  %3041 = vrot.lane.b32.xlu2 %v4250_v50, %s3758_s17  ;;  %v4281_v47 = vsel %vm809_vm0, %v781_v21, 0.0  ;;  %v739_v60 = vmul.f32 %v685_v22, %v4018_v27  ;;  %v735_v34 = vmul.f32 %v681_v23, %v4020_v19 }
  0xa5   : > { %6281 = vst [vmem:[#allocation25_spill] sm:$0xff] %v4250_v50  ;;  %v678_v62 = vmul.f32 %v4030_v37, %v4024_v30  ;;  %v796_v12 = vadd.f32 %v3986_v40, %v738_v43  ;;  %v736_v1 = vmul.f32 %v682_v49, %v4022_v29  ;;  %v679_v17 = vmul.f32 %v4030_v37, %v4026_v31 }
  0xa6   : > { %6282 = vst [vmem:[#allocation26_spill] sm:$0xff] %v4265_v26  ;;  %v659_v2 = vmul.f32 %v4030_v37, %v4028_v32  ;;  %v4295_v21 = vpack.i.bf16 %v4253_v41, %v4265_v26  ;;  %v793_v27 = vadd.f32 %v3986_v40, %v735_v34  ;;  %vm814_vm1 = vcmp.le.s32.totalorder %v4181_v9, 16 }
  0xa7   : > { %6283 = vst [vmem:[#allocation27_spill] sm:$0xff] %v4268_v58  ;;  %v732_v19 = vmul.f32 %v678_v62, %v4024_v30  ;;  %v4302_v22 = vpack.i.bf16 %v4268_v58, %v4272_v39  ;;  %v4306_v29 = vpack.i.bf16 %v4275_v59, %v4281_v47  ;;  %v733_v43 = vmul.f32 %v679_v17, %v4026_v31 }
  0xa8   : > { %6284 = vst [vmem:[#allocation28_spill] sm:$0xff] %v4272_v39  ;;  %v713_v23 = vmul.f32 %v659_v2, %v4028_v32  ;;  %v4311_v49 = vadd.f32 %v3986_v40, %v739_v60  ;;  %v687_v34 = vmul.f32 %v4030_v37, %v4032_v42  ;;  %v688_v62 = vmul.f32 %v4030_v37, %v4076_v20 }
  0xa9   : > { %6285 = vst [vmem:[#allocation29_spill] sm:$0xff] %v4281_v47  ;;  %v790_v30 = vadd.f32 %v3986_v40, %v732_v19  ;;  %v4320_v11 = vsel %vm809_vm0, %v796_v12, 0.0  ;;  %v4323_v7 = vadd.f32 %v3986_v40, %v736_v1  ;;  %v989_v31 = vrot.slane %v4116_v45, 1  ;;  %v372_v19 = vld [vmem:[%s3844_s12 + $0x70] sm:$0x3] }
  0xaa   : > { %6286 = vst [vmem:[#allocation30_spill] sm:$0xff] %v4295_v21  ;;  %v771_v2 = vadd.f32 %v3986_v40, %v713_v23  ;;  %v4329_v32 = vsel %vm809_vm0, %v793_v27, 0.0  ;;  %v4332_v60 = vadd.f32 %v3986_v40, %v733_v43  ;;  %v990_v17 = vrot.slane %v4106_v57, 1 }
  0xab   : > { %6287 = vst [vmem:[#allocation31_spill] sm:$0xff] %v4302_v22  ;;  %v644_v12 = vmul.f32 %v4030_v37, %v4185_v10  ;;  %3066 = vrot.lane.b32.xlu1 %v4295_v21, %s3758_s17  ;;  %3061 = vrot.lane.b32.xlu0 %v4302_v22, %s3758_s17  ;;  %v4344_v1 = vsel %vm809_vm0, %v790_v30, 0.0  ;;  %v741_v27 = vmul.f32 %v687_v34, %v4032_v42  ;;  %v964_v22 = vrot.slane %v4100_v53, 1 }
  0xac   : > { %6288 = vst [vmem:[#allocation32_spill] sm:$0xff] %v4306_v29  ;;  %v742_v43 = vmul.f32 %v688_v62, %v4076_v20  ;;  %3056 = vrot.lane.b32.xlu2 %v4306_v29, %s3758_s17  ;;  %v4352_v23 = vsel %vm814_vm1, %v771_v2, 0.0  ;;  %v965_v30 = vrot.slane %v4073_v3, 1  ;;  %v4359_v13 = vpack.i.bf16 %v4311_v49, %v4320_v11 }
  0xad   : > { %6289 = vst [vmem:[#allocation33_spill] sm:$0xff] %v4311_v49  ;;  %v698_v4 = vmul.f32 %v644_v12, %v4185_v10  ;;  %v4363_v42 = vpack.i.bf16 %v4323_v7, %v4329_v32  ;;  %v668_v20 = vmul.f32 %v4030_v37, %v4195_v16  ;;  %v430_v34 = vmul.f32 %v3849_v8, %v372_v19 }
  0xae   : > { %6290 = vst [vmem:[#allocation34_spill] sm:$0xff] %v4320_v11  ;;  %v4370_v10 = vpack.i.bf16 %v4332_v60, %v4344_v1  ;;  %v991_v62 = vsel %vm958_vm2, %v989_v31, %v990_v17  ;;  %v6296_v12 = vmax.f32 %v4155_v56, 0.0  ;;  %v992_v52 = vrot.slane %v4352_v23, 1 }
  0xaf   : > { %6291 = vst [vmem:[#allocation35_spill] sm:$0xff] %v4323_v7  ;;  %v756_v2 = vadd.f32 %v3986_v40, %v698_v4  ;;  %v799_v21 = vadd.f32 %v3986_v40, %v741_v27  ;;  %v4379_v50 = vadd.f32 %v3986_v40, %v742_v43  ;;  %v722_v19 = vmul.f32 %v668_v20, %v4195_v16 }
  0xb0   : > { %6292 = vst [vmem:[#allocation36_spill] sm:$0xff] %v4329_v32  ;;  %v587_v29 = vmin.f32 %v6296_v12, 6.0  ;;  %v966_v4 = vsel %vm958_vm2, %v964_v22, %v965_v30  ;;  %v1004_v56 = vrot.slane %v4201_v15, 1  ;;  %v1005_v43 = vrot.slane %v4178_v63, 1  ;;  %v369_v22 = vld [vmem:[%s3844_s12 + $0x58] sm:$0x3] }
  0xb1   : > { %6293 = vst [vmem:[#allocation37_spill] sm:$0xff] %v4359_v13  ;;  %v4385_v18 = vsel %vm814_vm1, %v756_v2, 0.0  ;;  %v780_v27 = vadd.f32 %v3986_v40, %v722_v19  ;;  %v485_v35 = vadd.f32 %v3859_v14, %v430_v34  ;;  %v969_v20 = vrot.slane %v4084_v33, 1 }
  0xb2   : > { %6294 = vst [vmem:[#allocation38_spill] sm:$0xff] %v4363_v42  ;;  %v647_v31 = vmul.f32 %v4030_v37, %v587_v29  ;;  %v967_v12 = vrot.slane %v4385_v18, 1  ;;  %v970_v2 = vrot.slane %v4069_v54, 1  ;;  %v454_v38 = vmul.f32 %v3849_v8, %v396_v36 }
  0xb3   : > { %6295 = vst [vmem:[#allocation39_spill] sm:$0xff] %v4370_v10  ;;  %3081 = vrot.lane.b32.xlu1 %v4359_v13, %s3758_s17  ;;  %3076 = vrot.lane.b32.xlu0 %v4363_v42, %s3758_s17  ;;  %v993_v19 = vsel %vm958_vm2, %v990_v17, %v992_v52  ;;  %v4405_v34 = vsel %vm809_vm0, %v799_v21, 0.0  ;;  %v979_v42 = vrot.slane %v4167_v61, 1  ;;  %v980_v52 = vrot.slane %v4152_v44, 1 }
  0xb4   : > { %6297 = vst [vmem:[#allocation40_spill] sm:$0xff] %v4379_v50  ;;  %v701_v16 = vmul.f32 %v647_v31, %v587_v29  ;;  %v4409_v29 = vsel %vm814_vm1, %v780_v27, 0.0  ;;  %v539_v31 = vmax.f32 %v485_v35, 0.0  ;;  %3071 = vrot.lane.b32.xlu2 %v4370_v10, %s3758_s17  ;;  %v968_v36 = vsel %vm958_vm2, %v965_v30, %v967_v12  ;;  %v381_v35 = vld [vmem:[%s3844_s12 + $0xb8] sm:$0x3] }
  0xb5   : > { %6298 = vst [vmem:[#allocation41_spill] sm:$0xff] %v4405_v34  ;;  %v1007_v24 = vrot.slane %v4409_v29, 1  ;;  %v509_v17 = vadd.f32 %v3859_v14, %v454_v38  ;;  %v427_v27 = vmul.f32 %v3849_v8, %v369_v22  ;;  %v4421_v51 = vpack.i.bf16 %v993_v19, %v991_v62 }
  0xb6   : > { %6299 = vst [vmem:[#allocation42_spill] sm:$0xff] %v4409_v29  ;;  %v759_v13 = vadd.f32 %v3986_v40, %v701_v16  ;;  %v593_v21 = vmin.f32 %v539_v31, 6.0  ;;  %v4425_v30 = vpack.i.bf16 %v4379_v50, %v4405_v34  ;;  %v1006_v12 = vsel %vm958_vm2, %v1004_v56, %v1005_v43  ;;  %v405_v34 = vld [vmem:[%s3844_s12 + $0x178] sm:$0x3] }
  0xb7   : > { %6300 = vst [vmem:[#allocation43_spill] sm:$0xff] %v4421_v51  ;;  %v971_v16 = vsel %vm958_vm2, %v969_v20, %v970_v2  ;;  %v563_v38 = vmax.f32 %v509_v17, 0.0  ;;  %v1019_v22 = vrot.slane %v4265_v26, 1  ;;  %v4435_v62 = vpack.i.bf16 %v968_v36, %v966_v4  ;;  %v375_v36 = vld [vmem:[%s3844_s12 + $0x88] sm:$0x3] }
  0xb8   : > { %6301 = vst [vmem:[#allocation44_spill] sm:$0xff] %v4425_v30  ;;  %v4431_v10 = vsel %vm814_vm1, %v759_v13, 0.0  ;;  %v653_v31 = vmul.f32 %v4030_v37, %v593_v21  ;;  %v6201_v19 = vrot.slane %v4253_v41, 1  ;;  %v482_v50 = vadd.f32 %v3859_v14, %v427_v27 }
  0xb9   : > { %6302 = vst [vmem:[#allocation45_spill] sm:$0xff] %v4435_v62  ;;  %v439_v56 = vmul.f32 %v3849_v8, %v381_v35  ;;  %v1008_v20 = vsel %vm958_vm2, %v1005_v43, %v1007_v24  ;;  %v981_v13 = vsel %vm958_vm2, %v979_v42, %v980_v52  ;;  %v617_v61 = vmin.f32 %v563_v38, 6.0 }
  0xba   : > { %v707_v44 = vmul.f32 %v653_v31, %v593_v21  ;;  %v972_v29 = vrot.slane %v4431_v10, 1  ;;  %v536_v17 = vmax.f32 %v482_v50, 0.0  ;;  %v974_v26 = vrot.slane %v4080_v28, 1 }
  0xbb   : > { %v494_v4 = vadd.f32 %v3859_v14, %v439_v56  ;;  %3116 = vrot.lane.b32.xlu0 %v4421_v51, %s3755_s30  ;;  %3091 = vrot.lane.b32.xlu1 %v4435_v62, %s3755_s30  ;;  %v677_v24 = vmul.f32 %v4030_v37, %v617_v61  ;;  %v975_v42 = vrot.slane %v4065_v25, 1  ;;  %v463_v21 = vmul.f32 %v3849_v8, %v405_v34 }
  0xbc   : > { %v765_v43 = vadd.f32 %v3986_v40, %v707_v44  ;;  %3086 = vrot.lane.b32.xlu2 %v4425_v30, %s3758_s17  ;;  %v4457_v50 = vpack.i.bf16 %v1008_v20, %v1006_v12  ;;  %v1021_v27 = vsel %vm958_vm2, %v1019_v22, %v6201_v19  ;;  %v590_v35 = vmin.f32 %v536_v17, 6.0 }
  0xbd   : > { %v548_v31 = vmax.f32 %v494_v4, 0.0  ;;  %v731_v38 = vmul.f32 %v677_v24, %v617_v61  ;;  %v518_v56 = vadd.f32 %v3859_v14, %v463_v21  ;;  %v433_v34 = vmul.f32 %v3849_v8, %v375_v36 }
  0xbe   : > { %6303 = vst [vmem:[#allocation46_spill] sm:$0xff] %v4457_v50  ;;  %v4464_v44 = vsel %vm814_vm1, %v765_v43, 0.0  ;;  %v973_v30 = vsel %vm958_vm2, %v970_v2, %v972_v29  ;;  %v650_v20 = vmul.f32 %v4030_v37, %v590_v35  ;;  %v994_v17 = vrot.slane %v4222_v46, 1  ;;  %v390_v2 = vld [vmem:[%s3844_s12 + $0x100] sm:$0x3] }
  0xbf   : > { %v982_v12 = vrot.slane %v4464_v44, 1  ;;  %v602_v51 = vmin.f32 %v548_v31, 6.0  ;;  %v789_v22 = vadd.f32 %v3986_v40, %v731_v38  ;;  %v572_v4 = vmax.f32 %v518_v56, 0.0 }
  0xc0   : > { %v488_v43 = vadd.f32 %v3859_v14, %v433_v34  ;;  %v704_v24 = vmul.f32 %v650_v20, %v590_v35  ;;  %v995_v36 = vrot.slane %v4216_v48, 1  ;;  %v4484_v62 = vpack.i.bf16 %v973_v30, %v971_v16 }
  0xc1   : > { %v983_v61 = vsel %vm958_vm2, %v980_v52, %v982_v12  ;;  %v662_v21 = vmul.f32 %v4030_v37, %v602_v51  ;;  %v4482_v31 = vsel %vm814_vm1, %v789_v22, 0.0  ;;  %v626_v38 = vmin.f32 %v572_v4, 6.0 }
  0xc2   : > { %v4478_v29 = vpack.i.bf16 %v983_v61, %v981_v13  ;;  %v542_v19 = vmax.f32 %v488_v43, 0.0  ;;  %6305 = vst [vmem:[#allocation48_spill] sm:$0xff] %v4484_v62  ;;  %v1022_v56 = vrot.slane %v4482_v31, 1  ;;  %v762_v52 = vadd.f32 %v3986_v40, %v704_v24 }
  0xc3   : > { %v716_v35 = vmul.f32 %v662_v21, %v602_v51  ;;  %3131 = vrot.lane.b32.xlu0 %v4457_v50, %s3755_s30  ;;  %v976_v13 = vsel %vm958_vm2, %v974_v26, %v975_v42  ;;  %v686_v34 = vmul.f32 %v4030_v37, %v626_v38  ;;  %v448_v20 = vmul.f32 %v3849_v8, %v390_v2 }
  0xc4   : > { %6304 = vst [vmem:[#allocation47_spill] sm:$0xff] %v4478_v29  ;;  %3106 = vrot.lane.b32.xlu1 %v4478_v29, %s3755_s30  ;;  %v596_v12 = vmin.f32 %v542_v19, 6.0  ;;  %3096 = vrot.lane.b32.xlu2 %v4484_v62, %s3755_s30  ;;  %v4499_v30 = vsel %vm814_vm1, %v762_v52, 0.0  ;;  %v996_v16 = vsel %vm958_vm2, %v994_v17, %v995_v36  ;;  %v1034_v22 = vrot.slane %v4320_v11, 1 }
  0xc5   : > { %v774_v51 = vadd.f32 %v3986_v40, %v716_v35  ;;  %v977_v26 = vrot.slane %v4499_v30, 1  ;;  %v740_v4 = vmul.f32 %v686_v34, %v626_v38  ;;  %v1035_v19 = vrot.slane %v4311_v49, 1 }
  0xc6   : > { %v656_v43 = vmul.f32 %v4030_v37, %v596_v12  ;;  %v6306_v61 = vrot.slane %v4253_v41, 1  ;;  %v984_v17 = vrot.slane %v4140_v0, 1  ;;  %v503_v2 = vadd.f32 %v3859_v14, %v448_v20 }
  0xc7   : > { %v4512_v21 = vsel %vm814_vm1, %v774_v51, 0.0  ;;  %v978_v52 = vsel %vm958_vm2, %v975_v42, %v977_v26  ;;  %v798_v35 = vadd.f32 %v3986_v40, %v740_v4  ;;  %v985_v50 = vrot.slane %v4127_v5, 1 }
  0xc8   : > { %v1023_v24 = vsel %vm958_vm2, %v6306_v61, %v1022_v56  ;;  %v997_v38 = vrot.slane %v4512_v21, 1  ;;  %v710_v34 = vmul.f32 %v656_v43, %v596_v12  ;;  %v557_v62 = vmax.f32 %v503_v2, 0.0  ;;  %v384_v61 = vld [vmem:[%s3844_s12 + $0xd0] sm:$0x3] }
  0xc9   : > { %v1009_v56 = vrot.slane %v4281_v47, 1  ;;  %v1010_v51 = vrot.slane %v4275_v59, 1  ;;  %v4523_v29 = vpack.i.bf16 %v1023_v24, %v1021_v27  ;;  %v4528_v42 = vsel %vm814_vm1, %v798_v35, 0.0  ;;  %v399_v47 = vld [vmem:[%s3844_s12 + $0x148] sm:$0x3] }
  0xca   : > { %v998_v20 = vsel %vm958_vm2, %v995_v36, %v997_v38  ;;  %v768_v26 = vadd.f32 %v3986_v40, %v710_v34  ;;  %v4531_v4 = vpack.i.bf16 %v978_v52, %v976_v13  ;;  %v1037_v43 = vrot.slane %v4528_v42, 1 }
  0xcb   : > { %6307 = vst [vmem:[#allocation49_spill] sm:$0xff] %v4523_v29  ;;  %v4533_v12 = vpack.i.bf16 %v998_v20, %v996_v16  ;;  %v611_v2 = vmin.f32 %v557_v62, 6.0  ;;  %3146 = vrot.lane.b32.xlu0 %v4523_v29, %s3755_s30  ;;  %v1050_v36 = vrot.slane %v4084_v33, 2  ;;  %v1051_v24 = vrot.slane %v4069_v54, 2  ;;  %v393_v54 = vld [vmem:[%s3844_s12 + $0x118] sm:$0x3] }
  0xcc   : > { %6308 = vst [vmem:[#allocation50_spill] sm:$0xff] %v4531_v4  ;;  %v873_v27 = vsel %vm814_vm1, %v768_v26, 0.0  ;;  %v442_v13 = vmul.f32 %v3849_v8, %v384_v61  ;;  %3101 = vrot.lane.b32.xlu2 %v4531_v4, %s3755_s30  ;;  %v1053_v52 = vrot.slane %v4431_v10, 2  ;;  %v1036_v38 = vsel %vm958_vm2, %v1034_v22, %v1035_v19 }
  0xcd   : > { %6309 = vst [vmem:[#allocation51_spill] sm:$0xff] %v4533_v12  ;;  %3121 = vrot.lane.b32.xlu1 %v4533_v12, %s3755_s30  ;;  %v987_v62 = vrot.slane %v873_v27, 1  ;;  %v671_v16 = vmul.f32 %v4030_v37, %v611_v2  ;;  %v1038_v35 = vsel %vm958_vm2, %v1035_v19, %v1037_v43  ;;  %v457_v61 = vmul.f32 %v3849_v8, %v399_v47 }
  0xce   : > { %v497_v34 = vadd.f32 %v3859_v14, %v442_v13  ;;  %v986_v20 = vsel %vm958_vm2, %v984_v17, %v985_v50  ;;  %v1011_v33 = vsel %vm958_vm2, %v1009_v56, %v1010_v51  ;;  %v1052_v4 = vsel %vm1039_vm3, %v1050_v36, %v1051_v24 }
  0xcf   : > { %v725_v26 = vmul.f32 %v671_v16, %v611_v2  ;;  %v988_v29 = vsel %vm958_vm2, %v985_v50, %v987_v62  ;;  %v512_v10 = vadd.f32 %v3859_v14, %v457_v61  ;;  %v4560_v22 = vpack.i.bf16 %v1038_v35, %v1036_v38 }
  0xd0   : > { %v551_v12 = vmax.f32 %v497_v34, 0.0  ;;  %v1054_v43 = vsel %vm1039_vm3, %v1051_v24, %v1053_v52  ;;  %v999_v47 = vrot.slane %v4213_v55, 1  ;;  %v1000_v2 = vrot.slane %v4209_v6, 1 }
  0xd1   : > { %6310 = vst [vmem:[#allocation52_spill] sm:$0xff] %v4560_v22  ;;  %v783_v19 = vadd.f32 %v3986_v40, %v725_v26  ;;  %v566_v56 = vmax.f32 %v512_v10, 0.0  ;;  %v451_v13 = vmul.f32 %v3849_v8, %v393_v54  ;;  %v4567_v50 = vpack.i.bf16 %v988_v29, %v986_v20  ;;  %v4586_v20 = vpop.permute.xlu1 %3001 }
  0xd2   : > { %v605_v17 = vmin.f32 %v551_v12, 6.0  ;;  %v1065_v62 = vrot.slane %v4140_v0, 2  ;;  %v1066_v16 = vrot.slane %v4127_v5, 2  ;;  %v1068_v38 = vrot.slane %v873_v27, 2 }
  0xd3   : > { %6311 = vst [vmem:[#allocation53_spill] sm:$0xff] %v4567_v50  ;;  %v4571_v36 = vsel %vm814_vm1, %v783_v19, 0.0  ;;  %3161 = vrot.lane.b32.xlu0 %v4560_v22, %s3755_s30  ;;  %v620_v52 = vmin.f32 %v566_v56, 6.0  ;;  %v1024_v8 = vrot.slane %v4344_v1, 1  ;;  %v1025_v54 = vrot.slane %v4332_v60, 1 }
  0xd4   : > { %v1012_v12 = vrot.slane %v4571_v36, 1  ;;  %v665_v24 = vmul.f32 %v4030_v37, %v605_v17  ;;  %3111 = vrot.lane.b32.xlu2 %v4567_v50, %s3755_s30  ;;  %v506_v29 = vadd.f32 %v3859_v14, %v451_v13  ;;  %v4590_v27 = vpack.i.bf16 %v1054_v43, %v1052_v4  ;;  %v402_v43 = vld [vmem:[%s3844_s12 + $0x160] sm:$0x3] }
  0xd5   : > { %v680_v61 = vmul.f32 %v4030_v37, %v620_v52  ;;  %v1001_v10 = vsel %vm958_vm2, %v999_v47, %v1000_v2  ;;  %v1067_v14 = vsel %vm1039_vm3, %v1065_v62, %v1066_v16  ;;  %v1015_v4 = vrot.slane %v4268_v58, 1 }
  0xd6   : > { %v1013_v35 = vsel %vm958_vm2, %v1010_v51, %v1012_v12  ;;  %v719_v34 = vmul.f32 %v665_v24, %v605_v17  ;;  %6313 = vst [vmem:[#allocation55_spill] sm:$0xff] %v4590_v27  ;;  %v560_v19 = vmax.f32 %v506_v29, 0.0  ;;  %v1069_v51 = vsel %vm1039_vm3, %v1066_v16, %v1068_v38 }
  0xd7   : > { %v4588_v26 = vpack.i.bf16 %v1013_v35, %v1011_v33  ;;  %v734_v0 = vmul.f32 %v680_v61, %v620_v52  ;;  %v1026_v17 = vsel %vm958_vm2, %v1024_v8, %v1025_v54  ;;  %v1014_v33 = vrot.slane %v4272_v39, 1 }
  0xd8   : > { %v777_v56 = vadd.f32 %v3986_v40, %v719_v34  ;;  %v614_v13 = vmin.f32 %v560_v19, 6.0  ;;  %v1055_v62 = vrot.slane %v4080_v28, 2  ;;  %v1056_v16 = vrot.slane %v4065_v25, 2  ;;  %v4622_v34 = vld [vmem:[%s6163_s2] ss:$0 sm:$0xff]  ;;  %v6324_v25 = vld [vmem:[#allocation15_spill] sm:$0xff] }
  0xd9   : > { %6312 = vst [vmem:[#allocation54_spill] sm:$0xff] %v4588_v26  ;;  %3136 = vrot.lane.b32.xlu1 %v4588_v26, %s3755_s30  ;;  %v792_v12 = vadd.f32 %v3986_v40, %v734_v0  ;;  %v4607_v52 = vpack.i.bf16 %v1069_v51, %v1067_v14  ;;  %v1058_v8 = vrot.slane %v4499_v30, 2  ;;  %v1080_v0 = vrot.slane %v4213_v55, 2  ;;  %v4633_v55 = vld [vmem:[%s6163_s2 + $0x1] ss:$0 sm:$0xff] }
  0xda   : > { %v882_v47 = vsel %vm814_vm1, %v777_v56, 0.0  ;;  %v674_v38 = vmul.f32 %v4030_v37, %v614_v13  ;;  %v1081_v35 = vrot.slane %v4209_v6, 2  ;;  %v460_v61 = vmul.f32 %v4622_v34, %v402_v43 }
  0xdb   : > { %v1002_v24 = vrot.slane %v882_v47, 1  ;;  %6314 = vst [vmem:[#allocation56_spill] sm:$0xff] %v4607_v52  ;;  %3171 = vrot.lane.b32.xlu0 %v4590_v27, %s3757_s8  ;;  %v4615_v29 = vsel %vm814_vm1, %v792_v12, 0.0  ;;  %v1083_v14 = vrot.slane %v882_v47, 2  ;;  %v1057_v12 = vsel %vm1039_vm3, %v1055_v62, %v1056_v16 }
  0xdc   : > { %v1027_v19 = vrot.slane %v4615_v29, 1  ;;  %v728_v56 = vmul.f32 %v674_v38, %v614_v13  ;;  %v515_v6 = vadd.f32 %v4633_v55, %v460_v61  ;;  %v3004_v13 = vunpack.i.h.bf16 %v4586_v20 }
  0xdd   : > { %v1003_v30 = vsel %vm958_vm2, %v1000_v2, %v1002_v24  ;;  %v1059_v24 = vsel %vm1039_vm3, %v1056_v16, %v1058_v8  ;;  %v3003_v47 = vunpack.i.l.bf16 %v4586_v20  ;;  %v1029_v38 = vrot.slane %v4329_v32, 1 }
  0xde   : > { %v4627_v51 = vpack.i.bf16 %v1003_v30, %v1001_v10  ;;  %v1028_v43 = vsel %vm958_vm2, %v1025_v54, %v1027_v19  ;;  %v786_v2 = vadd.f32 %v3986_v40, %v728_v56  ;;  %v569_v62 = vmax.f32 %v515_v6, 0.0  ;;  %v3007_v30 = vpop.permute.xlu1 %3006 }
  0xdf   : > { %v4642_v10 = vpack.i.bf16 %v1028_v43, %v1026_v17  ;;  %v1082_v61 = vsel %vm1039_vm3, %v1080_v0, %v1081_v35  ;;  %v1084_v16 = vsel %vm1039_vm3, %v1081_v35, %v1083_v14  ;;  %v1030_v8 = vrot.slane %v4323_v7, 1 }
  0xe0   : > { %6315 = vst [vmem:[#allocation57_spill] sm:$0xff] %v4627_v51  ;;  %3126 = vrot.lane.b32.xlu2 %v4627_v51, %s3755_s30  ;;  %v891_v54 = vsel %vm814_vm1, %v786_v2, 0.0  ;;  %v623_v19 = vmin.f32 %v569_v62, 6.0  ;;  %v1070_v20 = vrot.slane %v4116_v45, 2  ;;  %v1071_v6 = vrot.slane %v4106_v57, 2 }
  0xe1   : > { %6316 = vst [vmem:[#allocation58_spill] sm:$0xff] %v4642_v10  ;;  %3151 = vrot.lane.b32.xlu1 %v4642_v10, %s3755_s30  ;;  %v1017_v17 = vrot.slane %v891_v54, 1  ;;  %v4656_v56 = vsel %vm958_vm2, %v1014_v33, %v1015_v4  ;;  %v1073_v43 = vrot.slane %v4352_v23, 2  ;;  %v3009_v2 = vunpack.i.h.bf16 %v3007_v30 }
  0xe2   : > { %6317 = vst [vmem:[#allocation59_spill] sm:$0xff] %v4656_v56  ;;  %v2076_v35 = vsel %vm2074_vm4, 0.0, %v3004_v13  ;;  %v683_v14 = vmul.f32 %v4030_v37, %v623_v19  ;;  %v4666_v62 = vpack.i.bf16 %v1059_v24, %v1057_v12  ;;  %v2075_v45 = vsel %vm2074_vm4, 0.0, %v3003_v47 }
  0xe3   : > { %3186 = vrot.lane.b32.xlu0 %v4607_v52, %s3757_s8  ;;  %v4662_v0 = vsel %vm958_vm2, %v1015_v4, %v1017_v17  ;;  %v4669_v33 = vpack.i.bf16 %v1084_v16, %v1082_v61  ;;  %v4672_v23 = vsel %vm958_vm2, %v1029_v38, %v1030_v8  ;;  %v1072_v17 = vsel %vm1039_vm3, %v1070_v20, %v1071_v6 }
  0xe4   : > { %6318 = vst [vmem:[#allocation60_spill] sm:$0xff] %v4662_v0  ;;  %v4676_v57 = vpack.i.bf16 %v4662_v0, %v4656_v56  ;;  %v737_v4 = vmul.f32 %v683_v14, %v623_v19  ;;  %v3008_v13 = vunpack.i.l.bf16 %v3007_v30  ;;  %v1074_v28 = vsel %vm1039_vm3, %v1071_v6, %v1073_v43 }
  0xe5   : > { %6319 = vst [vmem:[#allocation61_spill] sm:$0xff] %v4666_v62  ;;  %v2109_v12 = vsel %vm2107_vm5, %v2076_v35, %v3009_v2  ;;  %v1095_v24 = vrot.slane %v4272_v39, 2  ;;  %v1096_v38 = vrot.slane %v4268_v58, 2  ;;  %v1098_v61 = vrot.slane %v891_v54, 2  ;;  %v6322_v2 = vld [vmem:[#allocation42_spill] sm:$0xff]  ;;  %v6323_v58 = vld [vmem:[#allocation17_spill] sm:$0xff] }
  0xe6   : > { %6320 = vst [vmem:[#allocation62_spill] sm:$0xff] %v4669_v33  ;;  %v795_v47 = vadd.f32 %v3986_v40, %v737_v4  ;;  %v1045_v16 = vrot.slane %v4100_v53, 2  ;;  %v1046_v19 = vrot.slane %v4073_v3, 2  ;;  %v1048_v30 = vrot.slane %v4385_v18, 2 }
  0xe7   : > { %6321 = vst [vmem:[#allocation63_spill] sm:$0xff] %v4672_v23  ;;  %v1085_v20 = vrot.slane %v4201_v15, 2  ;;  %v1086_v6 = vrot.slane %v4178_v63, 2  ;;  %v1088_v35 = vrot.slane %v6322_v2, 2  ;;  %v1110_v54 = vrot.slane %v4329_v32, 2 }
  0xe8   : > { %3141 = vrot.lane.b32.xlu2 %v4676_v57, %s3755_s30  ;;  %v900_v43 = vsel %vm814_vm1, %v795_v47, 0.0  ;;  %v1111_v14 = vrot.slane %v4323_v7, 2  ;;  %v1060_v18 = vrot.slane %v6323_v58, 2  ;;  %v1061_v15 = vrot.slane %v6324_v25, 2 }
  0xe9   : > { %3176 = vrot.lane.b32.xlu1 %v4666_v62, %s3757_s8  ;;  %v1032_v4 = vrot.slane %v900_v43, 1  ;;  %v1113_v39 = vrot.slane %v900_v43, 2  ;;  %v4702_v63 = vpack.i.bf16 %v1074_v28, %v1072_v17  ;;  %v2108_v5 = vsel %vm2107_vm5, %v2075_v45, %v3008_v13 }
  0xea   : > { %v1097_v47 = vsel %vm1039_vm3, %v1095_v24, %v1096_v38  ;;  %v1063_v2 = vrot.slane %v4464_v44, 2  ;;  %v1099_v43 = vsel %vm1039_vm3, %v1096_v38, %v1098_v61  ;;  %v1047_v7 = vsel %vm1039_vm3, %v1045_v16, %v1046_v19  ;;  %v6327_v24 = vld [vmem:[#allocation26_spill] sm:$0xff] }
  0xeb   : > { %3201 = vrot.lane.b32.xlu0 %v4669_v33, %s3757_s8  ;;  %6325 = vst [vmem:[#allocation42_spill] sm:$0xff] %v4702_v63  ;;  %v4708_v32 = vsel %vm958_vm2, %v1030_v8, %v1032_v4  ;;  %v1049_v58 = vsel %vm1039_vm3, %v1046_v19, %v1048_v30  ;;  %v1087_v28 = vsel %vm1039_vm3, %v1085_v20, %v1086_v6  ;;  %v1100_v38 = vrot.slane %v6327_v24, 2 }
  0xec   : > { %6326 = vst [vmem:[#allocation64_spill] sm:$0xff] %v4708_v32  ;;  %v4715_v25 = vpack.i.bf16 %v4708_v32, %v4672_v23  ;;  %v1089_v45 = vsel %vm1039_vm3, %v1086_v6, %v1088_v35  ;;  %v1112_v17 = vsel %vm1039_vm3, %v1110_v54, %v1111_v14  ;;  %v1114_v8 = vsel %vm1039_vm3, %v1111_v14, %v1113_v39  ;;  %v6348_v23 = vld [vmem:[#allocation5_spill] sm:$0xff] }
  0xed   : > { %v1062_v13 = vsel %vm1039_vm3, %v1060_v18, %v1061_v15  ;;  %v1101_v61 = vrot.slane %v4253_v41, 2  ;;  %v1064_v30 = vsel %vm1039_vm3, %v1061_v15, %v1063_v2  ;;  %v4727_v20 = vpack.i.bf16 %v1099_v43, %v1097_v47  ;;  %v6330_v43 = vld [vmem:[#allocation29_spill] sm:$0xff] }
  0xee   : > { %v3012_v44 = vpop.permute.xlu2 %3011  ;;  %v4737_v35 = vpack.i.bf16 %v1049_v58, %v1047_v7  ;;  %v4739_v54 = vpack.i.bf16 %v1089_v45, %v1087_v28  ;;  %v4741_v14 = vpack.i.bf16 %v1114_v8, %v1112_v17  ;;  %v4743_v4 = vpack.i.bf16 %v1064_v30, %v1062_v13  ;;  %v408_v13 = vld [vmem:[%s3844_s12 + $0x190] sm:$0x3]  ;;  %s3764_s12 = smov 72  }
  0xef   : > { %v3014_v16 = vunpack.i.h.bf16 %v3012_v44  ;;  %v3013_v19 = vunpack.i.l.bf16 %v3012_v44  ;;  %v1102_v15 = vsel %vm1039_vm3, %v1100_v38, %v1101_v61  ;;  %v1103_v18 = vrot.slane %v4482_v31, 2 }
  0xf0   : > { %3156 = vrot.lane.b32.xlu2 %v4715_v25, %s3755_s30  ;;  %6328 = vst [vmem:[#allocation26_spill] sm:$0xff] %v4739_v54  ;;  %v1078_v7 = vrot.slane %v4512_v21, 2  ;;  %v1115_v58 = vrot.slane %v4320_v11, 2  ;;  %v1116_v47 = vrot.slane %v4311_v49, 2  ;;  %v1118_v2 = vrot.slane %v4528_v42, 2  ;;  %s3763_s30 = smov 64  }
  0xf1   : > { %3191 = vrot.lane.b32.xlu1 %v4702_v63, %s3757_s8  ;;  %v4732_v39 = vsel %vm2140_vm6, %v2109_v12, %v3014_v16  ;;  %v4735_v6 = vsel %vm2140_vm6, %v2108_v5, %v3013_v19  ;;  %6329 = vst [vmem:[#allocation65_spill] sm:$0xff] %v4743_v4  ;;  %v1075_v12 = vrot.slane %v4222_v46, 2  ;;  %v1076_v5 = vrot.slane %v4216_v48, 2 }
  0xf2   : > { %v1090_v28 = vrot.slane %v6330_v43, 2  ;;  %v1091_v45 = vrot.slane %v4275_v59, 2  ;;  %v1093_v31 = vrot.slane %v4571_v36, 2  ;;  %v1105_v17 = vrot.slane %v4344_v1, 2 }
  0xf3   : > { %3216 = vrot.lane.b32.xlu0 %v4727_v20, %s3757_s8  ;;  %v1106_v8 = vrot.slane %v4332_v60, 2  ;;  %v1104_v21 = vsel %vm1039_vm3, %v1101_v61, %v1103_v18  ;;  %v1077_v42 = vsel %vm1039_vm3, %v1075_v12, %v1076_v5  ;;  %v1079_v38 = vsel %vm1039_vm3, %v1076_v5, %v1078_v7 }
  0xf4   : > { %v1108_v16 = vrot.slane %v4615_v29, 2  ;;  %v1117_v36 = vsel %vm1039_vm3, %v1115_v58, %v1116_v47  ;;  %v1119_v19 = vsel %vm1039_vm3, %v1116_v47, %v1118_v2  ;;  %v1092_v30 = vsel %vm1039_vm3, %v1090_v28, %v1091_v45 }
  0xf5   : > { %v1094_v11 = vsel %vm1039_vm3, %v1091_v45, %v1093_v31  ;;  %v466_v49 = vmul.f32 %v4622_v34, %v408_v13  ;;  %v1107_v61 = vsel %vm1039_vm3, %v1105_v17, %v1106_v8  ;;  %v4781_v12 = vpack.i.bf16 %v1079_v38, %v1077_v42 }
  0xf6   : > { %v4759_v44 = vpop.permute.xlu2 %3026  ;;  %v1109_v29 = vsel %vm1039_vm3, %v1106_v8, %v1108_v16  ;;  %v4783_v7 = vpack.i.bf16 %v1104_v21, %v1102_v15  ;;  %v4785_v58 = vpack.i.bf16 %v1094_v11, %v1092_v30  ;;  %v4789_v2 = vpack.i.bf16 %v1119_v19, %v1117_v36  ;;  %v6337_v8 = vld [vmem:[#allocation41_spill] sm:$0xff]  ;;  %v6338_v21 = vld [vmem:[#allocation40_spill] sm:$0xff] }
  0xf7   : > { %v521_v18 = vadd.f32 %v4633_v55, %v466_v49  ;;  %6331 = vst [vmem:[#allocation29_spill] sm:$0xff] %v4781_v12  ;;  %v4791_v34 = vpack.i.bf16 %v1109_v29, %v1107_v61  ;;  %v6336_v49 = vld [vmem:[#allocation45_spill] sm:$0xff]  ;;  %v1128_v13 = vrot.slane %v6337_v8, 2  ;;  %v1129_v42 = vrot.slane %v6338_v21, 2  ;;  %v6339_v29 = vld [vmem:[#allocation47_spill] sm:$0xff] }
  0xf8   : > { %3166 = vrot.lane.b32.xlu2 %v4737_v35, %s3757_s8  ;;  %6332 = vst [vmem:[#allocation66_spill] sm:$0xff] %v4783_v7  ;;  %v1123_v38 = vrot.slane %v6337_v8, 1  ;;  %v1124_v16 = vrot.slane %v6338_v21, 1  ;;  %v6341_v8 = vld [vmem:[#allocation48_spill] sm:$0xff] }
  0xf9   : > { %3206 = vrot.lane.b32.xlu1 %v4739_v54, %s3757_s8  ;;  %v575_v5 = vmax.f32 %v521_v18, 0.0  ;;  %6333 = vst [vmem:[#allocation67_spill] sm:$0xff] %v4785_v58  ;;  %v1130_v61 = vsel %vm1039_vm3, %v1128_v13, %v1129_v42  ;;  %v6342_v13 = vld [vmem:[#allocation51_spill] sm:$0xff] }
  0xfa   : > { %6334 = vst [vmem:[#allocation68_spill] sm:$0xff] %v4789_v2  ;;  %v1125_v18 = vsel %vm958_vm2, %v1123_v38, %v1124_v16 }
  0xfb   : > { %3231 = vrot.lane.b32.xlu0 %v4741_v14, %s3757_s8  ;;  %6335 = vst [vmem:[#allocation69_spill] sm:$0xff] %v4791_v34  ;;  %v629_v28 = vmin.f32 %v575_v5, 6.0 }
  0xfd   : > { %v689_v55 = vmul.f32 %v4030_v37, %v629_v28 }
  0xfe   : > { %v4787_v47 = vpop.permute.xlu2 %3041 }
  0xff   : > { %v743_v11 = vmul.f32 %v689_v55, %v629_v28 }
 0x100   : > { %3181 = vrot.lane.b32.xlu2 %v4743_v4, %s3757_s8 }
 0x101   : > { %3221 = vrot.lane.b32.xlu1 %v4783_v7, %s3757_s8  ;;  %v801_v31 = vadd.f32 %v3986_v40, %v743_v11 }
 0x103   : > { %3241 = vrot.lane.b32.xlu0 %v6336_v49, %s3759_s22  ;;  %v906_v37 = vsel %vm814_vm1, %v801_v31, 0.0 }
 0x104   : > { %v1126_v36 = vrot.slane %v906_v37, 1  ;;  %v1131_v19 = vrot.slane %v906_v37, 2 }
 0x105   : > { %v4800_v15 = vpop.permute.xlu1 %3021  ;;  %v4802_v45 = vpop.permute.xlu0 %3016 }
 0x106   : > { %v4805_v17 = vpop.permute.xlu2 %3056  ;;  %v1132_v9 = vsel %vm1039_vm3, %v1129_v42, %v1131_v19  ;;  %v1127_v5 = vsel %vm958_vm2, %v1124_v16, %v1126_v36  ;;  %v6343_v19 = vld [vmem:[#allocation50_spill] sm:$0xff] }
 0x107   : > { %v4831_v49 = vpack.i.bf16 %v1132_v9, %v1130_v61  ;;  %v4837_v31 = vpack.i.bf16 %v1127_v5, %v1125_v18  ;;  %v6345_v5 = vld [vmem:[#allocation43_spill] sm:$0xff] }
 0x108   : > { %3196 = vrot.lane.b32.xlu2 %v4781_v12, %s3757_s8 }
 0x109   : > { %3236 = vrot.lane.b32.xlu1 %v4789_v2, %s3757_s8  ;;  %6340 = vst [vmem:[#allocation45_spill] sm:$0xff] %v4837_v31 }
 0x10b   : > { %3256 = vrot.lane.b32.xlu0 %v6339_v29, %s3759_s22 }
 0x10d   : > { %v4827_v28 = vpop.permute.xlu1 %3036  ;;  %v4829_v55 = vpop.permute.xlu0 %3031 }
 0x10e   : > { %v4833_v11 = vpop.permute.xlu2 %3071 }
 0x110   : > { %3211 = vrot.lane.b32.xlu2 %v4785_v58, %s3757_s8 }
 0x111   : > { %3246 = vrot.lane.b32.xlu1 %v6341_v8, %s3759_s22 }
 0x113   : > { %3271 = vrot.lane.b32.xlu0 %v6342_v13, %s3759_s22 }
 0x115   : > { %v4843_v21 = vpop.permute.xlu1 %3051  ;;  %v4845_v42 = vpop.permute.xlu0 %3046 }
 0x116   : > { %v4847_v37 = vpop.permute.xlu2 %3086 }
 0x118   : > { %3226 = vrot.lane.b32.xlu2 %v4791_v34, %s3757_s8  ;;  %s2939_s8 = sshll.u32 %s6432_s24, 8 }
 0x119   : > { %3261 = vrot.lane.b32.xlu1 %v4567_v50, %s3759_s22  ;;  %s5415_s11 = scalar_lea.vmem %s6162_s1, %s2939_s8  ;;  %s5996_s13 = scalar_lea.vmem %s6168_s7, %s2939_s8 }
 0x11b   : > { %3286 = vrot.lane.b32.xlu0 %v4588_v26, %s3759_s22 }
 0x11d   : > { %v4855_v38 = vpop.permute.xlu1 %3066  ;;  %v4857_v16 = vpop.permute.xlu0 %3061 }
 0x11e   : > { %v3097_v36 = vpop.permute.xlu2 %3096 }
 0x120   : > { %3251 = vrot.lane.b32.xlu2 %v6343_v19, %s3759_s22 }
 0x121   : > { %3276 = vrot.lane.b32.xlu1 %v4627_v51, %s3759_s22 }
 0x123   : > { %3301 = vrot.lane.b32.xlu0 %v4642_v10, %s3759_s22  ;;  %v6346_v10 = vld [vmem:[#allocation46_spill] sm:$0xff] }
 0x125   : > { %v4865_v61 = vpop.permute.xlu1 %3081  ;;  %v4867_v9 = vpop.permute.xlu0 %3076 }
 0x126   : > { %6344 = vst [vmem:[#allocation41_spill] sm:$0xff] %v4867_v9  ;;  %v4869_v18 = vpop.permute.xlu2 %3101  ;;  %v6358_v9 = vld [vmem:[#allocation22_spill] sm:$0xff] }
 0x128   : > { %3266 = vrot.lane.b32.xlu2 %v6345_v5, %s3759_s22  ;;  %v6349_v5 = vld [vmem:[#allocation7_spill] sm:$0xff] }
 0x129   : > { %3291 = vrot.lane.b32.xlu1 %v4676_v57, %s3759_s22 }
 0x12b   : > { %3316 = vrot.lane.b32.xlu0 %v4837_v31, %s3759_s22  ;;  %v6347_v31 = vld [vmem:[#allocation49_spill] sm:$0xff] }
 0x12d   : > { %v4877_v30 = vpop.permute.xlu0 %3116  ;;  %v3092_v40 = vpop.permute.xlu1 %3091 }
 0x12e   : > { %v3112_v26 = vpop.permute.xlu2 %3111  ;;  %v3094_v51 = vunpack.i.h.bf16 %v3092_v40  ;;  %v3093_v19 = vunpack.i.l.bf16 %v3092_v40 }
 0x12f   : > { %v3114_v40 = vunpack.i.h.bf16 %v3112_v26 }
 0x130   : > { %3281 = vrot.lane.b32.xlu2 %v6346_v10, %s3759_s22  ;;  %v3098_v10 = vunpack.i.l.bf16 %v3097_v36 }
 0x131   : > { %3306 = vrot.lane.b32.xlu1 %v4715_v25, %s3759_s22 }
 0x133   : > { %3331 = vrot.lane.b32.xlu0 %v4666_v62, %s3760_s23 }
 0x135   : > { %v4885_v32 = vpop.permute.xlu0 %3131 }
 0x136   : > { %v4887_v57 = vpop.permute.xlu1 %3106 }
 0x138   : > { %3296 = vrot.lane.b32.xlu2 %v6347_v31, %s3759_s22 }
 0x139   : > { %3321 = vrot.lane.b32.xlu1 %v4737_v35, %s3760_s23 }
 0x13a   : > { %v4893_v0 = vpop.permute.xlu2 %3126 }
 0x13b   : > { %3346 = vrot.lane.b32.xlu0 %v4702_v63, %s3760_s23  ;;  %v3099_v63 = vunpack.i.h.bf16 %v3097_v36 }
 0x13d   : > { %v4897_v25 = vpop.permute.xlu0 %3146 }
 0x13f   : > { %v4901_v62 = vpop.permute.xlu1 %3121 }
 0x140   : > { %3311 = vrot.lane.b32.xlu2 %v4560_v22, %s3759_s22 }
 0x141   : > { %3336 = vrot.lane.b32.xlu1 %v4743_v4, %s3760_s23 }
 0x142   : > { %v4905_v13 = vpop.permute.xlu2 %3141 }
 0x143   : > { %3361 = vrot.lane.b32.xlu0 %v4739_v54, %s3760_s23 }
 0x145   : > { %v4909_v35 = vpop.permute.xlu0 %3161 }
 0x148   : > { %3326 = vrot.lane.b32.xlu2 %v4590_v27, %s3760_s23  ;;  %v2080_v27 = vsel %vm2074_vm4, %v6348_v23, %v3099_v63 }
 0x149   : > { %3351 = vrot.lane.b32.xlu1 %v4781_v12, %s3760_s23  ;;  %v2079_v12 = vsel %vm2074_vm4, %v6349_v5, %v3098_v10  ;;  %v3113_v5 = vunpack.i.l.bf16 %v3112_v26  ;;  %v3023_v26 = vunpack.i.l.bf16 %v4800_v15 }
 0x14a   : > { %v4915_v31 = vpop.permute.xlu2 %3156 }
 0x14b   : > { %v4917_v22 = vpop.permute.xlu1 %3136  ;;  %3376 = vrot.lane.b32.xlu0 %v4783_v7, %s3760_s23 }
 0x14d   : > { %v3172_v4 = vpop.permute.xlu0 %3171 }
 0x14e   : > { %v3174_v29 = vunpack.i.h.bf16 %v3172_v4  ;;  %v3173_v56 = vunpack.i.l.bf16 %v3172_v4  ;;  %v6350_v4 = vld [vmem:[#allocation12_spill] sm:$0xff] }
 0x14f   : > { %v2086_v36 = vsel %vm2074_vm4, %v6350_v4, %v3114_v40  ;;  %v3104_v4 = vunpack.i.h.bf16 %v4869_v18  ;;  %v3103_v40 = vunpack.i.l.bf16 %v4869_v18  ;;  %v3128_v18 = vunpack.i.l.bf16 %v4893_v0 }
 0x150   : > { %3341 = vrot.lane.b32.xlu2 %v4607_v52, %s3760_s23  ;;  %v2112_v7 = vsel %vm2107_vm5, %v2079_v12, %v3173_v56  ;;  %v2113_v50 = vsel %vm2107_vm5, %v2080_v27, %v3174_v29  ;;  %v2078_v52 = vsel %vm2074_vm4, %v4073_v3, %v3094_v51  ;;  %v2077_v56 = vsel %vm2074_vm4, %v4100_v53, %v3093_v19  ;;  %v6352_v53 = vld [vmem:[#allocation15_spill] sm:$0xff] }
 0x151   : > { %3366 = vrot.lane.b32.xlu1 %v4785_v58, %s3760_s23 }
 0x152   : > { %v3167_v63 = vpop.permute.xlu2 %3166 }
 0x153   : > { %v3169_v10 = vunpack.i.h.bf16 %v3167_v63  ;;  %v3168_v23 = vunpack.i.l.bf16 %v3167_v63  ;;  %v4939_v12 = vpop.permute.xlu1 %3151  ;;  %3391 = vrot.lane.b32.xlu0 %v4789_v2, %s3760_s23  ;;  %v3024_v63 = vunpack.i.h.bf16 %v4800_v15  ;;  %v6351_v2 = vld [vmem:[#allocation13_spill] sm:$0xff]  ;;  %v3039_v15 = vunpack.i.h.bf16 %v4827_v28 }
 0x155   : > { %v4944_v27 = vsel %vm2107_vm5, %v2077_v56, %v3168_v23  ;;  %v4947_v29 = vsel %vm2107_vm5, %v2078_v52, %v3169_v10  ;;  %v3187_v51 = vpop.permute.xlu0 %3186  ;;  %v2085_v23 = vsel %vm2074_vm4, %v6351_v2, %v3113_v5  ;;  %v3109_v52 = vunpack.i.h.bf16 %v4887_v57 }
 0x156   : > { %v3189_v19 = vunpack.i.h.bf16 %v3187_v51  ;;  %v3188_v54 = vunpack.i.l.bf16 %v3187_v51  ;;  %v3108_v10 = vunpack.i.l.bf16 %v4887_v57  ;;  %v3038_v56 = vunpack.i.l.bf16 %v4827_v28 }
 0x157   : > { %v4970_v57 = vsel %vm2140_vm6, %v2112_v7, %v3023_v26  ;;  %v4973_v5 = vsel %vm2140_vm6, %v2113_v50, %v3024_v63  ;;  %v6354_v50 = vld [vmem:[#allocation8_spill] sm:$0xff] }
 0x158   : > { %3356 = vrot.lane.b32.xlu2 %v4669_v33, %s3760_s23  ;;  %v2118_v3 = vsel %vm2107_vm5, %v2085_v23, %v3188_v54  ;;  %v2119_v51 = vsel %vm2107_vm5, %v2086_v36, %v3189_v19  ;;  %v3129_v19 = vunpack.i.h.bf16 %v4893_v0  ;;  %v6353_v33 = vld [vmem:[#allocation17_spill] sm:$0xff]  ;;  %v6355_v0 = vld [vmem:[#allocation4_spill] sm:$0xff] }
 0x159   : > { %3381 = vrot.lane.b32.xlu1 %v4791_v34, %s3760_s23  ;;  %v2084_v34 = vsel %vm2074_vm4, %v6352_v53, %v3109_v52  ;;  %v2083_v7 = vsel %vm2074_vm4, %v6353_v33, %v3108_v10  ;;  %v2082_v58 = vsel %vm2074_vm4, %v6355_v0, %v3104_v4  ;;  %v6356_v53 = vld [vmem:[#allocation6_spill] sm:$0xff]  ;;  %v3119_v33 = vunpack.i.h.bf16 %v4877_v30 }
 0x15a   : > { %v3182_v2 = vpop.permute.xlu2 %3181  ;;  %v2081_v52 = vsel %vm2074_vm4, %v6356_v53, %v3103_v40  ;;  %v3118_v10 = vunpack.i.l.bf16 %v4877_v30  ;;  %v2091_v4 = vsel %vm2074_vm4, %v6358_v9, %v3128_v18  ;;  %v3124_v0 = vunpack.i.h.bf16 %v4901_v62  ;;  %v6360_v53 = vld [vmem:[#allocation11_spill] sm:$0xff] }
 0x15b   : > { %v3184_v23 = vunpack.i.h.bf16 %v3182_v2  ;;  %v3183_v36 = vunpack.i.l.bf16 %v3182_v2  ;;  %v3177_v26 = vpop.permute.xlu1 %3176  ;;  %3406 = vrot.lane.b32.xlu0 %v6354_v50, %s3761_s28  ;;  %v3123_v40 = vunpack.i.l.bf16 %v4901_v62  ;;  %v3054_v30 = vunpack.i.h.bf16 %v4843_v21 }
 0x15c   : > { %v3179_v28 = vunpack.i.h.bf16 %v3177_v26  ;;  %v3178_v54 = vunpack.i.l.bf16 %v3177_v26  ;;  %v2087_v9 = vsel %vm2074_vm4, %v6360_v53, %v3118_v10  ;;  %v5018_v18 = vsel %vm2140_vm6, %v2118_v3, %v3038_v56 }
 0x15d   : > { %v4986_v63 = vsel %vm2107_vm5, %v2083_v7, %v3183_v36  ;;  %v4989_v2 = vsel %vm2107_vm5, %v2084_v34, %v3184_v23  ;;  %v3202_v8 = vpop.permute.xlu0 %3201  ;;  %v6357_v23 = vld [vmem:[#allocation21_spill] sm:$0xff]  ;;  %v3143_v10 = vunpack.i.l.bf16 %v4905_v13  ;;  %v2089_v3 = vsel %vm2074_vm4, %v4222_v46, %v3123_v40 }
 0x15e   : > { %v2115_v50 = vsel %vm2107_vm5, %v2082_v58, %v3179_v28  ;;  %v2114_v36 = vsel %vm2107_vm5, %v2081_v52, %v3178_v54  ;;  %v3204_v7 = vunpack.i.h.bf16 %v3202_v8  ;;  %v3203_v34 = vunpack.i.l.bf16 %v3202_v8  ;;  %v6359_v54 = vld [vmem:[#allocation10_spill] sm:$0xff] }
 0x15f   : > { %v2092_v26 = vsel %vm2074_vm4, %v6357_v23, %v3129_v19  ;;  %v3053_v58 = vunpack.i.l.bf16 %v4843_v21  ;;  %v2088_v19 = vsel %vm2074_vm4, %v6359_v54, %v3119_v33  ;;  %v5021_v52 = vsel %vm2140_vm6, %v2119_v51, %v3039_v15  ;;  %v6361_v15 = vld [vmem:[#allocation14_spill] sm:$0xff] }
 0x160   : > { %3371 = vrot.lane.b32.xlu2 %v4727_v20, %s3760_s23  ;;  %v2124_v28 = vsel %vm2107_vm5, %v2091_v4, %v3203_v34  ;;  %v2125_v8 = vsel %vm2107_vm5, %v2092_v26, %v3204_v7  ;;  %v3134_v21 = vunpack.i.h.bf16 %v4885_v32  ;;  %v3133_v7 = vunpack.i.l.bf16 %v4885_v32 }
 0x161   : > { %3396 = vrot.lane.b32.xlu1 %v4831_v49, %s3760_s23  ;;  %v3144_v33 = vunpack.i.h.bf16 %v4905_v13  ;;  %v2090_v26 = vsel %vm2074_vm4, %v4216_v48, %v3124_v0  ;;  %v6362_v13 = vunpack.i.l.bf16 %v4759_v44  ;;  %v6363_v46 = vunpack.i.h.bf16 %v4759_v44 }
 0x162   : > { %v3197_v62 = vpop.permute.xlu2 %3196  ;;  %v6364_v40 = vunpack.i.l.bf16 %v4802_v45 }
 0x163   : > { %v3199_v34 = vunpack.i.h.bf16 %v3197_v62  ;;  %v3198_v23 = vunpack.i.l.bf16 %v3197_v62  ;;  %v3192_v56 = vpop.permute.xlu1 %3191  ;;  %3421 = vrot.lane.b32.xlu0 %v6361_v15, %s3761_s28  ;;  %v5042_v48 = vsel %vm2140_vm6, %v2114_v36, %v6362_v13  ;;  %v5047_v0 = vsel %vm2140_vm6, %v2115_v50, %v6363_v46  ;;  %v6366_v50 = vld [vmem:[#allocation27_spill] sm:$0xff]  ;;  %v6367_v15 = vld [vmem:[#allocation28_spill] sm:$0xff]  ;;  %v6370_v46 = vld [vmem:[#allocation18_spill] sm:$0xff] }
 0x164   : > { %v3194_v4 = vunpack.i.h.bf16 %v3192_v56  ;;  %v3193_v54 = vunpack.i.l.bf16 %v3192_v56  ;;  %v5053_v62 = vsel %vm2140_vm6, %v4944_v27, %v6364_v40  ;;  %v2098_v56 = vsel %vm2074_vm4, %v6366_v50, %v3144_v33 }
 0x165   : > { %v5034_v51 = vsel %vm2107_vm5, %v2089_v3, %v3198_v23  ;;  %v5037_v32 = vsel %vm2107_vm5, %v2090_v26, %v3199_v34  ;;  %v3217_v53 = vpop.permute.xlu0 %3216  ;;  %v6365_v34 = vunpack.i.h.bf16 %v4802_v45  ;;  %v2097_v13 = vsel %vm2074_vm4, %v6367_v15, %v3143_v10 }
 0x166   : > { %v2121_v36 = vsel %vm2107_vm5, %v2088_v19, %v3194_v4  ;;  %v2120_v26 = vsel %vm2107_vm5, %v2087_v9, %v3193_v54  ;;  %v3219_v44 = vunpack.i.h.bf16 %v3217_v53  ;;  %v3218_v3 = vunpack.i.l.bf16 %v3217_v53  ;;  %v6368_v54 = vld [vmem:[#allocation19_spill] sm:$0xff]  ;;  %v6369_v53 = vld [vmem:[#allocation20_spill] sm:$0xff] }
 0x167   : > { %v5059_v23 = vsel %vm2140_vm6, %v4947_v29, %v6365_v34  ;;  %v3139_v27 = vunpack.i.h.bf16 %v4917_v22  ;;  %v3138_v45 = vunpack.i.l.bf16 %v4917_v22  ;;  %v3069_v29 = vunpack.i.h.bf16 %v4855_v38 }
 0x168   : > { %3386 = vrot.lane.b32.xlu2 %v4741_v14, %s3760_s23  ;;  %v3068_v19 = vunpack.i.l.bf16 %v4855_v38  ;;  %v2130_v9 = vsel %vm2107_vm5, %v2097_v13, %v3218_v3  ;;  %v2131_v4 = vsel %vm2107_vm5, %v2098_v56, %v3219_v44  ;;  %v2094_v33 = vsel %vm2074_vm4, %v6368_v54, %v3134_v21 }
 0x169   : > { %v2093_v10 = vsel %vm2074_vm4, %v6369_v53, %v3133_v7  ;;  %3411 = vrot.lane.b32.xlu1 %v6370_v46, %s3761_s28  ;;  %v5082_v40 = vsel %vm2140_vm6, %v2124_v28, %v3053_v58  ;;  %v5085_v34 = vsel %vm2140_vm6, %v2125_v8, %v3054_v30  ;;  %v3149_v38 = vunpack.i.h.bf16 %v4897_v25  ;;  %v6371_v30 = vld [vmem:[#allocation23_spill] sm:$0xff] }
 0x16a   : > { %v3212_v22 = vpop.permute.xlu2 %3211  ;;  %v3148_v44 = vunpack.i.l.bf16 %v4897_v25  ;;  %v3159_v21 = vunpack.i.h.bf16 %v4915_v31  ;;  %v3158_v7 = vunpack.i.l.bf16 %v4915_v31  ;;  %v2096_v56 = vsel %vm2074_vm4, %v4275_v59, %v3139_v27 }
 0x16b   : > { %v3214_v3 = vunpack.i.h.bf16 %v3212_v22  ;;  %v3213_v50 = vunpack.i.l.bf16 %v3212_v22  ;;  %v2095_v58 = vsel %vm2074_vm4, %v6330_v43, %v3138_v45  ;;  %v3207_v28 = vpop.permute.xlu1 %3206  ;;  %3436 = vrot.lane.b32.xlu0 %v6371_v30, %s3761_s28  ;;  %v6372_v31 = vunpack.i.l.bf16 %v4787_v47  ;;  %v6378_v30 = vld [vmem:[#allocation9_spill] sm:$0xff] }
 0x16c   : > { %v3209_v15 = vunpack.i.h.bf16 %v3207_v28  ;;  %v3208_v13 = vunpack.i.l.bf16 %v3207_v28  ;;  %v6373_v43 = vunpack.i.h.bf16 %v4787_v47  ;;  %v6374_v45 = vunpack.i.l.bf16 %v4829_v55 }
 0x16d   : > { %v5098_v8 = vsel %vm2107_vm5, %v2095_v58, %v3213_v50  ;;  %v5101_v25 = vsel %vm2107_vm5, %v2096_v56, %v3214_v3  ;;  %v3232_v54 = vpop.permute.xlu0 %3231  ;;  %v5106_v59 = vsel %vm2140_vm6, %v2120_v26, %v6372_v31  ;;  %v6375_v46 = vunpack.i.h.bf16 %v4829_v55  ;;  %v6377_v58 = vld [vmem:[#allocation36_spill] sm:$0xff] }
 0x16e   : > { %v5111_v27 = vsel %vm2140_vm6, %v2121_v36, %v6373_v43  ;;  %v5117_v53 = vsel %vm2140_vm6, %v4986_v63, %v6374_v45  ;;  %v2127_v26 = vsel %vm2107_vm5, %v2094_v33, %v3209_v15  ;;  %v2126_v3 = vsel %vm2107_vm5, %v2093_v10, %v3208_v13  ;;  %v6376_v36 = vld [vmem:[#allocation35_spill] sm:$0xff]  ;;  %v6379_v13 = vld [vmem:[#allocation25_spill] sm:$0xff] }
 0x16f   : > { %v5123_v22 = vsel %vm2140_vm6, %v4989_v2, %v6375_v46  ;;  %v3234_v47 = vunpack.i.h.bf16 %v3232_v54  ;;  %v3233_v50 = vunpack.i.l.bf16 %v3232_v54  ;;  %v2104_v56 = vsel %vm2074_vm4, %v6376_v36, %v3159_v21 }
 0x170   : > { %v2103_v28 = vsel %vm2074_vm4, %v6377_v58, %v3158_v7  ;;  %v3154_v63 = vunpack.i.h.bf16 %v4939_v12  ;;  %v3153_v55 = vunpack.i.l.bf16 %v4939_v12  ;;  %3401 = vrot.lane.b32.xlu2 %v6378_v30, %s3761_s28  ;;  %v3059_v2 = vunpack.i.h.bf16 %v4805_v17 }
 0x171   : > { %v2136_v33 = vsel %vm2107_vm5, %v2103_v28, %v3233_v50  ;;  %v2137_v10 = vsel %vm2107_vm5, %v2104_v56, %v3234_v47  ;;  %v3058_v15 = vunpack.i.l.bf16 %v4805_v17  ;;  %v3049_v21 = vunpack.i.h.bf16 %v4845_v42  ;;  %3426 = vrot.lane.b32.xlu1 %v6379_v13, %s3761_s28 }
 0x172   : > { %v3227_v7 = vpop.permute.xlu2 %3226  ;;  %v5143_v54 = vsel %vm2140_vm6, %v2130_v9, %v3068_v19  ;;  %v5146_v12 = vsel %vm2140_vm6, %v2131_v4, %v3069_v29  ;;  %v3048_v31 = vunpack.i.l.bf16 %v4845_v42  ;;  %v2100_v43 = vsel %vm2074_vm4, %v4253_v41, %v3149_v38  ;;  %v6380_v29 = vld [vmem:[#allocation30_spill] sm:$0xff] }
 0x173   : > { %v3229_v45 = vunpack.i.h.bf16 %v3227_v7  ;;  %v3228_v46 = vunpack.i.l.bf16 %v3227_v7  ;;  %v2099_v17 = vsel %vm2074_vm4, %v6327_v24, %v3148_v44  ;;  %v2102_v47 = vsel %vm2074_vm4, %v4332_v60, %v3154_v63  ;;  %v3222_v9 = vpop.permute.xlu1 %3221  ;;  %3451 = vrot.lane.b32.xlu0 %v6380_v29, %s3761_s28 }
 0x174   : > { %v2101_v19 = vsel %vm2074_vm4, %v4344_v1, %v3153_v55  ;;  %v3224_v4 = vunpack.i.h.bf16 %v3222_v9  ;;  %v3223_v38 = vunpack.i.l.bf16 %v3222_v9  ;;  %v5166_v44 = vsel %vm2140_vm6, %v2126_v3, %v3058_v15 }
 0x175   : > { %v5160_v42 = vsel %vm2107_vm5, %v2101_v19, %v3228_v46  ;;  %v5163_v41 = vsel %vm2107_vm5, %v2102_v47, %v3229_v45  ;;  %v3242_v24 = vpop.permute.xlu0 %3241  ;;  %v5169_v60 = vsel %vm2140_vm6, %v2127_v26, %v3059_v2  ;;  %v5173_v1 = vsel %vm2140_vm6, %v5034_v51, %v3048_v31  ;;  %v6381_v51 = vld [vmem:[#allocation16_spill] sm:$0xff]  ;;  %v6384_v46 = vld [vmem:[#allocation34_spill] sm:$0xff] }
 0x176   : > { %v5177_v50 = vsel %vm2140_vm6, %v5037_v32, %v3049_v21  ;;  %v2133_v36 = vsel %vm2107_vm5, %v2100_v43, %v3224_v4  ;;  %v2132_v56 = vsel %vm2107_vm5, %v2099_v17, %v3223_v38  ;;  %v3244_v58 = vunpack.i.h.bf16 %v3242_v24  ;;  %v6382_v2 = vld [vmem:[#allocation32_spill] sm:$0xff]  ;;  %v6383_v43 = vld [vmem:[#allocation33_spill] sm:$0xff] }
 0x177   : > { %v3243_v28 = vunpack.i.l.bf16 %v3242_v24  ;;  %v3084_v3 = vunpack.i.h.bf16 %v4865_v61  ;;  %v3083_v63 = vunpack.i.l.bf16 %v4865_v61  ;;  %v3164_v26 = vunpack.i.h.bf16 %v4909_v35 }
 0x178   : > { %v3163_v55 = vunpack.i.l.bf16 %v4909_v35  ;;  %3416 = vrot.lane.b32.xlu2 %v6381_v51, %s3761_s28  ;;  %v5189_v32 = vsel %vm2173_vm7, %v4732_v39, %v3244_v58  ;;  %v3074_v21 = vunpack.i.h.bf16 %v4833_v11  ;;  %v3073_v13 = vunpack.i.l.bf16 %v4833_v11 }
 0x179   : > { %v5193_v30 = vsel %vm2173_vm7, %v4735_v6, %v3243_v28  ;;  %3441 = vrot.lane.b32.xlu1 %v6382_v2, %s3761_s28  ;;  %v5198_v61 = vsel %vm2140_vm6, %v2136_v33, %v3083_v63  ;;  %v5201_v35 = vsel %vm2140_vm6, %v2137_v10, %v3084_v3  ;;  %v3064_v31 = vunpack.i.h.bf16 %v4857_v16  ;;  %v6385_v10 = vld [vmem:[#allocation37_spill] sm:$0xff] }
 0x17a   : > { %v3252_v15 = vpop.permute.xlu2 %3251  ;;  %v3063_v6 = vunpack.i.l.bf16 %v4857_v16  ;;  %v2106_v45 = vsel %vm2074_vm4, %v6383_v43, %v3164_v26  ;;  %v2105_v33 = vsel %vm2074_vm4, %v6384_v46, %v3163_v55  ;;  %v5222_v29 = vsel %vm2140_vm6, %v2132_v56, %v3073_v13  ;;  %v6386_v56 = vld [vmem:[#allocation24_spill] sm:$0xff]  ;;  %v6388_v2 = vld [vmem:[#allocation41_spill] sm:$0xff] }
 0x17b   : > { %v3254_v39 = vunpack.i.h.bf16 %v3252_v15  ;;  %v3253_v7 = vunpack.i.l.bf16 %v3252_v15  ;;  %v3237_v17 = vpop.permute.xlu1 %3236  ;;  %3466 = vrot.lane.b32.xlu0 %v6385_v10, %s3761_s28  ;;  %v5225_v4 = vsel %vm2140_vm6, %v2133_v36, %v3074_v21  ;;  %v3089_v55 = vunpack.i.h.bf16 %v4847_v37  ;;  %v6389_v13 = vld [vmem:[#allocation48_spill] sm:$0xff]  ;;  %v6390_v10 = vld [vmem:[#allocation31_spill] sm:$0xff] }
 0x17c   : > { %v3239_v19 = vunpack.i.h.bf16 %v3237_v17  ;;  %v3238_v16 = vunpack.i.l.bf16 %v3237_v17  ;;  %v5229_v38 = vsel %vm2140_vm6, %v5098_v8, %v3063_v6  ;;  %v3088_v51 = vunpack.i.l.bf16 %v4847_v37 }
 0x17d   : > { %v5215_v47 = vsel %vm2173_vm7, %v4973_v5, %v3254_v39  ;;  %v5219_v11 = vsel %vm2173_vm7, %v4970_v57, %v3253_v7  ;;  %v3257_v9 = vpop.permute.xlu0 %3256  ;;  %v5233_v5 = vsel %vm2140_vm6, %v5101_v25, %v3064_v31  ;;  %v6387_v25 = vld [vmem:[#allocation39_spill] sm:$0xff]  ;;  %v3079_v15 = vunpack.i.h.bf16 %v6388_v2 }
 0x17e   : > { %v2139_v57 = vsel %vm2107_vm5, %v2106_v45, %v3239_v19  ;;  %v2138_v24 = vsel %vm2107_vm5, %v2105_v33, %v3238_v16  ;;  %v3259_v58 = vunpack.i.h.bf16 %v3257_v9  ;;  %v3258_v28 = vunpack.i.l.bf16 %v3257_v9 }
 0x17f   : > { %v3078_v21 = vunpack.i.l.bf16 %v6388_v2  ;;  %v5264_v6 = vsel %vm2140_vm6, %v2138_v24, %v3088_v51  ;;  %v5267_v43 = vsel %vm2140_vm6, %v2139_v57, %v3089_v55  ;;  %v6392_v57 = vld [vmem:[#allocation53_spill] sm:$0xff] }
 0x180   : > { %3431 = vrot.lane.b32.xlu2 %v6386_v56, %s3761_s28  ;;  %v5241_v36 = vsel %vm2173_vm7, %v5042_v48, %v3258_v28  ;;  %v5245_v8 = vsel %vm2173_vm7, %v5047_v0, %v3259_v58 }
 0x181   : > { %3456 = vrot.lane.b32.xlu1 %v6387_v25, %s3761_s28  ;;  %v5271_v45 = vsel %vm2140_vm6, %v5160_v42, %v3078_v21 }
 0x182   : > { %v3267_v3 = vpop.permute.xlu2 %3266 }
 0x183   : > { %v3269_v63 = vunpack.i.h.bf16 %v3267_v3  ;;  %v3268_v26 = vunpack.i.l.bf16 %v3267_v3  ;;  %v3247_v48 = vpop.permute.xlu1 %3246  ;;  %3481 = vrot.lane.b32.xlu0 %v6389_v13, %s3762_s29 }
 0x184   : > { %v3249_v7 = vunpack.i.h.bf16 %v3247_v48  ;;  %v3248_v31 = vunpack.i.l.bf16 %v3247_v48 }
 0x185   : > { %v5257_v0 = vsel %vm2173_vm7, %v5021_v52, %v3269_v63  ;;  %v5261_v39 = vsel %vm2173_vm7, %v5018_v18, %v3268_v26  ;;  %v3272_v37 = vpop.permute.xlu0 %3271  ;;  %v5275_v52 = vsel %vm2140_vm6, %v5163_v41, %v3079_v15  ;;  %v6395_v15 = vld [vmem:[#allocation57_spill] sm:$0xff] }
 0x186   : > { %v5279_v18 = vsel %vm2173_vm7, %v5053_v62, %v3248_v31  ;;  %v5283_v46 = vsel %vm2173_vm7, %v5059_v23, %v3249_v7  ;;  %v3274_v33 = vunpack.i.h.bf16 %v3272_v37  ;;  %v3273_v17 = vunpack.i.l.bf16 %v3272_v37  ;;  %v6391_v62 = vld [vmem:[#allocation44_spill] sm:$0xff] }
 0x188   : > { %3446 = vrot.lane.b32.xlu2 %v6390_v10, %s3761_s28  ;;  %v5289_v42 = vsel %vm2173_vm7, %v5106_v59, %v3273_v17  ;;  %v5293_v41 = vsel %vm2173_vm7, %v5111_v27, %v3274_v33 }
 0x189   : > { %3471 = vrot.lane.b32.xlu1 %v6391_v62, %s3761_s28 }
 0x18a   : > { %v3282_v19 = vpop.permute.xlu2 %3281 }
 0x18b   : > { %v3284_v16 = vunpack.i.h.bf16 %v3282_v19  ;;  %v3283_v23 = vunpack.i.l.bf16 %v3282_v19  ;;  %v3262_v9 = vpop.permute.xlu1 %3261  ;;  %3496 = vrot.lane.b32.xlu0 %v6392_v57, %s3762_s29 }
 0x18c   : > { %v3264_v27 = vunpack.i.h.bf16 %v3262_v9  ;;  %v3263_v58 = vunpack.i.l.bf16 %v3262_v9 }
 0x18d   : > { %v5301_v24 = vsel %vm2173_vm7, %v5085_v34, %v3284_v16  ;;  %v5305_v59 = vsel %vm2173_vm7, %v5082_v40, %v3283_v23  ;;  %v3287_v28 = vpop.permute.xlu0 %3286  ;;  %v6393_v34 = vld [vmem:[#allocation38_spill] sm:$0xff]  ;;  %v6398_v16 = vld [vmem:[#allocation63_spill] sm:$0xff] }
 0x18e   : > { %v5309_v56 = vsel %vm2173_vm7, %v5117_v53, %v3263_v58  ;;  %v5313_v25 = vsel %vm2173_vm7, %v5123_v22, %v3264_v27  ;;  %v3289_v3 = vunpack.i.h.bf16 %v3287_v28  ;;  %v3288_v63 = vunpack.i.l.bf16 %v3287_v28  ;;  %v6394_v53 = vld [vmem:[#allocation50_spill] sm:$0xff]  ;;  %v6399_v23 = vld [vmem:[#allocation59_spill] sm:$0xff] }
 0x18f   : > { %v6400_v9 = vpack.i.bf16 %v6398_v16, %v6399_v23  ;;  %v6407_v23 = vld [vmem:[#allocation55_spill] sm:$0xff] }
 0x190   : > { %3461 = vrot.lane.b32.xlu2 %v6393_v34, %s3761_s28  ;;  %v5319_v40 = vsel %vm2173_vm7, %v5166_v44, %v3288_v63  ;;  %v5323_v26 = vsel %vm2173_vm7, %v5169_v60, %v3289_v3 }
 0x191   : > { %3486 = vrot.lane.b32.xlu1 %v6394_v53, %s3762_s29 }
 0x192   : > { %v3297_v55 = vpop.permute.xlu2 %3296 }
 0x193   : > { %v3299_v51 = vunpack.i.h.bf16 %v3297_v55  ;;  %v3298_v22 = vunpack.i.l.bf16 %v3297_v55  ;;  %v3277_v2 = vpop.permute.xlu1 %3276  ;;  %3511 = vrot.lane.b32.xlu0 %v6395_v15, %s3762_s29 }
 0x194   : > { %v3279_v60 = vunpack.i.h.bf16 %v3277_v2  ;;  %v3278_v48 = vunpack.i.l.bf16 %v3277_v2 }
 0x195   : > { %v5331_v21 = vsel %vm2173_vm7, %v5146_v12, %v3299_v51  ;;  %v5335_v44 = vsel %vm2173_vm7, %v5143_v54, %v3298_v22  ;;  %v3302_v13 = vpop.permute.xlu0 %3301  ;;  %v6396_v12 = vmov 0.0  }
 0x196   : > { %v5339_v7 = vsel %vm2173_vm7, %v5173_v1, %v3278_v48  ;;  %v5343_v31 = vsel %vm2173_vm7, %v5177_v50, %v3279_v60  ;;  %v3304_v37 = vunpack.i.h.bf16 %v3302_v13  ;;  %v3303_v33 = vunpack.i.l.bf16 %v3302_v13  ;;  %v6397_v1 = vld [vmem:[#allocation43_spill] sm:$0xff] }
 0x198   : > { %3476 = vrot.lane.b32.xlu2 %v6396_v12, %s3761_s28  ;;  %v5349_v54 = vsel %vm2173_vm7, %v5222_v29, %v3303_v33  ;;  %v5353_v17 = vsel %vm2173_vm7, %v5225_v4, %v3304_v37  ;;  %v6405_v33 = vld [vmem:[#allocation64_spill] sm:$0xff] }
 0x199   : > { %3501 = vrot.lane.b32.xlu1 %v6397_v1, %s3762_s29 }
 0x19a   : > { %v3312_v10 = vpop.permute.xlu2 %3311 }
 0x19b   : > { %v3314_v62 = vunpack.i.h.bf16 %v3312_v10  ;;  %v3313_v50 = vunpack.i.l.bf16 %v3312_v10  ;;  %v3292_v19 = vpop.permute.xlu1 %3291  ;;  %3526 = vrot.lane.b32.xlu0 %v6400_v9, %s3762_s29 }
 0x19c   : > { %v3294_v57 = vunpack.i.h.bf16 %v3292_v19  ;;  %v3293_v27 = vunpack.i.l.bf16 %v3292_v19  ;;  %v1163_v19 = vld [vmem:[%s5415_s11 + $0x88] sm:$0xff] }
 0x19d   : > { %v5363_v29 = vsel %vm2173_vm7, %v5201_v35, %v3314_v62  ;;  %v5367_v4 = vsel %vm2173_vm7, %v5198_v61, %v3313_v50  ;;  %v3317_v58 = vpop.permute.xlu0 %3316  ;;  %v6401_v35 = vld [vmem:[#allocation47_spill] sm:$0xff]  ;;  %v1162_v50 = vld [vmem:[%s5415_s11 + $0x80] sm:$0xff] }
 0x19e   : > { %v5371_v28 = vsel %vm2173_vm7, %v5229_v38, %v3293_v27  ;;  %v5375_v3 = vsel %vm2173_vm7, %v5233_v5, %v3294_v57  ;;  %v3319_v63 = vunpack.i.h.bf16 %v3317_v58  ;;  %v3318_v34 = vunpack.i.l.bf16 %v3317_v58  ;;  %v6402_v38 = vld [vmem:[#allocation46_spill] sm:$0xff]  ;;  %v1155_v58 = vld [vmem:[%s5415_s11 + $0x48] sm:$0xff] }
 0x19f   : > { %v1154_v27 = vld [vmem:[%s5415_s11 + $0x40] sm:$0xff] }
 0x1a0   : > { %3491 = vrot.lane.b32.xlu2 %v6401_v35, %s3762_s29  ;;  %v5381_v61 = vsel %vm2173_vm7, %v5264_v6, %v3318_v34  ;;  %v5385_v53 = vsel %vm2173_vm7, %v5267_v43, %v3319_v63  ;;  %v3545_v63 = vpack.i.bf16 %v1163_v19, %v1162_v50 }
 0x1a1   : > { %3516 = vrot.lane.b32.xlu1 %v6402_v38, %s3762_s29 }
 0x1a2   : > { %v3327_v5 = vpop.permute.xlu2 %3326 }
 0x1a3   : > { %v3329_v55 = vunpack.i.h.bf16 %v3327_v5  ;;  %v3328_v51 = vunpack.i.l.bf16 %v3327_v5  ;;  %v3307_v22 = vpop.permute.xlu1 %3306  ;;  %3541 = vrot.lane.b32.xlu0 %v4741_v14, %s3763_s30 }
 0x1a4   : > { %v3309_v2 = vunpack.i.h.bf16 %v3307_v22  ;;  %v3308_v15 = vunpack.i.l.bf16 %v3307_v22 }
 0x1a5   : > { %v5393_v6 = vsel %vm2206_vm8, %v5279_v18, %v3328_v51  ;;  %v5397_v43 = vsel %vm2206_vm8, %v5283_v46, %v3329_v55  ;;  %v3332_v60 = vpop.permute.xlu0 %3331  ;;  %v6403_v18 = vld [vmem:[#allocation51_spill] sm:$0xff]  ;;  %v6404_v46 = vld [vmem:[#allocation60_spill] sm:$0xff]  ;;  %v6408_v55 = vld [vmem:[#allocation54_spill] sm:$0xff] }
 0x1a6   : > { %v5402_v48 = vsel %vm2173_vm7, %v5271_v45, %v3308_v15  ;;  %v5406_v13 = vsel %vm2173_vm7, %v5275_v52, %v3309_v2  ;;  %v3334_v14 = vunpack.i.h.bf16 %v3332_v60  ;;  %v3333_v37 = vunpack.i.l.bf16 %v3332_v60 }
 0x1a7   : > { %v6406_v12 = vpack.i.bf16 %v6404_v46, %v6405_v33 }
 0x1a8   : > { %3506 = vrot.lane.b32.xlu2 %v6403_v18, %s3762_s29  ;;  %v5419_v45 = vsel %vm2206_vm8, %v5215_v47, %v3334_v14  ;;  %v5423_v52 = vsel %vm2206_vm8, %v5219_v11, %v3333_v37 }
 0x1a9   : > { %3531 = vrot.lane.b32.xlu1 %v6406_v12, %s3762_s29 }
 0x1aa   : > { %v3342_v1 = vpop.permute.xlu2 %3341 }
 0x1ab   : > { %v3344_v10 = vunpack.i.h.bf16 %v3342_v1  ;;  %v3343_v62 = vunpack.i.l.bf16 %v3342_v1  ;;  %v3322_v16 = vpop.permute.xlu1 %3321  ;;  %3556 = vrot.lane.b32.xlu0 %v6407_v23, %s3763_s30 }
 0x1ac   : > { %v3324_v9 = vunpack.i.h.bf16 %v3322_v16  ;;  %v3323_v57 = vunpack.i.l.bf16 %v3322_v16 }
 0x1ad   : > { %v5435_v47 = vsel %vm2206_vm8, %v5309_v56, %v3343_v62  ;;  %v5439_v11 = vsel %vm2206_vm8, %v5313_v25, %v3344_v10  ;;  %v3347_v34 = vpop.permute.xlu0 %3346  ;;  %v3570_v25 = vpack.i.bf16 %v1155_v58, %v1154_v27  ;;  %v1170_v10 = vld [vmem:[%s5415_s11 + $0xc0] sm:$0xff] }
 0x1ae   : > { %v5445_v35 = vsel %vm2206_vm8, %v5189_v32, %v3324_v9  ;;  %v5449_v38 = vsel %vm2206_vm8, %v5193_v30, %v3323_v57  ;;  %v3349_v56 = vunpack.i.h.bf16 %v3347_v34  ;;  %v3348_v5 = vunpack.i.l.bf16 %v3347_v34  ;;  %v6410_v62 = vld [vmem:[#allocation42_spill] sm:$0xff]  ;;  %v6411_v9 = vld [vmem:[#allocation68_spill] sm:$0xff] }
 0x1b0   : > { %3521 = vrot.lane.b32.xlu2 %v6408_v55, %s3762_s29  ;;  %v5455_v51 = vsel %vm2206_vm8, %v5257_v0, %v3349_v56  ;;  %v5459_v22 = vsel %vm2206_vm8, %v5261_v39, %v3348_v5  ;;  %v1146_v55 = vld [vmem:[%s5415_s11] sm:$0xff] }
 0x1b1   : > { %3546 = vrot.lane.b32.xlu1 %v3545_v63, %s3764_s12 }
 0x1b2   : > { %v3357_v32 = vpop.permute.xlu2 %3356 }
 0x1b3   : > { %v3359_v30 = vunpack.i.h.bf16 %v3357_v32  ;;  %v3358_v2 = vunpack.i.l.bf16 %v3357_v32  ;;  %v3337_v15 = vpop.permute.xlu1 %3336  ;;  %3571 = vrot.lane.b32.xlu0 %v3570_v25, %s3764_s12  ;;  %v6412_v25 = vld [vmem:[#allocation52_spill] sm:$0xff] }
 0x1b4   : > { %v3339_v39 = vunpack.i.h.bf16 %v3337_v15  ;;  %v3338_v14 = vunpack.i.l.bf16 %v3337_v15  ;;  %v1165_v15 = vld [vmem:[%s5415_s11 + $0x98] sm:$0xff] }
 0x1b5   : > { %v5465_v60 = vsel %vm2206_vm8, %v5339_v7, %v3358_v2  ;;  %v5469_v0 = vsel %vm2206_vm8, %v5343_v31, %v3359_v30  ;;  %v3362_v37 = vpop.permute.xlu0 %3361  ;;  %v6409_v7 = vld [vmem:[#allocation67_spill] sm:$0xff]  ;;  %v1164_v2 = vld [vmem:[%s5415_s11 + $0x90] sm:$0xff] }
 0x1b6   : > { %v5473_v18 = vsel %vm2206_vm8, %v5241_v36, %v3338_v14  ;;  %v5477_v46 = vsel %vm2206_vm8, %v5245_v8, %v3339_v39  ;;  %v3364_v33 = vunpack.i.h.bf16 %v3362_v37  ;;  %v3363_v12 = vunpack.i.l.bf16 %v3362_v37  ;;  %v1171_v36 = vld [vmem:[%s5415_s11 + $0xc8] sm:$0xff] }
 0x1b7   : > { %v3550_v23 = vpack.i.bf16 %v1171_v36, %v1170_v10  ;;  %v1157_v10 = vld [vmem:[%s5415_s11 + $0x58] sm:$0xff]  ;;  %v3590_v36 = vpack.i.bf16 %v1165_v15, %v1164_v2 }
 0x1b8   : > { %3536 = vrot.lane.b32.xlu2 %v6409_v7, %s3763_s30  ;;  %v5483_v31 = vsel %vm2206_vm8, %v5301_v24, %v3364_v33  ;;  %v5487_v1 = vsel %vm2206_vm8, %v5305_v59, %v3363_v12  ;;  %v1156_v7 = vld [vmem:[%s5415_s11 + $0x50] sm:$0xff] }
 0x1b9   : > { %3561 = vrot.lane.b32.xlu1 %v6410_v62, %s3763_s30 }
 0x1ba   : > { %v3372_v8 = vpop.permute.xlu2 %3371 }
 0x1bb   : > { %v3374_v50 = vunpack.i.h.bf16 %v3372_v8  ;;  %v3373_v19 = vunpack.i.l.bf16 %v3372_v8  ;;  %v3352_v16 = vpop.permute.xlu1 %3351  ;;  %3586 = vrot.lane.b32.xlu0 %v6411_v9, %s3763_s30 }
 0x1bc   : > { %v3354_v57 = vunpack.i.h.bf16 %v3352_v16  ;;  %v3353_v27 = vunpack.i.l.bf16 %v3352_v16 }
 0x1bd   : > { %v5497_v24 = vsel %vm2206_vm8, %v5371_v28, %v3373_v19  ;;  %v5501_v59 = vsel %vm2206_vm8, %v5375_v3, %v3374_v50  ;;  %v3377_v58 = vpop.permute.xlu0 %3376 }
 0x1be   : > { %v5505_v63 = vsel %vm2206_vm8, %v5289_v42, %v3353_v27  ;;  %v5509_v34 = vsel %vm2206_vm8, %v5293_v41, %v3354_v57  ;;  %v3379_v56 = vunpack.i.h.bf16 %v3377_v58  ;;  %v3378_v28 = vunpack.i.l.bf16 %v3377_v58  ;;  %v1147_v42 = vld [vmem:[%s5415_s11 + $0x8] sm:$0xff] }
 0x1bf   : > { %v3565_v14 = vpack.i.bf16 %v1147_v42, %v1146_v55 }
 0x1c0   : > { %3551 = vrot.lane.b32.xlu2 %v3550_v23, %s3764_s12  ;;  %v5514_v3 = vsel %vm2206_vm8, %v5331_v21, %v3379_v56  ;;  %v5518_v5 = vsel %vm2206_vm8, %v5335_v44, %v3378_v28  ;;  %v6413_v21 = vld [vmem:[#allocation61_spill] sm:$0xff] }
 0x1c1   : > { %3576 = vrot.lane.b32.xlu1 %v6412_v25, %s3762_s29 }
 0x1c2   : > { %v3387_v41 = vpop.permute.xlu2 %3386 }
 0x1c3   : > { %v3389_v32 = vunpack.i.h.bf16 %v3387_v41  ;;  %v3388_v30 = vunpack.i.l.bf16 %v3387_v41  ;;  %v3367_v39 = vpop.permute.xlu1 %3366  ;;  %3601 = vrot.lane.b32.xlu0 %v6413_v21, %s3763_s30  ;;  %v1173_v41 = vld [vmem:[%s5415_s11 + $0xd8] sm:$0xff] }
 0x1c4   : > { %v3369_v33 = vunpack.i.h.bf16 %v3367_v39  ;;  %v3368_v12 = vunpack.i.l.bf16 %v3367_v39  ;;  %v6415_v39 = vld [vmem:[#allocation66_spill] sm:$0xff] }
 0x1c5   : > { %v5530_v44 = vsel %vm2206_vm8, %v5402_v48, %v3388_v30  ;;  %v5534_v37 = vsel %vm2206_vm8, %v5406_v13, %v3389_v32  ;;  %v3392_v62 = vpop.permute.xlu0 %3391  ;;  %v3615_v13 = vpack.i.bf16 %v1157_v10, %v1156_v7 }
 0x1c6   : > { %v5540_v8 = vsel %vm2206_vm8, %v5319_v40, %v3368_v12  ;;  %v5544_v50 = vsel %vm2206_vm8, %v5323_v26, %v3369_v33  ;;  %v3394_v48 = vunpack.i.h.bf16 %v3392_v62  ;;  %v3393_v19 = vunpack.i.l.bf16 %v3392_v62  ;;  %v1174_v33 = vld [vmem:[%s5415_s11 + $0xe0] sm:$0xff]  ;;  %v1175_v12 = vld [vmem:[%s5415_s11 + $0xe8] sm:$0xff] }
 0x1c8   : > { %3566 = vrot.lane.b32.xlu2 %v3565_v14, %s3764_s12  ;;  %v5549_v16 = vsel %vm2206_vm8, %v5363_v29, %v3394_v48  ;;  %v5553_v23 = vsel %vm2206_vm8, %v5367_v4, %v3393_v19  ;;  %v3645_v48 = vpack.i.bf16 %v1175_v12, %v1174_v33 }
 0x1c9   : > { %3591 = vrot.lane.b32.xlu1 %v3590_v36, %s3764_s12 }
 0x1ca   : > { %v3402_v40 = vpop.permute.xlu2 %3401 }
 0x1cb   : > { %v3404_v9 = vunpack.i.h.bf16 %v3402_v40  ;;  %v3403_v26 = vunpack.i.l.bf16 %v3402_v40  ;;  %v3382_v57 = vpop.permute.xlu1 %3381  ;;  %3616 = vrot.lane.b32.xlu0 %v3615_v13, %s3764_s12  ;;  %v1149_v13 = vld [vmem:[%s5415_s11 + $0x18] sm:$0xff] }
 0x1cc   : > { %v3384_v4 = vunpack.i.h.bf16 %v3382_v57  ;;  %v3383_v58 = vunpack.i.l.bf16 %v3382_v57 }
 0x1cd   : > { %v5559_v27 = vsel %vm2239_vm9, %v5449_v38, %v3403_v26  ;;  %v5563_v29 = vsel %vm2239_vm9, %v5445_v35, %v3404_v9  ;;  %v3407_v56 = vpop.permute.xlu0 %3406 }
 0x1ce   : > { %v5567_v28 = vsel %vm2206_vm8, %v5349_v54, %v3383_v58  ;;  %v5571_v55 = vsel %vm2206_vm8, %v5353_v17, %v3384_v4  ;;  %v3409_v42 = vunpack.i.h.bf16 %v3407_v56  ;;  %v3408_v25 = vunpack.i.l.bf16 %v3407_v56  ;;  %v1172_v54 = vld [vmem:[%s5415_s11 + $0xd0] sm:$0xff]  ;;  %v6414_v17 = vld [vmem:[#allocation29_spill] sm:$0xff] }
 0x1d0   : > { %3581 = vrot.lane.b32.xlu2 %v4727_v20, %s3763_s30  ;;  %v5577_v35 = vsel %vm2239_vm9, %v5393_v6, %v3408_v25  ;;  %v5581_v38 = vsel %vm2239_vm9, %v5397_v43, %v3409_v42  ;;  %v3595_v20 = vpack.i.bf16 %v1173_v41, %v1172_v54  ;;  %v1150_v42 = vld [vmem:[%s5415_s11 + $0x20] sm:$0xff]  ;;  %v1151_v25 = vld [vmem:[%s5415_s11 + $0x28] sm:$0xff] }
 0x1d1   : > { %3606 = vrot.lane.b32.xlu1 %v6414_v17, %s3763_s30 }
 0x1d2   : > { %v3417_v32 = vpop.permute.xlu2 %3416 }
 0x1d3   : > { %v3419_v30 = vunpack.i.h.bf16 %v3417_v32  ;;  %v3418_v2 = vunpack.i.l.bf16 %v3417_v32  ;;  %v3397_v15 = vpop.permute.xlu1 %3396  ;;  %3631 = vrot.lane.b32.xlu0 %v6415_v39, %s3763_s30 }
 0x1d4   : > { %v3399_v14 = vunpack.i.h.bf16 %v3397_v15  ;;  %v3398_v21 = vunpack.i.l.bf16 %v3397_v15 }
 0x1d5   : > { %v5591_v6 = vsel %vm2239_vm9, %v5473_v18, %v3418_v2  ;;  %v5595_v43 = vsel %vm2239_vm9, %v5477_v46, %v3419_v30  ;;  %v3422_v7 = vpop.permute.xlu0 %3421  ;;  %v3660_v30 = vpack.i.bf16 %v1151_v25, %v1150_v42  ;;  %v2945_v42 = vld [vmem:[%s6164_s3 + $0x20] sm:$0x30] }
 0x1d6   : > { %v5601_v10 = vsel %vm2206_vm8, %v5381_v61, %v3398_v21  ;;  %v5605_v36 = vsel %vm2206_vm8, %v5385_v53, %v3399_v14  ;;  %v3424_v18 = vunpack.i.h.bf16 %v3422_v7  ;;  %v3423_v62 = vunpack.i.l.bf16 %v3422_v7  ;;  %v1148_v61 = vld [vmem:[%s5415_s11 + $0x10] sm:$0xff]  ;;  %v6416_v53 = vld [vmem:[#allocation49_spill] sm:$0xff] }
 0x1d7   : > { %v3610_v4 = vpack.i.bf16 %v1149_v13, %v1148_v61  ;;  %v6417_v7 = vld [vmem:[#allocation45_spill] sm:$0xff]  ;;  %v1158_v61 = vld [vmem:[%s5415_s11 + $0x60] sm:$0xff]  ;;  %v1159_v13 = vld [vmem:[%s5415_s11 + $0x68] sm:$0xff] }
 0x1d8   : > { %3596 = vrot.lane.b32.xlu2 %v3595_v20, %s3764_s12  ;;  %v5610_v46 = vsel %vm2239_vm9, %v5435_v47, %v3423_v62  ;;  %v5614_v19 = vsel %vm2239_vm9, %v5439_v11, %v3424_v18  ;;  %v1167_v62 = vld [vmem:[%s5415_s11 + $0xa8] sm:$0xff] }
 0x1d9   : > { %3621 = vrot.lane.b32.xlu1 %v6416_v53, %s3762_s29 }
 0x1da   : > { %v3432_v40 = vpop.permute.xlu2 %3431 }
 0x1db   : > { %v3434_v9 = vunpack.i.h.bf16 %v3432_v40  ;;  %v3433_v26 = vunpack.i.l.bf16 %v3432_v40  ;;  %v3412_v57 = vpop.permute.xlu1 %3411  ;;  %3646 = vrot.lane.b32.xlu0 %v3645_v48, %s3764_s12  ;;  %v6418_v48 = vld [vmem:[#allocation65_spill] sm:$0xff] }
 0x1dc   : > { %v3414_v58 = vunpack.i.h.bf16 %v3412_v57  ;;  %v3413_v56 = vunpack.i.l.bf16 %v3412_v57  ;;  %v3665_v57 = vpack.i.bf16 %v1159_v13, %v1158_v61  ;;  %v1177_v61 = vld [vmem:[%s5415_s11 + $0xf8] sm:$0xff] }
 0x1dd   : > { %v5623_v47 = vsel %vm2239_vm9, %v5505_v63, %v3433_v26  ;;  %v5627_v11 = vsel %vm2239_vm9, %v5509_v34, %v3434_v9  ;;  %v3437_v54 = vpop.permute.xlu0 %3436  ;;  %v6419_v9 = vld [vmem:[#allocation2_spill] sm:$0xff]  ;;  %v1169_v26 = vld [vmem:[%s5415_s11 + $0xb8] sm:$0xff] }
 0x1de   : > { %v5633_v41 = vsel %vm2239_vm9, %v5419_v45, %v3414_v58  ;;  %v5637_v17 = vsel %vm2239_vm9, %v5423_v52, %v3413_v56  ;;  %v3439_v32 = vunpack.i.h.bf16 %v3437_v54  ;;  %v3438_v63 = vunpack.i.l.bf16 %v3437_v54  ;;  %v2919_v56 = vld [vmem:[%s6164_s3 + $0x20] sm:$0xf] }
 0x1df   : > { %v2920_v54 = vor.u32 %v2945_v42, %v2919_v56 }
 0x1e0   : > { %3611 = vrot.lane.b32.xlu2 %v3610_v4, %s3764_s12  ;;  %v5642_v34 = vsel %vm2239_vm9, %v5465_v60, %v3438_v63  ;;  %v5646_v2 = vsel %vm2239_vm9, %v5469_v0, %v3439_v32 }
 0x1e1   : > { %3636 = vrot.lane.b32.xlu1 %v4831_v49, %s3763_s30 }
 0x1e2   : > { %v3447_v45 = vpop.permute.xlu2 %3446 }
 0x1e3   : > { %v3449_v15 = vunpack.i.h.bf16 %v3447_v45  ;;  %v3448_v52 = vunpack.i.l.bf16 %v3447_v45  ;;  %v3427_v20 = vpop.permute.xlu1 %3426  ;;  %3661 = vrot.lane.b32.xlu0 %v3660_v30, %s3764_s12  ;;  %v2480_v45 = vsel %vm1039_vm3, %v2920_v54, 0 }
 0x1e4   : > { %v3429_v0 = vunpack.i.h.bf16 %v3427_v20  ;;  %v3428_v49 = vunpack.i.l.bf16 %v3427_v20  ;;  %2948 = vmatpush.bf16.msra.mxu3 %v2480_v45  ;;  %2947 = vmatpush.bf16.msra.mxu2 %v2480_v45 }
 0x1e5   : > { %v5653_v39 = vsel %vm2239_vm9, %v5540_v8, %v3448_v52  ;;  %v5657_v60 = vsel %vm2239_vm9, %v5544_v50, %v3449_v15  ;;  %v3452_v14 = vpop.permute.xlu0 %3451  ;;  %2485 = vmatpush.bf16.msra.mxu0 %v2480_v45  ;;  %2946 = vmatpush.bf16.msra.mxu1 %v2480_v45 }
 0x1e6   : > { %v5661_v21 = vsel %vm2239_vm9, %v5455_v51, %v3429_v0  ;;  %v5665_v33 = vsel %vm2239_vm9, %v5459_v22, %v3428_v49  ;;  %v3454_v8 = vunpack.i.h.bf16 %v3452_v14  ;;  %v3453_v12 = vunpack.i.l.bf16 %v3452_v14  ;;  %v1166_v51 = vld [vmem:[%s5415_s11 + $0xa0] sm:$0xff] }
 0x1e7   : > { %v3640_v40 = vpack.i.bf16 %v1167_v62, %v1166_v51 }
 0x1e8   : > { %3626 = vrot.lane.b32.xlu2 %v6417_v7, %s3762_s29  ;;  %v5671_v50 = vsel %vm2239_vm9, %v5497_v24, %v3453_v12  ;;  %v5675_v18 = vsel %vm2239_vm9, %v5501_v59, %v3454_v8  ;;  %v1168_v24 = vld [vmem:[%s5415_s11 + $0xb0] sm:$0xff] }
 0x1e9   : > { %3651 = vrot.lane.b32.xlu1 %v6418_v48, %s3763_s30  ;;  %v3690_v25 = vpack.i.bf16 %v1169_v26, %v1168_v24  ;;  %v2943_v7 = vld [vmem:[%s6164_s3 + $0x10] sm:$0xff] }
 0x1ea   : > { %v5681_v22 = vpop.permute.xlu2 %3461  ;;  %v1176_v48 = vld [vmem:[%s5415_s11 + $0xf0] sm:$0xff] }
 0x1eb   : > { %v5685_v53 = vpop.permute.xlu1 %3441  ;;  %3676 = vrot.lane.b32.xlu0 %v6419_v9, %s3762_s29 }
 0x1ed   : > { %v3467_v59 = vpop.permute.xlu0 %3466 }
 0x1ee   : > { %v3469_v4 = vunpack.i.h.bf16 %v3467_v59  ;;  %v3468_v58 = vunpack.i.l.bf16 %v3467_v59  ;;  %v3695_v59 = vpack.i.bf16 %v1177_v61, %v1176_v48  ;;  %v6425_v48 = vmov 1  }
 0x1f0   : > { %3641 = vrot.lane.b32.xlu2 %v3640_v40, %s3764_s12  ;;  %v5700_v32 = vsel %vm2239_vm9, %v5530_v44, %v3468_v58  ;;  %v5704_v63 = vsel %vm2239_vm9, %v5534_v37, %v3469_v4  ;;  %v6422_v40 = vld [vmem:[#allocation26_spill] sm:$0xff] }
 0x1f1   : > { %3666 = vrot.lane.b32.xlu1 %v3665_v57, %s3764_s12 }
 0x1f2   : > { %v3477_v30 = vpop.permute.xlu2 %3476 }
 0x1f3   : > { %v3479_v15 = vunpack.i.h.bf16 %v3477_v30  ;;  %v3478_v52 = vunpack.i.l.bf16 %v3477_v30  ;;  %v3457_v20 = vpop.permute.xlu1 %3456  ;;  %3691 = vrot.lane.b32.xlu0 %v3690_v25, %s3764_s12  ;;  %v6423_v25 = vld [vmem:[#allocation58_spill] sm:$0xff] }
 0x1f4   : > { %v3459_v0 = vunpack.i.h.bf16 %v3457_v20  ;;  %v3458_v49 = vunpack.i.l.bf16 %v3457_v20  ;;  %v2941_v30 = vld [vmem:[%s6164_s3] sm:$0xff]  ;;  %v1152_v20 = vld [vmem:[%s5415_s11 + $0x30] sm:$0xff] }
 0x1f5   : > { %v5711_v44 = vsel %vm2239_vm9, %v5601_v10, %v3478_v52  ;;  %v5715_v37 = vsel %vm2239_vm9, %v5605_v36, %v3479_v15  ;;  %v5717_v14 = vpop.permute.xlu0 %3481  ;;  %v2944_v10 = vld [vmem:[%s6164_s3 + $0x18] sm:$0xff]  ;;  %v6420_v36 = vld [vmem:[#allocation62_spill] sm:$0xff] }
 0x1f6   : > { %v5721_v8 = vsel %vm2239_vm9, %v5514_v3, %v3459_v0  ;;  %v5725_v12 = vsel %vm2239_vm9, %v5518_v5, %v3458_v49  ;;  %2951 = vmatpush.bf16.msra.mxu3 %v2944_v10  ;;  %2950 = vmatpush.bf16.msra.mxu2 %v2944_v10  ;;  %v6421_v3 = vld [vmem:[#allocation69_spill] sm:$0xff] }
 0x1f7   : > { %2486 = vmatpush.bf16.msra.mxu0 %v2944_v10  ;;  %2949 = vmatpush.bf16.msra.mxu1 %v2944_v10  ;;  %v1153_v0 = vld [vmem:[%s5415_s11 + $0x38] sm:$0xff] }
 0x1f8   : > { %3656 = vrot.lane.b32.xlu2 %v6420_v36, %s3763_s30  ;;  %v3710_v10 = vpack.i.bf16 %v1153_v0, %v1152_v20 }
 0x1f9   : > { %3681 = vrot.lane.b32.xlu1 %v6421_v3, %s3763_s30 }
 0x1fa   : > { %v3492_v51 = vpop.permute.xlu2 %3491  ;;  %2954 = vmatpush.bf16.msra.mxu3 %v2943_v7  ;;  %2953 = vmatpush.bf16.msra.mxu2 %v2943_v7 }
 0x1fb   : > { %v3494_v5 = vunpack.i.h.bf16 %v3492_v51  ;;  %v3493_v62 = vunpack.i.l.bf16 %v3492_v51  ;;  %v3472_v13 = vpop.permute.xlu1 %3471  ;;  %3706 = vrot.lane.b32.xlu0 %v6422_v40, %s3763_s30  ;;  %2487 = vmatpush.bf16.msra.mxu0 %v2943_v7  ;;  %v6424_v51 = vld [vmem:[#allocation3_spill] sm:$0xff]  ;;  %v1160_v40 = vld [vmem:[%s5415_s11 + $0x70] sm:$0xff] }
 0x1fc   : > { %v3474_v26 = vunpack.i.h.bf16 %v3472_v13  ;;  %v3473_v57 = vunpack.i.l.bf16 %v3472_v13  ;;  %2952 = vmatpush.bf16.msra.mxu1 %v2943_v7  ;;  %v6426_v13 = vld [vmem:[#allocation56_spill] sm:$0xff] }
 0x1fd   : > { %v5743_v9 = vsel %vm2272_vm10, %v5637_v17, %v3493_v62  ;;  %v5747_v24 = vsel %vm2272_vm10, %v5633_v41, %v3494_v5  ;;  %v3497_v4 = vpop.permute.xlu0 %3496  ;;  %v2942_v41 = vld [vmem:[%s6164_s3 + $0x8] sm:$0xff] }
 0x1fe   : > { %v5751_v58 = vsel %vm2239_vm9, %v5549_v16, %v3474_v26  ;;  %v5755_v56 = vsel %vm2239_vm9, %v5553_v23, %v3473_v57  ;;  %v3499_v17 = vunpack.i.h.bf16 %v3497_v4  ;;  %v3498_v42 = vunpack.i.l.bf16 %v3497_v4  ;;  %v3725_v16 = vld [vmem:[%s6167_s6] ss:$0 sm:$0xff]  ;;  %2957 = vmatpush.bf16.msra.mxu3 %v2942_v41  ;;  %2956 = vmatpush.bf16.msra.mxu2 %v2942_v41  ;;  %v1161_v26 = vld [vmem:[%s5415_s11 + $0x78] sm:$0xff] }
 0x1ff   : > { %2488 = vmatpush.bf16.msra.mxu0 %v2942_v41 }
 0x200   : > { %3671 = vrot.lane.b32.xlu2 %v6423_v25, %s3762_s29  ;;  %v5767_v23 = vsel %vm2272_vm10, %v5591_v6, %v3498_v42  ;;  %v5771_v54 = vsel %vm2272_vm10, %v5595_v43, %v3499_v17  ;;  %2955 = vmatpush.bf16.msra.mxu1 %v2942_v41  ;;  %v3463_v17 = vunpack.i.l.bf16 %v5681_v22 }
 0x201   : > { %3696 = vrot.lane.b32.xlu1 %v3695_v59, %s3764_s12 }
 0x202   : > { %v3507_v45 = vpop.permute.xlu2 %3506  ;;  %2960 = vmatpush.bf16.msra.mxu3 %v2941_v30  ;;  %2959 = vmatpush.bf16.msra.mxu2 %v2941_v30 }
 0x203   : > { %v3509_v15 = vunpack.i.h.bf16 %v3507_v45  ;;  %v3508_v52 = vunpack.i.l.bf16 %v3507_v45  ;;  %v5779_v6 = vpop.permute.xlu1 %3486  ;;  %2639 = vperm.xlu0 %2999, %v3725_v16   ;;  %2489 = vmatpush.bf16.msra.mxu0 %v2941_v30  ;;  %v3464_v45 = vunpack.i.h.bf16 %v5681_v22 }
 0x204   : > { %2958 = vmatpush.bf16.msra.mxu1 %v2941_v30 }
 0x205   : > { %v5783_v43 = vsel %vm2272_vm10, %v5665_v33, %v3508_v52  ;;  %v5787_v49 = vsel %vm2272_vm10, %v5661_v21, %v3509_v15  ;;  %v3512_v36 = vpop.permute.xlu0 %3511  ;;  %v2264_v15 = vsel %vm2239_vm9, %v5567_v28, %v3463_v17  ;;  %v2265_v28 = vsel %vm2239_vm9, %v5571_v55, %v3464_v45 }
 0x206   : > { %v3514_v7 = vunpack.i.h.bf16 %v3512_v36  ;;  %v3513_v3 = vunpack.i.l.bf16 %v3512_v36 }
 0x208   : > { %3686 = vrot.lane.b32.xlu2 %v6424_v51, %s3763_s30  ;;  %v5793_v33 = vsel %vm2272_vm10, %v5623_v47, %v3513_v3  ;;  %v5797_v21 = vsel %vm2272_vm10, %v5627_v11, %v3514_v7  ;;  %v3715_v11 = vpack.i.bf16 %v1161_v26, %v1160_v40  ;;  %v3484_v7 = vunpack.i.h.bf16 %v5717_v14 }
 0x209   : > { %3711 = vrot.lane.b32.xlu1 %v3710_v10, %s3764_s12  ;;  %v3444_v51 = vunpack.i.h.bf16 %v5685_v53 }
 0x20a   : > { %v3522_v5 = vpop.permute.xlu2 %3521  ;;  %v2274_v55 = vsel %vm2272_vm10, %v5563_v29, %v3484_v7 }
 0x20b   : > { %v5800_v62 = vpop.permute.xlu1 %3501  ;;  %3721 = vset.pattern.permute.xlu0 %v6425_v48  ;;  %v3443_v48 = vunpack.i.l.bf16 %v5685_v53 }
 0x20d   : > { %v5803_v61 = vpop.permute.xlu0 %3526 }
 0x20e   : > { %v3529_v41 = vunpack.i.h.bf16 %v5803_v61 }
 0x210   : > { %3701 = vrot.lane.b32.xlu2 %v6426_v13, %s3763_s30  ;;  %v2297_v20 = vsel %vm2272_vm10, %v2264_v15, %v3529_v41 }
 0x211   : > { %2707 = vperm.xlu1 %3720, %v3725_v16  }
 0x212   : > { %v5809_v47 = vpop.permute.xlu2 %3536 }
 0x213   : > { %v3517_v57 = vpop.permute.xlu1 %3516  ;;  %v3538_v41 = vunpack.i.l.bf16 %v5809_v47 }
 0x214   : > { %v3519_v59 = vunpack.i.h.bf16 %v3517_v57  ;;  %v3518_v4 = vunpack.i.l.bf16 %v3517_v57 }
 0x215   : > { %v3542_v42 = vpop.permute.xlu0 %3541 }
 0x216   : > { %v5815_v25 = vsel %vm2272_vm10, %v5642_v34, %v3518_v4  ;;  %v5819_v30 = vsel %vm2272_vm10, %v5646_v2, %v3519_v59  ;;  %v3543_v16 = vunpack.i.l.bf16 %v3542_v42  ;;  %v3483_v34 = vunpack.i.l.bf16 %v5717_v14 }
 0x217   : > { %v3544_v10 = vunpack.i.h.bf16 %v3542_v42  ;;  %v3524_v59 = vunpack.i.h.bf16 %v3522_v5  ;;  %v3523_v4 = vunpack.i.l.bf16 %v3522_v5  ;;  %v3539_v42 = vunpack.i.h.bf16 %v5809_v47 }
 0x218   : > { %3716 = vrot.lane.b32.xlu2 %v3715_v11, %s3764_s12  ;;  %v2330_v36 = vsel %vm2305_vm11, %v2297_v20, %v3543_v16  ;;  %v2273_v14 = vsel %vm2272_vm10, %v5559_v27, %v3483_v34  ;;  %v2257_v5 = vsel %vm2239_vm9, %v5483_v31, %v3444_v51 }
 0x219   : > { %v2290_v34 = vsel %vm2272_vm10, %v2257_v5, %v3524_v59 }
 0x21a   : > { %v3552_v52 = vpop.permute.xlu2 %3551 }
 0x21b   : > { %v3553_v0 = vunpack.i.l.bf16 %v3552_v52  ;;  %v5828_v2 = vpop.permute.xlu1 %3531  ;;  %v3554_v3 = vunpack.i.h.bf16 %v3552_v52  ;;  %v2256_v52 = vsel %vm2239_vm9, %v5487_v1, %v3443_v48 }
 0x21c   : > { %v3533_v22 = vunpack.i.l.bf16 %v5828_v2 }
 0x21d   : > { %v3557_v13 = vpop.permute.xlu0 %3556  ;;  %v2363_v11 = vsel %vm2338_vm12, %v2330_v36, %v3553_v0  ;;  %v2289_v0 = vsel %vm2272_vm10, %v2256_v52, %v3523_v4 }
 0x21e   : > { %v2298_v40 = vsel %vm2272_vm10, %v2265_v28, %v3533_v22  ;;  %v3559_v26 = vunpack.i.h.bf16 %v3557_v13  ;;  %v3558_v57 = vunpack.i.l.bf16 %v3557_v13  ;;  %v2322_v31 = vsel %vm2305_vm11, %v2289_v0, %v3538_v41 }
 0x21f   : > { %v2331_v17 = vsel %vm2305_vm11, %v2298_v40, %v3544_v10  ;;  %v2323_v22 = vsel %vm2305_vm11, %v2290_v34, %v3539_v42  ;;  %v3504_v40 = vunpack.i.h.bf16 %v5800_v62 }
 0x220   : > { %v2364_v53 = vsel %vm2338_vm12, %v2331_v17, %v3554_v3  ;;  %v2306_v45 = vsel %vm2305_vm11, %v2273_v14, %v3558_v57  ;;  %v2307_v15 = vsel %vm2305_vm11, %v2274_v55, %v3559_v26  ;;  %v3503_v26 = vunpack.i.l.bf16 %v5800_v62 }
 0x221   : > { %v2383_v27 = vpack.c.bf16 %v2364_v53, %v2363_v11  ;;  %v2282_v42 = vsel %vm2272_vm10, %v5614_v19, %v3504_v40 }
 0x222   : > { %v3567_v16 = vpop.permute.xlu2 %3566  ;;  %v2281_v55 = vsel %vm2272_vm10, %v5610_v46, %v3503_v26  ;;  %v3489_v46 = vunpack.i.h.bf16 %v5779_v6 }
 0x223   : > { %v3569_v29 = vunpack.i.h.bf16 %v3567_v16  ;;  %v3568_v20 = vunpack.i.l.bf16 %v3567_v16  ;;  %v3547_v10 = vpop.permute.xlu1 %3546  ;;  %2933 = vmatmul.msk.bf16.vlgmr.msra.gmra.mxu3 %vm2430_vm13, %v2383_v27  ;;  %v3488_v27 = vunpack.i.l.bf16 %v5779_v6  ;;  %v3528_v6 = vunpack.i.l.bf16 %v5803_v61 }
 0x224   : > { %v3549_v47 = vunpack.i.h.bf16 %v3547_v10  ;;  %v3548_v36 = vunpack.i.l.bf16 %v3547_v10 }
 0x225   : > { %v2339_v7 = vsel %vm2338_vm12, %v2306_v45, %v3568_v20  ;;  %v2340_v3 = vsel %vm2338_vm12, %v2307_v15, %v3569_v29  ;;  %v3572_v28 = vpop.permute.xlu0 %3571 }
 0x226   : > { %v2371_v1 = vpack.c.bf16 %v2340_v3, %v2339_v7  ;;  %v2355_v51 = vsel %vm2338_vm12, %v2322_v31, %v3548_v36  ;;  %v2356_v48 = vsel %vm2338_vm12, %v2323_v22, %v3549_v47  ;;  %v3574_v11 = vunpack.i.h.bf16 %v3572_v28 }
 0x227   : > { %v2379_v13 = vpack.c.bf16 %v2356_v48, %v2355_v51  ;;  %v3573_v14 = vunpack.i.l.bf16 %v3572_v28  ;;  %v2275_v47 = vsel %vm2272_vm10, %v5577_v35, %v3488_v27  ;;  %v2276_v35 = vsel %vm2272_vm10, %v5581_v38, %v3489_v46 }
 0x228   : > { %2921 = vmatmul.msk.bf16.vlgmr.msra.gmra.mxu0 %vm2430_vm13, %v2371_v1  ;;  %v3534_v1 = vunpack.i.h.bf16 %v5828_v2 }
 0x229   : > { %2929 = vmatmul.msk.bf16.vlgmr.msra.gmra.mxu2 %vm2430_vm13, %v2379_v13 }
 0x22a   : > { %v3582_v57 = vpop.permute.xlu2 %3581  ;;  %v2292_v38 = vsel %vm2272_vm10, %v5657_v60, %v3534_v1 }
 0x22b   : > { %v3562_v59 = vpop.permute.xlu1 %3561  ;;  %v3584_v48 = vunpack.i.h.bf16 %v3582_v57  ;;  %v3583_v40 = vunpack.i.l.bf16 %v3582_v57 }
 0x22c   : > { %v3564_v4 = vunpack.i.h.bf16 %v3562_v59  ;;  %v3563_v17 = vunpack.i.l.bf16 %v3562_v59  ;;  %v2291_v59 = vsel %vm2272_vm10, %v5653_v39, %v3528_v6 }
 0x22d   : > { %v3587_v53 = vpop.permute.xlu0 %3586 }
 0x22e   : > { %v2314_v41 = vsel %vm2305_vm11, %v2281_v55, %v3563_v17  ;;  %v2315_v16 = vsel %vm2305_vm11, %v2282_v42, %v3564_v4  ;;  %v3589_v52 = vunpack.i.h.bf16 %v3587_v53  ;;  %v3588_v29 = vunpack.i.l.bf16 %v3587_v53 }
 0x22f   : > { %v2347_v62 = vsel %vm2338_vm12, %v2314_v41, %v3573_v14  ;;  %v2348_v45 = vsel %vm2338_vm12, %v2315_v16, %v3574_v11  ;;  %v2324_v53 = vsel %vm2305_vm11, %v2291_v59, %v3583_v40  ;;  %v2325_v41 = vsel %vm2305_vm11, %v2292_v38, %v3584_v48 }
 0x230   : > { %v2375_v15 = vpack.c.bf16 %v2348_v45, %v2347_v62 }
 0x232   : > { %v3597_v5 = vpop.permute.xlu2 %3596  ;;  %2925 = vmatmul.msk.bf16.vlgmr.msra.gmra.mxu1 %vm2430_vm13, %v2375_v15 }
 0x233   : > { %v3577_v19 = vpop.permute.xlu1 %3576  ;;  %v3599_v20 = vunpack.i.h.bf16 %v3597_v5  ;;  %v3598_v0 = vunpack.i.l.bf16 %v3597_v5 }
 0x234   : > { %v3579_v34 = vunpack.i.h.bf16 %v3577_v19  ;;  %v3578_v10 = vunpack.i.l.bf16 %v3577_v19 }
 0x235   : > { %v3602_v36 = vpop.permute.xlu0 %3601 }
 0x236   : > { %v2299_v7 = vsel %vm2272_vm10, %v5700_v32, %v3578_v10  ;;  %v2300_v3 = vsel %vm2272_vm10, %v5704_v63, %v3579_v34  ;;  %v3604_v31 = vunpack.i.h.bf16 %v3602_v36  ;;  %v3603_v22 = vunpack.i.l.bf16 %v3602_v36 }
 0x237   : > { %v2332_v28 = vsel %vm2305_vm11, %v2299_v7, %v3588_v29  ;;  %v2333_v51 = vsel %vm2305_vm11, %v2300_v3, %v3589_v52 }
 0x238   : > { %v2365_v13 = vsel %vm2338_vm12, %v2332_v28, %v3598_v0  ;;  %v2366_v32 = vsel %vm2338_vm12, %v2333_v51, %v3599_v20  ;;  %v2308_v26 = vsel %vm2305_vm11, %v2275_v47, %v3603_v22  ;;  %v2309_v61 = vsel %vm2305_vm11, %v2276_v35, %v3604_v31 }
 0x239   : > { %v2384_v11 = vpack.c.bf16 %v2366_v32, %v2365_v13 }
 0x23a   : > { %v3612_v63 = vpop.permute.xlu2 %3611 }
 0x23b   : > { %v3614_v2 = vunpack.i.h.bf16 %v3612_v63  ;;  %v3613_v14 = vunpack.i.l.bf16 %v3612_v63  ;;  %v3592_v4 = vpop.permute.xlu1 %3591  ;;  %2934 = vmatmul.msk.bf16.gmra.mxu3 %vm2430_vm13, %v2384_v11 }
 0x23c   : > { %v3594_v17 = vunpack.i.h.bf16 %v3592_v4  ;;  %v3593_v55 = vunpack.i.l.bf16 %v3592_v4 }
 0x23d   : > { %v2341_v57 = vsel %vm2338_vm12, %v2308_v26, %v3613_v14  ;;  %v2342_v42 = vsel %vm2338_vm12, %v2309_v61, %v3614_v2  ;;  %v3617_v62 = vpop.permute.xlu0 %3616 }
 0x23e   : > { %v2372_v16 = vpack.c.bf16 %v2342_v42, %v2341_v57  ;;  %v2357_v39 = vsel %vm2338_vm12, %v2324_v53, %v3593_v55  ;;  %v2358_v45 = vsel %vm2338_vm12, %v2325_v41, %v3594_v17  ;;  %v3619_v27 = vunpack.i.h.bf16 %v3617_v62 }
 0x23f   : > { %v2380_v60 = vpack.c.bf16 %v2358_v45, %v2357_v39  ;;  %v3618_v5 = vunpack.i.l.bf16 %v3617_v62 }
 0x240   : > { %2922 = vmatmul.msk.bf16.gmra.mxu0 %vm2430_vm13, %v2372_v16 }
 0x241   : > { %2930 = vmatmul.msk.bf16.gmra.mxu2 %vm2430_vm13, %v2380_v60 }
 0x242   : > { %v3627_v15 = vpop.permute.xlu2 %3626 }
 0x243   : > { %v3607_v46 = vpop.permute.xlu1 %3606  ;;  %v3629_v40 = vunpack.i.h.bf16 %v3627_v15  ;;  %v3628_v63 = vunpack.i.l.bf16 %v3627_v15 }
 0x244   : > { %v3609_v52 = vunpack.i.h.bf16 %v3607_v46  ;;  %v3608_v29 = vunpack.i.l.bf16 %v3607_v46 }
 0x245   : > { %v3632_v19 = vpop.permute.xlu0 %3631  ;;  %v2302_v38 = vsel %vm2272_vm10, %v5751_v58, %v3629_v40 }
 0x246   : > { %v2316_v20 = vsel %vm2305_vm11, %v5783_v43, %v3608_v29  ;;  %v2317_v0 = vsel %vm2305_vm11, %v5787_v49, %v3609_v52  ;;  %v3634_v7 = vunpack.i.h.bf16 %v3632_v19  ;;  %v3633_v3 = vunpack.i.l.bf16 %v3632_v19 }
 0x247   : > { %v2349_v34 = vsel %vm2338_vm12, %v2316_v20, %v3618_v5  ;;  %v2350_v10 = vsel %vm2338_vm12, %v2317_v0, %v3619_v27 }
 0x248   : > { %v2376_v47 = vpack.c.bf16 %v2350_v10, %v2349_v34 }
 0x24a   : > { %v3642_v36 = vpop.permute.xlu2 %3641  ;;  %2926 = vmatmul.msk.bf16.gmra.mxu1 %vm2430_vm13, %v2376_v47 }
 0x24b   : > { %v3622_v31 = vpop.permute.xlu1 %3621  ;;  %v3644_v22 = vunpack.i.h.bf16 %v3642_v36  ;;  %v3643_v6 = vunpack.i.l.bf16 %v3642_v36 }
 0x24c   : > { %v3624_v1 = vunpack.i.h.bf16 %v3622_v31  ;;  %v3623_v28 = vunpack.i.l.bf16 %v3622_v31 }
 0x24d   : > { %v3647_v51 = vpop.permute.xlu0 %3646 }
 0x24e   : > { %v2293_v43 = vsel %vm2272_vm10, %v5671_v50, %v3623_v28  ;;  %v2294_v49 = vsel %vm2272_vm10, %v5675_v18, %v3624_v1  ;;  %v3649_v11 = vunpack.i.h.bf16 %v3647_v51  ;;  %v3648_v2 = vunpack.i.l.bf16 %v3647_v51 }
 0x24f   : > { %v2326_v35 = vsel %vm2305_vm11, %v2293_v43, %v3633_v3  ;;  %v2327_v48 = vsel %vm2305_vm11, %v2294_v49, %v3634_v7  ;;  %v2301_v18 = vsel %vm2272_vm10, %v5755_v56, %v3628_v63 }
 0x250   : > { %v2359_v13 = vsel %vm2338_vm12, %v2326_v35, %v3643_v6  ;;  %v2360_v32 = vsel %vm2338_vm12, %v2327_v48, %v3644_v22 }
 0x251   : > { %v2381_v61 = vpack.c.bf16 %v2360_v32, %v2359_v13 }
 0x252   : > { %v3657_v26 = vpop.permute.xlu2 %3656 }
 0x253   : > { %v3637_v14 = vpop.permute.xlu1 %3636  ;;  %2931 = vmatmul.msk.bf16.gmra.mxu2 %vm2430_vm13, %v2381_v61  ;;  %v3659_v52 = vunpack.i.h.bf16 %v3657_v26  ;;  %v3658_v29 = vunpack.i.l.bf16 %v3657_v26 }
 0x254   : > { %v3639_v50 = vunpack.i.h.bf16 %v3637_v14  ;;  %v3638_v59 = vunpack.i.l.bf16 %v3637_v14 }
 0x255   : > { %v3662_v4 = vpop.permute.xlu0 %3661  ;;  %v2318_v10 = vsel %vm2305_vm11, %v5793_v33, %v3658_v29 }
 0x256   : > { %v2334_v17 = vsel %vm2305_vm11, %v2301_v18, %v3638_v59  ;;  %v2335_v55 = vsel %vm2305_vm11, %v2302_v38, %v3639_v50  ;;  %v3664_v16 = vunpack.i.h.bf16 %v3662_v4  ;;  %v3663_v62 = vunpack.i.l.bf16 %v3662_v4 }
 0x257   : > { %v2367_v57 = vsel %vm2338_vm12, %v2334_v17, %v3648_v2  ;;  %v2368_v42 = vsel %vm2338_vm12, %v2335_v55, %v3649_v11 }
 0x258   : > { %v2385_v53 = vpack.c.bf16 %v2368_v42, %v2367_v57 }
 0x25a   : > { %v3672_v41 = vpop.permute.xlu2 %3671  ;;  %2935 = vmatmul.msk.bf16.gmra.mxu3 %vm2430_vm13, %v2385_v53 }
 0x25b   : > { %v3652_v39 = vpop.permute.xlu1 %3651  ;;  %v3674_v3 = vunpack.i.h.bf16 %v3672_v41  ;;  %v3673_v31 = vunpack.i.l.bf16 %v3672_v41 }
 0x25c   : > { %v3654_v56 = vunpack.i.h.bf16 %v3652_v39  ;;  %v3653_v45 = vunpack.i.l.bf16 %v3652_v39 }
 0x25d   : > { %v3677_v60 = vpop.permute.xlu0 %3676  ;;  %v2295_v33 = vsel %vm2272_vm10, %v5725_v12, %v3673_v31 }
 0x25e   : > { %v2310_v58 = vsel %vm2305_vm11, %v5743_v9, %v3653_v45  ;;  %v2311_v15 = vsel %vm2305_vm11, %v5747_v24, %v3654_v56  ;;  %v2319_v9 = vsel %vm2305_vm11, %v5797_v21, %v3659_v52  ;;  %v2296_v21 = vsel %vm2272_vm10, %v5721_v8, %v3674_v3  ;;  %v5979_v52 = vld [vmem:[%s6165_s4] ss:$0 sm:$0xff] }
 0x25f   : > { %v2343_v27 = vsel %vm2338_vm12, %v2310_v58, %v3663_v62  ;;  %v2344_v5 = vsel %vm2338_vm12, %v2311_v15, %v3664_v16  ;;  %v3679_v49 = vunpack.i.h.bf16 %v3677_v60  ;;  %v3678_v35 = vunpack.i.l.bf16 %v3677_v60 }
 0x260   : > { %v2373_v46 = vpack.c.bf16 %v2344_v5, %v2343_v27 }
 0x261   : > { %v2303_v59 = vsel %vm2272_vm10, %v5711_v44, %v3678_v35  ;;  %v2304_v18 = vsel %vm2272_vm10, %v5715_v37, %v3679_v49 }
 0x262   : > { %v3687_v19 = vpop.permute.xlu2 %3686  ;;  %2923 = vmatmul.msk.bf16.gmra.mxu0 %vm2430_vm13, %v2373_v46 }
 0x263   : > { %v3667_v20 = vpop.permute.xlu1 %3666  ;;  %v3689_v2 = vunpack.i.h.bf16 %v3687_v19  ;;  %v3688_v14 = vunpack.i.l.bf16 %v3687_v19 }
 0x264   : > { %v3669_v0 = vunpack.i.h.bf16 %v3667_v20  ;;  %v3668_v34 = vunpack.i.l.bf16 %v3667_v20 }
 0x265   : > { %v3692_v24 = vpop.permute.xlu0 %3691  ;;  %v2337_v53 = vsel %vm2305_vm11, %v2304_v18, %v3689_v2 }
 0x266   : > { %v2351_v47 = vsel %vm2338_vm12, %v2318_v10, %v3668_v34  ;;  %v2352_v36 = vsel %vm2338_vm12, %v2319_v9, %v3669_v0  ;;  %v3694_v6 = vunpack.i.h.bf16 %v3692_v24  ;;  %v3693_v1 = vunpack.i.l.bf16 %v3692_v24 }
 0x267   : > { %v2377_v7 = vpack.c.bf16 %v2352_v36, %v2351_v47 }
 0x269   : > { %2927 = vmatmul.msk.bf16.gmra.mxu1 %vm2430_vm13, %v2377_v7 }
 0x26a   : > { %v3702_v22 = vpop.permute.xlu2 %3701 }
 0x26b   : > { %v3682_v28 = vpop.permute.xlu1 %3681  ;;  %v3704_v62 = vunpack.i.h.bf16 %v3702_v22  ;;  %v3703_v39 = vunpack.i.l.bf16 %v3702_v22 }
 0x26c   : > { %v3684_v51 = vunpack.i.h.bf16 %v3682_v28  ;;  %v3683_v43 = vunpack.i.l.bf16 %v3682_v28 }
 0x26d   : > { %v3707_v48 = vpop.permute.xlu0 %3706  ;;  %v2312_v58 = vsel %vm2305_vm11, %v5767_v23, %v3703_v39  ;;  %v2313_v15 = vsel %vm2305_vm11, %v5771_v54, %v3704_v62 }
 0x26e   : > { %v2328_v13 = vsel %vm2305_vm11, %v2295_v33, %v3683_v43  ;;  %v2329_v32 = vsel %vm2305_vm11, %v2296_v21, %v3684_v51  ;;  %v3709_v40 = vunpack.i.h.bf16 %v3707_v48  ;;  %v3708_v63 = vunpack.i.l.bf16 %v3707_v48 }
 0x26f   : > { %v2361_v26 = vsel %vm2338_vm12, %v2328_v13, %v3693_v1  ;;  %v2362_v61 = vsel %vm2338_vm12, %v2329_v32, %v3694_v6 }
 0x270   : > { %v2382_v11 = vpack.c.bf16 %v2362_v61, %v2361_v26  ;;  %v2320_v12 = vsel %vm2305_vm11, %v5815_v25, %v3708_v63  ;;  %v2321_v8 = vsel %vm2305_vm11, %v5819_v30, %v3709_v40  ;;  %v2336_v30 = vsel %vm2305_vm11, %v2303_v59, %v3688_v14 }
 0x272   : > { %v3717_v50 = vpop.permute.xlu2 %3716  ;;  %2932 = vmatmul.msk.bf16.gmra.mxu2 %vm2430_vm13, %v2382_v11 }
 0x273   : > { %v3719_v38 = vunpack.i.h.bf16 %v3717_v50  ;;  %v3718_v4 = vunpack.i.l.bf16 %v3717_v50  ;;  %v3697_v17 = vpop.permute.xlu1 %3696 }
 0x274   : > { %v3699_v55 = vunpack.i.h.bf16 %v3697_v17  ;;  %v3698_v57 = vunpack.i.l.bf16 %v3697_v17 }
 0x275   : > { %v2353_v42 = vsel %vm2338_vm12, %v2320_v12, %v3718_v4  ;;  %v2354_v25 = vsel %vm2338_vm12, %v2321_v8, %v3719_v38  ;;  %v5983_v10 = vpop.permute.xlu0 %2639 }
 0x276   : > { %v2378_v41 = vpack.c.bf16 %v2354_v25, %v2353_v42  ;;  %v2369_v44 = vsel %vm2338_vm12, %v2336_v30, %v3698_v57  ;;  %v2370_v37 = vsel %vm2338_vm12, %v2337_v53, %v3699_v55 }
 0x277   : > { %v2386_v16 = vpack.c.bf16 %v2370_v37, %v2369_v44 }
 0x279   : > { %2936 = vmatmul.msk.bf16.gmra.mxu3 %vm2430_vm13, %v2386_v16  ;;  %2928 = vmatmul.msk.bf16.gmra.mxu1 %vm2430_vm13, %v2378_v41 }
 0x27b   : > { %v3712_v56 = vpop.permute.xlu1 %3711 }
 0x27c   : > { %v3714_v45 = vunpack.i.h.bf16 %v3712_v56  ;;  %v3713_v60 = vunpack.i.l.bf16 %v3712_v56 }
 0x27e   : > { %v2345_v27 = vsel %vm2338_vm12, %v2312_v58, %v3713_v60  ;;  %v2346_v5 = vsel %vm2338_vm12, %v2313_v15, %v3714_v45 }
 0x27f   : > { %v2374_v46 = vpack.c.bf16 %v2346_v5, %v2345_v27 }
 0x281   : > { %2924 = vmatmul.msk.bf16.gmra.mxu0 %vm2430_vm13, %v2374_v46 }
 0x283   : > { %v5989_v6 = vpop.permute.xlu1 %2707 }
 0x2a5   : > { %v2491_v29 = vpop.f32.mrf.mxu0 }
 0x2a6   : > { %v2492_v19 = vadd.f32 %v5979_v52, %v2491_v29  ;;  %v2551_v20 = vpop.f32.mrf.mxu3 }
 0x2a7   : > { %v2552_v23 = vadd.f32 %v5979_v52, %v2551_v20 }
 0x2a8   : > { %v2571_v54 = vmax.f32 %v2492_v19, 0.0 }
 0x2a9   : > { %v2595_v0 = vmax.f32 %v2552_v23, 0.0 }
 0x2aa   : > { %v2603_v34 = vmin.f32 %v2571_v54, 6.0 }
 0x2ab   : > { %v2627_v9 = vmin.f32 %v2595_v0, 6.0 }
 0x2ac   : > { %v2642_v24 = vmul.f32 %v5983_v10, %v2603_v34  ;;  %v2531_v47 = vpop.f32.mrf.mxu2 }
 0x2ad   : > { %v2493_v36 = vpop.f32.mrf.mxu0  ;;  %v2666_v7 = vmul.f32 %v5983_v10, %v2627_v9  ;;  %v2532_v31 = vadd.f32 %v5979_v52, %v2531_v47 }
 0x2ae   : > { %v2674_v3 = vmul.f32 %v2642_v24, %v2603_v34  ;;  %v2494_v22 = vadd.f32 %v5979_v52, %v2493_v36  ;;  %v2553_v1 = vpop.f32.mrf.mxu3 }
 0x2af   : > { %v2698_v28 = vmul.f32 %v2666_v7, %v2627_v9  ;;  %v2587_v51 = vmax.f32 %v2532_v31, 0.0  ;;  %v2554_v43 = vadd.f32 %v5979_v52, %v2553_v1  ;;  %v2511_v21 = vpop.f32.mrf.mxu1 }
 0x2b0   : > { %v2572_v33 = vmax.f32 %v2494_v22, 0.0  ;;  %v2512_v49 = vadd.f32 %v5979_v52, %v2511_v21  ;;  %v2710_v35 = vadd.f32 %v5989_v6, %v2674_v3 }
 0x2b1   : > { %v2619_v48 = vmin.f32 %v2587_v51, 6.0  ;;  %v2596_v13 = vmax.f32 %v2554_v43, 0.0  ;;  %v2734_v40 = vadd.f32 %v5989_v6, %v2698_v28 }
 0x2b2   : > { %v2604_v32 = vmin.f32 %v2572_v33, 6.0  ;;  %v2579_v63 = vmax.f32 %v2512_v49, 0.0  ;;  %2742 = vst.msk [vmem:[%s5996_s13] sm:$0xff] %vm2074_vm4, %v2710_v35 }
 0x2b3   : > { %v2658_v26 = vmul.f32 %v5983_v10, %v2619_v48  ;;  %v2628_v61 = vmin.f32 %v2596_v13, 6.0  ;;  %2766 = vst.msk [vmem:[%s5996_s13 + $0xc0] sm:$0xff] %vm2074_vm4, %v2734_v40 }
 0x2b4   : > { %v2643_v11 = vmul.f32 %v5983_v10, %v2604_v32  ;;  %v2611_v2 = vmin.f32 %v2579_v63, 6.0  ;;  %v2533_v14 = vpop.f32.mrf.mxu2 }
 0x2b5   : > { %v2690_v12 = vmul.f32 %v2658_v26, %v2619_v48  ;;  %v2667_v8 = vmul.f32 %v5983_v10, %v2628_v61  ;;  %v2534_v59 = vadd.f32 %v5979_v52, %v2533_v14 }
 0x2b6   : > { %v2675_v50 = vmul.f32 %v2643_v11, %v2604_v32  ;;  %v2650_v18 = vmul.f32 %v5983_v10, %v2611_v2 }
 0x2b7   : > { %v2699_v38 = vmul.f32 %v2667_v8, %v2628_v61  ;;  %v2726_v17 = vadd.f32 %v5989_v6, %v2690_v12  ;;  %v2588_v55 = vmax.f32 %v2534_v59, 0.0  ;;  %v2513_v57 = vpop.f32.mrf.mxu1 }
 0x2b8   : > { %v2711_v4 = vadd.f32 %v5989_v6, %v2675_v50  ;;  %v2682_v42 = vmul.f32 %v2650_v18, %v2611_v2  ;;  %v2514_v25 = vadd.f32 %v5979_v52, %v2513_v57 }
 0x2b9   : > { %v2735_v30 = vadd.f32 %v5989_v6, %v2699_v38  ;;  %v2620_v53 = vmin.f32 %v2588_v55, 6.0  ;;  %2758 = vst.msk [vmem:[%s5996_s13 + $0x80] sm:$0xff] %vm2074_vm4, %v2726_v17 }
 0x2ba   : > { %2743 = vst.msk [vmem:[%s5996_s13 + $0x8] sm:$0xff] %vm2074_vm4, %v2711_v4  ;;  %v2718_v41 = vadd.f32 %v5989_v6, %v2682_v42  ;;  %v2580_v44 = vmax.f32 %v2514_v25, 0.0 }
 0x2bb   : > { %2767 = vst.msk [vmem:[%s5996_s13 + $0xc8] sm:$0xff] %vm2074_vm4, %v2735_v30  ;;  %v2659_v37 = vmul.f32 %v5983_v10, %v2620_v53 }
 0x2bc   : > { %2750 = vst.msk [vmem:[%s5996_s13 + $0x40] sm:$0xff] %vm2074_vm4, %v2718_v41  ;;  %v2612_v16 = vmin.f32 %v2580_v44, 6.0 }
 0x2bd   : > { %v2496_v62 = vpop.f32.mrf.mxu0  ;;  %v2691_v39 = vmul.f32 %v2659_v37, %v2620_v53 }
 0x2be   : > { %v2497_v56 = vadd.f32 %v5979_v52, %v2496_v62  ;;  %v2651_v45 = vmul.f32 %v5983_v10, %v2612_v16  ;;  %v2556_v60 = vpop.f32.mrf.mxu3 }
 0x2bf   : > { %v2727_v58 = vadd.f32 %v5989_v6, %v2691_v39  ;;  %v2557_v15 = vadd.f32 %v5979_v52, %v2556_v60 }
 0x2c0   : > { %v2573_v27 = vmax.f32 %v2497_v56, 0.0  ;;  %v2683_v5 = vmul.f32 %v2651_v45, %v2612_v16 }
 0x2c1   : > { %2759 = vst.msk [vmem:[%s5996_s13 + $0x88] sm:$0xff] %vm2074_vm4, %v2727_v58  ;;  %v2597_v46 = vmax.f32 %v2557_v15, 0.0 }
 0x2c2   : > { %v2605_v29 = vmin.f32 %v2573_v27, 6.0  ;;  %v2719_v19 = vadd.f32 %v5989_v6, %v2683_v5 }
 0x2c3   : > { %v2629_v20 = vmin.f32 %v2597_v46, 6.0 }
 0x2c4   : > { %v2644_v23 = vmul.f32 %v5983_v10, %v2605_v29  ;;  %2751 = vst.msk [vmem:[%s5996_s13 + $0x48] sm:$0xff] %vm2074_vm4, %v2719_v19  ;;  %v2536_v54 = vpop.f32.mrf.mxu2 }
 0x2c5   : > { %v2498_v0 = vpop.f32.mrf.mxu0  ;;  %v2668_v34 = vmul.f32 %v5983_v10, %v2629_v20  ;;  %v2537_v24 = vadd.f32 %v5979_v52, %v2536_v54 }
 0x2c6   : > { %v2676_v9 = vmul.f32 %v2644_v23, %v2605_v29  ;;  %v2499_v47 = vadd.f32 %v5979_v52, %v2498_v0  ;;  %v2558_v36 = vpop.f32.mrf.mxu3 }
 0x2c7   : > { %v2700_v7 = vmul.f32 %v2668_v34, %v2629_v20  ;;  %v2589_v31 = vmax.f32 %v2537_v24, 0.0  ;;  %v2559_v22 = vadd.f32 %v5979_v52, %v2558_v36  ;;  %v2516_v1 = vpop.f32.mrf.mxu1 }
 0x2c8   : > { %v2712_v3 = vadd.f32 %v5989_v6, %v2676_v9  ;;  %v2574_v28 = vmax.f32 %v2499_v47, 0.0  ;;  %v2517_v51 = vadd.f32 %v5979_v52, %v2516_v1 }
 0x2c9   : > { %v2736_v43 = vadd.f32 %v5989_v6, %v2700_v7  ;;  %v2621_v33 = vmin.f32 %v2589_v31, 6.0  ;;  %v2598_v21 = vmax.f32 %v2559_v22, 0.0 }
 0x2ca   : > { %2744 = vst.msk [vmem:[%s5996_s13 + $0x10] sm:$0xff] %vm2074_vm4, %v2712_v3  ;;  %v2606_v49 = vmin.f32 %v2574_v28, 6.0  ;;  %v2581_v35 = vmax.f32 %v2517_v51, 0.0 }
 0x2cb   : > { %2768 = vst.msk [vmem:[%s5996_s13 + $0xd0] sm:$0xff] %vm2074_vm4, %v2736_v43  ;;  %v2660_v48 = vmul.f32 %v5983_v10, %v2621_v33  ;;  %v2630_v13 = vmin.f32 %v2598_v21, 6.0 }
 0x2cc   : > { %v2645_v32 = vmul.f32 %v5983_v10, %v2606_v49  ;;  %v2613_v40 = vmin.f32 %v2581_v35, 6.0  ;;  %v2538_v63 = vpop.f32.mrf.mxu2 }
 0x2cd   : > { %v2692_v26 = vmul.f32 %v2660_v48, %v2621_v33  ;;  %v2669_v61 = vmul.f32 %v5983_v10, %v2630_v13  ;;  %v2539_v11 = vadd.f32 %v5979_v52, %v2538_v63 }
 0x2ce   : > { %v2677_v2 = vmul.f32 %v2645_v32, %v2606_v49  ;;  %v2652_v14 = vmul.f32 %v5983_v10, %v2613_v40 }
 0x2cf   : > { %v2728_v12 = vadd.f32 %v5989_v6, %v2692_v26  ;;  %v2701_v8 = vmul.f32 %v2669_v61, %v2630_v13  ;;  %v2590_v50 = vmax.f32 %v2539_v11, 0.0  ;;  %v2518_v59 = vpop.f32.mrf.mxu1 }
 0x2d0   : > { %v2713_v18 = vadd.f32 %v5989_v6, %v2677_v2  ;;  %v2684_v38 = vmul.f32 %v2652_v14, %v2613_v40  ;;  %v2519_v4 = vadd.f32 %v5979_v52, %v2518_v59 }
 0x2d1   : > { %2760 = vst.msk [vmem:[%s5996_s13 + $0x90] sm:$0xff] %vm2074_vm4, %v2728_v12  ;;  %v2737_v17 = vadd.f32 %v5989_v6, %v2701_v8  ;;  %v2622_v55 = vmin.f32 %v2590_v50, 6.0 }
 0x2d2   : > { %2745 = vst.msk [vmem:[%s5996_s13 + $0x18] sm:$0xff] %vm2074_vm4, %v2713_v18  ;;  %v2720_v57 = vadd.f32 %v5989_v6, %v2684_v38  ;;  %v2582_v42 = vmax.f32 %v2519_v4, 0.0 }
 0x2d3   : > { %2769 = vst.msk [vmem:[%s5996_s13 + $0xd8] sm:$0xff] %vm2074_vm4, %v2737_v17  ;;  %v2661_v25 = vmul.f32 %v5983_v10, %v2622_v55 }
 0x2d4   : > { %2752 = vst.msk [vmem:[%s5996_s13 + $0x50] sm:$0xff] %vm2074_vm4, %v2720_v57  ;;  %v2614_v30 = vmin.f32 %v2582_v42, 6.0 }
 0x2d5   : > { %v2693_v53 = vmul.f32 %v2661_v25, %v2622_v55 }
 0x2d6   : > { %v2653_v41 = vmul.f32 %v5983_v10, %v2614_v30  ;;  %v2541_v44 = vpop.f32.mrf.mxu2 }
 0x2d7   : > { %v2729_v37 = vadd.f32 %v5989_v6, %v2693_v53  ;;  %v2542_v16 = vadd.f32 %v5979_v52, %v2541_v44 }
 0x2d8   : > { %v2685_v62 = vmul.f32 %v2653_v41, %v2614_v30 }
 0x2d9   : > { %2761 = vst.msk [vmem:[%s5996_s13 + $0x98] sm:$0xff] %vm2074_vm4, %v2729_v37  ;;  %v2591_v39 = vmax.f32 %v2542_v16, 0.0 }
 0x2da   : > { %v2721_v56 = vadd.f32 %v5989_v6, %v2685_v62 }
 0x2db   : > { %v2623_v45 = vmin.f32 %v2591_v39, 6.0 }
 0x2dc   : > { %2753 = vst.msk [vmem:[%s5996_s13 + $0x58] sm:$0xff] %vm2074_vm4, %v2721_v56 }
 0x2dd   : > { %v2662_v60 = vmul.f32 %v5983_v10, %v2623_v45  ;;  %v2561_v58 = vpop.f32.mrf.mxu3 }
 0x2de   : > { %v2562_v15 = vadd.f32 %v5979_v52, %v2561_v58  ;;  %v2543_v27 = vpop.f32.mrf.mxu2 }
 0x2df   : > { %v2694_v5 = vmul.f32 %v2662_v60, %v2623_v45  ;;  %v2544_v46 = vadd.f32 %v5979_v52, %v2543_v27  ;;  %v2501_v29 = vpop.f32.mrf.mxu0 }
 0x2e0   : > { %v2599_v19 = vmax.f32 %v2562_v15, 0.0  ;;  %v2502_v20 = vadd.f32 %v5979_v52, %v2501_v29 }
 0x2e1   : > { %v2730_v23 = vadd.f32 %v5989_v6, %v2694_v5  ;;  %v2592_v54 = vmax.f32 %v2544_v46, 0.0 }
 0x2e2   : > { %v2631_v0 = vmin.f32 %v2599_v19, 6.0  ;;  %v2575_v34 = vmax.f32 %v2502_v20, 0.0 }
 0x2e3   : > { %2762 = vst.msk [vmem:[%s5996_s13 + $0xa0] sm:$0xff] %vm2074_vm4, %v2730_v23  ;;  %v2624_v9 = vmin.f32 %v2592_v54, 6.0 }
 0x2e4   : > { %v2670_v24 = vmul.f32 %v5983_v10, %v2631_v0  ;;  %v2607_v47 = vmin.f32 %v2575_v34, 6.0 }
 0x2e5   : > { %v2663_v36 = vmul.f32 %v5983_v10, %v2624_v9  ;;  %v2563_v7 = vpop.f32.mrf.mxu3 }
 0x2e6   : > { %v2702_v3 = vmul.f32 %v2670_v24, %v2631_v0  ;;  %v2646_v31 = vmul.f32 %v5983_v10, %v2607_v47  ;;  %v2564_v22 = vadd.f32 %v5979_v52, %v2563_v7  ;;  %v2521_v1 = vpop.f32.mrf.mxu1 }
 0x2e7   : > { %v2695_v28 = vmul.f32 %v2663_v36, %v2624_v9  ;;  %v2522_v51 = vadd.f32 %v5979_v52, %v2521_v1  ;;  %v2503_v43 = vpop.f32.mrf.mxu0 }
 0x2e8   : > { %v2738_v33 = vadd.f32 %v5989_v6, %v2702_v3  ;;  %v2678_v21 = vmul.f32 %v2646_v31, %v2607_v47  ;;  %v2600_v49 = vmax.f32 %v2564_v22, 0.0  ;;  %v2504_v35 = vadd.f32 %v5979_v52, %v2503_v43 }
 0x2e9   : > { %v2731_v48 = vadd.f32 %v5989_v6, %v2695_v28  ;;  %v2583_v13 = vmax.f32 %v2522_v51, 0.0 }
 0x2ea   : > { %2770 = vst.msk [vmem:[%s5996_s13 + $0xe0] sm:$0xff] %vm2074_vm4, %v2738_v33  ;;  %v2714_v32 = vadd.f32 %v5989_v6, %v2678_v21  ;;  %v2632_v40 = vmin.f32 %v2600_v49, 6.0  ;;  %v2576_v63 = vmax.f32 %v2504_v35, 0.0 }
 0x2eb   : > { %2763 = vst.msk [vmem:[%s5996_s13 + $0xa8] sm:$0xff] %vm2074_vm4, %v2731_v48  ;;  %v2615_v26 = vmin.f32 %v2583_v13, 6.0 }
 0x2ec   : > { %2746 = vst.msk [vmem:[%s5996_s13 + $0x20] sm:$0xff] %vm2074_vm4, %v2714_v32  ;;  %v2671_v61 = vmul.f32 %v5983_v10, %v2632_v40  ;;  %v2608_v11 = vmin.f32 %v2576_v63, 6.0 }
 0x2ed   : > { %v2654_v2 = vmul.f32 %v5983_v10, %v2615_v26 }
 0x2ee   : > { %v2703_v14 = vmul.f32 %v2671_v61, %v2632_v40  ;;  %v2647_v12 = vmul.f32 %v5983_v10, %v2608_v11  ;;  %v2523_v8 = vpop.f32.mrf.mxu1 }
 0x2ef   : > { %v2686_v50 = vmul.f32 %v2654_v2, %v2615_v26  ;;  %v2524_v59 = vadd.f32 %v5979_v52, %v2523_v8 }
 0x2f0   : > { %v2739_v18 = vadd.f32 %v5989_v6, %v2703_v14  ;;  %v2679_v38 = vmul.f32 %v2647_v12, %v2608_v11 }
 0x2f1   : > { %v2722_v4 = vadd.f32 %v5989_v6, %v2686_v50  ;;  %v2584_v17 = vmax.f32 %v2524_v59, 0.0 }
 0x2f2   : > { %2771 = vst.msk [vmem:[%s5996_s13 + $0xe8] sm:$0xff] %vm2074_vm4, %v2739_v18  ;;  %v2715_v55 = vadd.f32 %v5989_v6, %v2679_v38 }
 0x2f3   : > { %2754 = vst.msk [vmem:[%s5996_s13 + $0x60] sm:$0xff] %vm2074_vm4, %v2722_v4  ;;  %v2616_v57 = vmin.f32 %v2584_v17, 6.0 }
 0x2f4   : > { %2747 = vst.msk [vmem:[%s5996_s13 + $0x28] sm:$0xff] %vm2074_vm4, %v2715_v55 }
 0x2f5   : > { %v2655_v42 = vmul.f32 %v5983_v10, %v2616_v57  ;;  %v2546_v25 = vpop.f32.mrf.mxu2 }
 0x2f6   : > { %v2547_v30 = vadd.f32 %v5979_v52, %v2546_v25  ;;  %v2526_v53 = vpop.f32.mrf.mxu1 }
 0x2f7   : > { %v2687_v41 = vmul.f32 %v2655_v42, %v2616_v57  ;;  %v2527_v44 = vadd.f32 %v5979_v52, %v2526_v53 }
 0x2f8   : > { %v2593_v37 = vmax.f32 %v2547_v30, 0.0 }
 0x2f9   : > { %v2723_v16 = vadd.f32 %v5989_v6, %v2687_v41  ;;  %v2585_v62 = vmax.f32 %v2527_v44, 0.0 }
 0x2fa   : > { %v2625_v39 = vmin.f32 %v2593_v37, 6.0 }
 0x2fb   : > { %2755 = vst.msk [vmem:[%s5996_s13 + $0x68] sm:$0xff] %vm2074_vm4, %v2723_v16  ;;  %v2617_v56 = vmin.f32 %v2585_v62, 6.0 }
 0x2fc   : > { %v2664_v45 = vmul.f32 %v5983_v10, %v2625_v39  ;;  %v2566_v60 = vpop.f32.mrf.mxu3 }
 0x2fd   : > { %v2656_v58 = vmul.f32 %v5983_v10, %v2617_v56  ;;  %v2567_v15 = vadd.f32 %v5979_v52, %v2566_v60  ;;  %v2548_v27 = vpop.f32.mrf.mxu2 }
 0x2fe   : > { %v2696_v5 = vmul.f32 %v2664_v45, %v2625_v39  ;;  %v2549_v46 = vadd.f32 %v5979_v52, %v2548_v27  ;;  %v2506_v29 = vpop.f32.mrf.mxu0  ;;  %v2528_v19 = vpop.f32.mrf.mxu1 }
 0x2ff   : > { %v2688_v20 = vmul.f32 %v2656_v58, %v2617_v56  ;;  %v2601_v23 = vmax.f32 %v2567_v15, 0.0  ;;  %v2507_v54 = vadd.f32 %v5979_v52, %v2506_v29  ;;  %v2529_v0 = vadd.f32 %v5979_v52, %v2528_v19 }
 0x300   : > { %v2732_v34 = vadd.f32 %v5989_v6, %v2696_v5  ;;  %v2594_v9 = vmax.f32 %v2549_v46, 0.0 }
 0x301   : > { %v2724_v24 = vadd.f32 %v5989_v6, %v2688_v20  ;;  %v2633_v47 = vmin.f32 %v2601_v23, 6.0  ;;  %v2577_v36 = vmax.f32 %v2507_v54, 0.0  ;;  %v2586_v7 = vmax.f32 %v2529_v0, 0.0 }
 0x302   : > { %2764 = vst.msk [vmem:[%s5996_s13 + $0xb0] sm:$0xff] %vm2074_vm4, %v2732_v34  ;;  %v2626_v3 = vmin.f32 %v2594_v9, 6.0 }
 0x303   : > { %2756 = vst.msk [vmem:[%s5996_s13 + $0x70] sm:$0xff] %vm2074_vm4, %v2724_v24  ;;  %v2672_v31 = vmul.f32 %v5983_v10, %v2633_v47  ;;  %v2609_v22 = vmin.f32 %v2577_v36, 6.0  ;;  %v2618_v1 = vmin.f32 %v2586_v7, 6.0 }
 0x304   : > { %v2665_v28 = vmul.f32 %v5983_v10, %v2626_v3  ;;  %v2568_v51 = vpop.f32.mrf.mxu3 }
 0x305   : > { %v2704_v43 = vmul.f32 %v2672_v31, %v2633_v47  ;;  %v2648_v33 = vmul.f32 %v5983_v10, %v2609_v22  ;;  %v2657_v21 = vmul.f32 %v5983_v10, %v2618_v1  ;;  %v2569_v49 = vadd.f32 %v5979_v52, %v2568_v51 }
 0x306   : > { %v2697_v35 = vmul.f32 %v2665_v28, %v2626_v3  ;;  %v2508_v48 = vpop.f32.mrf.mxu0 }
 0x307   : > { %v2740_v13 = vadd.f32 %v5989_v6, %v2704_v43  ;;  %v2680_v32 = vmul.f32 %v2648_v33, %v2609_v22  ;;  %v2689_v40 = vmul.f32 %v2657_v21, %v2618_v1  ;;  %v2602_v63 = vmax.f32 %v2569_v49, 0.0 }
 0x308   : > { %v2733_v26 = vadd.f32 %v5989_v6, %v2697_v35  ;;  %v2509_v61 = vadd.f32 %v5979_v52, %v2508_v48 }
 0x309   : > { %2772 = vst.msk [vmem:[%s5996_s13 + $0xf0] sm:$0xff] %vm2074_vm4, %v2740_v13  ;;  %v2716_v11 = vadd.f32 %v5989_v6, %v2680_v32  ;;  %v2725_v2 = vadd.f32 %v5989_v6, %v2689_v40  ;;  %v2634_v14 = vmin.f32 %v2602_v63, 6.0 }
 0x30a   : > { %2765 = vst.msk [vmem:[%s5996_s13 + $0xb8] sm:$0xff] %vm2074_vm4, %v2733_v26  ;;  %v2578_v12 = vmax.f32 %v2509_v61, 0.0 }
 0x30b   : > { %2748 = vst.msk [vmem:[%s5996_s13 + $0x30] sm:$0xff] %vm2074_vm4, %v2716_v11  ;;  %v2673_v8 = vmul.f32 %v5983_v10, %v2634_v14 }
 0x30c   : > { %2757 = vst.msk [vmem:[%s5996_s13 + $0x78] sm:$0xff] %vm2074_vm4, %v2725_v2  ;;  %v2610_v50 = vmin.f32 %v2578_v12, 6.0 }
 0x30d   : > { %v2705_v59 = vmul.f32 %v2673_v8, %v2634_v14 }
 0x30e   : > { %v2649_v52 = vmul.f32 %v5983_v10, %v2610_v50 }
 0x30f   : > { %v2741_v18 = vadd.f32 %v5989_v6, %v2705_v59 }
 0x310   : > { %v2681_v38 = vmul.f32 %v2649_v52, %v2610_v50 }
 0x311   : > { %2773 = vst.msk [vmem:[%s5996_s13 + $0xf8] sm:$0xff] %vm2074_vm4, %v2741_v18 }
 0x312   : > { %v2717_v4 = vadd.f32 %v5989_v6, %v2681_v38 }
 0x314   : > { %2749 = vst.msk [vmem:[%s5996_s13 + $0x38] sm:$0xff] %vm2074_vm4, %v2717_v4 }
 0x315 PF: > { %s17_s26 = sadd.s32 1, %s3751_s26   ;;  %s6427_s24 = smov %s3747_s25 }
 0x316   : > { %p14_p5 = scmp.ge.s32.totalorder %s17_s26, 4   ;;  %s6428_s25 = smov %s6430_s27 }
 0x318   :  { %16 = sbr.rel (!%p14_p5) target bundleno = 2 (0x2), region = 81 }

</bundles_post_ra>
